<compile_context>
chip_gen: v7x
topology: tpu7x:2x2x1
jax: 0.10.0
libtpu: 0.0.40
codegen_flags: <defaults>
</compile_context>

<pallas_src>
import functools

import jax
import jax.numpy as jnp
from jax.experimental import pallas as pl
from jax.experimental.pallas import tpu as pltpu


# ----------------------------------------------------------------------------
# Conv kernel: conv1/2/3 + relu + 2x2 pool, one image per grid step
# ----------------------------------------------------------------------------
def _make_conv_kernel(H, W, C1, C2, C3):
    H2, W2 = H // 2, W // 2          # after pool 1
    H3, W3 = H2 // 2, W2 // 2        # after pool 2
    H4, W4 = H3 // 2, W3 // 2        # after pool 3
    f32, bf16 = jnp.float32, jnp.bfloat16

    def kernel(x1_ref,               # (1, H*W, 9) bf16   conv1 im2col lhs (K=9)
               w1_ref, b1_ref,       # (9, C1) bf16, (1, C1) f32
               w2_ref, b2_ref,       # (9*C1, C2) bf16, (1, C2) f32
               w3_ref, b3_ref,       # (9*C2, C3) bf16, (1, C3) f32
               o_ref,                # (1, H4, W4, C3) f32  pooled conv3 output
               s1_ref,               # (H2, W, C1)  row-pooled conv1 staging
               p2_ref,               # (H2+2, W2+2, C1)  zero-halo conv2 input
               s2_ref,               # (H3, W2, C2)  row-pooled conv2 staging
               p3_ref,               # (H3+2, W3+2, C2)  zero-halo conv3 input
               s3_ref):              # (H4, W3, C3)  row-pooled conv3 staging

        def conv_relu_pool(lhs, w_ref, b_ref, hh, ww, s_ref, store):
            # lhs: (hh*ww, 9*Cin) bf16 im2col matrix; one MXU matmul, f32 accum.
            cout = w_ref.shape[1]
            z = jnp.dot(lhs, w_ref[...], preferred_element_type=f32) + b_ref[...]
            z = jnp.maximum(z, 0.0)                           # (hh*ww, cout) f32
            # 2x2 max-pool fused in the epilogue:
            #   rows: layout-free split of the sublane dim (ww % 8 == 0) + maximum
            z = z.reshape(hh // 2, 2, ww, cout)
            s_ref[...] = jnp.maximum(z[:, 0], z[:, 1])        # (hh/2, ww, cout)
            #   cols: sublane-strided reads (even / odd columns) + maximum, stored
            #   directly into the caller's destination (pad-ref interior / output).
            store(jnp.maximum(s_ref[:, pl.ds(0, ww // 2, stride=2), :],
                              s_ref[:, pl.ds(1, ww // 2, stride=2), :]))

        def im2col(pad_ref, hh, ww, cin):
            # 9 shifted windows of the zero-halo scratch, concatenated on the
            # contraction axis -> (hh*ww, 9*cin), cast to bf16 for the MXU.
            cols = [pad_ref[dy:dy + hh, dx:dx + ww, :].reshape(hh * ww, cin)
                    for dy in range(3) for dx in range(3)]
            return jnp.concatenate(cols, axis=1).astype(bf16)

        def zero_halo(pad_ref, hh, ww, cc):
            # Only the 1-pixel halo needs zeros; the interior is fully overwritten
            # every grid step.  Done every step (scratch is per-core, uninitialized).
            row = jnp.zeros((1, ww + 2, cc), f32)
            col = jnp.zeros((hh, 1, cc), f32)
            pad_ref[0:1, :, :] = row
            pad_ref[hh + 1:hh + 2, :, :] = row
            pad_ref[1:hh + 1, 0:1, :] = col
            pad_ref[1:hh + 1, ww + 1:ww + 2, :] = col

        # ---- stage 1: conv1 (Cin=1, lhs built host-side) -> relu -> pool ----
        zero_halo(p2_ref, H2, W2, C1)

        def to_p2(v):
            p2_ref[1:H2 + 1, 1:W2 + 1, :] = v

        conv_relu_pool(x1_ref[0], w1_ref, b1_ref, H, W, s1_ref, to_p2)

        # ---- stage 2: conv2 -> relu -> pool (halo in VMEM scratch) ----
        zero_halo(p3_ref, H3, W3, C2)

        def to_p3(v):
            p3_ref[1:H3 + 1, 1:W3 + 1, :] = v

        conv_relu_pool(im2col(p2_ref, H2, W2, C1),
                       w2_ref, b2_ref, H2, W2, s2_ref, to_p3)

        # ---- stage 3: conv3 -> relu -> pool, straight to the output block ----
        def to_out(v):
            o_ref[0] = v                                     # (H4, W4, C3)

        conv_relu_pool(im2col(p3_ref, H3, W3, C2),
                       w3_ref, b3_ref, H3, W3, s3_ref, to_out)

    return kernel


# ----------------------------------------------------------------------------
# FC kernel: fc1 -> relu -> fc2 over the WHOLE batch (M = batch) in one call
# ----------------------------------------------------------------------------
def _fc_kernel(a_ref, fc1w_ref, fc1b_ref, fc2w_ref, fc2b_ref, o_ref):
    # a: (n, H4*W4*C3) f32; weights bf16; f32 accumulation.  M = batch amortizes the
    # fc1 weight push over every image (vs. the old per-image M=1 matvec).
    h = jnp.dot(a_ref[...].astype(jnp.bfloat16), fc1w_ref[...],
                preferred_element_type=jnp.float32) + fc1b_ref[...]
    h = jnp.maximum(h, 0.0)
    o_ref[...] = jnp.dot(h.astype(jnp.bfloat16), fc2w_ref[...],
                         preferred_element_type=jnp.float32) + fc2b_ref[...]


# ----------------------------------------------------------------------------
# Forward wrapper: conv pallas_call (grid over batch) + batched FC pallas_call
# ----------------------------------------------------------------------------
@functools.partial(jax.jit, static_argnums=(2,))
def keypoint_cnn_forward(x_nchw, prep, out_features):
    n, cin, H, W = x_nchw.shape
    assert cin == 1, "KeypointCNN conv1 expects a single input channel"
    assert H % 8 == 0 and W % 32 == 0, "spatial dims must be pool/layout friendly"

    C1 = prep["w1"].shape[1]
    C2 = prep["w2"].shape[1]
    C3 = prep["w3"].shape[1]
    K1, F1 = prep["fc1_w"].shape
    F2P = prep["fc2_w"].shape[1]
    H2, W2 = H // 2, W // 2
    H3, W3 = H2 // 2, W2 // 2
    H4, W4 = H3 // 2, W3 // 2
    assert K1 == H4 * W4 * C3

    # conv1 im2col on the tiny raw input: turns the Cin=1 conv into a real
    # (H*W, 9) x (9, C1) matmul.  bf16 halves the DMA bytes and VMEM residency.
    # TODO(synk): tile is still lane-sparse (9/128 lanes); see header note.
    xp = jnp.pad(x_nchw[:, 0], ((0, 0), (1, 1), (1, 1)))
    x1col = jnp.stack([xp[:, dy:dy + H, dx:dx + W]
                       for dy in range(3) for dx in range(3)], axis=-1)
    x1col = x1col.reshape(n, H * W, 9).astype(jnp.bfloat16)

    conv_out = pl.pallas_call(
        _make_conv_kernel(H, W, C1, C2, C3),
        out_shape=jax.ShapeDtypeStruct((n, H4, W4, C3), jnp.float32),
        grid=(n,),
        in_specs=[
            pl.BlockSpec((1, H * W, 9), lambda i: (i, 0, 0)),
            pl.BlockSpec((9, C1), lambda i: (0, 0)),
            pl.BlockSpec((1, C1), lambda i: (0, 0)),
            pl.BlockSpec((9 * C1, C2), lambda i: (0, 0)),
            pl.BlockSpec((1, C2), lambda i: (0, 0)),
            pl.BlockSpec((9 * C2, C3), lambda i: (0, 0)),
            pl.BlockSpec((1, C3), lambda i: (0, 0)),
        ],
        out_specs=pl.BlockSpec((1, H4, W4, C3), lambda i: (i, 0, 0, 0)),
        scratch_shapes=[
            pltpu.VMEM((H2, W, C1), jnp.float32),
            pltpu.VMEM((H2 + 2, W2 + 2, C1), jnp.float32),
            pltpu.VMEM((H3, W2, C2), jnp.float32),
            pltpu.VMEM((H3 + 2, W3 + 2, C2), jnp.float32),
            pltpu.VMEM((H4, W3, C3), jnp.float32),
        ],
        compiler_params=pltpu.CompilerParams(
            dimension_semantics=("parallel",),      # batch across TCs (v7x megacore)
            vmem_limit_bytes=32 * 1024 * 1024),
    )(x1col, prep["w1"], prep["b1"], prep["w2"], prep["b2"],
      prep["w3"], prep["b3"])

    # (n, H4, W4, C3) row-major flatten gives (h, w, c) order, matching the
    # flatten permutation folded into prep["fc1_w"].
    acts = conv_out.reshape(n, H4 * W4 * C3)

    # Whole-batch FC: single invocation (no grid), all operands resident once in
    # VMEM.  For large batches, tile M into <=256-row blocks with a grid.
    out_padded = pl.pallas_call(
        _fc_kernel,
        out_shape=jax.ShapeDtypeStruct((n, F2P), jnp.float32),
    )(acts, prep["fc1_w"], prep["fc1_b"], prep["fc2_w"], prep["fc2_b"])

    return out_padded[:, :out_features]


# ----------------------------------------------------------------------------
# One-time parameter relayout + bf16 cast (hoisted out of the jitted forward)
# ----------------------------------------------------------------------------
def prepare_params(p, H, W):
    C3 = p["w3"].shape[0]
    H4, W4 = H // 8, W // 8
    F1, flat = p["fc1_w"].shape
    F2 = p["fc2_w"].shape[0]
    F2P = 128                        # pad fc2 out-features to a full lane tile
    bf16 = jnp.bfloat16
    assert flat == C3 * H4 * W4

    def conv_w(w):  # (Cout, Cin, 3, 3) -> (9*Cin, Cout), row = (dy*3+dx)*Cin + ci
        cout, cin = w.shape[0], w.shape[1]
        return jnp.transpose(w, (2, 3, 1, 0)).reshape(9 * cin, cout).astype(bf16)

    # Fold PyTorch's NCHW flatten (c*H4*W4 + h*W4 + w) into fc1's weight layout:
    # (F1, C3*H4*W4) -> (H4*W4*C3, F1) with row r = (h*W4 + w)*C3 + c, matching the
    # (h, w, c)-ordered activations the conv kernel emits.
    fc1 = p["fc1_w"].reshape(F1, C3, H4, W4).transpose(2, 3, 1, 0)
    fc1 = fc1.reshape(H4 * W4 * C3, F1)

    # Lane-dense fc2: zero-pad out-features 10 -> 128 (sliced back in the wrapper).
    fc2 = jnp.zeros((F1, F2P), jnp.float32).at[:, :F2].set(p["fc2_w"].T)
    fc2_b = jnp.zeros((1, F2P), jnp.float32).at[:, :F2].set(p["fc2_b"][None, :])

    return {
        "w1": conv_w(p["w1"]), "b1": p["b1"].reshape(1, -1),
        "w2": conv_w(p["w2"]), "b2": p["b2"].reshape(1, -1),
        "w3": conv_w(p["w3"]), "b3": p["b3"].reshape(1, -1),
        "fc1_w": fc1.astype(bf16), "fc1_b": p["fc1_b"].reshape(1, -1),
        "fc2_w": fc2.astype(bf16), "fc2_b": fc2_b,
    }


# ----------------------------------------------------------------------------
# Deterministic parameter init (PyTorch-layout shapes) + pure-JAX reference
# ----------------------------------------------------------------------------
def init_params(key, flat_dim):
    ks = jax.random.split(key, 10)

    def rnd(k, shape, scale):
        return (scale * jax.random.normal(k, shape)).astype(jnp.float32)

    return {
        "w1": rnd(ks[0], (32, 1, 3, 3), 0.10),   "b1": rnd(ks[1], (32,), 0.10),
        "w2": rnd(ks[2], (64, 32, 3, 3), 0.05),  "b2": rnd(ks[3], (64,), 0.05),
        "w3": rnd(ks[4], (128, 64, 3, 3), 0.05), "b3": rnd(ks[5], (128,), 0.05),
        "fc1_w": rnd(ks[6], (768, flat_dim), 0.02), "fc1_b": rnd(ks[7], (768,), 0.02),
        "fc2_w": rnd(ks[8], (10, 768), 0.02),       "fc2_b": rnd(ks[9], (10,), 0.02),
    }


def reference_forward(x_nchw, p):
    conv = functools.partial(
        jax.lax.conv_general_dilated,
        window_strides=(1, 1), padding=((1, 1), (1, 1)),
        dimension_numbers=("NCHW", "OIHW", "NCHW"),
        precision=jax.lax.Precision.HIGHEST)

    def block(x, w, b):
        y = jax.nn.relu(conv(x, w) + b[None, :, None, None])
        return jax.lax.reduce_window(y, -jnp.inf, jax.lax.max,
                                     (1, 1, 2, 2), (1, 1, 2, 2), "VALID")

    x = block(x_nchw, p["w1"], p["b1"])
    x = block(x, p["w2"], p["b2"])
    x = block(x, p["w3"], p["b3"])
    x = x.reshape(x.shape[0], -1)
    h = jax.nn.relu(
        jnp.dot(x, p["fc1_w"].T, precision=jax.lax.Precision.HIGHEST) + p["fc1_b"])
    return jnp.dot(h, p["fc2_w"].T, precision=jax.lax.Precision.HIGHEST) + p["fc2_b"]


if __name__ == "__main__":
    N, C, H, W = 2, 1, 32, 32                     # small spatial size for the test
    flat_dim = 128 * (H // 8) * (W // 8)          # = 2048 (original module: 128*64*53)
    key = jax.random.PRNGKey(0)
    k_x, k_p = jax.random.split(key)
    x = jax.random.normal(k_x, (N, C, H, W), dtype=jnp.float32)
    params = init_params(k_p, flat_dim)
    prep = prepare_params(params, H, W)           # one-time relayout, outside jit

    out = jax.block_until_ready(keypoint_cnn_forward(x, prep, 10))
    assert out.shape == (N, 10), out.shape

    ref = jax.block_until_ready(reference_forward(x, params))
    assert jnp.all(jnp.isfinite(out))
    # bf16 MXU operands with f32 accumulation: tolerance loosened slightly vs. f32.
    assert jnp.allclose(out, ref, rtol=2e-2, atol=2e-2), (
        float(jnp.max(jnp.abs(out - ref))))

    print("KERNEL_OK")
</pallas_src>

<mosaic_0001>
module attributes {stable_mosaic.version = 11 : i64} {
  func.func @_fc_kernel(%arg0: memref<2x2048xf32, #tpu.memory_space<vmem>>, %arg1: memref<2048x768xbf16, #tpu.memory_space<vmem>>, %arg2: memref<1x768xf32, #tpu.memory_space<vmem>>, %arg3: memref<768x128xbf16, #tpu.memory_space<vmem>>, %arg4: memref<1x128xf32, #tpu.memory_space<vmem>>, %arg5: memref<2x128xf32, #tpu.memory_space<vmem>>) attributes {dimension_semantics = [], scalar_prefetch = 0 : i64, scratch_operands = 0 : i64, tpu.core_type = #tpu.core_type<tc>} {
    %c0 = arith.constant 0 : index
    %c0_0 = arith.constant 0 : index
    %0 = vector.load %arg0[%c0, %c0_0] : memref<2x2048xf32, #tpu.memory_space<vmem>>, vector<2x2048xf32>
    %1 = arith.truncf %0 : vector<2x2048xf32> to vector<2x2048xbf16>
    %c0_1 = arith.constant 0 : index
    %c0_2 = arith.constant 0 : index
    %2 = vector.load %arg1[%c0_1, %c0_2] : memref<2048x768xbf16, #tpu.memory_space<vmem>>, vector<2048x768xbf16>
    %cst = arith.constant dense<0.000000e+00> : vector<2x768xf32>
    %3 = tpu.matmul %1, %2, %cst {dimension_numbers = #tpu.dot_dimension_numbers<[1], [0], [0], [1], [0, 0, 1, 1], [], []>} : vector<2x2048xbf16>, vector<2048x768xbf16>, vector<2x768xf32> -> vector<2x768xf32>
    %c0_3 = arith.constant 0 : index
    %c0_4 = arith.constant 0 : index
    %4 = vector.load %arg2[%c0_3, %c0_4] : memref<1x768xf32, #tpu.memory_space<vmem>>, vector<1x768xf32>
    %5 = vector.broadcast %4 : vector<1x768xf32> to vector<2x768xf32>
    %6 = arith.addf %3, %5 : vector<2x768xf32>
    %cst_5 = arith.constant 0.000000e+00 : f32
    %7 = vector.broadcast %cst_5 : f32 to vector<2x768xf32>
    %8 = arith.maximumf %6, %7 : vector<2x768xf32>
    %9 = arith.truncf %8 : vector<2x768xf32> to vector<2x768xbf16>
    %c0_6 = arith.constant 0 : index
    %c0_7 = arith.constant 0 : index
    %10 = vector.load %arg3[%c0_6, %c0_7] : memref<768x128xbf16, #tpu.memory_space<vmem>>, vector<768x128xbf16>
    %cst_8 = arith.constant dense<0.000000e+00> : vector<2x128xf32>
    %11 = tpu.matmul %9, %10, %cst_8 {dimension_numbers = #tpu.dot_dimension_numbers<[1], [0], [0], [1], [0, 0, 1, 1], [], []>} : vector<2x768xbf16>, vector<768x128xbf16>, vector<2x128xf32> -> vector<2x128xf32>
    %c0_9 = arith.constant 0 : index
    %c0_10 = arith.constant 0 : index
    %12 = vector.load %arg4[%c0_9, %c0_10] : memref<1x128xf32, #tpu.memory_space<vmem>>, vector<1x128xf32>
    %13 = vector.broadcast %12 : vector<1x128xf32> to vector<2x128xf32>
    %14 = arith.addf %11, %13 : vector<2x128xf32>
    %c0_11 = arith.constant 0 : index
    %c0_12 = arith.constant 0 : index
    %15 = vector.load %arg5[%c0_11, %c0_12] : memref<2x128xf32, #tpu.memory_space<vmem>>, vector<2x128xf32>
    tpu.vector_store %arg5[%c0_11, %c0_12], %14 {strides = array<i32>} : memref<2x128xf32, #tpu.memory_space<vmem>>, vector<2x128xf32>,
    return
  }
}

module attributes {stable_mosaic.version = 11 : i64} {
  func.func @kernel(%arg0: i32, %arg1: memref<1x1024x9xbf16, #tpu.memory_space<vmem>>, %arg2: memref<9x32xbf16, #tpu.memory_space<vmem>>, %arg3: memref<1x32xf32, #tpu.memory_space<vmem>>, %arg4: memref<288x64xbf16, #tpu.memory_space<vmem>>, %arg5: memref<1x64xf32, #tpu.memory_space<vmem>>, %arg6: memref<576x128xbf16, #tpu.memory_space<vmem>>, %arg7: memref<1x128xf32, #tpu.memory_space<vmem>>, %arg8: memref<1x4x4x128xf32, #tpu.memory_space<vmem>>, %arg9: memref<16x32x32xf32, #tpu.memory_space<vmem>>, %arg10: memref<18x18x32xf32, #tpu.memory_space<vmem>>, %arg11: memref<8x16x64xf32, #tpu.memory_space<vmem>>, %arg12: memref<10x10x64xf32, #tpu.memory_space<vmem>>, %arg13: memref<4x8x128xf32, #tpu.memory_space<vmem>>) attributes {dimension_semantics = [#tpu.dimension_semantics<parallel>], iteration_bounds = array<i64: 2>, scalar_prefetch = 0 : i64, scratch_operands = 5 : i64, tpu.core_type = #tpu.core_type<tc>, window_params = [{transform_indices = @transform_0, window_bounds = array<i64: 1, 1024, 9>}, {pipeline_mode = #tpu.pipeline_mode<synchronous>, transform_indices = @transform_1, window_bounds = array<i64: 9, 32>}, {pipeline_mode = #tpu.pipeline_mode<synchronous>, transform_indices = @transform_2, window_bounds = array<i64: 1, 32>}, {pipeline_mode = #tpu.pipeline_mode<synchronous>, transform_indices = @transform_3, window_bounds = array<i64: 288, 64>}, {pipeline_mode = #tpu.pipeline_mode<synchronous>, transform_indices = @transform_4, window_bounds = array<i64: 1, 64>}, {pipeline_mode = #tpu.pipeline_mode<synchronous>, transform_indices = @transform_5, window_bounds = array<i64: 576, 128>}, {pipeline_mode = #tpu.pipeline_mode<synchronous>, transform_indices = @transform_6, window_bounds = array<i64: 1, 128>}, {transform_indices = @transform_7, window_bounds = array<i64: 1, 4, 4, 128>}]} {
    %cst = arith.constant 0.000000e+00 : f32
    %0 = vector.broadcast %cst : f32 to vector<1x18x32xf32>
    %cst_0 = arith.constant 0.000000e+00 : f32
    %1 = vector.broadcast %cst_0 : f32 to vector<16x1x32xf32>
    %c0 = arith.constant 0 : index
    %c0_1 = arith.constant 0 : index
    %c0_2 = arith.constant 0 : index
    %2 = vector.load %arg10[%c0, %c0_1, %c0_2] : memref<18x18x32xf32, #tpu.memory_space<vmem>>, vector<1x18x32xf32>
    tpu.vector_store %arg10[%c0, %c0_1, %c0_2], %0 {strides = array<i32>} : memref<18x18x32xf32, #tpu.memory_space<vmem>>, vector<1x18x32xf32>,
    %c17 = arith.constant 17 : index
    %c0_3 = arith.constant 0 : index
    %c0_4 = arith.constant 0 : index
    %3 = vector.load %arg10[%c17, %c0_3, %c0_4] : memref<18x18x32xf32, #tpu.memory_space<vmem>>, vector<1x18x32xf32>
    tpu.vector_store %arg10[%c17, %c0_3, %c0_4], %0 {strides = array<i32>} : memref<18x18x32xf32, #tpu.memory_space<vmem>>, vector<1x18x32xf32>,
    %c1 = arith.constant 1 : index
    %c0_5 = arith.constant 0 : index
    %c0_6 = arith.constant 0 : index
    %4 = vector.load %arg10[%c1, %c0_5, %c0_6] : memref<18x18x32xf32, #tpu.memory_space<vmem>>, vector<16x1x32xf32>
    tpu.vector_store %arg10[%c1, %c0_5, %c0_6], %1 {strides = array<i32>} : memref<18x18x32xf32, #tpu.memory_space<vmem>>, vector<16x1x32xf32>,
    %c1_7 = arith.constant 1 : index
    %c17_8 = arith.constant 17 : index
    %c0_9 = arith.constant 0 : index
    %5 = vector.load %arg10[%c1_7, %c17_8, %c0_9] : memref<18x18x32xf32, #tpu.memory_space<vmem>>, vector<16x1x32xf32>
    tpu.vector_store %arg10[%c1_7, %c17_8, %c0_9], %1 {strides = array<i32>} : memref<18x18x32xf32, #tpu.memory_space<vmem>>, vector<16x1x32xf32>,
    %c0_10 = arith.constant 0 : index
    %c0_11 = arith.constant 0 : index
    %c0_12 = arith.constant 0 : index
    %6 = vector.load %arg1[%c0_10, %c0_11, %c0_12] : memref<1x1024x9xbf16, #tpu.memory_space<vmem>>, vector<1x1024x9xbf16>
    %7 = vector.shape_cast %6 : vector<1x1024x9xbf16> to vector<1024x9xbf16>
    %c0_13 = arith.constant 0 : index
    %c0_14 = arith.constant 0 : index
    %8 = vector.load %arg2[%c0_13, %c0_14] : memref<9x32xbf16, #tpu.memory_space<vmem>>, vector<9x32xbf16>
    %cst_15 = arith.constant dense<0.000000e+00> : vector<1024x32xf32>
    %9 = tpu.matmul %7, %8, %cst_15 {dimension_numbers = #tpu.dot_dimension_numbers<[1], [0], [0], [1], [0, 0, 1, 1], [], []>} : vector<1024x9xbf16>, vector<9x32xbf16>, vector<1024x32xf32> -> vector<1024x32xf32>
    %c0_16 = arith.constant 0 : index
    %c0_17 = arith.constant 0 : index
    %10 = vector.load %arg3[%c0_16, %c0_17] : memref<1x32xf32, #tpu.memory_space<vmem>>, vector<1x32xf32>
    %11 = vector.broadcast %10 : vector<1x32xf32> to vector<1024x32xf32>
    %12 = arith.addf %9, %11 : vector<1024x32xf32>
    %cst_18 = arith.constant 0.000000e+00 : f32
    %13 = vector.broadcast %cst_18 : f32 to vector<1024x32xf32>
    %14 = arith.maximumf %12, %13 : vector<1024x32xf32>
    %15 = vector.shape_cast %14 : vector<1024x32xf32> to vector<16x2x32x32xf32>
    %16 = vector.extract_strided_slice %15 {offsets = [0, 0, 0, 0], sizes = [16, 1, 32, 32], strides = [1, 1, 1, 1]} : vector<16x2x32x32xf32> to vector<16x1x32x32xf32>
    %17 = vector.shape_cast %16 : vector<16x1x32x32xf32> to vector<16x32x32xf32>
    %18 = vector.extract_strided_slice %15 {offsets = [0, 1, 0, 0], sizes = [16, 1, 32, 32], strides = [1, 1, 1, 1]} : vector<16x2x32x32xf32> to vector<16x1x32x32xf32>
    %19 = vector.shape_cast %18 : vector<16x1x32x32xf32> to vector<16x32x32xf32>
    %20 = arith.maximumf %17, %19 : vector<16x32x32xf32>
    %c0_19 = arith.constant 0 : index
    %c0_20 = arith.constant 0 : index
    %c0_21 = arith.constant 0 : index
    %21 = vector.load %arg9[%c0_19, %c0_20, %c0_21] : memref<16x32x32xf32, #tpu.memory_space<vmem>>, vector<16x32x32xf32>
    tpu.vector_store %arg9[%c0_19, %c0_20, %c0_21], %20 {strides = array<i32>} : memref<16x32x32xf32, #tpu.memory_space<vmem>>, vector<16x32x32xf32>,
    %c0_22 = arith.constant 0 : index
    %c0_23 = arith.constant 0 : index
    %c0_24 = arith.constant 0 : index
    %22 = tpu.strided_load %arg9[%c0_22, %c0_23, %c0_24] {strides = array<i32: 1, 2, 1>} : memref<16x32x32xf32, #tpu.memory_space<vmem>>, vector<16x16x32xf32>
    %c0_25 = arith.constant 0 : index
    %c1_26 = arith.constant 1 : index
    %c0_27 = arith.constant 0 : index
    %23 = tpu.strided_load %arg9[%c0_25, %c1_26, %c0_27] {strides = array<i32: 1, 2, 1>} : memref<16x32x32xf32, #tpu.memory_space<vmem>>, vector<16x16x32xf32>
    %24 = arith.maximumf %22, %23 : vector<16x16x32xf32>
    %c1_28 = arith.constant 1 : index
    %c1_29 = arith.constant 1 : index
    %c0_30 = arith.constant 0 : index
    %25 = vector.load %arg10[%c1_28, %c1_29, %c0_30] : memref<18x18x32xf32, #tpu.memory_space<vmem>>, vector<16x16x32xf32>
    tpu.vector_store %arg10[%c1_28, %c1_29, %c0_30], %24 {strides = array<i32>} : memref<18x18x32xf32, #tpu.memory_space<vmem>>, vector<16x16x32xf32>,
    %cst_31 = arith.constant 0.000000e+00 : f32
    %26 = vector.broadcast %cst_31 : f32 to vector<1x10x64xf32>
    %cst_32 = arith.constant 0.000000e+00 : f32
    %27 = vector.broadcast %cst_32 : f32 to vector<8x1x64xf32>
    %c0_33 = arith.constant 0 : index
    %c0_34 = arith.constant 0 : index
    %c0_35 = arith.constant 0 : index
    %28 = vector.load %arg12[%c0_33, %c0_34, %c0_35] : memref<10x10x64xf32, #tpu.memory_space<vmem>>, vector<1x10x64xf32>
    tpu.vector_store %arg12[%c0_33, %c0_34, %c0_35], %26 {strides = array<i32>} : memref<10x10x64xf32, #tpu.memory_space<vmem>>, vector<1x10x64xf32>,
    %c9 = arith.constant 9 : index
    %c0_36 = arith.constant 0 : index
    %c0_37 = arith.constant 0 : index
    %29 = vector.load %arg12[%c9, %c0_36, %c0_37] : memref<10x10x64xf32, #tpu.memory_space<vmem>>, vector<1x10x64xf32>
    tpu.vector_store %arg12[%c9, %c0_36, %c0_37], %26 {strides = array<i32>} : memref<10x10x64xf32, #tpu.memory_space<vmem>>, vector<1x10x64xf32>,
    %c1_38 = arith.constant 1 : index
    %c0_39 = arith.constant 0 : index
    %c0_40 = arith.constant 0 : index
    %30 = vector.load %arg12[%c1_38, %c0_39, %c0_40] : memref<10x10x64xf32, #tpu.memory_space<vmem>>, vector<8x1x64xf32>
    tpu.vector_store %arg12[%c1_38, %c0_39, %c0_40], %27 {strides = array<i32>} : memref<10x10x64xf32, #tpu.memory_space<vmem>>, vector<8x1x64xf32>,
    %c1_41 = arith.constant 1 : index
    %c9_42 = arith.constant 9 : index
    %c0_43 = arith.constant 0 : index
    %31 = vector.load %arg12[%c1_41, %c9_42, %c0_43] : memref<10x10x64xf32, #tpu.memory_space<vmem>>, vector<8x1x64xf32>
    tpu.vector_store %arg12[%c1_41, %c9_42, %c0_43], %27 {strides = array<i32>} : memref<10x10x64xf32, #tpu.memory_space<vmem>>, vector<8x1x64xf32>,
    %c0_44 = arith.constant 0 : index
    %c0_45 = arith.constant 0 : index
    %c0_46 = arith.constant 0 : index
    %32 = vector.load %arg10[%c0_44, %c0_45, %c0_46] : memref<18x18x32xf32, #tpu.memory_space<vmem>>, vector<16x16x32xf32>
    %33 = vector.shape_cast %32 : vector<16x16x32xf32> to vector<256x32xf32>
    %c0_47 = arith.constant 0 : index
    %c1_48 = arith.constant 1 : index
    %c0_49 = arith.constant 0 : index
    %34 = vector.load %arg10[%c0_47, %c1_48, %c0_49] : memref<18x18x32xf32, #tpu.memory_space<vmem>>, vector<16x16x32xf32>
    %35 = vector.shape_cast %34 : vector<16x16x32xf32> to vector<256x32xf32>
    %c0_50 = arith.constant 0 : index
    %c2 = arith.constant 2 : index
    %c0_51 = arith.constant 0 : index
    %36 = vector.load %arg10[%c0_50, %c2, %c0_51] : memref<18x18x32xf32, #tpu.memory_space<vmem>>, vector<16x16x32xf32>
    %37 = vector.shape_cast %36 : vector<16x16x32xf32> to vector<256x32xf32>
    %c1_52 = arith.constant 1 : index
    %c0_53 = arith.constant 0 : index
    %c0_54 = arith.constant 0 : index
    %38 = vector.load %arg10[%c1_52, %c0_53, %c0_54] : memref<18x18x32xf32, #tpu.memory_space<vmem>>, vector<16x16x32xf32>
    %39 = vector.shape_cast %38 : vector<16x16x32xf32> to vector<256x32xf32>
    %c1_55 = arith.constant 1 : index
    %c1_56 = arith.constant 1 : index
    %c0_57 = arith.constant 0 : index
    %40 = vector.load %arg10[%c1_55, %c1_56, %c0_57] : memref<18x18x32xf32, #tpu.memory_space<vmem>>, vector<16x16x32xf32>
    %41 = vector.shape_cast %40 : vector<16x16x32xf32> to vector<256x32xf32>
    %c1_58 = arith.constant 1 : index
    %c2_59 = arith.constant 2 : index
    %c0_60 = arith.constant 0 : index
    %42 = vector.load %arg10[%c1_58, %c2_59, %c0_60] : memref<18x18x32xf32, #tpu.memory_space<vmem>>, vector<16x16x32xf32>
    %43 = vector.shape_cast %42 : vector<16x16x32xf32> to vector<256x32xf32>
    %c2_61 = arith.constant 2 : index
    %c0_62 = arith.constant 0 : index
    %c0_63 = arith.constant 0 : index
    %44 = vector.load %arg10[%c2_61, %c0_62, %c0_63] : memref<18x18x32xf32, #tpu.memory_space<vmem>>, vector<16x16x32xf32>
    %45 = vector.shape_cast %44 : vector<16x16x32xf32> to vector<256x32xf32>
    %c2_64 = arith.constant 2 : index
    %c1_65 = arith.constant 1 : index
    %c0_66 = arith.constant 0 : index
    %46 = vector.load %arg10[%c2_64, %c1_65, %c0_66] : memref<18x18x32xf32, #tpu.memory_space<vmem>>, vector<16x16x32xf32>
    %47 = vector.shape_cast %46 : vector<16x16x32xf32> to vector<256x32xf32>
    %c2_67 = arith.constant 2 : index
    %c2_68 = arith.constant 2 : index
    %c0_69 = arith.constant 0 : index
    %48 = vector.load %arg10[%c2_67, %c2_68, %c0_69] : memref<18x18x32xf32, #tpu.memory_space<vmem>>, vector<16x16x32xf32>
    %49 = vector.shape_cast %48 : vector<16x16x32xf32> to vector<256x32xf32>
    %50 = tpu.concatenate %33, %35, %37, %39, %41, %43, %45, %47, %49 in 1 : vector<256x32xf32>, vector<256x32xf32>, vector<256x32xf32>, vector<256x32xf32>, vector<256x32xf32>, vector<256x32xf32>, vector<256x32xf32>, vector<256x32xf32>, vector<256x32xf32> -> vector<256x288xf32>
    %51 = arith.truncf %50 : vector<256x288xf32> to vector<256x288xbf16>
    %c0_70 = arith.constant 0 : index
    %c0_71 = arith.constant 0 : index
    %52 = vector.load %arg4[%c0_70, %c0_71] : memref<288x64xbf16, #tpu.memory_space<vmem>>, vector<288x64xbf16>
    %cst_72 = arith.constant dense<0.000000e+00> : vector<256x64xf32>
    %53 = tpu.matmul %51, %52, %cst_72 {dimension_numbers = #tpu.dot_dimension_numbers<[1], [0], [0], [1], [0, 0, 1, 1], [], []>} : vector<256x288xbf16>, vector<288x64xbf16>, vector<256x64xf32> -> vector<256x64xf32>
    %c0_73 = arith.constant 0 : index
    %c0_74 = arith.constant 0 : index
    %54 = vector.load %arg5[%c0_73, %c0_74] : memref<1x64xf32, #tpu.memory_space<vmem>>, vector<1x64xf32>
    %55 = vector.broadcast %54 : vector<1x64xf32> to vector<256x64xf32>
    %56 = arith.addf %53, %55 : vector<256x64xf32>
    %cst_75 = arith.constant 0.000000e+00 : f32
    %57 = vector.broadcast %cst_75 : f32 to vector<256x64xf32>
    %58 = arith.maximumf %56, %57 : vector<256x64xf32>
    %59 = vector.shape_cast %58 : vector<256x64xf32> to vector<8x2x16x64xf32>
    %60 = vector.extract_strided_slice %59 {offsets = [0, 0, 0, 0], sizes = [8, 1, 16, 64], strides = [1, 1, 1, 1]} : vector<8x2x16x64xf32> to vector<8x1x16x64xf32>
    %61 = vector.shape_cast %60 : vector<8x1x16x64xf32> to vector<8x16x64xf32>
    %62 = vector.extract_strided_slice %59 {offsets = [0, 1, 0, 0], sizes = [8, 1, 16, 64], strides = [1, 1, 1, 1]} : vector<8x2x16x64xf32> to vector<8x1x16x64xf32>
    %63 = vector.shape_cast %62 : vector<8x1x16x64xf32> to vector<8x16x64xf32>
    %64 = arith.maximumf %61, %63 : vector<8x16x64xf32>
    %c0_76 = arith.constant 0 : index
    %c0_77 = arith.constant 0 : index
    %c0_78 = arith.constant 0 : index
    %65 = vector.load %arg11[%c0_76, %c0_77, %c0_78] : memref<8x16x64xf32, #tpu.memory_space<vmem>>, vector<8x16x64xf32>
    tpu.vector_store %arg11[%c0_76, %c0_77, %c0_78], %64 {strides = array<i32>} : memref<8x16x64xf32, #tpu.memory_space<vmem>>, vector<8x16x64xf32>,
    %c0_79 = arith.constant 0 : index
    %c0_80 = arith.constant 0 : index
    %c0_81 = arith.constant 0 : index
    %66 = tpu.strided_load %arg11[%c0_79, %c0_80, %c0_81] {strides = array<i32: 1, 2, 1>} : memref<8x16x64xf32, #tpu.memory_space<vmem>>, vector<8x8x64xf32>
    %c0_82 = arith.constant 0 : index
    %c1_83 = arith.constant 1 : index
    %c0_84 = arith.constant 0 : index
    %67 = tpu.strided_load %arg11[%c0_82, %c1_83, %c0_84] {strides = array<i32: 1, 2, 1>} : memref<8x16x64xf32, #tpu.memory_space<vmem>>, vector<8x8x64xf32>
    %68 = arith.maximumf %66, %67 : vector<8x8x64xf32>
    %c1_85 = arith.constant 1 : index
    %c1_86 = arith.constant 1 : index
    %c0_87 = arith.constant 0 : index
    %69 = vector.load %arg12[%c1_85, %c1_86, %c0_87] : memref<10x10x64xf32, #tpu.memory_space<vmem>>, vector<8x8x64xf32>
    tpu.vector_store %arg12[%c1_85, %c1_86, %c0_87], %68 {strides = array<i32>} : memref<10x10x64xf32, #tpu.memory_space<vmem>>, vector<8x8x64xf32>,
    %c0_88 = arith.constant 0 : index
    %c0_89 = arith.constant 0 : index
    %c0_90 = arith.constant 0 : index
    %70 = vector.load %arg12[%c0_88, %c0_89, %c0_90] : memref<10x10x64xf32, #tpu.memory_space<vmem>>, vector<8x8x64xf32>
    %71 = vector.shape_cast %70 : vector<8x8x64xf32> to vector<64x64xf32>
    %c0_91 = arith.constant 0 : index
    %c1_92 = arith.constant 1 : index
    %c0_93 = arith.constant 0 : index
    %72 = vector.load %arg12[%c0_91, %c1_92, %c0_93] : memref<10x10x64xf32, #tpu.memory_space<vmem>>, vector<8x8x64xf32>
    %73 = vector.shape_cast %72 : vector<8x8x64xf32> to vector<64x64xf32>
    %c0_94 = arith.constant 0 : index
    %c2_95 = arith.constant 2 : index
    %c0_96 = arith.constant 0 : index
    %74 = vector.load %arg12[%c0_94, %c2_95, %c0_96] : memref<10x10x64xf32, #tpu.memory_space<vmem>>, vector<8x8x64xf32>
    %75 = vector.shape_cast %74 : vector<8x8x64xf32> to vector<64x64xf32>
    %c1_97 = arith.constant 1 : index
    %c0_98 = arith.constant 0 : index
    %c0_99 = arith.constant 0 : index
    %76 = vector.load %arg12[%c1_97, %c0_98, %c0_99] : memref<10x10x64xf32, #tpu.memory_space<vmem>>, vector<8x8x64xf32>
    %77 = vector.shape_cast %76 : vector<8x8x64xf32> to vector<64x64xf32>
    %c1_100 = arith.constant 1 : index
    %c1_101 = arith.constant 1 : index
    %c0_102 = arith.constant 0 : index
    %78 = vector.load %arg12[%c1_100, %c1_101, %c0_102] : memref<10x10x64xf32, #tpu.memory_space<vmem>>, vector<8x8x64xf32>
    %79 = vector.shape_cast %78 : vector<8x8x64xf32> to vector<64x64xf32>
    %c1_103 = arith.constant 1 : index
    %c2_104 = arith.constant 2 : index
    %c0_105 = arith.constant 0 : index
    %80 = vector.load %arg12[%c1_103, %c2_104, %c0_105] : memref<10x10x64xf32, #tpu.memory_space<vmem>>, vector<8x8x64xf32>
    %81 = vector.shape_cast %80 : vector<8x8x64xf32> to vector<64x64xf32>
    %c2_106 = arith.constant 2 : index
    %c0_107 = arith.constant 0 : index
    %c0_108 = arith.constant 0 : index
    %82 = vector.load %arg12[%c2_106, %c0_107, %c0_108] : memref<10x10x64xf32, #tpu.memory_space<vmem>>, vector<8x8x64xf32>
    %83 = vector.shape_cast %82 : vector<8x8x64xf32> to vector<64x64xf32>
    %c2_109 = arith.constant 2 : index
    %c1_110 = arith.constant 1 : index
    %c0_111 = arith.constant 0 : index
    %84 = vector.load %arg12[%c2_109, %c1_110, %c0_111] : memref<10x10x64xf32, #tpu.memory_space<vmem>>, vector<8x8x64xf32>
    %85 = vector.shape_cast %84 : vector<8x8x64xf32> to vector<64x64xf32>
    %c2_112 = arith.constant 2 : index
    %c2_113 = arith.constant 2 : index
    %c0_114 = arith.constant 0 : index
    %86 = vector.load %arg12[%c2_112, %c2_113, %c0_114] : memref<10x10x64xf32, #tpu.memory_space<vmem>>, vector<8x8x64xf32>
    %87 = vector.shape_cast %86 : vector<8x8x64xf32> to vector<64x64xf32>
    %88 = tpu.concatenate %71, %73, %75, %77, %79, %81, %83, %85, %87 in 1 : vector<64x64xf32>, vector<64x64xf32>, vector<64x64xf32>, vector<64x64xf32>, vector<64x64xf32>, vector<64x64xf32>, vector<64x64xf32>, vector<64x64xf32>, vector<64x64xf32> -> vector<64x576xf32>
    %89 = arith.truncf %88 : vector<64x576xf32> to vector<64x576xbf16>
    %c0_115 = arith.constant 0 : index
    %c0_116 = arith.constant 0 : index
    %90 = vector.load %arg6[%c0_115, %c0_116] : memref<576x128xbf16, #tpu.memory_space<vmem>>, vector<576x128xbf16>
    %cst_117 = arith.constant dense<0.000000e+00> : vector<64x128xf32>
    %91 = tpu.matmul %89, %90, %cst_117 {dimension_numbers = #tpu.dot_dimension_numbers<[1], [0], [0], [1], [0, 0, 1, 1], [], []>} : vector<64x576xbf16>, vector<576x128xbf16>, vector<64x128xf32> -> vector<64x128xf32>
    %c0_118 = arith.constant 0 : index
    %c0_119 = arith.constant 0 : index
    %92 = vector.load %arg7[%c0_118, %c0_119] : memref<1x128xf32, #tpu.memory_space<vmem>>, vector<1x128xf32>
    %93 = vector.broadcast %92 : vector<1x128xf32> to vector<64x128xf32>
    %94 = arith.addf %91, %93 : vector<64x128xf32>
    %cst_120 = arith.constant 0.000000e+00 : f32
    %95 = vector.broadcast %cst_120 : f32 to vector<64x128xf32>
    %96 = arith.maximumf %94, %95 : vector<64x128xf32>
    %97 = vector.shape_cast %96 : vector<64x128xf32> to vector<4x2x8x128xf32>
    %98 = vector.extract_strided_slice %97 {offsets = [0, 0, 0, 0], sizes = [4, 1, 8, 128], strides = [1, 1, 1, 1]} : vector<4x2x8x128xf32> to vector<4x1x8x128xf32>
    %99 = vector.shape_cast %98 : vector<4x1x8x128xf32> to vector<4x8x128xf32>
    %100 = vector.extract_strided_slice %97 {offsets = [0, 1, 0, 0], sizes = [4, 1, 8, 128], strides = [1, 1, 1, 1]} : vector<4x2x8x128xf32> to vector<4x1x8x128xf32>
    %101 = vector.shape_cast %100 : vector<4x1x8x128xf32> to vector<4x8x128xf32>
    %102 = arith.maximumf %99, %101 : vector<4x8x128xf32>
    %c0_121 = arith.constant 0 : index
    %c0_122 = arith.constant 0 : index
    %c0_123 = arith.constant 0 : index
    %103 = vector.load %arg13[%c0_121, %c0_122, %c0_123] : memref<4x8x128xf32, #tpu.memory_space<vmem>>, vector<4x8x128xf32>
    tpu.vector_store %arg13[%c0_121, %c0_122, %c0_123], %102 {strides = array<i32>} : memref<4x8x128xf32, #tpu.memory_space<vmem>>, vector<4x8x128xf32>,
    %c0_124 = arith.constant 0 : index
    %c0_125 = arith.constant 0 : index
    %c0_126 = arith.constant 0 : index
    %104 = tpu.strided_load %arg13[%c0_124, %c0_125, %c0_126] {strides = array<i32: 1, 2, 1>} : memref<4x8x128xf32, #tpu.memory_space<vmem>>, vector<4x4x128xf32>
    %c0_127 = arith.constant 0 : index
    %c1_128 = arith.constant 1 : index
    %c0_129 = arith.constant 0 : index
    %105 = tpu.strided_load %arg13[%c0_127, %c1_128, %c0_129] {strides = array<i32: 1, 2, 1>} : memref<4x8x128xf32, #tpu.memory_space<vmem>>, vector<4x4x128xf32>
    %106 = arith.maximumf %104, %105 : vector<4x4x128xf32>
    %c0_130 = arith.constant 0 : index
    %c0_131 = arith.constant 0 : index
    %c0_132 = arith.constant 0 : index
    %c0_133 = arith.constant 0 : index
    %107 = vector.load %arg8[%c0_130, %c0_131, %c0_132, %c0_133] : memref<1x4x4x128xf32, #tpu.memory_space<vmem>>, vector<1x4x4x128xf32>
    %108 = vector.shape_cast %107 : vector<1x4x4x128xf32> to vector<4x4x128xf32>
    %109 = vector.shape_cast %106 : vector<4x4x128xf32> to vector<1x4x4x128xf32>
    tpu.vector_store %arg8[%c0_130, %c0_131, %c0_132, %c0_133], %109 {strides = array<i32>} : memref<1x4x4x128xf32, #tpu.memory_space<vmem>>, vector<1x4x4x128xf32>,
    return
  }
  func.func @transform_0(%arg0: i32) -> (i32, i32, i32) {
    %c0_i32 = arith.constant 0 : i32
    %c0_i32_0 = arith.constant 0 : i32
    %c0_i32_1 = arith.constant 0 : i32
    return %arg0, %c0_i32, %c0_i32_0 : i32, i32, i32
  }
  func.func @transform_1(%arg0: i32) -> (i32, i32) {
    %c0_i32 = arith.constant 0 : i32
    %c0_i32_0 = arith.constant 0 : i32
    %c0_i32_1 = arith.constant 0 : i32
    return %c0_i32, %c0_i32_0 : i32, i32
  }
  func.func @transform_2(%arg0: i32) -> (i32, i32) {
    %c0_i32 = arith.constant 0 : i32
    %c0_i32_0 = arith.constant 0 : i32
    %c0_i32_1 = arith.constant 0 : i32
    return %c0_i32, %c0_i32_0 : i32, i32
  }
  func.func @transform_3(%arg0: i32) -> (i32, i32) {
    %c0_i32 = arith.constant 0 : i32
    %c0_i32_0 = arith.constant 0 : i32
    %c0_i32_1 = arith.constant 0 : i32
    return %c0_i32, %c0_i32_0 : i32, i32
  }
  func.func @transform_4(%arg0: i32) -> (i32, i32) {
    %c0_i32 = arith.constant 0 : i32
    %c0_i32_0 = arith.constant 0 : i32
    %c0_i32_1 = arith.constant 0 : i32
    return %c0_i32, %c0_i32_0 : i32, i32
  }
  func.func @transform_5(%arg0: i32) -> (i32, i32) {
    %c0_i32 = arith.constant 0 : i32
    %c0_i32_0 = arith.constant 0 : i32
    %c0_i32_1 = arith.constant 0 : i32
    return %c0_i32, %c0_i32_0 : i32, i32
  }
  func.func @transform_6(%arg0: i32) -> (i32, i32) {
    %c0_i32 = arith.constant 0 : i32
    %c0_i32_0 = arith.constant 0 : i32
    %c0_i32_1 = arith.constant 0 : i32
    return %c0_i32, %c0_i32_0 : i32, i32
  }
  func.func @transform_7(%arg0: i32) -> (i32, i32, i32, i32) {
    %c0_i32 = arith.constant 0 : i32
    %c0_i32_0 = arith.constant 0 : i32
    %c0_i32_1 = arith.constant 0 : i32
    %c0_i32_2 = arith.constant 0 : i32
    return %arg0, %c0_i32, %c0_i32_0, %c0_i32_1 : i32, i32, i32, i32
  }
}

</mosaic_0001>

<bundles_post_ra>
// kernel: keypoint_cnn_forward.2
= control target key start
LH: loop header
LB: loop body
LE: loop exit
PB: predicated region body
PF: predicated region fallthrough
CT: control target
= control target key end

     0   :  { %12 = vsyncpa [#allocation8], 0  ;;  %s8064_s0 = inlined_call_operand.vmem [shape: bf16[2,1024,9], index: 0, kind: input, shape index: {}]   ;;  %s8065_s1 = inlined_call_operand.hbm [shape: bf16[9,32], index: 1, kind: input, shape index: {}]   ;;  %s8066_s2 = inlined_call_operand.hbm [shape: f32[1,32], index: 2, kind: input, shape index: {}]   ;;  %s8067_s3 = inlined_call_operand.vmem [shape: bf16[288,64], index: 3, kind: input, shape index: {}]   ;;  %s8068_s4 = inlined_call_operand.hbm [shape: f32[1,64], index: 4, kind: input, shape index: {}]   ;;  %s8069_s5 = inlined_call_operand.hbm [shape: bf16[576,128], index: 5, kind: input, shape index: {}]   ;;  %s8070_s6 = inlined_call_operand.hbm [shape: f32[1,128], index: 6, kind: input, shape index: {}]   ;;  %s8071_s7 = inlined_call_operand.vmem [shape: f32[2,4,4,128], index: 7, kind: output, shape index: {}]  }
   0x1   :  { %13 = vsyncpa [#allocation10], 0 }
   0x2   :  { %14 = vsyncpa [#allocation13], 0  ;;  %s6555_s24 = smov 0  }
   0x3 LB: > { %s6503_s25 = smov [#allocation9]   ;;  %s6561_s27 = sadd.s32 4294967295, %s6501_s24   ;;  %s6501_s24 = sphi %s6555_s24, %s20_s24  }
   0x4   : > { %s229_s26 = sshll.u32 %s6503_s25, 4  ;;  %p4900_p0 = scmp.ge.s32.totalorder %s6501_s24, 1  ;;  %s6566_s26 = int_to_ptr.vmem [resolvable:$true] %s229_s26 }
   0x5   : > { %p203_p1 = scmp.lt.s32.totalorder %s6501_s24, 3  ;;  %p8072_p2 = scmp.eq.s32.totalorder %s6561_s27, 0 }
   0x6   : > { %s6504_s29 = smov [#allocation12]   ;;  %s6505_s9 = smov [#allocation7]  }
   0x7   : > { %p6568_p3 = pnand %p4900_p0, %p203_p1  ;;  %s253_s30 = sshll.u32 %s6504_s29, 4  ;;  %s6574_s30 = int_to_ptr.vmem [resolvable:$true] %s253_s30 }
   0x8   : > { %s215_s10 = sshll.u32 %s6505_s9, 4  ;;  %s6506_s11 = smov [#allocation11]   ;;  %s6582_s10 = int_to_ptr.vmem [resolvable:$true] %s215_s10 }
   0x9   : > { %s8074_s28 = scalar_select %p6568_p3, 1, 0 }
   0xa   : > { %p5612_p4 = pneg %p6568_p3  ;;  %s6584_s12 = sshll.u32 %s6506_s11, 4  ;;  %s244_s12 = int_to_ptr.vmem [resolvable:$true] %s6584_s12 }
   0xb   : > { %s6343_s15 = scalar_lea.hbm %s8066_s2, 16 }
   0xc   : > { %p6578_p5 = pnand %p8072_p2, %p5612_p4  ;;  %p6344_p6 = scmp.ne.s32.totalorder %s8066_s2, %s6343_s15 }
   0xd   : > { %p6350_p10 = scmp.lt.u32.totalorder %s6343_s15, %s8066_s2 }
   0xe   : > { %p6594_p7 = pneg %p6578_p5 }
  0x10   : > { %p6346_p8 = pnand %p6594_p7, %p6344_p6 }
  0x12   : > { %p6347_p9 = pneg %p6346_p8 }
  0x14   : > { %p6352_p11 = pnand %p6350_p10, %p6347_p9 }
  0x16   : > { %6355 = shalt.err (!%p6352_p11)
}
  0x17   : > { %s6356_s21 = scalar_lea.vmem %s6566_s26, 16  ;;  %s6363_s22 = scalar_lea.vmem %s6566_s26, 32 }
  0x18   : > { %p6357_p12 = scmp.ne.s32.totalorder %s6566_s26, %s6356_s21  ;;  %p6364_p1 = scmp.lt.s32.totalorder %s6566_s26, %s6566_s26 }
  0x19   : > { %p6365_p4 = scmp.lt.s32.totalorder %s6363_s22, %s6356_s21 }
  0x1a   : > { %p6359_p13 = pnand %p6357_p12, %p6594_p7 }
  0x1b   : > { %p6366_p6 = por %p6365_p4, %p6364_p1 }
  0x1c   : > { %p6360_p0 = pneg %p6359_p13 }
  0x1e   : > { %p6367_p8 = pnand %p6366_p6, %p6360_p0 }
  0x20   : > { %6370 = shalt.err (!%p6367_p8)
}
  0x21   : > { %5618 = dma.hbm_to_vmem [thread:$0]  (!%p6578_p5), %s8066_s2, 16, %s6566_s26, [#allocation10]  }
  0x22   : > { %s6371_s11 = scalar_lea.hbm %s8069_s5, 4608 }
  0x23   : > { %p6372_p9 = scmp.ne.s32.totalorder %s8069_s5, %s6371_s11  ;;  %p6378_p12 = scmp.lt.u32.totalorder %s6371_s11, %s8069_s5 }
  0x25   : > { %p6374_p10 = pnand %p6372_p9, %p6594_p7 }
  0x27   : > { %p6375_p11 = pneg %p6374_p10 }
  0x29   : > { %p6380_p13 = pnand %p6378_p12, %p6375_p11 }
  0x2b   : > { %6383 = shalt.err (!%p6380_p13)
}
  0x2c   : > { %s6384_s26 = scalar_lea.vmem %s6574_s30, 4608  ;;  %p6392_p6 = scmp.lt.s32.totalorder %s6574_s30, %s6574_s30 }
  0x2d   : > { %p6385_p0 = scmp.ne.s32.totalorder %s6574_s30, %s6384_s26  ;;  %p6393_p8 = scmp.lt.s32.totalorder %s6384_s26, %s6384_s26 }
  0x2f   : > { %p6387_p1 = pnand %p6385_p0, %p6594_p7  ;;  %p6394_p9 = por %p6393_p8, %p6392_p6 }
  0x31   : > { %p6388_p4 = pneg %p6387_p1 }
  0x33   : > { %p6395_p10 = pnand %p6394_p9, %p6388_p4 }
  0x35   : > { %6398 = shalt.err (!%p6395_p10)
}
  0x36   : > { %s6507_s17 = smov 64   ;;  %s6508_s19 = smov 4  }
  0x37   : > { %5624 = dma.hbm_to_vmem [thread:$0]  (!%p6578_p5), %s8069_s5, 4608, %s6574_s30, [#allocation13], %s6507_s17, %s6507_s17, %s6508_s19  }
  0x38   : > { %s6399_s25 = scalar_lea.hbm %s8065_s1, 128 }
  0x39   : > { %p6400_p11 = scmp.ne.s32.totalorder %s8065_s1, %s6399_s25  ;;  %p6406_p0 = scmp.lt.u32.totalorder %s6399_s25, %s8065_s1 }
  0x3b   : > { %p6402_p12 = pnand %p6400_p11, %p6594_p7 }
  0x3d   : > { %p6403_p13 = pneg %p6402_p12 }
  0x3f   : > { %p6408_p1 = pnand %p6406_p0, %p6403_p13 }
  0x41   : > { %6411 = shalt.err (!%p6408_p1)
}
  0x42   : > { %s6412_s30 = scalar_lea.vmem %s6582_s10, 128  ;;  %p6420_p9 = scmp.lt.s32.totalorder %s6582_s10, %s6582_s10 }
  0x43   : > { %p6413_p4 = scmp.ne.s32.totalorder %s6582_s10, %s6412_s30  ;;  %p6421_p10 = scmp.lt.s32.totalorder %s6412_s30, %s6412_s30 }
  0x45   : > { %p6415_p6 = pnand %p6413_p4, %p6594_p7  ;;  %p6422_p11 = por %p6421_p10, %p6420_p9 }
  0x47   : > { %p6416_p8 = pneg %p6415_p6 }
  0x49   : > { %p6423_p12 = pnand %p6422_p11, %p6416_p8 }
  0x4b   : > { %6426 = shalt.err (!%p6423_p12)
}
  0x4c   : > { %5615 = dma.hbm_to_vmem [thread:$0]  (!%p6578_p5), %s8065_s1, 128, %s6582_s10, [#allocation8], %s6507_s17, %s6507_s17, %s6508_s19  }
  0x4d   : > { %s6427_s20 = scalar_lea.hbm %s8068_s4, 16 }
  0x4e   : > { %p6428_p13 = scmp.ne.s32.totalorder %s8068_s4, %s6427_s20  ;;  %p6434_p4 = scmp.lt.u32.totalorder %s6427_s20, %s8068_s4 }
  0x50   : > { %p6430_p0 = pnand %p6428_p13, %p6594_p7 }
  0x52   : > { %p6431_p1 = pneg %p6430_p0 }
  0x54   : > { %p6436_p6 = pnand %p6434_p4, %p6431_p1 }
  0x56   : > { %6439 = shalt.err (!%p6436_p6)
}
  0x57   : > { %s6440_s29 = scalar_lea.vmem %s244_s12, 16  ;;  %s6447_s10 = scalar_lea.vmem %s244_s12, 32 }
  0x58   : > { %p6441_p8 = scmp.ne.s32.totalorder %s244_s12, %s6440_s29  ;;  %p6448_p11 = scmp.lt.s32.totalorder %s244_s12, %s244_s12 }
  0x59   : > { %p6449_p12 = scmp.lt.s32.totalorder %s6447_s10, %s6440_s29 }
  0x5a   : > { %p6443_p9 = pnand %p6441_p8, %p6594_p7 }
  0x5b   : > { %p6450_p2 = por %p6449_p12, %p6448_p11 }
  0x5c   : > { %p6444_p10 = pneg %p6443_p9 }
  0x5e   : > { %p6451_p3 = pnand %p6450_p2, %p6444_p10 }
  0x60   : > { %6454 = shalt.err (!%p6451_p3)
}
  0x61   : > { %5621 = dma.hbm_to_vmem [thread:$0]  (!%p6578_p5), %s8068_s4, 16, %s244_s12, [#allocation10]  }
  0x62   : > { %s6509_s9 = smov [#allocation14]   ;;  %s6455_s14 = scalar_lea.hbm %s8070_s6, 16 }
  0x63   : > { %s267_s11 = sshll.u32 %s6509_s9, 4  ;;  %p6456_p13 = scmp.ne.s32.totalorder %s8070_s6, %s6455_s14  ;;  %s268_s11 = int_to_ptr.vmem [resolvable:$true] %s267_s11 }
  0x64   : > { %p6462_p0 = scmp.lt.u32.totalorder %s6455_s14, %s8070_s6 }
  0x65   : > { %p6458_p2 = pnand %p6456_p13, %p6594_p7 }
  0x67   : > { %p6459_p3 = pneg %p6458_p2 }
  0x69   : > { %p6464_p1 = pnand %p6462_p0, %p6459_p3 }
  0x6b   : > { %6467 = shalt.err (!%p6464_p1)
}
  0x6c   : > { %s6468_s12 = scalar_lea.vmem %s268_s11, 16  ;;  %s6475_s21 = scalar_lea.vmem %s268_s11, 32 }
  0x6d   : > { %p6469_p4 = scmp.ne.s32.totalorder %s268_s11, %s6468_s12  ;;  %p6476_p9 = scmp.lt.s32.totalorder %s268_s11, %s268_s11 }
  0x6e   : > { %p6477_p10 = scmp.lt.s32.totalorder %s6475_s21, %s6468_s12 }
  0x6f   : > { %p6471_p6 = pnand %p6469_p4, %p6594_p7 }
  0x70   : > { %p6478_p11 = por %p6477_p10, %p6476_p9 }
  0x71   : > { %p6472_p8 = pneg %p6471_p6 }
  0x73   : > { %p6479_p12 = pnand %p6478_p11, %p6472_p8 }
  0x75   : > { %6482 = shalt.err (!%p6479_p12)
}
  0x76   : > { %5627 = dma.hbm_to_vmem [thread:$0]  (!%p6578_p5), %s8070_s6, 16, %s268_s11, [#allocation13]  }
  0x77   : > { %p8077_p13 = scmp.ne.s32.totalorder %s8074_s28, 0 }
  0x78   : > { %p8078_p2 = scmp.eq.s32.totalorder (!%p8077_p13), %s6561_s27, 0 }
  0x79   : > { %288 = sbr.rel (%p8077_p13) target bundleno = 1462 (0x5b6), region = 48 }
  0x80   : > { %6488 = dma.done.wait (%p8078_p2), [#allocation8], 128   ;;  %p8079_p7 = pmov %p8078_p2 }
  0x81   : > { %p8080_p3 = pmov %p8078_p2 }
  0x82   : > { %6490 = vsyncadd (%p8079_p7), [#allocation8], 4294967168 }
  0x83   : > { %6492 = dma.done.wait (%p8080_p3), [#allocation10], 32   ;;  %p8081_p0 = pmov %p8078_p2 }
  0x85   : > { %6494 = vsyncadd (%p8081_p0), [#allocation10], 4294967264  ;;  %p8082_p1 = pmov %p8081_p0 }
  0x86   : > { %p8083_p5 = pmov %p8081_p0 }
  0x87   : > { %6496 = dma.done.wait (%p8082_p1), [#allocation13], 4624  }
  0x88   : > { %6498 = vsyncadd (%p8083_p5), [#allocation13], 4294962672  ;;  %vm1045_vm0 = vcmask 1043456   ;;  %p336_p4 = scmp.lt.s32.totalorder %s6561_s27, 1  ;;  %vm1046_vm1 = vcmask 1044480   ;;  %v6510_v0 = vmov 65535  }
  0x89   : > { %v1047_v1 = vsel %vm1045_vm0, 4294967295, %v6510_v0  ;;  %vm852_vm2 = vcmask 72704   ;;  %v6218_v3 = vld [vmem:[#allocation7] sm:$0x1f]   ;;  %vm347_vm3 = vcmask 261120   ;;  %vm350_vm4 = vcmask 254976  }
  0x8a   : > { %s8085_s27 = smov (!%p336_p4, %s6561_s27), 1  ;;  %v1048_v2 = vsel %vm1046_vm1, %v1047_v1, 0  ;;  %v6511_v34 = vmov 0.0   ;;  %vm357_vm5 = vcmask 253952   ;;  %s6512_s29 = smov 32   ;;  %vm2044_vm6 = vcmask 523264  }
  0x8b   : > { %s5125_s28 = sshll.u32 %s8085_s27, 9  ;;  %v1050_v5 = vand.u32 %v6218_v3, %v1048_v2  ;;  %348 = vst.msk [vmem:[#allocation3] sm:$0xff] %vm347_vm3, %v6511_v34  ;;  %349 = vst.msk [vmem:[#allocation3 + $0x8] sm:$0xff] %vm347_vm3, %v6511_v34  ;;  %s6513_s10 = smov 64   ;;  %vm3190_vm7 = vcmask 785408   ;;  %vm2046_vm8 = vcmask 517120  }
  0x8c   : > { %s6721_s25 = scalar_lea.vmem %s8064_s0, %s5125_s28  ;;  %351 = vst.msk [vmem:[#allocation3 + $0x10] sm:$0x3] %vm350_vm4, %v6511_v34  ;;  %355 = vst.msk [vmem:[#allocation3 + $0x1a8] sm:$0x3] %vm350_vm4, %v6511_v34  ;;  %s6514_s30 = smov 96   ;;  %vm2052_vm9 = vcmask 516096  }
  0x8d   : > { %v6219_v4 = vld [vmem:[%s6721_s25] sm:$0xff]   ;;  %5410 = vmatprep.subr.bf16.mxu0 %v1050_v5  ;;  %v6220_v6 = vld [vmem:[%s6721_s25 + $0x8] sm:$0xff]   ;;  %v6221_v7 = vld [vmem:[%s6721_s25 + $0x10] sm:$0xff]   ;;  %353 = vst.msk [vmem:[#allocation3 + $0x198] sm:$0xff] %vm347_vm3, %v6511_v34 }
  0x8e   : > { %5412 = vmatprep.mubr.msk.bf16.mxu0 %vm852_vm2, %v6219_v4  ;;  %5411 = vmatpush3.bf16.msra.mxu0 %v1050_v5  ;;  %v6222_v8 = vld [vmem:[%s6721_s25 + $0x18] sm:$0xff]   ;;  %v6223_v9 = vld [vmem:[%s6721_s25 + $0x20] sm:$0xff]   ;;  %v6224_v10 = vld [vmem:[%s6721_s25 + $0x28] sm:$0xff]   ;;  %354 = vst.msk [vmem:[#allocation3 + $0x1a0] sm:$0xff] %vm347_vm3, %v6511_v34 }
  0x8f   : > { %v6225_v11 = vld [vmem:[%s6721_s25 + $0x30] sm:$0xff]   ;;  %v6226_v12 = vld [vmem:[%s6721_s25 + $0x38] sm:$0xff]   ;;  %v6227_v13 = vld [vmem:[%s6721_s25 + $0x40] sm:$0xff]   ;;  %358 = vst.msk [vmem:[#allocation3 + $0x18] sm:$0x1] %vm357_vm5, %v6511_v34 }
  0x90   : > { %v6228_v14 = vld [vmem:[%s6721_s25 + $0x48] sm:$0xff]   ;;  %v6229_v15 = vld [vmem:[%s6721_s25 + $0x50] sm:$0xff]   ;;  %v6230_v16 = vld [vmem:[%s6721_s25 + $0x58] sm:$0xff]   ;;  %359 = vst.msk [vmem:[#allocation3 + $0x30] sm:$0x1] %vm357_vm5, %v6511_v34 }
  0x91   : > { %5413 = vmatmul.mubr.msk.bf16.vlgmr.msra.gmra.mrb[0].mxu0 %vm852_vm2, %v6220_v6  ;;  %v6231_v17 = vld [vmem:[%s6721_s25 + $0x60] sm:$0xff]   ;;  %v6232_v18 = vld [vmem:[%s6721_s25 + $0x68] sm:$0xff]   ;;  %v6233_v19 = vld [vmem:[%s6721_s25 + $0x70] sm:$0xff]   ;;  %360 = vst.msk [vmem:[#allocation3 + $0x48] sm:$0x1] %vm357_vm5, %v6511_v34 }
  0x92   : > { %5416 = vmatprep.mubr.msk.bf16.mxu0 %vm852_vm2, %v6221_v7  ;;  %v6234_v20 = vld [vmem:[%s6721_s25 + $0x78] sm:$0xff]   ;;  %v6235_v21 = vld [vmem:[%s6721_s25 + $0x80] sm:$0xff]   ;;  %v6236_v22 = vld [vmem:[%s6721_s25 + $0x88] sm:$0xff]   ;;  %361 = vst.msk [vmem:[#allocation3 + $0x60] sm:$0x1] %vm357_vm5, %v6511_v34 }
  0x93   : > { %v6237_v23 = vld [vmem:[%s6721_s25 + $0x90] sm:$0xff]   ;;  %v6238_v24 = vld [vmem:[%s6721_s25 + $0x98] sm:$0xff]   ;;  %v6239_v25 = vld [vmem:[%s6721_s25 + $0xa0] sm:$0xff]   ;;  %362 = vst.msk [vmem:[#allocation3 + $0x78] sm:$0x1] %vm357_vm5, %v6511_v34 }
  0x94   : > { %v6240_v26 = vld [vmem:[%s6721_s25 + $0xa8] sm:$0xff]   ;;  %v6241_v27 = vld [vmem:[%s6721_s25 + $0xb0] sm:$0xff]   ;;  %v6242_v28 = vld [vmem:[%s6721_s25 + $0xb8] sm:$0xff]   ;;  %363 = vst.msk [vmem:[#allocation3 + $0x90] sm:$0x1] %vm357_vm5, %v6511_v34 }
  0x95   : > { %v6243_v29 = vld [vmem:[%s6721_s25 + $0xc0] sm:$0xff]   ;;  %v6244_v30 = vld [vmem:[%s6721_s25 + $0xc8] sm:$0xff]   ;;  %v6245_v31 = vld [vmem:[%s6721_s25 + $0xd0] sm:$0xff]   ;;  %364 = vst.msk [vmem:[#allocation3 + $0xa8] sm:$0x1] %vm357_vm5, %v6511_v34 }
  0x96   : > { %v6246_v32 = vld [vmem:[%s6721_s25 + $0xd8] sm:$0xff]   ;;  %v6247_v33 = vld [vmem:[%s6721_s25 + $0xe0] sm:$0xff]   ;;  %v6248_v35 = vld [vmem:[%s6721_s25 + $0xe8] sm:$0xff]   ;;  %365 = vst.msk [vmem:[#allocation3 + $0xc0] sm:$0x1] %vm357_vm5, %v6511_v34 }
  0x97   : > { %v6249_v36 = vld [vmem:[%s6721_s25 + $0xf0] sm:$0xff]   ;;  %v2101_v37 = vld [vmem:[#allocation3 + $0x1] sm:$0xff]  ;;  %366 = vst.msk [vmem:[#allocation3 + $0xd8] sm:$0x1] %vm357_vm5, %v6511_v34  ;;  %367 = vst.msk [vmem:[#allocation3 + $0xf0] sm:$0x1] %vm357_vm5, %v6511_v34 }
  0x98   : > { %v2102_v38 = vld [vmem:[#allocation3 + $0x9] sm:$0xff]  ;;  %368 = vst.msk [vmem:[#allocation3 + $0x108] sm:$0x1] %vm357_vm5, %v6511_v34  ;;  %369 = vst.msk [vmem:[#allocation3 + $0x120] sm:$0x1] %vm357_vm5, %v6511_v34  ;;  %v2292_v42 = vld [vmem:[#allocation3 + $0x198] sm:$0xff] }
  0x99   : > { %5417 = vmatmul.mubr.msk.bf16.gmra.mrb[4].mxu0 %vm852_vm2, %v6222_v8  ;;  %370 = vst.msk [vmem:[#allocation3 + $0x138] sm:$0x1] %vm357_vm5, %v6511_v34  ;;  %371 = vst.msk [vmem:[#allocation3 + $0x150] sm:$0x1] %vm357_vm5, %v6511_v34  ;;  %v5658_v39 = vpack.i.bf16 %v2102_v38, %v2101_v37  ;;  %v2133_v40 = vld [vmem:[#allocation3 + $0x2] sm:$0xff]  ;;  %v2134_v41 = vld [vmem:[#allocation3 + $0xa] sm:$0xff] }
  0x9a   : > { %5420 = vmatprep.mubr.msk.bf16.mxu0 %vm852_vm2, %v6223_v9  ;;  %372 = vst.msk [vmem:[#allocation3 + $0x168] sm:$0x1] %vm357_vm5, %v6511_v34  ;;  %373 = vst.msk [vmem:[#allocation3 + $0x180] sm:$0x1] %vm357_vm5, %v6511_v34  ;;  %v5663_v43 = vpack.i.bf16 %v2134_v41, %v2133_v40  ;;  %v2293_v44 = vld [vmem:[#allocation3 + $0x1a0] sm:$0xff]  ;;  %v6250_v45 = vld [vmem:[%s6721_s25 + $0xf8] sm:$0xff]  }
  0x9b   : > { %374 = vst.msk [vmem:[#allocation3 + $0x29] sm:$0x1] %vm357_vm5, %v6511_v34  ;;  %375 = vst.msk [vmem:[#allocation3 + $0x41] sm:$0x1] %vm357_vm5, %v6511_v34  ;;  %5659 = vrot.lane.b32.xlu0 %v5658_v39, %s6512_s29  ;;  %v5668_v46 = vpack.i.bf16 %v2293_v44, %v2292_v42  ;;  %v6251_v47 = vld [vmem:[%s6721_s25 + $0x100] sm:$0xff]   ;;  %v6252_v48 = vld [vmem:[%s6721_s25 + $0x108] sm:$0xff]  }
  0x9c   : > { %376 = vst.msk [vmem:[#allocation3 + $0x59] sm:$0x1] %vm357_vm5, %v6511_v34  ;;  %377 = vst.msk [vmem:[#allocation3 + $0x71] sm:$0x1] %vm357_vm5, %v6511_v34  ;;  %5664 = vrot.lane.b32.xlu1 %v5663_v43, %s6513_s10  ;;  %v6253_v49 = vld [vmem:[%s6721_s25 + $0x110] sm:$0xff]   ;;  %v6254_v50 = vld [vmem:[%s6721_s25 + $0x118] sm:$0xff]  }
  0x9d   : > { %378 = vst.msk [vmem:[#allocation3 + $0x89] sm:$0x1] %vm357_vm5, %v6511_v34  ;;  %379 = vst.msk [vmem:[#allocation3 + $0xa1] sm:$0x1] %vm357_vm5, %v6511_v34  ;;  %v6255_v51 = vld [vmem:[%s6721_s25 + $0x120] sm:$0xff]   ;;  %v6256_v52 = vld [vmem:[%s6721_s25 + $0x128] sm:$0xff]  }
  0x9e   : > { %380 = vst.msk [vmem:[#allocation3 + $0xb9] sm:$0x1] %vm357_vm5, %v6511_v34  ;;  %381 = vst.msk [vmem:[#allocation3 + $0xd1] sm:$0x1] %vm357_vm5, %v6511_v34  ;;  %v6257_v53 = vld [vmem:[%s6721_s25 + $0x130] sm:$0xff]   ;;  %v6258_v54 = vld [vmem:[%s6721_s25 + $0x138] sm:$0xff]  }
  0x9f   : > { %382 = vst.msk [vmem:[#allocation3 + $0xe9] sm:$0x1] %vm357_vm5, %v6511_v34  ;;  %383 = vst.msk [vmem:[#allocation3 + $0x101] sm:$0x1] %vm357_vm5, %v6511_v34  ;;  %5669 = vrot.lane.b32.xlu0 %v5668_v46, %s6513_s10  ;;  %v6259_v55 = vld [vmem:[%s6721_s25 + $0x140] sm:$0xff]   ;;  %v6260_v56 = vld [vmem:[%s6721_s25 + $0x148] sm:$0xff]  }
  0xa0   : > { %384 = vst.msk [vmem:[#allocation3 + $0x119] sm:$0x1] %vm357_vm5, %v6511_v34  ;;  %385 = vst.msk [vmem:[#allocation3 + $0x131] sm:$0x1] %vm357_vm5, %v6511_v34  ;;  %v6261_v57 = vld [vmem:[%s6721_s25 + $0x150] sm:$0xff]   ;;  %v6262_v58 = vld [vmem:[%s6721_s25 + $0x158] sm:$0xff]  }
  0xa1   : > { %5421 = vmatmul.mubr.msk.bf16.gmra.mrb[8].mxu0 %vm852_vm2, %v6224_v10  ;;  %386 = vst.msk [vmem:[#allocation3 + $0x149] sm:$0x1] %vm357_vm5, %v6511_v34  ;;  %387 = vst.msk [vmem:[#allocation3 + $0x161] sm:$0x1] %vm357_vm5, %v6511_v34  ;;  %v6263_v59 = vld [vmem:[%s6721_s25 + $0x160] sm:$0xff]   ;;  %v6264_v60 = vld [vmem:[%s6721_s25 + $0x168] sm:$0xff]  }
  0xa2   : > { %5424 = vmatprep.mubr.msk.bf16.mxu0 %vm852_vm2, %v6225_v11  ;;  %388 = vst.msk [vmem:[#allocation3 + $0x179] sm:$0x1] %vm357_vm5, %v6511_v34  ;;  %389 = vst.msk [vmem:[#allocation3 + $0x191] sm:$0x1] %vm357_vm5, %v6511_v34  ;;  %v6265_v61 = vld [vmem:[%s6721_s25 + $0x170] sm:$0xff]   ;;  %v6266_v62 = vld [vmem:[%s6721_s25 + $0x178] sm:$0xff]  }
  0xa3   : > { %v6267_v63 = vld [vmem:[%s6721_s25 + $0x180] sm:$0xff]   ;;  %v6268_v0 = vld [vmem:[%s6721_s25 + $0x188] sm:$0xff]   ;;  %v6269_v1 = vld [vmem:[%s6721_s25 + $0x190] sm:$0xff]   ;;  %2045 = vst.msk [vmem:[#allocation5] sm:$0xff] %vm2044_vm6, %v6511_v34 }
  0xa4   : > { %v6270_v2 = vld [vmem:[%s6721_s25 + $0x198] sm:$0xff]   ;;  %v6271_v3 = vld [vmem:[%s6721_s25 + $0x1a0] sm:$0xff]   ;;  %v6272_v4 = vld [vmem:[%s6721_s25 + $0x1a8] sm:$0xff]   ;;  %2049 = vst.msk [vmem:[#allocation5 + $0x90] sm:$0xff] %vm2044_vm6, %v6511_v34 }
  0xa5   : > { %v6273_v5 = vld [vmem:[%s6721_s25 + $0x1b0] sm:$0xff]   ;;  %v6274_v8 = vld [vmem:[%s6721_s25 + $0x1b8] sm:$0xff]   ;;  %v6275_v10 = vld [vmem:[%s6721_s25 + $0x1c0] sm:$0xff]   ;;  %2047 = vst.msk [vmem:[#allocation5 + $0x8] sm:$0x3] %vm2046_vm8, %v6511_v34 }
  0xa6   : > { %v6283_v39 = vld [vmem:[%s8067_s3 + $0x40] sm:$0xff]   ;;  %v6278_v44 = vld [vmem:[%s6721_s25 + $0x1d8] sm:$0xff]   ;;  %2050 = vst.msk [vmem:[#allocation5 + $0x98] sm:$0x3] %vm2046_vm8, %v6511_v34 }
  0xa7   : > { %v6284_v42 = vld [vmem:[%s8067_s3] sm:$0xff]   ;;  %5192 = vmatprep.subr.bf16.mxu1 %v6283_v39  ;;  %v6293_v39 = vld [vmem:[%s8067_s3 + $0x68] sm:$0xff]   ;;  %2053 = vst.msk [vmem:[#allocation5 + $0x10] sm:$0x1] %vm2052_vm9, %v6511_v34  ;;  %2054 = vst.msk [vmem:[#allocation5 + $0x20] sm:$0x1] %vm2052_vm9, %v6511_v34 }
  0xa8   : > { %v6279_v46 = vld [vmem:[%s6721_s25 + $0x1e0] sm:$0xff]   ;;  %5193 = vmatpush3.bf16.msra.mxu1 %v6284_v42  ;;  %v6295_v42 = vld [vmem:[%s8067_s3 + $0x70] sm:$0xff]   ;;  %2055 = vst.msk [vmem:[#allocation5 + $0x30] sm:$0x1] %vm2052_vm9, %v6511_v34  ;;  %2056 = vst.msk [vmem:[#allocation5 + $0x40] sm:$0x1] %vm2052_vm9, %v6511_v34 }
  0xa9   : > { %5425 = vmatmul.mubr.msk.bf16.gmra.mrb[12].mxu0 %vm852_vm2, %v6226_v12  ;;  %v6912_v12 = vld [vmem:[#allocation9] ss:$0 sm:$0xff]  ;;  %2057 = vst.msk [vmem:[#allocation5 + $0x50] sm:$0x1] %vm2052_vm9, %v6511_v34  ;;  %2058 = vst.msk [vmem:[#allocation5 + $0x60] sm:$0x1] %vm2052_vm9, %v6511_v34 }
  0xaa   : > { %5428 = vmatprep.mubr.msk.bf16.mxu0 %vm852_vm2, %v6227_v13  ;;  %2059 = vst.msk [vmem:[#allocation5 + $0x70] sm:$0x1] %vm2052_vm9, %v6511_v34  ;;  %2060 = vst.msk [vmem:[#allocation5 + $0x80] sm:$0x1] %vm2052_vm9, %v6511_v34 }
  0xab   : > { %2061 = vst.msk [vmem:[#allocation5 + $0x19] sm:$0x1] %vm2052_vm9, %v6511_v34  ;;  %2062 = vst.msk [vmem:[#allocation5 + $0x29] sm:$0x1] %vm2052_vm9, %v6511_v34 }
  0xac   : > { %2063 = vst.msk [vmem:[#allocation5 + $0x39] sm:$0x1] %vm2052_vm9, %v6511_v34  ;;  %2064 = vst.msk [vmem:[#allocation5 + $0x49] sm:$0x1] %vm2052_vm9, %v6511_v34 }
  0xad   : > { %2065 = vst.msk [vmem:[#allocation5 + $0x59] sm:$0x1] %vm2052_vm9, %v6511_v34  ;;  %2066 = vst.msk [vmem:[#allocation5 + $0x69] sm:$0x1] %vm2052_vm9, %v6511_v34 }
  0xae   : > { %2067 = vst.msk [vmem:[#allocation5 + $0x79] sm:$0x1] %vm2052_vm9, %v6511_v34  ;;  %2068 = vst.msk [vmem:[#allocation5 + $0x89] sm:$0x1] %vm2052_vm9, %v6511_v34  ;;  %v6303_v34 = vld [vmem:[#allocation12 + $0x110] sm:$0xff]  }
  0xb1   : > { %5429 = vmatmul.mubr.msk.bf16.gmra.mrb[16].mxu0 %vm852_vm2, %v6228_v14 }
  0xb2   : > { %5432 = vmatprep.mubr.msk.bf16.mxu0 %vm852_vm2, %v6229_v15 }
  0xb9   : > { %5433 = vmatmul.mubr.msk.bf16.gmra.mrb[20].mxu0 %vm852_vm2, %v6230_v16 }
  0xba   : > { %5436 = vmatprep.mubr.msk.bf16.mxu0 %vm852_vm2, %v6231_v17 }
  0xc1   : > { %5437 = vmatmul.mubr.msk.bf16.gmra.mrb[24].mxu0 %vm852_vm2, %v6232_v18 }
  0xc2   : > { %5440 = vmatprep.mubr.msk.bf16.mxu0 %vm852_vm2, %v6233_v19  ;;  %v6276_v19 = vld [vmem:[%s6721_s25 + $0x1c8] sm:$0xff]  }
  0xc9   : > { %5441 = vmatmul.mubr.msk.bf16.gmra.mrb[28].mxu0 %vm852_vm2, %v6234_v20 }
  0xca   : > { %5444 = vmatprep.mubr.msk.bf16.mxu0 %vm852_vm2, %v6235_v21 }
  0xd1   : > { %5445 = vmatmul.mubr.msk.bf16.gmra.mrb[32].mxu0 %vm852_vm2, %v6236_v22 }
  0xd2   : > { %5448 = vmatprep.mubr.msk.bf16.mxu0 %vm852_vm2, %v6237_v23  ;;  %v6277_v23 = vld [vmem:[%s6721_s25 + $0x1d0] sm:$0xff]  }
  0xd9   : > { %5449 = vmatmul.mubr.msk.bf16.gmra.mrb[36].mxu0 %vm852_vm2, %v6238_v24 }
  0xda   : > { %5452 = vmatprep.mubr.msk.bf16.mxu0 %vm852_vm2, %v6239_v25 }
  0xe1   : > { %5453 = vmatmul.mubr.msk.bf16.gmra.mrb[40].mxu0 %vm852_vm2, %v6240_v26 }
  0xe2   : > { %5456 = vmatprep.mubr.msk.bf16.mxu0 %vm852_vm2, %v6241_v27 }
  0xe9   : > { %5457 = vmatmul.mubr.msk.bf16.gmra.mrb[44].mxu0 %vm852_vm2, %v6242_v28 }
  0xea   : > { %5460 = vmatprep.mubr.msk.bf16.mxu0 %vm852_vm2, %v6243_v29 }
  0xf1   : > { %5461 = vmatmul.mubr.msk.bf16.gmra.mrb[48].mxu0 %vm852_vm2, %v6244_v30 }
  0xf2   : > { %5464 = vmatprep.mubr.msk.bf16.mxu0 %vm852_vm2, %v6245_v31 }
  0xf9   : > { %5465 = vmatmul.mubr.msk.bf16.gmra.mrb[52].mxu0 %vm852_vm2, %v6246_v32 }
  0xfa   : > { %5468 = vmatprep.mubr.msk.bf16.mxu0 %vm852_vm2, %v6247_v33 }
 0x101   : > { %5469 = vmatmul.mubr.msk.bf16.gmra.mrb[56].mxu0 %vm852_vm2, %v6248_v35 }
 0x102   : > { %5472 = vmatprep.mubr.msk.bf16.mxu0 %vm852_vm2, %v6249_v36 }
 0x109   : > { %5473 = vmatmul.mubr.msk.bf16.gmra.mrb[60].mxu0 %vm852_vm2, %v6250_v45 }
 0x10a   : > { %5476 = vmatprep.mubr.msk.bf16.mxu0 %vm852_vm2, %v6251_v47 }
 0x111   : > { %5477 = vmatmul.mubr.msk.bf16.gmra.mrb[64].mxu0 %vm852_vm2, %v6252_v48  ;;  %v6285_v48 = vld [vmem:[%s8067_s3 + $0x48] sm:$0xff]  }
 0x112   : > { %5480 = vmatprep.mubr.msk.bf16.mxu0 %vm852_vm2, %v6253_v49  ;;  %v6286_v49 = vld [vmem:[%s8067_s3 + $0x8] sm:$0xff]   ;;  %5194 = vmatprep.subr.bf16.mxu1 %v6285_v48  ;;  %v6296_v48 = vld [vmem:[%s8067_s3 + $0x30] sm:$0xff]  }
 0x113   : > { %5195 = vmatpush3.bf16.msra.mxu1 %v6286_v49 }
 0x119   : > { %5481 = vmatmul.mubr.msk.bf16.gmra.mrb[68].mxu0 %vm852_vm2, %v6254_v50 }
 0x11a   : > { %5484 = vmatprep.mubr.msk.bf16.mxu0 %vm852_vm2, %v6255_v51  ;;  %v6287_v51 = vld [vmem:[%s8067_s3 + $0x50] sm:$0xff]  }
 0x11b   : > { %5196 = vmatprep.subr.bf16.mxu1 %v6287_v51 }
 0x121   : > { %5485 = vmatmul.mubr.msk.bf16.gmra.mrb[72].mxu0 %vm852_vm2, %v6256_v52 }
 0x122   : > { %5488 = vmatprep.mubr.msk.bf16.mxu0 %vm852_vm2, %v6257_v53 }
 0x129   : > { %5489 = vmatmul.mubr.msk.bf16.gmra.mrb[76].mxu0 %vm852_vm2, %v6258_v54 }
 0x12a   : > { %5492 = vmatprep.mubr.msk.bf16.mxu0 %vm852_vm2, %v6259_v55 }
 0x131   : > { %5493 = vmatmul.mubr.msk.bf16.gmra.mrb[80].mxu0 %vm852_vm2, %v6260_v56  ;;  %v6288_v56 = vld [vmem:[%s8067_s3 + $0x10] sm:$0xff]  }
 0x132   : > { %5496 = vmatprep.mubr.msk.bf16.mxu0 %vm852_vm2, %v6261_v57  ;;  %5197 = vmatpush3.bf16.msra.mxu1 %v6288_v56 }
 0x139   : > { %5497 = vmatmul.mubr.msk.bf16.gmra.mrb[84].mxu0 %vm852_vm2, %v6262_v58 }
 0x13a   : > { %5500 = vmatprep.mubr.msk.bf16.mxu0 %vm852_vm2, %v6263_v59 }
 0x141   : > { %5501 = vmatmul.mubr.msk.bf16.gmra.mrb[88].mxu0 %vm852_vm2, %v6264_v60 }
 0x142   : > { %5504 = vmatprep.mubr.msk.bf16.mxu0 %vm852_vm2, %v6265_v61 }
 0x149   : > { %5505 = vmatmul.mubr.msk.bf16.gmra.mrb[92].mxu0 %vm852_vm2, %v6266_v62 }
 0x14a   : > { %5508 = vmatprep.mubr.msk.bf16.mxu0 %vm852_vm2, %v6267_v63  ;;  %v6280_v63 = vld [vmem:[%s6721_s25 + $0x1e8] sm:$0xff]  }
 0x151   : > { %5509 = vmatmul.mubr.msk.bf16.gmra.mrb[96].mxu0 %vm852_vm2, %v6268_v0 }
 0x152   : > { %5512 = vmatprep.mubr.msk.bf16.mxu0 %vm852_vm2, %v6269_v1 }
 0x159   : > { %5513 = vmatmul.mubr.msk.bf16.gmra.mrb[100].mxu0 %vm852_vm2, %v6270_v2 }
 0x15a   : > { %5516 = vmatprep.mubr.msk.bf16.mxu0 %vm852_vm2, %v6271_v3 }
 0x161   : > { %5517 = vmatmul.mubr.msk.bf16.gmra.mrb[104].mxu0 %vm852_vm2, %v6272_v4  ;;  %v6281_v4 = vld [vmem:[%s6721_s25 + $0x1f0] sm:$0xff]  }
 0x162   : > { %5520 = vmatprep.mubr.msk.bf16.mxu0 %vm852_vm2, %v6273_v5 }
 0x164   : > { %v5414_v6 = vpop.f32.mrb[0].mxu0 }
 0x165   : > { %v1086_v7 = vpop.f32.mrb[1].mxu0  ;;  %v1095_v13 = vadd.f32 %v5414_v6, %v6912_v12 }
 0x166   : > { %v5415_v9 = vpop.f32.mrb[2].mxu0  ;;  %v1087_v14 = vadd.f32 %v6912_v12, %v1086_v7 }
 0x167   : > { %v1089_v11 = vpop.f32.mrb[3].mxu0  ;;  %v1098_v16 = vadd.f32 %v5415_v9, %v6912_v12  ;;  %v1599_v24 = vmax.f32 %v1095_v13, 0.0  ;;  %v6289_v9 = vld [vmem:[%s8067_s3 + $0x58] sm:$0xff]  }
 0x168   : > { %v1090_v20 = vadd.f32 %v6912_v12, %v1089_v11  ;;  %v1597_v28 = vmax.f32 %v1087_v14, 0.0  ;;  %v6290_v14 = vld [vmem:[%s8067_s3 + $0x18] sm:$0xff]   ;;  %5198 = vmatprep.subr.bf16.mxu1 %v6289_v9 }
 0x169   : > { %5521 = vmatmul.mubr.msk.bf16.gmra.mrb[108].mxu0 %vm852_vm2, %v6274_v8  ;;  %v1600_v31 = vmax.f32 %v1098_v16, 0.0  ;;  %5199 = vmatpush3.bf16.msra.mxu1 %v6290_v14 }
 0x16a   : > { %5524 = vmatprep.mubr.msk.bf16.mxu0 %vm852_vm2, %v6275_v10  ;;  %v1598_v35 = vmax.f32 %v1090_v20, 0.0 }
 0x16c   : > { %v5418_v15 = vpop.f32.mrb[4].mxu0 }
 0x16d   : > { %v1111_v17 = vadd.f32 %v5418_v15, %v6912_v12  ;;  %v1102_v18 = vpop.f32.mrb[5].mxu0 }
 0x16e   : > { %v1103_v21 = vadd.f32 %v6912_v12, %v1102_v18  ;;  %v5419_v22 = vpop.f32.mrb[6].mxu0 }
 0x16f   : > { %v1603_v25 = vmax.f32 %v1111_v17, 0.0  ;;  %v1114_v26 = vadd.f32 %v5419_v22, %v6912_v12  ;;  %v1105_v27 = vpop.f32.mrb[7].mxu0  ;;  %v6291_v22 = vld [vmem:[%s8067_s3 + $0x60] sm:$0xff]  }
 0x170   : > { %v1601_v29 = vmax.f32 %v1103_v21, 0.0  ;;  %v1106_v30 = vadd.f32 %v6912_v12, %v1105_v27  ;;  %v6282_v27 = vld [vmem:[%s6721_s25 + $0x1f8] sm:$0xff]   ;;  %5200 = vmatprep.subr.bf16.mxu1 %v6291_v22 }
 0x171   : > { %v1727_v32 = vmax.f32 %v1599_v24, %v1603_v25  ;;  %v1604_v33 = vmax.f32 %v1114_v26, 0.0  ;;  %5525 = vmatmul.mubr.msk.bf16.gmra.mrb[112].mxu0 %vm852_vm2, %v6276_v19  ;;  %v6292_v25 = vld [vmem:[%s8067_s3 + $0x20] sm:$0xff]  }
 0x172   : > { %v1725_v36 = vmax.f32 %v1597_v28, %v1601_v29  ;;  %v1602_v37 = vmax.f32 %v1106_v30, 0.0  ;;  %5528 = vmatprep.mubr.msk.bf16.mxu0 %vm852_vm2, %v6277_v23  ;;  %5201 = vmatpush3.bf16.msra.mxu1 %v6292_v25 }
 0x173   : > { %1791 = vst.msk [vmem:[#allocation2 + $0x10] sm:$0xff] %vm347_vm3, %v1727_v32  ;;  %v1728_v38 = vmax.f32 %v1600_v31, %v1604_v33  ;;  %5202 = vmatprep.subr.bf16.mxu1 %v6293_v39 }
 0x174   : > { %1789 = vst.msk [vmem:[#allocation2] sm:$0xff] %vm347_vm3, %v1725_v36  ;;  %v1726_v40 = vmax.f32 %v1598_v35, %v1602_v37  ;;  %v5422_v41 = vpop.f32.mrb[8].mxu0 }
 0x175   : > { %1792 = vst.msk [vmem:[#allocation2 + $0x18] sm:$0xff] %vm347_vm3, %v1728_v38  ;;  %v1118_v43 = vpop.f32.mrb[9].mxu0  ;;  %v1127_v50 = vadd.f32 %v5422_v41, %v6912_v12 }
 0x176   : > { %1790 = vst.msk [vmem:[#allocation2 + $0x8] sm:$0xff] %vm347_vm3, %v1726_v40  ;;  %v5423_v45 = vpop.f32.mrb[10].mxu0  ;;  %v1119_v54 = vadd.f32 %v6912_v12, %v1118_v43  ;;  %v6294_v40 = vld [vmem:[%s8067_s3 + $0x28] sm:$0xff]  }
 0x177   : > { %v1121_v47 = vpop.f32.mrb[11].mxu0  ;;  %v1130_v60 = vadd.f32 %v5423_v45, %v6912_v12  ;;  %v1607_v5 = vmax.f32 %v1127_v50, 0.0  ;;  %5203 = vmatpush3.bf16.msra.mxu1 %v6294_v40 }
 0x178   : > { %v1122_v1 = vadd.f32 %v6912_v12, %v1121_v47  ;;  %v1605_v10 = vmax.f32 %v1119_v54, 0.0  ;;  %5204 = vmatprep.subr.bf16.mxu1 %v6295_v42 }
 0x179   : > { %5529 = vmatmul.mubr.msk.bf16.gmra.mrb[116].mxu0 %vm852_vm2, %v6278_v44  ;;  %v1608_v15 = vmax.f32 %v1130_v60, 0.0 }
 0x17a   : > { %5532 = vmatprep.mubr.msk.bf16.mxu0 %vm852_vm2, %v6279_v46  ;;  %v1606_v18 = vmax.f32 %v1122_v1, 0.0 }
 0x17b   : > { %5205 = vmatpush3.bf16.msra.mxu1 %v6296_v48 }
 0x17c   : > { %v1855_v52 = vld [vmem:[#allocation2 + $0x10] ss:$2 sm:$0xff]  ;;  %v1919_v53 = vld [vmem:[#allocation2 + $0x11] ss:$2 sm:$0xff]  ;;  %v5426_v55 = vpop.f32.mrb[12].mxu0 }
 0x17d   : > { %v1981_v57 = vmax.f32 %v1855_v52, %v1919_v53  ;;  %v1853_v58 = vld [vmem:[#allocation2] ss:$2 sm:$0xff]  ;;  %v1917_v59 = vld [vmem:[#allocation2 + $0x1] ss:$2 sm:$0xff]  ;;  %v1143_v61 = vadd.f32 %v5426_v55, %v6912_v12  ;;  %v1134_v62 = vpop.f32.mrb[13].mxu0 }
 0x17e   : > { %v1980_v0 = vmax.f32 %v1853_v58, %v1917_v59  ;;  %v1135_v2 = vadd.f32 %v6912_v12, %v1134_v62  ;;  %v5427_v3 = vpop.f32.mrb[14].mxu0 }
 0x17f   : > { %2013 = vst.msk [vmem:[#allocation3 + $0x21] sm:$0xff] %vm347_vm3, %v1981_v57  ;;  %v1611_v6 = vmax.f32 %v1143_v61, 0.0  ;;  %v1146_v7 = vadd.f32 %v5427_v3, %v6912_v12  ;;  %v1137_v8 = vpop.f32.mrb[15].mxu0  ;;  %v6298_v3 = vld [vmem:[%s8067_s3 + $0x38] sm:$0xff]  }
 0x180   : > { %2012 = vst.msk [vmem:[#allocation3 + $0x19] sm:$0xff] %vm347_vm3, %v1980_v0  ;;  %v1609_v11 = vmax.f32 %v1135_v2, 0.0  ;;  %v1138_v13 = vadd.f32 %v6912_v12, %v1137_v8 }
 0x181   : > { %v1731_v16 = vmax.f32 %v1607_v5, %v1611_v6  ;;  %v1612_v17 = vmax.f32 %v1146_v7, 0.0  ;;  %5533 = vmatmul.mubr.msk.bf16.gmra.mrb[120].mxu0 %vm852_vm2, %v6280_v63  ;;  %v6297_v63 = vld [vmem:[%s8067_s3 + $0x78] sm:$0xff]  }
 0x182   : > { %v1729_v19 = vmax.f32 %v1605_v10, %v1609_v11  ;;  %v1610_v20 = vmax.f32 %v1138_v13, 0.0  ;;  %5536 = vmatprep.mubr.msk.bf16.mxu0 %vm852_vm2, %v6281_v4  ;;  %5206 = vmatprep.subr.bf16.mxu1 %v6297_v63 }
 0x183   : > { %1795 = vst.msk [vmem:[#allocation2 + $0x30] sm:$0xff] %vm347_vm3, %v1731_v16  ;;  %v1732_v21 = vmax.f32 %v1608_v15, %v1612_v17  ;;  %5207 = vmatpush3.bf16.msra.mxu1 %v6298_v3 }
 0x184   : > { %1793 = vst.msk [vmem:[#allocation2 + $0x20] sm:$0xff] %vm347_vm3, %v1729_v19  ;;  %v1730_v23 = vmax.f32 %v1606_v18, %v1610_v20  ;;  %v5430_v24 = vpop.f32.mrb[16].mxu0 }
 0x185   : > { %1796 = vst.msk [vmem:[#allocation2 + $0x38] sm:$0xff] %vm347_vm3, %v1732_v21  ;;  %v1150_v26 = vpop.f32.mrb[17].mxu0  ;;  %v1159_v41 = vadd.f32 %v5430_v24, %v6912_v12 }
 0x186   : > { %1794 = vst.msk [vmem:[#allocation2 + $0x28] sm:$0xff] %vm347_vm3, %v1730_v23  ;;  %v5431_v28 = vpop.f32.mrb[18].mxu0  ;;  %v2230_v29 = vld [vmem:[#allocation3 + $0x22] sm:$0xff]  ;;  %v1151_v45 = vadd.f32 %v6912_v12, %v1150_v26 }
 0x187   : > { %v1153_v30 = vpop.f32.mrb[19].mxu0  ;;  %v2165_v31 = vld [vmem:[#allocation3 + $0x18] sm:$0xff]  ;;  %v2166_v32 = vld [vmem:[#allocation3 + $0x20] sm:$0xff]  ;;  %v1162_v52 = vadd.f32 %v5431_v28, %v6912_v12  ;;  %v1615_v59 = vmax.f32 %v1159_v41, 0.0 }
 0x188   : > { %v2229_v33 = vld [vmem:[#allocation3 + $0x1a] sm:$0xff]  ;;  %v5678_v35 = vpack.i.bf16 %v2166_v32, %v2165_v31  ;;  %v1154_v56 = vadd.f32 %v6912_v12, %v1153_v30  ;;  %v1613_v0 = vmax.f32 %v1151_v45, 0.0 }
 0x189   : > { %v5673_v36 = vpack.i.bf16 %v2230_v29, %v2229_v33  ;;  %v2104_v37 = vld [vmem:[#allocation3 + $0x21] sm:$0xff]  ;;  %5537 = vmatmul.mubr.msk.bf16.gmra.mrb[124].mxu0 %vm852_vm2, %v6282_v27  ;;  %v2103_v38 = vld [vmem:[#allocation3 + $0x19] sm:$0xff]  ;;  %v1616_v4 = vmax.f32 %v1162_v52, 0.0 }
 0x18a   : > { %5679 = vrot.lane.b32.xlu1 %v5678_v35, %s6514_s30  ;;  %v5683_v47 = vpack.i.bf16 %v2104_v37, %v2103_v38  ;;  %v1614_v7 = vmax.f32 %v1154_v56, 0.0 }
 0x18b   : > { %5674 = vrot.lane.b32.xlu0 %v5673_v36, %s6512_s29 }
 0x18c   : > { %v1859_v43 = vld [vmem:[#allocation2 + $0x30] ss:$2 sm:$0xff]  ;;  %v1923_v44 = vld [vmem:[#allocation2 + $0x31] ss:$2 sm:$0xff]  ;;  %v5434_v46 = vpop.f32.mrb[20].mxu0 }
 0x18d   : > { %v1983_v49 = vmax.f32 %v1859_v43, %v1923_v44  ;;  %v1857_v50 = vld [vmem:[#allocation2 + $0x20] ss:$2 sm:$0xff]  ;;  %v1921_v51 = vld [vmem:[#allocation2 + $0x21] ss:$2 sm:$0xff]  ;;  %v1175_v53 = vadd.f32 %v5434_v46, %v6912_v12  ;;  %v1166_v54 = vpop.f32.mrb[21].mxu0 }
 0x18e   : > { %v1982_v55 = vmax.f32 %v1857_v50, %v1921_v51  ;;  %v1167_v57 = vadd.f32 %v6912_v12, %v1166_v54  ;;  %v5435_v58 = vpop.f32.mrb[22].mxu0  ;;  %5684 = vrot.lane.b32.xlu1 %v5683_v47, %s6512_s29 }
 0x18f   : > { %2015 = vst.msk [vmem:[#allocation3 + $0x39] sm:$0xff] %vm347_vm3, %v1983_v49  ;;  %v1619_v60 = vmax.f32 %v1175_v53, 0.0  ;;  %v1178_v61 = vadd.f32 %v5435_v58, %v6912_v12  ;;  %v1169_v62 = vpop.f32.mrb[23].mxu0 }
 0x190   : > { %2014 = vst.msk [vmem:[#allocation3 + $0x31] sm:$0xff] %vm347_vm3, %v1982_v55  ;;  %v1617_v1 = vmax.f32 %v1167_v57, 0.0  ;;  %v1170_v2 = vadd.f32 %v6912_v12, %v1169_v62 }
 0x191   : > { %v1735_v5 = vmax.f32 %v1615_v59, %v1619_v60  ;;  %v1620_v6 = vmax.f32 %v1178_v61, 0.0 }
 0x192   : > { %v1733_v8 = vmax.f32 %v1613_v0, %v1617_v1  ;;  %v1618_v9 = vmax.f32 %v1170_v2, 0.0  ;;  %5689 = vrot.lane.b32.xlu1 %v5673_v36, %s6513_s10 }
 0x193   : > { %1799 = vst.msk [vmem:[#allocation2 + $0x50] sm:$0xff] %vm347_vm3, %v1735_v5  ;;  %v1736_v10 = vmax.f32 %v1616_v4, %v1620_v6 }
 0x194   : > { %1797 = vst.msk [vmem:[#allocation2 + $0x40] sm:$0xff] %vm347_vm3, %v1733_v8  ;;  %v1734_v11 = vmax.f32 %v1614_v7, %v1618_v9  ;;  %v5438_v13 = vpop.f32.mrb[24].mxu0 }
 0x195   : > { %1800 = vst.msk [vmem:[#allocation2 + $0x58] sm:$0xff] %vm347_vm3, %v1736_v10  ;;  %v1182_v14 = vpop.f32.mrb[25].mxu0  ;;  %v1191_v25 = vadd.f32 %v5438_v13, %v6912_v12 }
 0x196   : > { %1798 = vst.msk [vmem:[#allocation2 + $0x48] sm:$0xff] %vm347_vm3, %v1734_v11  ;;  %v5439_v15 = vpop.f32.mrb[26].mxu0  ;;  %v2295_v16 = vld [vmem:[#allocation3 + $0x39] sm:$0xff]  ;;  %v1183_v28 = vadd.f32 %v6912_v12, %v1182_v14 }
 0x197   : > { %v1185_v17 = vpop.f32.mrb[27].mxu0  ;;  %v2262_v18 = vld [vmem:[#allocation3 + $0x30] sm:$0xff]  ;;  %v2263_v19 = vld [vmem:[#allocation3 + $0x38] sm:$0xff]  ;;  %v1194_v35 = vadd.f32 %v5439_v15, %v6912_v12  ;;  %v1623_v42 = vmax.f32 %v1191_v25, 0.0 }
 0x198   : > { %v2294_v20 = vld [vmem:[#allocation3 + $0x31] sm:$0xff]  ;;  %v5693_v21 = vpack.i.bf16 %v2263_v19, %v2262_v18  ;;  %v2232_v24 = vld [vmem:[#allocation3 + $0x3a] sm:$0xff]  ;;  %v1186_v39 = vadd.f32 %v6912_v12, %v1185_v17  ;;  %v1621_v46 = vmax.f32 %v1183_v28, 0.0 }
 0x199   : > { %v5698_v22 = vpack.i.bf16 %v2295_v16, %v2294_v20  ;;  %v2231_v23 = vld [vmem:[#allocation3 + $0x32] sm:$0xff]  ;;  %v1624_v49 = vmax.f32 %v1194_v35, 0.0 }
 0x19a   : > { %5694 = vrot.lane.b32.xlu1 %v5693_v21, %s6513_s10  ;;  %v5703_v30 = vpack.i.bf16 %v2232_v24, %v2231_v23  ;;  %v1622_v52 = vmax.f32 %v1186_v39, 0.0 }
 0x19b   : > { %5699 = vrot.lane.b32.xlu0 %v5698_v22, %s6514_s30 }
 0x19c   : > { %v1863_v26 = vld [vmem:[#allocation2 + $0x50] ss:$2 sm:$0xff]  ;;  %v1927_v27 = vld [vmem:[#allocation2 + $0x51] ss:$2 sm:$0xff]  ;;  %v5442_v29 = vpop.f32.mrb[28].mxu0 }
 0x19d   : > { %v1985_v31 = vmax.f32 %v1863_v26, %v1927_v27  ;;  %v1861_v32 = vld [vmem:[#allocation2 + $0x40] ss:$2 sm:$0xff]  ;;  %v1925_v33 = vld [vmem:[#allocation2 + $0x41] ss:$2 sm:$0xff]  ;;  %v1207_v36 = vadd.f32 %v5442_v29, %v6912_v12  ;;  %v1198_v37 = vpop.f32.mrb[29].mxu0 }
 0x19e   : > { %v1984_v38 = vmax.f32 %v1861_v32, %v1925_v33  ;;  %v1199_v40 = vadd.f32 %v6912_v12, %v1198_v37  ;;  %v5443_v41 = vpop.f32.mrb[30].mxu0  ;;  %5709 = vrot.lane.b32.xlu1 %v5693_v21, %s6514_s30 }
 0x19f   : > { %5704 = vrot.lane.b32.xlu0 %v5703_v30, %s6512_s29  ;;  %2017 = vst.msk [vmem:[#allocation3 + $0x51] sm:$0xff] %vm347_vm3, %v1985_v31  ;;  %v1627_v43 = vmax.f32 %v1207_v36, 0.0  ;;  %v1210_v44 = vadd.f32 %v5443_v41, %v6912_v12  ;;  %v1201_v45 = vpop.f32.mrb[31].mxu0 }
 0x1a0   : > { %2016 = vst.msk [vmem:[#allocation3 + $0x49] sm:$0xff] %vm347_vm3, %v1984_v38  ;;  %v1625_v47 = vmax.f32 %v1199_v40, 0.0  ;;  %v1202_v48 = vadd.f32 %v6912_v12, %v1201_v45 }
 0x1a1   : > { %v1739_v50 = vmax.f32 %v1623_v42, %v1627_v43  ;;  %v1628_v51 = vmax.f32 %v1210_v44, 0.0 }
 0x1a2   : > { %v1737_v53 = vmax.f32 %v1621_v46, %v1625_v47  ;;  %v1626_v54 = vmax.f32 %v1202_v48, 0.0  ;;  %5714 = vrot.lane.b32.xlu1 %v5698_v22, %s6512_s29 }
 0x1a3   : > { %1803 = vst.msk [vmem:[#allocation2 + $0x70] sm:$0xff] %vm347_vm3, %v1739_v50  ;;  %v1740_v55 = vmax.f32 %v1624_v49, %v1628_v51 }
 0x1a4   : > { %1801 = vst.msk [vmem:[#allocation2 + $0x60] sm:$0xff] %vm347_vm3, %v1737_v53  ;;  %v1738_v56 = vmax.f32 %v1622_v52, %v1626_v54  ;;  %v5446_v57 = vpop.f32.mrb[32].mxu0 }
 0x1a5   : > { %1804 = vst.msk [vmem:[#allocation2 + $0x78] sm:$0xff] %vm347_vm3, %v1740_v55  ;;  %v1214_v58 = vpop.f32.mrb[33].mxu0  ;;  %v1223_v2 = vadd.f32 %v5446_v57, %v6912_v12 }
 0x1a6   : > { %1802 = vst.msk [vmem:[#allocation2 + $0x68] sm:$0xff] %vm347_vm3, %v1738_v56  ;;  %v5447_v59 = vpop.f32.mrb[34].mxu0  ;;  %5719 = vrot.lane.b32.xlu1 %v5703_v30, %s6513_s10  ;;  %v2108_v1 = vld [vmem:[#allocation3 + $0x51] sm:$0xff]  ;;  %v1215_v5 = vadd.f32 %v6912_v12, %v1214_v58 }
 0x1a7   : > { %v1217_v60 = vpop.f32.mrb[35].mxu0  ;;  %v2169_v61 = vld [vmem:[#allocation3 + $0x48] sm:$0xff]  ;;  %v2170_v62 = vld [vmem:[#allocation3 + $0x50] sm:$0xff]  ;;  %v1226_v13 = vadd.f32 %v5447_v59, %v6912_v12  ;;  %v1631_v21 = vmax.f32 %v1223_v2, 0.0 }
 0x1a8   : > { %v5738_v63 = vpack.i.bf16 %v2170_v62, %v2169_v61  ;;  %v2107_v0 = vld [vmem:[#allocation3 + $0x49] sm:$0xff]  ;;  %v2140_v8 = vld [vmem:[#allocation3 + $0x52] sm:$0xff]  ;;  %v1218_v18 = vadd.f32 %v6912_v12, %v1217_v60  ;;  %v1629_v25 = vmax.f32 %v1215_v5, 0.0 }
 0x1a9   : > { %v5743_v7 = vpack.i.bf16 %v2108_v1, %v2107_v0  ;;  %v2139_v16 = vld [vmem:[#allocation3 + $0x4a] sm:$0xff]  ;;  %v1632_v29 = vmax.f32 %v1226_v13, 0.0 }
 0x1aa   : > { %5739 = vrot.lane.b32.xlu1 %v5738_v63, %s6514_s30  ;;  %5724 = vrot.lane.b32.xlu0 %v5738_v63, %s6513_s10  ;;  %v5748_v28 = vpack.i.bf16 %v2140_v8, %v2139_v16  ;;  %v1630_v32 = vmax.f32 %v1218_v18, 0.0 }
 0x1ac   : > { %v1867_v3 = vld [vmem:[#allocation2 + $0x70] ss:$2 sm:$0xff]  ;;  %v1931_v4 = vld [vmem:[#allocation2 + $0x71] ss:$2 sm:$0xff]  ;;  %v5450_v6 = vpop.f32.mrb[36].mxu0 }
 0x1ad   : > { %v1987_v9 = vmax.f32 %v1867_v3, %v1931_v4  ;;  %v1865_v10 = vld [vmem:[#allocation2 + $0x60] ss:$2 sm:$0xff]  ;;  %v1929_v11 = vld [vmem:[#allocation2 + $0x61] ss:$2 sm:$0xff]  ;;  %v1239_v14 = vadd.f32 %v5450_v6, %v6912_v12  ;;  %v1230_v15 = vpop.f32.mrb[37].mxu0 }
 0x1ae   : > { %v1986_v17 = vmax.f32 %v1865_v10, %v1929_v11  ;;  %v1231_v19 = vadd.f32 %v6912_v12, %v1230_v15  ;;  %v5451_v20 = vpop.f32.mrb[38].mxu0  ;;  %5744 = vrot.lane.b32.xlu1 %v5743_v7, %s6512_s29  ;;  %5729 = vrot.lane.b32.xlu0 %v5743_v7, %s6514_s30 }
 0x1af   : > { %2019 = vst.msk [vmem:[#allocation3 + $0x69] sm:$0xff] %vm347_vm3, %v1987_v9  ;;  %v1635_v22 = vmax.f32 %v1239_v14, 0.0  ;;  %v1242_v23 = vadd.f32 %v5451_v20, %v6912_v12  ;;  %v1233_v24 = vpop.f32.mrb[39].mxu0 }
 0x1b0   : > { %2018 = vst.msk [vmem:[#allocation3 + $0x61] sm:$0xff] %vm347_vm3, %v1986_v17  ;;  %v1633_v26 = vmax.f32 %v1231_v19, 0.0  ;;  %v1234_v27 = vadd.f32 %v6912_v12, %v1233_v24 }
 0x1b1   : > { %v1743_v30 = vmax.f32 %v1631_v21, %v1635_v22  ;;  %v1636_v31 = vmax.f32 %v1242_v23, 0.0 }
 0x1b2   : > { %v1741_v33 = vmax.f32 %v1629_v25, %v1633_v26  ;;  %v1634_v35 = vmax.f32 %v1234_v27, 0.0  ;;  %5749 = vrot.lane.b32.xlu1 %v5748_v28, %s6513_s10  ;;  %5734 = vrot.lane.b32.xlu0 %v5748_v28, %s6512_s29 }
 0x1b3   : > { %1807 = vst.msk [vmem:[#allocation2 + $0x90] sm:$0xff] %vm347_vm3, %v1743_v30  ;;  %v1744_v36 = vmax.f32 %v1632_v29, %v1636_v31 }
 0x1b4   : > { %1805 = vst.msk [vmem:[#allocation2 + $0x80] sm:$0xff] %vm347_vm3, %v1741_v33  ;;  %v1742_v37 = vmax.f32 %v1630_v32, %v1634_v35  ;;  %v5454_v38 = vpop.f32.mrb[40].mxu0 }
 0x1b5   : > { %1808 = vst.msk [vmem:[#allocation2 + $0x98] sm:$0xff] %vm347_vm3, %v1744_v36  ;;  %v1246_v39 = vpop.f32.mrb[41].mxu0  ;;  %v1255_v47 = vadd.f32 %v5454_v38, %v6912_v12 }
 0x1b6   : > { %1806 = vst.msk [vmem:[#allocation2 + $0x88] sm:$0xff] %vm347_vm3, %v1742_v37  ;;  %v5455_v40 = vpop.f32.mrb[42].mxu0  ;;  %v2110_v46 = vld [vmem:[#allocation3 + $0x69] sm:$0xff]  ;;  %v1247_v50 = vadd.f32 %v6912_v12, %v1246_v39 }
 0x1b7   : > { %v1249_v41 = vpop.f32.mrb[43].mxu0  ;;  %v2171_v42 = vld [vmem:[#allocation3 + $0x60] sm:$0xff]  ;;  %v2172_v43 = vld [vmem:[#allocation3 + $0x68] sm:$0xff]  ;;  %v1258_v57 = vadd.f32 %v5455_v40, %v6912_v12  ;;  %v1639_v1 = vmax.f32 %v1255_v47, 0.0 }
 0x1b8   : > { %v5768_v44 = vpack.i.bf16 %v2172_v43, %v2171_v42  ;;  %v2109_v45 = vld [vmem:[#allocation3 + $0x61] sm:$0xff]  ;;  %v2142_v53 = vld [vmem:[#allocation3 + $0x6a] sm:$0xff]  ;;  %v1250_v62 = vadd.f32 %v6912_v12, %v1249_v41  ;;  %v1637_v5 = vmax.f32 %v1247_v50, 0.0 }
 0x1b9   : > { %v5773_v52 = vpack.i.bf16 %v2110_v46, %v2109_v45  ;;  %v2141_v60 = vld [vmem:[#allocation3 + $0x62] sm:$0xff]  ;;  %v1640_v9 = vmax.f32 %v1258_v57, 0.0 }
 0x1ba   : > { %5769 = vrot.lane.b32.xlu1 %v5768_v44, %s6514_s30  ;;  %5754 = vrot.lane.b32.xlu0 %v5768_v44, %s6513_s10  ;;  %v5778_v8 = vpack.i.bf16 %v2142_v53, %v2141_v60  ;;  %v1638_v13 = vmax.f32 %v1250_v62, 0.0 }
 0x1bc   : > { %v1871_v48 = vld [vmem:[#allocation2 + $0x90] ss:$2 sm:$0xff]  ;;  %v1935_v49 = vld [vmem:[#allocation2 + $0x91] ss:$2 sm:$0xff]  ;;  %v5458_v51 = vpop.f32.mrb[44].mxu0 }
 0x1bd   : > { %v1989_v54 = vmax.f32 %v1871_v48, %v1935_v49  ;;  %v1869_v55 = vld [vmem:[#allocation2 + $0x80] ss:$2 sm:$0xff]  ;;  %v1933_v56 = vld [vmem:[#allocation2 + $0x81] ss:$2 sm:$0xff]  ;;  %v1271_v58 = vadd.f32 %v5458_v51, %v6912_v12  ;;  %v1262_v59 = vpop.f32.mrb[45].mxu0 }
 0x1be   : > { %v1988_v61 = vmax.f32 %v1869_v55, %v1933_v56  ;;  %v1263_v63 = vadd.f32 %v6912_v12, %v1262_v59  ;;  %v5459_v0 = vpop.f32.mrb[46].mxu0  ;;  %5774 = vrot.lane.b32.xlu1 %v5773_v52, %s6512_s29  ;;  %5759 = vrot.lane.b32.xlu0 %v5773_v52, %s6514_s30 }
 0x1bf   : > { %2021 = vst.msk [vmem:[#allocation3 + $0x81] sm:$0xff] %vm347_vm3, %v1989_v54  ;;  %v1643_v2 = vmax.f32 %v1271_v58, 0.0  ;;  %v1274_v3 = vadd.f32 %v5459_v0, %v6912_v12  ;;  %v1265_v4 = vpop.f32.mrb[47].mxu0 }
 0x1c0   : > { %2020 = vst.msk [vmem:[#allocation3 + $0x79] sm:$0xff] %vm347_vm3, %v1988_v61  ;;  %v1641_v6 = vmax.f32 %v1263_v63, 0.0  ;;  %v1266_v7 = vadd.f32 %v6912_v12, %v1265_v4 }
 0x1c1   : > { %v1747_v10 = vmax.f32 %v1639_v1, %v1643_v2  ;;  %v1644_v11 = vmax.f32 %v1274_v3, 0.0 }
 0x1c2   : > { %v1745_v14 = vmax.f32 %v1637_v5, %v1641_v6  ;;  %v1642_v15 = vmax.f32 %v1266_v7, 0.0  ;;  %5779 = vrot.lane.b32.xlu1 %v5778_v8, %s6513_s10  ;;  %5764 = vrot.lane.b32.xlu0 %v5778_v8, %s6512_s29 }
 0x1c3   : > { %1811 = vst.msk [vmem:[#allocation2 + $0xb0] sm:$0xff] %vm347_vm3, %v1747_v10  ;;  %v1748_v16 = vmax.f32 %v1640_v9, %v1644_v11 }
 0x1c4   : > { %1809 = vst.msk [vmem:[#allocation2 + $0xa0] sm:$0xff] %vm347_vm3, %v1745_v14  ;;  %v1746_v17 = vmax.f32 %v1638_v13, %v1642_v15  ;;  %v5462_v18 = vpop.f32.mrb[48].mxu0 }
 0x1c5   : > { %1812 = vst.msk [vmem:[#allocation2 + $0xb8] sm:$0xff] %vm347_vm3, %v1748_v16  ;;  %v1278_v19 = vpop.f32.mrb[49].mxu0  ;;  %v1287_v27 = vadd.f32 %v5462_v18, %v6912_v12 }
 0x1c6   : > { %1810 = vst.msk [vmem:[#allocation2 + $0xa8] sm:$0xff] %vm347_vm3, %v1746_v17  ;;  %v5463_v20 = vpop.f32.mrb[50].mxu0  ;;  %v2112_v26 = vld [vmem:[#allocation3 + $0x81] sm:$0xff]  ;;  %v1279_v30 = vadd.f32 %v6912_v12, %v1278_v19 }
 0x1c7   : > { %v1281_v21 = vpop.f32.mrb[51].mxu0  ;;  %v2173_v22 = vld [vmem:[#allocation3 + $0x78] sm:$0xff]  ;;  %v2174_v23 = vld [vmem:[#allocation3 + $0x80] sm:$0xff]  ;;  %v1290_v38 = vadd.f32 %v5463_v20, %v6912_v12  ;;  %v1647_v46 = vmax.f32 %v1287_v27, 0.0 }
 0x1c8   : > { %v5798_v24 = vpack.i.bf16 %v2174_v23, %v2173_v22  ;;  %v2111_v25 = vld [vmem:[#allocation3 + $0x79] sm:$0xff]  ;;  %v2144_v33 = vld [vmem:[#allocation3 + $0x82] sm:$0xff]  ;;  %v1282_v43 = vadd.f32 %v6912_v12, %v1281_v21  ;;  %v1645_v50 = vmax.f32 %v1279_v30, 0.0 }
 0x1c9   : > { %v5803_v32 = vpack.i.bf16 %v2112_v26, %v2111_v25  ;;  %v2143_v41 = vld [vmem:[#allocation3 + $0x7a] sm:$0xff]  ;;  %v1648_v54 = vmax.f32 %v1290_v38, 0.0 }
 0x1ca   : > { %5799 = vrot.lane.b32.xlu1 %v5798_v24, %s6514_s30  ;;  %5784 = vrot.lane.b32.xlu0 %v5798_v24, %s6513_s10  ;;  %v5808_v53 = vpack.i.bf16 %v2144_v33, %v2143_v41  ;;  %v1646_v57 = vmax.f32 %v1282_v43, 0.0 }
 0x1cc   : > { %v1875_v28 = vld [vmem:[#allocation2 + $0xb0] ss:$2 sm:$0xff]  ;;  %v1939_v29 = vld [vmem:[#allocation2 + $0xb1] ss:$2 sm:$0xff]  ;;  %v5466_v31 = vpop.f32.mrb[52].mxu0 }
 0x1cd   : > { %v1991_v35 = vmax.f32 %v1875_v28, %v1939_v29  ;;  %v1873_v36 = vld [vmem:[#allocation2 + $0xa0] ss:$2 sm:$0xff]  ;;  %v1937_v37 = vld [vmem:[#allocation2 + $0xa1] ss:$2 sm:$0xff]  ;;  %v1303_v39 = vadd.f32 %v5466_v31, %v6912_v12  ;;  %v1294_v40 = vpop.f32.mrb[53].mxu0 }
 0x1ce   : > { %v1990_v42 = vmax.f32 %v1873_v36, %v1937_v37  ;;  %v1295_v44 = vadd.f32 %v6912_v12, %v1294_v40  ;;  %v5467_v45 = vpop.f32.mrb[54].mxu0  ;;  %5804 = vrot.lane.b32.xlu1 %v5803_v32, %s6512_s29  ;;  %5789 = vrot.lane.b32.xlu0 %v5803_v32, %s6514_s30 }
 0x1cf   : > { %2023 = vst.msk [vmem:[#allocation3 + $0x99] sm:$0xff] %vm347_vm3, %v1991_v35  ;;  %v1651_v47 = vmax.f32 %v1303_v39, 0.0  ;;  %v1306_v48 = vadd.f32 %v5467_v45, %v6912_v12  ;;  %v1297_v49 = vpop.f32.mrb[55].mxu0 }
 0x1d0   : > { %2022 = vst.msk [vmem:[#allocation3 + $0x91] sm:$0xff] %vm347_vm3, %v1990_v42  ;;  %v1649_v51 = vmax.f32 %v1295_v44, 0.0  ;;  %v1298_v52 = vadd.f32 %v6912_v12, %v1297_v49 }
 0x1d1   : > { %v1751_v55 = vmax.f32 %v1647_v46, %v1651_v47  ;;  %v1652_v56 = vmax.f32 %v1306_v48, 0.0 }
 0x1d2   : > { %v1749_v58 = vmax.f32 %v1645_v50, %v1649_v51  ;;  %v1650_v59 = vmax.f32 %v1298_v52, 0.0  ;;  %5809 = vrot.lane.b32.xlu1 %v5808_v53, %s6513_s10  ;;  %5794 = vrot.lane.b32.xlu0 %v5808_v53, %s6512_s29 }
 0x1d3   : > { %1815 = vst.msk [vmem:[#allocation2 + $0xd0] sm:$0xff] %vm347_vm3, %v1751_v55  ;;  %v1752_v60 = vmax.f32 %v1648_v54, %v1652_v56 }
 0x1d4   : > { %1813 = vst.msk [vmem:[#allocation2 + $0xc0] sm:$0xff] %vm347_vm3, %v1749_v58  ;;  %v1750_v61 = vmax.f32 %v1646_v57, %v1650_v59  ;;  %v5470_v62 = vpop.f32.mrb[56].mxu0 }
 0x1d5   : > { %1816 = vst.msk [vmem:[#allocation2 + $0xd8] sm:$0xff] %vm347_vm3, %v1752_v60  ;;  %v1310_v63 = vpop.f32.mrb[57].mxu0  ;;  %v1319_v7 = vadd.f32 %v5470_v62, %v6912_v12 }
 0x1d6   : > { %1814 = vst.msk [vmem:[#allocation2 + $0xc8] sm:$0xff] %vm347_vm3, %v1750_v61  ;;  %v5471_v0 = vpop.f32.mrb[58].mxu0  ;;  %v2114_v6 = vld [vmem:[#allocation3 + $0x99] sm:$0xff]  ;;  %v1311_v10 = vadd.f32 %v6912_v12, %v1310_v63 }
 0x1d7   : > { %v1313_v1 = vpop.f32.mrb[59].mxu0  ;;  %v2175_v2 = vld [vmem:[#allocation3 + $0x90] sm:$0xff]  ;;  %v2176_v3 = vld [vmem:[#allocation3 + $0x98] sm:$0xff]  ;;  %v1322_v18 = vadd.f32 %v5471_v0, %v6912_v12  ;;  %v1655_v26 = vmax.f32 %v1319_v7, 0.0 }
 0x1d8   : > { %v5828_v4 = vpack.i.bf16 %v2176_v3, %v2175_v2  ;;  %v2113_v5 = vld [vmem:[#allocation3 + $0x91] sm:$0xff]  ;;  %v2146_v14 = vld [vmem:[#allocation3 + $0x9a] sm:$0xff]  ;;  %v1314_v23 = vadd.f32 %v6912_v12, %v1313_v1  ;;  %v1653_v30 = vmax.f32 %v1311_v10, 0.0 }
 0x1d9   : > { %v5833_v13 = vpack.i.bf16 %v2114_v6, %v2113_v5  ;;  %v2145_v21 = vld [vmem:[#allocation3 + $0x92] sm:$0xff]  ;;  %v1656_v35 = vmax.f32 %v1322_v18, 0.0 }
 0x1da   : > { %5829 = vrot.lane.b32.xlu1 %v5828_v4, %s6514_s30  ;;  %5814 = vrot.lane.b32.xlu0 %v5828_v4, %s6513_s10  ;;  %v5838_v33 = vpack.i.bf16 %v2146_v14, %v2145_v21  ;;  %v1654_v38 = vmax.f32 %v1314_v23, 0.0 }
 0x1dc   : > { %v1879_v8 = vld [vmem:[#allocation2 + $0xd0] ss:$2 sm:$0xff]  ;;  %v1943_v9 = vld [vmem:[#allocation2 + $0xd1] ss:$2 sm:$0xff]  ;;  %v5474_v11 = vpop.f32.mrb[60].mxu0 }
 0x1dd   : > { %v1993_v15 = vmax.f32 %v1879_v8, %v1943_v9  ;;  %v1877_v16 = vld [vmem:[#allocation2 + $0xc0] ss:$2 sm:$0xff]  ;;  %v1941_v17 = vld [vmem:[#allocation2 + $0xc1] ss:$2 sm:$0xff]  ;;  %v1335_v19 = vadd.f32 %v5474_v11, %v6912_v12  ;;  %v1326_v20 = vpop.f32.mrb[61].mxu0 }
 0x1de   : > { %v1992_v22 = vmax.f32 %v1877_v16, %v1941_v17  ;;  %v1327_v24 = vadd.f32 %v6912_v12, %v1326_v20  ;;  %v5475_v25 = vpop.f32.mrb[62].mxu0  ;;  %5834 = vrot.lane.b32.xlu1 %v5833_v13, %s6512_s29  ;;  %5819 = vrot.lane.b32.xlu0 %v5833_v13, %s6514_s30 }
 0x1df   : > { %2025 = vst.msk [vmem:[#allocation3 + $0xb1] sm:$0xff] %vm347_vm3, %v1993_v15  ;;  %v1659_v27 = vmax.f32 %v1335_v19, 0.0  ;;  %v1338_v28 = vadd.f32 %v5475_v25, %v6912_v12  ;;  %v1329_v29 = vpop.f32.mrb[63].mxu0  ;;  %v7146_v25 = vpop.permute.xlu1 %5664 }
 0x1e0   : > { %2024 = vst.msk [vmem:[#allocation3 + $0xa9] sm:$0xff] %vm347_vm3, %v1992_v22  ;;  %v1657_v31 = vmax.f32 %v1327_v24, 0.0  ;;  %v1330_v32 = vadd.f32 %v6912_v12, %v1329_v29  ;;  %v7148_v29 = vpop.permute.xlu0 %5659 }
 0x1e1   : > { %v1755_v36 = vmax.f32 %v1655_v26, %v1659_v27  ;;  %v1660_v37 = vmax.f32 %v1338_v28, 0.0 }
 0x1e2   : > { %v1753_v39 = vmax.f32 %v1653_v30, %v1657_v31  ;;  %v1658_v40 = vmax.f32 %v1330_v32, 0.0  ;;  %5839 = vrot.lane.b32.xlu1 %v5838_v33, %s6513_s10  ;;  %5824 = vrot.lane.b32.xlu0 %v5838_v33, %s6512_s29  ;;  %v7152_v33 = vld [vmem:[#allocation9] ss:$0 sm:$0xff] }
 0x1e3   : > { %1819 = vst.msk [vmem:[#allocation2 + $0xf0] sm:$0xff] %vm347_vm3, %v1755_v36  ;;  %v1756_v41 = vmax.f32 %v1656_v35, %v1660_v37 }
 0x1e4   : > { %1817 = vst.msk [vmem:[#allocation2 + $0xe0] sm:$0xff] %vm347_vm3, %v1753_v39  ;;  %v1754_v42 = vmax.f32 %v1654_v38, %v1658_v40  ;;  %v5478_v43 = vpop.f32.mrb[64].mxu0 }
 0x1e5   : > { %1820 = vst.msk [vmem:[#allocation2 + $0xf8] sm:$0xff] %vm347_vm3, %v1756_v41  ;;  %v1342_v44 = vpop.f32.mrb[65].mxu0  ;;  %v1351_v52 = vadd.f32 %v5478_v43, %v6912_v12 }
 0x1e6   : > { %1818 = vst.msk [vmem:[#allocation2 + $0xe8] sm:$0xff] %vm347_vm3, %v1754_v42  ;;  %v5479_v45 = vpop.f32.mrb[66].mxu0  ;;  %v2116_v51 = vld [vmem:[#allocation3 + $0xb1] sm:$0xff]  ;;  %v1343_v55 = vadd.f32 %v6912_v12, %v1342_v44 }
 0x1e7   : > { %v1345_v46 = vpop.f32.mrb[67].mxu0  ;;  %v2177_v47 = vld [vmem:[#allocation3 + $0xa8] sm:$0xff]  ;;  %v2178_v48 = vld [vmem:[#allocation3 + $0xb0] sm:$0xff]  ;;  %v1354_v62 = vadd.f32 %v5479_v45, %v6912_v12  ;;  %v1663_v6 = vmax.f32 %v1351_v52, 0.0  ;;  %v7161_v52 = vpop.permute.xlu0 %5669 }
 0x1e8   : > { %v5858_v49 = vpack.i.bf16 %v2178_v48, %v2177_v47  ;;  %v2115_v50 = vld [vmem:[#allocation3 + $0xa9] sm:$0xff]  ;;  %v2148_v58 = vld [vmem:[#allocation3 + $0xb2] sm:$0xff]  ;;  %v1346_v3 = vadd.f32 %v6912_v12, %v1345_v46  ;;  %v1661_v10 = vmax.f32 %v1343_v55, 0.0 }
 0x1e9   : > { %v5863_v57 = vpack.i.bf16 %v2116_v51, %v2115_v50  ;;  %v2147_v1 = vld [vmem:[#allocation3 + $0xaa] sm:$0xff]  ;;  %v1664_v15 = vmax.f32 %v1354_v62, 0.0 }
 0x1ea   : > { %5859 = vrot.lane.b32.xlu1 %v5858_v49, %s6514_s30  ;;  %5844 = vrot.lane.b32.xlu0 %v5858_v49, %s6513_s10  ;;  %v5868_v14 = vpack.i.bf16 %v2148_v58, %v2147_v1  ;;  %v1662_v18 = vmax.f32 %v1346_v3, 0.0 }
 0x1ec   : > { %v1883_v53 = vld [vmem:[#allocation2 + $0xf0] ss:$2 sm:$0xff]  ;;  %v1947_v54 = vld [vmem:[#allocation2 + $0xf1] ss:$2 sm:$0xff]  ;;  %v5482_v56 = vpop.f32.mrb[68].mxu0 }
 0x1ed   : > { %v1995_v59 = vmax.f32 %v1883_v53, %v1947_v54  ;;  %v1881_v60 = vld [vmem:[#allocation2 + $0xe0] ss:$2 sm:$0xff]  ;;  %v1945_v61 = vld [vmem:[#allocation2 + $0xe1] ss:$2 sm:$0xff]  ;;  %v1367_v63 = vadd.f32 %v5482_v56, %v6912_v12  ;;  %v1358_v0 = vpop.f32.mrb[69].mxu0  ;;  %v5661_v56 = vunpack.i.l.bf16 %v7148_v29 }
 0x1ee   : > { %v1994_v2 = vmax.f32 %v1881_v60, %v1945_v61  ;;  %v1359_v4 = vadd.f32 %v6912_v12, %v1358_v0  ;;  %v5483_v5 = vpop.f32.mrb[70].mxu0  ;;  %5864 = vrot.lane.b32.xlu1 %v5863_v57, %s6512_s29  ;;  %5849 = vrot.lane.b32.xlu0 %v5863_v57, %s6514_s30  ;;  %v2069_v0 = vld [vmem:[#allocation3] sm:$0xff] }
 0x1ef   : > { %2027 = vst.msk [vmem:[#allocation3 + $0xc9] sm:$0xff] %vm347_vm3, %v1995_v59  ;;  %v1667_v7 = vmax.f32 %v1367_v63, 0.0  ;;  %v1370_v8 = vadd.f32 %v5483_v5, %v6912_v12  ;;  %v1361_v9 = vpop.f32.mrb[71].mxu0 }
 0x1f0   : > { %2026 = vst.msk [vmem:[#allocation3 + $0xc1] sm:$0xff] %vm347_vm3, %v1994_v2  ;;  %v1665_v11 = vmax.f32 %v1359_v4, 0.0  ;;  %v1362_v13 = vadd.f32 %v6912_v12, %v1361_v9  ;;  %v5662_v4 = vunpack.i.h.bf16 %v7148_v29  ;;  %v2070_v9 = vld [vmem:[#allocation3 + $0x8] sm:$0xff] }
 0x1f1   : > { %v1759_v16 = vmax.f32 %v1663_v6, %v1667_v7  ;;  %v1668_v17 = vmax.f32 %v1370_v8, 0.0 }
 0x1f2   : > { %v1757_v19 = vmax.f32 %v1661_v10, %v1665_v11  ;;  %v1666_v20 = vmax.f32 %v1362_v13, 0.0  ;;  %5869 = vrot.lane.b32.xlu1 %v5868_v14, %s6513_s10  ;;  %5854 = vrot.lane.b32.xlu0 %v5868_v14, %s6512_s29  ;;  %v5666_v10 = vunpack.i.l.bf16 %v7146_v25  ;;  %v3126_v13 = vsel %vm347_vm3, %v2069_v0, %v5661_v56 }
 0x1f3   : > { %1823 = vst.msk [vmem:[#allocation2 + $0x110] sm:$0xff] %vm347_vm3, %v1759_v16  ;;  %v1760_v21 = vmax.f32 %v1664_v15, %v1668_v17 }
 0x1f4   : > { %1821 = vst.msk [vmem:[#allocation2 + $0x100] sm:$0xff] %vm347_vm3, %v1757_v19  ;;  %v1758_v22 = vmax.f32 %v1662_v18, %v1666_v20  ;;  %v5486_v23 = vpop.f32.mrb[72].mxu0  ;;  %v3127_v18 = vsel %vm347_vm3, %v2070_v9, %v5662_v4  ;;  %v5667_v19 = vunpack.i.h.bf16 %v7146_v25 }
 0x1f5   : > { %1824 = vst.msk [vmem:[#allocation2 + $0x118] sm:$0xff] %vm347_vm3, %v1760_v21  ;;  %v1374_v12 = vpop.f32.mrb[73].mxu0  ;;  %v1383_v35 = vadd.f32 %v7152_v33, %v5486_v23 }
 0x1f6   : > { %1822 = vst.msk [vmem:[#allocation2 + $0x108] sm:$0xff] %vm347_vm3, %v1758_v22  ;;  %v5487_v24 = vpop.f32.mrb[74].mxu0  ;;  %v2118_v32 = vld [vmem:[#allocation3 + $0xc9] sm:$0xff]  ;;  %v1375_v38 = vadd.f32 %v7152_v33, %v1374_v12 }
 0x1f7   : > { %v1377_v26 = vpop.f32.mrb[75].mxu0  ;;  %v2179_v27 = vld [vmem:[#allocation3 + $0xc0] sm:$0xff]  ;;  %v2180_v28 = vld [vmem:[#allocation3 + $0xc8] sm:$0xff]  ;;  %v1386_v46 = vadd.f32 %v7152_v33, %v5487_v24  ;;  %v1671_v55 = vmax.f32 %v1383_v35, 0.0 }
 0x1f8   : > { %v5888_v30 = vpack.i.bf16 %v2180_v28, %v2179_v27  ;;  %v2117_v31 = vld [vmem:[#allocation3 + $0xc1] sm:$0xff]  ;;  %v2150_v42 = vld [vmem:[#allocation3 + $0xca] sm:$0xff]  ;;  %v1378_v51 = vadd.f32 %v7152_v33, %v1377_v26  ;;  %v1669_v60 = vmax.f32 %v1375_v38, 0.0  ;;  %v3158_v28 = vsel %vm2044_vm6, %v3126_v13, %v5666_v10 }
 0x1f9   : > { %v5893_v41 = vpack.i.bf16 %v2118_v32, %v2117_v31  ;;  %v2149_v49 = vld [vmem:[#allocation3 + $0xc2] sm:$0xff]  ;;  %v1672_v1 = vmax.f32 %v1386_v46, 0.0 }
 0x1fa   : > { %5889 = vrot.lane.b32.xlu1 %v5888_v30, %s6514_s30  ;;  %5874 = vrot.lane.b32.xlu0 %v5888_v30, %s6513_s10  ;;  %v5898_v63 = vpack.i.bf16 %v2150_v42, %v2149_v49  ;;  %v1670_v5 = vmax.f32 %v1378_v51, 0.0  ;;  %v3159_v42 = vsel %vm2044_vm6, %v3127_v18, %v5667_v19 }
 0x1fc   : > { %v1887_v36 = vld [vmem:[#allocation2 + $0x110] ss:$2 sm:$0xff]  ;;  %v1951_v37 = vld [vmem:[#allocation2 + $0x111] ss:$2 sm:$0xff]  ;;  %v5490_v39 = vpop.f32.mrb[76].mxu0  ;;  %v7156_v40 = vpop.permute.xlu1 %5679 }
 0x1fd   : > { %v1997_v43 = vmax.f32 %v1887_v36, %v1951_v37  ;;  %v1885_v44 = vld [vmem:[#allocation2 + $0x100] ss:$2 sm:$0xff]  ;;  %v1949_v45 = vld [vmem:[#allocation2 + $0x101] ss:$2 sm:$0xff]  ;;  %v1399_v47 = vadd.f32 %v7152_v33, %v5490_v39  ;;  %v1390_v48 = vpop.f32.mrb[77].mxu0  ;;  %v5675_v14 = vpop.permute.xlu0 %5674  ;;  %v5681_v20 = vunpack.i.l.bf16 %v7156_v40  ;;  %v5682_v38 = vunpack.i.h.bf16 %v7156_v40 }
 0x1fe   : > { %v1996_v50 = vmax.f32 %v1885_v44, %v1949_v45  ;;  %v1391_v53 = vadd.f32 %v7152_v33, %v1390_v48  ;;  %v5491_v54 = vpop.f32.mrb[78].mxu0  ;;  %5894 = vrot.lane.b32.xlu1 %v5893_v41, %s6512_s29  ;;  %5879 = vrot.lane.b32.xlu0 %v5893_v41, %s6514_s30  ;;  %v5677_v22 = vunpack.i.h.bf16 %v5675_v14  ;;  %v5676_v23 = vunpack.i.l.bf16 %v5675_v14  ;;  %v7193_v37 = vld [vmem:[%s8067_s3 + $0x80] sm:$0xff]  }
 0x1ff   : > { %2029 = vst.msk [vmem:[#allocation3 + $0xe1] sm:$0xff] %vm347_vm3, %v1997_v43  ;;  %v1675_v57 = vmax.f32 %v1399_v47, 0.0  ;;  %v1402_v58 = vadd.f32 %v7152_v33, %v5491_v54  ;;  %v1393_v59 = vpop.f32.mrb[79].mxu0  ;;  %v2197_v39 = vld [vmem:[#allocation3 + $0x19] sm:$0xff]  ;;  %v2198_v41 = vld [vmem:[#allocation3 + $0x21] sm:$0xff]  ;;  %v7200_v43 = vsel %vm3190_vm7, %v3158_v28, %v5681_v20  ;;  %5540 = vmatprep.subr.bf16.mxu1 %v7193_v37  ;;  %v3192_v19 = vsel %vm3190_vm7, %v3159_v42, %v5682_v38 }
 0x200   : > { %2028 = vst.msk [vmem:[#allocation3 + $0xd9] sm:$0xff] %vm347_vm3, %v1996_v50  ;;  %v1673_v61 = vmax.f32 %v1391_v53, 0.0  ;;  %v1394_v62 = vadd.f32 %v7152_v33, %v1393_v59  ;;  %v7172_v8 = vpop.permute.xlu1 %5684  ;;  %v3223_v46 = vsel %vm347_vm3, %v2197_v39, %v5676_v23  ;;  %v3224_v47 = vsel %vm347_vm3, %v2198_v41, %v5677_v22 }
 0x201   : > { %v1763_v2 = vmax.f32 %v1671_v55, %v1675_v57  ;;  %v1676_v3 = vmax.f32 %v1402_v58, 0.0  ;;  %v3319_v28 = vpack.c.bf16 %v3192_v19, %v7200_v43  ;;  %v2071_v43 = vld [vmem:[#allocation3 + $0x18] sm:$0xff] }
 0x202   : > { %v1761_v6 = vmax.f32 %v1669_v60, %v1673_v61  ;;  %v1674_v7 = vmax.f32 %v1394_v62, 0.0  ;;  %5899 = vrot.lane.b32.xlu1 %v5898_v63, %s6513_s10  ;;  %5884 = vrot.lane.b32.xlu0 %v5898_v63, %s6512_s29 }
 0x203   : > { %1827 = vst.msk [vmem:[#allocation2 + $0x130] sm:$0xff] %vm347_vm3, %v1763_v2  ;;  %v1764_v11 = vmax.f32 %v1672_v1, %v1676_v3 }
 0x204   : > { %1825 = vst.msk [vmem:[#allocation2 + $0x120] sm:$0xff] %vm347_vm3, %v1761_v6  ;;  %v1762_v15 = vmax.f32 %v1670_v5, %v1674_v7  ;;  %v5494_v16 = vpop.f32.mrb[80].mxu0  ;;  %v7187_v29 = vpop.permute.xlu1 %5689 }
 0x205   : > { %1828 = vst.msk [vmem:[#allocation2 + $0x138] sm:$0xff] %vm347_vm3, %v1764_v11  ;;  %v1406_v17 = vpop.f32.mrb[81].mxu0  ;;  %v1415_v12 = vadd.f32 %v7152_v33, %v5494_v16  ;;  %v5691_v38 = vunpack.i.l.bf16 %v7187_v29 }
 0x206   : > { %1826 = vst.msk [vmem:[#allocation2 + $0x128] sm:$0xff] %vm347_vm3, %v1762_v15  ;;  %v5495_v21 = vpop.f32.mrb[82].mxu0  ;;  %v1407_v30 = vadd.f32 %v7152_v33, %v1406_v17  ;;  %v2120_v31 = vld [vmem:[#allocation3 + $0xe1] sm:$0xff] }
 0x207   : > { %v1409_v24 = vpop.f32.mrb[83].mxu0  ;;  %v2181_v26 = vld [vmem:[#allocation3 + $0xd8] sm:$0xff]  ;;  %v2182_v27 = vld [vmem:[#allocation3 + $0xe0] sm:$0xff]  ;;  %v1679_v44 = vmax.f32 %v1415_v12, 0.0  ;;  %v1418_v45 = vadd.f32 %v7152_v33, %v5495_v21 }
 0x208   : > { %v5918_v25 = vpack.i.bf16 %v2182_v27, %v2181_v26  ;;  %v2152_v32 = vld [vmem:[#allocation3 + $0xe2] sm:$0xff]  ;;  %v2119_v35 = vld [vmem:[#allocation3 + $0xd9] sm:$0xff]  ;;  %v1677_v49 = vmax.f32 %v1407_v30, 0.0  ;;  %v1410_v50 = vadd.f32 %v7152_v33, %v1409_v24 }
 0x209   : > { %v2151_v36 = vld [vmem:[#allocation3 + $0xda] sm:$0xff]  ;;  %v5923_v54 = vpack.i.bf16 %v2120_v31, %v2119_v35  ;;  %v1680_v16 = vmax.f32 %v1418_v45, 0.0  ;;  %v5687_v31 = vunpack.i.h.bf16 %v7172_v8 }
 0x20a   : > { %5919 = vrot.lane.b32.xlu1 %v5918_v25, %s6514_s30  ;;  %5904 = vrot.lane.b32.xlu0 %v5918_v25, %s6513_s10  ;;  %v5928_v55 = vpack.i.bf16 %v2152_v32, %v2151_v36  ;;  %v1678_v20 = vmax.f32 %v1410_v50, 0.0  ;;  %v5686_v32 = vunpack.i.l.bf16 %v7172_v8  ;;  %v5692_v36 = vunpack.i.h.bf16 %v7187_v29 }
 0x20c   : > { %v1891_v40 = vld [vmem:[#allocation2 + $0x130] ss:$2 sm:$0xff]  ;;  %v1955_v48 = vld [vmem:[#allocation2 + $0x131] ss:$2 sm:$0xff]  ;;  %v5498_v51 = vpop.f32.mrb[84].mxu0  ;;  %v5695_v53 = vpop.permute.xlu1 %5694  ;;  %v3128_v50 = vsel %vm347_vm3, %v2071_v43, %v5686_v32 }
 0x20d   : > { %v1999_v56 = vmax.f32 %v1891_v40, %v1955_v48  ;;  %v1889_v57 = vld [vmem:[#allocation2 + $0x120] ss:$2 sm:$0xff]  ;;  %v1953_v58 = vld [vmem:[#allocation2 + $0x121] ss:$2 sm:$0xff]  ;;  %v1431_v59 = vadd.f32 %v7152_v33, %v5498_v51  ;;  %v5697_v60 = vunpack.i.h.bf16 %v5695_v53  ;;  %v5696_v61 = vunpack.i.l.bf16 %v5695_v53  ;;  %v5700_v62 = vpop.permute.xlu0 %5699  ;;  %v1422_v63 = vpop.f32.mrb[85].mxu0  ;;  %v2199_v53 = vld [vmem:[#allocation3 + $0x31] sm:$0xff] }
 0x20e   : > { %v1998_v0 = vmax.f32 %v1889_v57, %v1953_v58  ;;  %v5702_v1 = vunpack.i.h.bf16 %v5700_v62  ;;  %v5701_v2 = vunpack.i.l.bf16 %v5700_v62  ;;  %v1423_v3 = vadd.f32 %v7152_v33, %v1422_v63  ;;  %v5499_v4 = vpop.f32.mrb[86].mxu0  ;;  %5924 = vrot.lane.b32.xlu1 %v5923_v54, %s6512_s29  ;;  %5909 = vrot.lane.b32.xlu0 %v5923_v54, %s6514_s30  ;;  %v2200_v54 = vld [vmem:[#allocation3 + $0x39] sm:$0xff] }
 0x20f   : > { %2031 = vst.msk [vmem:[#allocation3 + $0xf9] sm:$0xff] %vm347_vm3, %v1999_v56  ;;  %v1683_v5 = vmax.f32 %v1431_v59, 0.0  ;;  %v1434_v6 = vadd.f32 %v7152_v33, %v5499_v4  ;;  %v1425_v7 = vpop.f32.mrb[87].mxu0  ;;  %v3255_v9 = vsel %vm2044_vm6, %v3223_v46, %v5696_v61  ;;  %v3256_v10 = vsel %vm2044_vm6, %v3224_v47, %v5697_v60  ;;  %v2072_v47 = vld [vmem:[#allocation3 + $0x20] sm:$0xff] }
 0x210   : > { %2030 = vst.msk [vmem:[#allocation3 + $0xf1] sm:$0xff] %vm347_vm3, %v1998_v0  ;;  %v1681_v11 = vmax.f32 %v1423_v3, 0.0  ;;  %v1426_v13 = vadd.f32 %v7152_v33, %v1425_v7  ;;  %v3287_v14 = vsel %vm3190_vm7, %v3255_v9, %v5701_v2  ;;  %v3288_v15 = vsel %vm3190_vm7, %v3256_v10, %v5702_v1  ;;  %v7220_v23 = vpop.permute.xlu1 %5709 }
 0x211   : > { %v1767_v17 = vmax.f32 %v1679_v44, %v1683_v5  ;;  %v1684_v18 = vmax.f32 %v1434_v6, 0.0  ;;  %v3320_v24 = vpack.c.bf16 %v3288_v15, %v3287_v14  ;;  %v5705_v30 = vpop.permute.xlu0 %5704  ;;  %v5711_v44 = vunpack.i.l.bf16 %v7220_v23 }
 0x212   : > { %v1765_v21 = vmax.f32 %v1677_v49, %v1681_v11  ;;  %v1682_v22 = vmax.f32 %v1426_v13, 0.0  ;;  %5929 = vrot.lane.b32.xlu1 %v5928_v55, %s6513_s10  ;;  %5914 = vrot.lane.b32.xlu0 %v5928_v55, %s6512_s29  ;;  %v5707_v45 = vunpack.i.h.bf16 %v5705_v30  ;;  %v3129_v49 = vsel %vm347_vm3, %v2072_v47, %v5687_v31 }
 0x213   : > { %1831 = vst.msk [vmem:[#allocation2 + $0x150] sm:$0xff] %vm347_vm3, %v1767_v17  ;;  %v1768_v12 = vmax.f32 %v1680_v16, %v1684_v18  ;;  %3598 = vmatprep.mubr.bf16.mxu1 %v3320_v24  ;;  %v5706_v29 = vunpack.i.l.bf16 %v5705_v30  ;;  %v3160_v55 = vsel %vm2044_vm6, %v3128_v50, %v5691_v38  ;;  %v3161_v56 = vsel %vm2044_vm6, %v3129_v49, %v5692_v36 }
 0x214   : > { %1829 = vst.msk [vmem:[#allocation2 + $0x140] sm:$0xff] %vm347_vm3, %v1765_v21  ;;  %v1766_v26 = vmax.f32 %v1678_v20, %v1682_v22  ;;  %v5502_v27 = vpop.f32.mrb[88].mxu0  ;;  %3599 = vmatmul.mubr.bf16.vlgmr.msra.gmra.mrb[0].mxu1 %v3319_v28  ;;  %v7235_v46 = vpop.permute.xlu1 %5714  ;;  %v3226_v59 = vsel %vm347_vm3, %v2200_v54, %v5707_v45  ;;  %v7248_v0 = vsel %vm3190_vm7, %v3160_v55, %v5711_v44 }
 0x215   : > { %1832 = vst.msk [vmem:[#allocation2 + $0x158] sm:$0xff] %vm347_vm3, %v1768_v12  ;;  %v1438_v25 = vpop.f32.mrb[89].mxu0  ;;  %5541 = vmatpush3.bf16.msra.mxu1 %v7193_v37  ;;  %v1447_v51 = vadd.f32 %v7152_v33, %v5502_v27  ;;  %v5712_v37 = vunpack.i.h.bf16 %v7220_v23  ;;  %v3225_v13 = vsel %vm347_vm3, %v2199_v53, %v5706_v29  ;;  %v5717_v29 = vunpack.i.h.bf16 %v7235_v46 }
 0x216   : > { %1830 = vst.msk [vmem:[#allocation2 + $0x148] sm:$0xff] %vm347_vm3, %v1766_v26  ;;  %v5503_v35 = vpop.f32.mrb[90].mxu0  ;;  %v2122_v48 = vld [vmem:[#allocation3 + $0xf9] sm:$0xff]  ;;  %v1439_v60 = vadd.f32 %v7152_v33, %v1438_v25 }
 0x217   : > { %v1441_v39 = vpop.f32.mrb[91].mxu0  ;;  %v2183_v41 = vld [vmem:[#allocation3 + $0xf0] sm:$0xff]  ;;  %v2184_v42 = vld [vmem:[#allocation3 + $0xf8] sm:$0xff]  ;;  %v1450_v4 = vadd.f32 %v7152_v33, %v5503_v35  ;;  %v1687_v14 = vmax.f32 %v1447_v51, 0.0  ;;  %v3194_v43 = vsel %vm3190_vm7, %v3161_v56, %v5712_v37 }
 0x218   : > { %v5948_v8 = vpack.i.bf16 %v2184_v42, %v2183_v41  ;;  %v2121_v40 = vld [vmem:[#allocation3 + $0xf1] sm:$0xff]  ;;  %v2154_v63 = vld [vmem:[#allocation3 + $0xfa] sm:$0xff]  ;;  %v1442_v5 = vadd.f32 %v7152_v33, %v1441_v39  ;;  %v7254_v15 = vpop.permute.xlu1 %5719  ;;  %v1685_v23 = vmax.f32 %v1439_v60, 0.0  ;;  %v3322_v53 = vpack.c.bf16 %v3194_v43, %v7248_v0 }
 0x219   : > { %v5953_v62 = vpack.i.bf16 %v2122_v48, %v2121_v40  ;;  %v2153_v10 = vld [vmem:[#allocation3 + $0xf2] sm:$0xff]  ;;  %v1688_v27 = vmax.f32 %v1450_v4, 0.0  ;;  %v5716_v48 = vunpack.i.l.bf16 %v7235_v46  ;;  %v5721_v51 = vunpack.i.l.bf16 %v7254_v15 }
 0x21a   : > { %5949 = vrot.lane.b32.xlu1 %v5948_v8, %s6514_s30  ;;  %5934 = vrot.lane.b32.xlu0 %v5948_v8, %s6513_s10  ;;  %v5958_v26 = vpack.i.bf16 %v2154_v63, %v2153_v10  ;;  %v1686_v28 = vmax.f32 %v1442_v5, 0.0  ;;  %v5722_v54 = vunpack.i.h.bf16 %v7254_v15  ;;  %v2073_v60 = vld [vmem:[#allocation3 + $0x30] sm:$0xff]  ;;  %v2074_v46 = vld [vmem:[#allocation3 + $0x38] sm:$0xff] }
 0x21b   : > { %v3130_v63 = vsel %vm347_vm3, %v2073_v60, %v5716_v48  ;;  %v2202_v10 = vld [vmem:[#allocation3 + $0x51] sm:$0xff] }
 0x21c   : > { %v1895_v57 = vld [vmem:[#allocation2 + $0x150] ss:$2 sm:$0xff]  ;;  %v1959_v58 = vld [vmem:[#allocation2 + $0x151] ss:$2 sm:$0xff]  ;;  %v5506_v61 = vpop.f32.mrb[92].mxu0  ;;  %v5725_v7 = vpop.permute.xlu0 %5724  ;;  %v3162_v0 = vsel %vm2044_vm6, %v3130_v63, %v5721_v51 }
 0x21d   : > { %v2001_v1 = vmax.f32 %v1895_v57, %v1959_v58  ;;  %v1893_v2 = vld [vmem:[#allocation2 + $0x140] ss:$2 sm:$0xff]  ;;  %v1957_v3 = vld [vmem:[#allocation2 + $0x141] ss:$2 sm:$0xff]  ;;  %v1463_v6 = vadd.f32 %v7152_v33, %v5506_v61  ;;  %v1454_v9 = vpop.f32.mrb[93].mxu0  ;;  %v5727_v19 = vunpack.i.h.bf16 %v5725_v7  ;;  %v5726_v20 = vunpack.i.l.bf16 %v5725_v7  ;;  %v5740_v44 = vpop.permute.xlu1 %5739 }
 0x21e   : > { %v2000_v11 = vmax.f32 %v1893_v2, %v1957_v3  ;;  %v1455_v16 = vadd.f32 %v7152_v33, %v1454_v9  ;;  %v5507_v17 = vpop.f32.mrb[94].mxu0  ;;  %5954 = vrot.lane.b32.xlu1 %v5953_v62, %s6512_s29  ;;  %5939 = vrot.lane.b32.xlu0 %v5953_v62, %s6514_s30  ;;  %v5741_v55 = vunpack.i.l.bf16 %v5740_v44  ;;  %v5742_v61 = vunpack.i.h.bf16 %v5740_v44 }
 0x21f   : > { %2033 = vst.msk [vmem:[#allocation3 + $0x111] sm:$0xff] %vm347_vm3, %v2001_v1  ;;  %v1691_v18 = vmax.f32 %v1463_v6, 0.0  ;;  %v1466_v21 = vadd.f32 %v7152_v33, %v5507_v17  ;;  %v1457_v22 = vpop.f32.mrb[95].mxu0  ;;  %v3257_v41 = vsel %vm2044_vm6, %v3225_v13, %v5726_v20  ;;  %v3258_v42 = vsel %vm2044_vm6, %v3226_v59, %v5727_v19 }
 0x220   : > { %2032 = vst.msk [vmem:[#allocation3 + $0x109] sm:$0xff] %vm347_vm3, %v2000_v11  ;;  %v1689_v12 = vmax.f32 %v1455_v16, 0.0  ;;  %v1458_v24 = vadd.f32 %v7152_v33, %v1457_v22  ;;  %v5730_v31 = vpop.permute.xlu0 %5729  ;;  %v3131_v2 = vsel %vm347_vm3, %v2074_v46, %v5717_v29  ;;  %v7289_v11 = vsel %vm3190_vm7, %v3162_v0, %v5741_v55 }
 0x221   : > { %v1771_v30 = vmax.f32 %v1687_v14, %v1691_v18  ;;  %v1692_v25 = vmax.f32 %v1466_v21, 0.0  ;;  %v5732_v36 = vunpack.i.h.bf16 %v5730_v31  ;;  %v5731_v38 = vunpack.i.l.bf16 %v5730_v31  ;;  %v7283_v3 = vpop.permute.xlu1 %5744 }
 0x222   : > { %v1769_v32 = vmax.f32 %v1685_v23, %v1689_v12  ;;  %v1690_v35 = vmax.f32 %v1458_v24, 0.0  ;;  %5959 = vrot.lane.b32.xlu1 %v5958_v26, %s6513_s10  ;;  %5944 = vrot.lane.b32.xlu0 %v5958_v26, %s6512_s29  ;;  %v3163_v9 = vsel %vm2044_vm6, %v3131_v2, %v5722_v54  ;;  %v2201_v23 = vld [vmem:[#allocation3 + $0x49] sm:$0xff] }
 0x223   : > { %1835 = vst.msk [vmem:[#allocation2 + $0x170] sm:$0xff] %vm347_vm3, %v1771_v30  ;;  %v1772_v39 = vmax.f32 %v1688_v27, %v1692_v25  ;;  %v3289_v47 = vsel %vm3190_vm7, %v3257_v41, %v5731_v38  ;;  %v3290_v40 = vsel %vm3190_vm7, %v3258_v42, %v5732_v36  ;;  %v7294_v19 = vsel %vm3190_vm7, %v3163_v9, %v5742_v61 }
 0x224   : > { %1833 = vst.msk [vmem:[#allocation2 + $0x160] sm:$0xff] %vm347_vm3, %v1769_v32  ;;  %v1770_v45 = vmax.f32 %v1686_v28, %v1690_v35  ;;  %v5510_v8 = vpop.f32.mrb[96].mxu0  ;;  %v3323_v50 = vpack.c.bf16 %v3290_v40, %v3289_v47  ;;  %v5735_v56 = vpop.permute.xlu0 %5734 }
 0x225   : > { %1836 = vst.msk [vmem:[#allocation2 + $0x178] sm:$0xff] %vm347_vm3, %v1772_v39  ;;  %v1470_v49 = vpop.f32.mrb[97].mxu0  ;;  %v1479_v62 = vadd.f32 %v7152_v33, %v5510_v8  ;;  %v5737_v4 = vunpack.i.h.bf16 %v5735_v56  ;;  %v5736_v5 = vunpack.i.l.bf16 %v5735_v56 }
 0x226   : > { %1834 = vst.msk [vmem:[#allocation2 + $0x168] sm:$0xff] %vm347_vm3, %v1770_v45  ;;  %v5511_v37 = vpop.f32.mrb[98].mxu0  ;;  %3606 = vmatprep.mubr.bf16.mxu1 %v3323_v50  ;;  %v2124_v7 = vld [vmem:[#allocation3 + $0x111] sm:$0xff]  ;;  %v1471_v16 = vadd.f32 %v7152_v33, %v1470_v49  ;;  %v5750_v45 = vpop.permute.xlu1 %5749 }
 0x227   : > { %v1473_v57 = vpop.f32.mrb[99].mxu0  ;;  %v2185_v58 = vld [vmem:[#allocation3 + $0x108] sm:$0xff]  ;;  %v2186_v59 = vld [vmem:[#allocation3 + $0x110] sm:$0xff]  ;;  %3607 = vmatmul.mubr.bf16.gmra.mrb[4].mxu1 %v3322_v53  ;;  %v1695_v15 = vmax.f32 %v1479_v62, 0.0  ;;  %v1482_v17 = vadd.f32 %v7152_v33, %v5511_v37  ;;  %v3228_v25 = vsel %vm347_vm3, %v2202_v10, %v5737_v4  ;;  %v3227_v31 = vsel %vm347_vm3, %v2201_v23, %v5736_v5 }
 0x228   : > { %v5978_v1 = vpack.i.bf16 %v2186_v59, %v2185_v58  ;;  %v2123_v6 = vld [vmem:[#allocation3 + $0x109] sm:$0xff]  ;;  %v1474_v12 = vadd.f32 %v7152_v33, %v1473_v57  ;;  %v2156_v38 = vld [vmem:[#allocation3 + $0x112] sm:$0xff]  ;;  %v1693_v8 = vmax.f32 %v1471_v16, 0.0  ;;  %v5747_v4 = vunpack.i.h.bf16 %v7283_v3 }
 0x229   : > { %v5983_v28 = vpack.i.bf16 %v2124_v7, %v2123_v6  ;;  %v2155_v36 = vld [vmem:[#allocation3 + $0x10a] sm:$0xff]  ;;  %v1696_v47 = vmax.f32 %v1482_v17, 0.0  ;;  %v5751_v5 = vunpack.i.l.bf16 %v5750_v45  ;;  %v3325_v7 = vpack.c.bf16 %v7294_v19, %v7289_v11 }
 0x22a   : > { %5979 = vrot.lane.b32.xlu1 %v5978_v1, %s6514_s30  ;;  %5964 = vrot.lane.b32.xlu0 %v5978_v1, %s6513_s10  ;;  %v1694_v49 = vmax.f32 %v1474_v12, 0.0  ;;  %v5988_v37 = vpack.i.bf16 %v2156_v38, %v2155_v36  ;;  %v5746_v1 = vunpack.i.l.bf16 %v7283_v3  ;;  %v5752_v9 = vunpack.i.h.bf16 %v5750_v45  ;;  %v2075_v17 = vld [vmem:[#allocation3 + $0x48] sm:$0xff]  ;;  %v2076_v3 = vld [vmem:[#allocation3 + $0x50] sm:$0xff] }
 0x22b   : > { %v3133_v23 = vsel %vm347_vm3, %v2076_v3, %v5747_v4  ;;  %v2203_v45 = vld [vmem:[#allocation3 + $0x61] sm:$0xff] }
 0x22c   : > { %v1899_v13 = vld [vmem:[#allocation2 + $0x170] ss:$2 sm:$0xff]  ;;  %v1963_v14 = vld [vmem:[#allocation2 + $0x171] ss:$2 sm:$0xff]  ;;  %v5514_v18 = vpop.f32.mrb[100].mxu0  ;;  %v5755_v26 = vpop.permute.xlu0 %5754 }
 0x22d   : > { %v2003_v20 = vmax.f32 %v1899_v13, %v1963_v14  ;;  %v1897_v21 = vld [vmem:[#allocation2 + $0x160] ss:$2 sm:$0xff]  ;;  %v1961_v22 = vld [vmem:[#allocation2 + $0x161] ss:$2 sm:$0xff]  ;;  %v1495_v24 = vadd.f32 %v7152_v33, %v5514_v18  ;;  %v1486_v27 = vpop.f32.mrb[101].mxu0  ;;  %v5757_v41 = vunpack.i.h.bf16 %v5755_v26  ;;  %v5756_v42 = vunpack.i.l.bf16 %v5755_v26  ;;  %v5770_v60 = vpop.permute.xlu1 %5769 }
 0x22e   : > { %v2002_v30 = vmax.f32 %v1897_v21, %v1961_v22  ;;  %v1487_v32 = vadd.f32 %v7152_v33, %v1486_v27  ;;  %v5515_v35 = vpop.f32.mrb[102].mxu0  ;;  %5984 = vrot.lane.b32.xlu1 %v5983_v28, %s6512_s29  ;;  %5969 = vrot.lane.b32.xlu0 %v5983_v28, %s6514_s30  ;;  %v5771_v10 = vunpack.i.l.bf16 %v5770_v60  ;;  %v5772_v18 = vunpack.i.h.bf16 %v5770_v60 }
 0x22f   : > { %2035 = vst.msk [vmem:[#allocation3 + $0x129] sm:$0xff] %vm347_vm3, %v2003_v20  ;;  %v1699_v39 = vmax.f32 %v1495_v24, 0.0  ;;  %v1498_v43 = vadd.f32 %v7152_v33, %v5515_v35  ;;  %v1489_v44 = vpop.f32.mrb[103].mxu0  ;;  %v3259_v57 = vsel %vm2044_vm6, %v3227_v31, %v5756_v42  ;;  %v3260_v58 = vsel %vm2044_vm6, %v3228_v25, %v5757_v41 }
 0x230   : > { %2034 = vst.msk [vmem:[#allocation3 + $0x121] sm:$0xff] %vm347_vm3, %v2002_v30  ;;  %v1697_v40 = vmax.f32 %v1487_v32, 0.0  ;;  %v1490_v48 = vadd.f32 %v7152_v33, %v1489_v44  ;;  %v5760_v51 = vpop.permute.xlu0 %5759  ;;  %v3132_v21 = vsel %vm347_vm3, %v2075_v17, %v5746_v1  ;;  %v3165_v28 = vsel %vm2044_vm6, %v3133_v23, %v5752_v9  ;;  %v2204_v30 = vld [vmem:[#allocation3 + $0x69] sm:$0xff] }
 0x231   : > { %v1775_v50 = vmax.f32 %v1695_v15, %v1699_v39  ;;  %v1700_v29 = vmax.f32 %v1498_v43, 0.0  ;;  %v5762_v55 = vunpack.i.h.bf16 %v5760_v51  ;;  %v5761_v56 = vunpack.i.l.bf16 %v5760_v51  ;;  %v7325_v19 = vpop.permute.xlu1 %5774 }
 0x232   : > { %v1773_v53 = vmax.f32 %v1693_v8, %v1697_v40  ;;  %v1698_v54 = vmax.f32 %v1490_v48, 0.0  ;;  %5989 = vrot.lane.b32.xlu1 %v5988_v37, %s6513_s10  ;;  %5974 = vrot.lane.b32.xlu0 %v5988_v37, %s6512_s29  ;;  %v3164_v11 = vsel %vm2044_vm6, %v3132_v21, %v5751_v5  ;;  %v7336_v41 = vsel %vm3190_vm7, %v3165_v28, %v5772_v18 }
 0x233   : > { %1839 = vst.msk [vmem:[#allocation2 + $0x190] sm:$0xff] %vm347_vm3, %v1775_v50  ;;  %v1776_v59 = vmax.f32 %v1696_v47, %v1700_v29  ;;  %v3291_v46 = vsel %vm3190_vm7, %v3259_v57, %v5761_v56  ;;  %v3292_v63 = vsel %vm3190_vm7, %v3260_v58, %v5762_v55  ;;  %v7331_v25 = vsel %vm3190_vm7, %v3164_v11, %v5771_v10 }
 0x234   : > { %1837 = vst.msk [vmem:[#allocation2 + $0x180] sm:$0xff] %vm347_vm3, %v1773_v53  ;;  %v1774_v61 = vmax.f32 %v1694_v49, %v1698_v54  ;;  %v5518_v62 = vpop.f32.mrb[104].mxu0  ;;  %v3326_v0 = vpack.c.bf16 %v3292_v63, %v3291_v46  ;;  %v5765_v13 = vpop.permute.xlu0 %5764 }
 0x235   : > { %1840 = vst.msk [vmem:[#allocation2 + $0x198] sm:$0xff] %vm347_vm3, %v1776_v59  ;;  %v1502_v2 = vpop.f32.mrb[105].mxu0  ;;  %v1511_v20 = vadd.f32 %v7152_v33, %v5518_v62  ;;  %v5767_v12 = vunpack.i.h.bf16 %v5765_v13  ;;  %v5766_v24 = vunpack.i.l.bf16 %v5765_v13 }
 0x236   : > { %1838 = vst.msk [vmem:[#allocation2 + $0x188] sm:$0xff] %vm347_vm3, %v1774_v61  ;;  %v5519_v6 = vpop.f32.mrb[106].mxu0  ;;  %3614 = vmatprep.mubr.bf16.mxu1 %v3326_v0  ;;  %v2126_v27 = vld [vmem:[#allocation3 + $0x129] sm:$0xff]  ;;  %v1503_v36 = vadd.f32 %v7152_v33, %v1502_v2  ;;  %v5780_v61 = vpop.permute.xlu1 %5779 }
 0x237   : > { %v1505_v14 = vpop.f32.mrb[107].mxu0  ;;  %v2187_v15 = vld [vmem:[#allocation3 + $0x120] sm:$0xff]  ;;  %v2188_v16 = vld [vmem:[#allocation3 + $0x128] sm:$0xff]  ;;  %3615 = vmatmul.mubr.bf16.gmra.mrb[8].mxu1 %v3325_v7  ;;  %v1703_v35 = vmax.f32 %v1511_v20, 0.0  ;;  %v1514_v38 = vadd.f32 %v7152_v33, %v5519_v6  ;;  %v3230_v29 = vsel %vm347_vm3, %v2204_v30, %v5767_v12  ;;  %v3229_v51 = vsel %vm347_vm3, %v2203_v45, %v5766_v24 }
 0x238   : > { %v6008_v22 = vpack.i.bf16 %v2188_v16, %v2187_v15  ;;  %v2125_v26 = vld [vmem:[#allocation3 + $0x121] sm:$0xff]  ;;  %v1506_v8 = vadd.f32 %v7152_v33, %v1505_v14  ;;  %v2158_v55 = vld [vmem:[#allocation3 + $0x12a] sm:$0xff]  ;;  %v1701_v62 = vmax.f32 %v1503_v36, 0.0  ;;  %v5777_v12 = vunpack.i.h.bf16 %v7325_v19 }
 0x239   : > { %v6013_v49 = vpack.i.bf16 %v2126_v27, %v2125_v26  ;;  %v2157_v54 = vld [vmem:[#allocation3 + $0x122] sm:$0xff]  ;;  %v1704_v46 = vmax.f32 %v1514_v38, 0.0  ;;  %v5781_v24 = vunpack.i.l.bf16 %v5780_v61  ;;  %v3328_v27 = vpack.c.bf16 %v7336_v41, %v7331_v25 }
 0x23a   : > { %6009 = vrot.lane.b32.xlu1 %v6008_v22, %s6514_s30  ;;  %5994 = vrot.lane.b32.xlu0 %v6008_v22, %s6513_s10  ;;  %v1702_v2 = vmax.f32 %v1506_v8, 0.0  ;;  %v6018_v6 = vpack.i.bf16 %v2158_v55, %v2157_v54  ;;  %v5776_v22 = vunpack.i.l.bf16 %v7325_v19  ;;  %v5782_v28 = vunpack.i.h.bf16 %v5780_v61  ;;  %v2077_v38 = vld [vmem:[#allocation3 + $0x60] sm:$0xff] }
 0x23c   : > { %v1903_v31 = vld [vmem:[#allocation2 + $0x190] ss:$2 sm:$0xff]  ;;  %v1967_v32 = vld [vmem:[#allocation2 + $0x191] ss:$2 sm:$0xff]  ;;  %v5522_v39 = vpop.f32.mrb[108].mxu0  ;;  %v5785_v40 = vpop.permute.xlu0 %5784  ;;  %v3134_v25 = vsel %vm347_vm3, %v2077_v38, %v5776_v22 }
 0x23d   : > { %v2005_v42 = vmax.f32 %v1903_v31, %v1967_v32  ;;  %v1901_v43 = vld [vmem:[#allocation2 + $0x180] ss:$2 sm:$0xff]  ;;  %v1965_v44 = vld [vmem:[#allocation2 + $0x181] ss:$2 sm:$0xff]  ;;  %v1527_v47 = vadd.f32 %v7152_v33, %v5522_v39  ;;  %v1518_v48 = vpop.f32.mrb[109].mxu0  ;;  %v5787_v57 = vunpack.i.h.bf16 %v5785_v40  ;;  %v5786_v58 = vunpack.i.l.bf16 %v5785_v40  ;;  %v5800_v17 = vpop.permute.xlu1 %5799 }
 0x23e   : > { %v2004_v50 = vmax.f32 %v1901_v43, %v1965_v44  ;;  %v1519_v37 = vadd.f32 %v7152_v33, %v1518_v48  ;;  %v5523_v53 = vpop.f32.mrb[110].mxu0  ;;  %6014 = vrot.lane.b32.xlu1 %v6013_v49, %s6512_s29  ;;  %5999 = vrot.lane.b32.xlu0 %v6013_v49, %s6514_s30  ;;  %v5801_v30 = vunpack.i.l.bf16 %v5800_v17  ;;  %v5802_v39 = vunpack.i.h.bf16 %v5800_v17  ;;  %v2078_v43 = vld [vmem:[#allocation3 + $0x68] sm:$0xff] }
 0x23f   : > { %2037 = vst.msk [vmem:[#allocation3 + $0x141] sm:$0xff] %vm347_vm3, %v2005_v42  ;;  %v1707_v56 = vmax.f32 %v1527_v47, 0.0  ;;  %v1530_v59 = vadd.f32 %v7152_v33, %v5523_v53  ;;  %v1521_v60 = vpop.f32.mrb[111].mxu0  ;;  %v3261_v14 = vsel %vm2044_vm6, %v3229_v51, %v5786_v58  ;;  %v3262_v15 = vsel %vm2044_vm6, %v3230_v29, %v5787_v57  ;;  %v6300_v42 = vld [vmem:[%s8067_s3 + $0x88] sm:$0xff]  }
 0x240   : > { %2036 = vst.msk [vmem:[#allocation3 + $0x139] sm:$0xff] %vm347_vm3, %v2004_v50  ;;  %v1705_v63 = vmax.f32 %v1519_v37, 0.0  ;;  %v1522_v1 = vadd.f32 %v7152_v33, %v1521_v60  ;;  %v5790_v5 = vpop.permute.xlu0 %5789  ;;  %v3135_v44 = vsel %vm347_vm3, %v2078_v43, %v5777_v12  ;;  %v3166_v45 = vsel %vm2044_vm6, %v3134_v25, %v5781_v24  ;;  %5542 = vmatprep.subr.bf16.mxu1 %v6300_v42  ;;  %v2206_v29 = vld [vmem:[#allocation3 + $0x81] sm:$0xff] }
 0x241   : > { %v1779_v0 = vmax.f32 %v1703_v35, %v1707_v56  ;;  %v1708_v4 = vmax.f32 %v1530_v59, 0.0  ;;  %v5792_v10 = vunpack.i.h.bf16 %v5790_v5  ;;  %v5791_v13 = vunpack.i.l.bf16 %v5790_v5  ;;  %v7376_v8 = vpop.permute.xlu1 %5804  ;;  %5543 = vmatpush3.bf16.msra.mxu1 %v6300_v42 }
 0x242   : > { %v1777_v7 = vmax.f32 %v1701_v62, %v1705_v63  ;;  %v1706_v9 = vmax.f32 %v1522_v1, 0.0  ;;  %6019 = vrot.lane.b32.xlu1 %v6018_v6, %s6513_s10  ;;  %6004 = vrot.lane.b32.xlu0 %v6018_v6, %s6512_s29  ;;  %v3167_v50 = vsel %vm2044_vm6, %v3135_v44, %v5782_v28  ;;  %v7386_v51 = vsel %vm3190_vm7, %v3166_v45, %v5801_v30  ;;  %v2205_v62 = vld [vmem:[#allocation3 + $0x79] sm:$0xff] }
 0x243   : > { %1843 = vst.msk [vmem:[#allocation2 + $0x1b0] sm:$0xff] %vm347_vm3, %v1779_v0  ;;  %v1780_v16 = vmax.f32 %v1704_v46, %v1708_v4  ;;  %v3293_v3 = vsel %vm3190_vm7, %v3261_v14, %v5791_v13  ;;  %v3294_v21 = vsel %vm3190_vm7, %v3262_v15, %v5792_v10  ;;  %v7391_v58 = vsel %vm3190_vm7, %v3167_v50, %v5802_v39 }
 0x244   : > { %1841 = vst.msk [vmem:[#allocation2 + $0x1a0] sm:$0xff] %vm347_vm3, %v1777_v7  ;;  %v1778_v18 = vmax.f32 %v1702_v2, %v1706_v9  ;;  %v5526_v20 = vpop.f32.mrb[112].mxu0  ;;  %v3329_v11 = vpack.c.bf16 %v3294_v21, %v3293_v3  ;;  %v5795_v31 = vpop.permute.xlu0 %5794  ;;  %v5807_v44 = vunpack.i.h.bf16 %v7376_v8  ;;  %v5806_v45 = vunpack.i.l.bf16 %v7376_v8 }
 0x245   : > { %1844 = vst.msk [vmem:[#allocation2 + $0x1b8] sm:$0xff] %vm347_vm3, %v1780_v16  ;;  %v1534_v23 = vpop.f32.mrb[113].mxu0  ;;  %v1543_v19 = vadd.f32 %v7152_v33, %v5526_v20  ;;  %v5797_v47 = vunpack.i.h.bf16 %v5795_v31  ;;  %v5796_v40 = vunpack.i.l.bf16 %v5795_v31  ;;  %v5810_v20 = vpop.permute.xlu1 %5809 }
 0x246   : > { %1842 = vst.msk [vmem:[#allocation2 + $0x1a8] sm:$0xff] %vm347_vm3, %v1778_v18  ;;  %v5527_v26 = vpop.f32.mrb[114].mxu0  ;;  %3622 = vmatprep.mubr.bf16.mxu1 %v3329_v11  ;;  %v7380_v49 = vld [vmem:[#allocation3 + $0x141] sm:$0xff]  ;;  %v1535_v55 = vadd.f32 %v7152_v33, %v1534_v23  ;;  %v5811_v50 = vunpack.i.l.bf16 %v5810_v20 }
 0x247   : > { %v1537_v32 = vpop.f32.mrb[115].mxu0  ;;  %v7363_v35 = vld [vmem:[#allocation3 + $0x138] sm:$0xff]  ;;  %v7365_v36 = vld [vmem:[#allocation3 + $0x140] sm:$0xff]  ;;  %3623 = vmatmul.mubr.bf16.gmra.mrb[12].mxu1 %v3328_v27  ;;  %v1711_v54 = vmax.f32 %v1543_v19, 0.0  ;;  %v1546_v56 = vadd.f32 %v7152_v33, %v5527_v26  ;;  %v3232_v5 = vsel %vm347_vm3, %v2206_v29, %v5797_v47  ;;  %v3231_v6 = vsel %vm347_vm3, %v2205_v62, %v5796_v40 }
 0x248   : > { %v6038_v41 = vpack.i.bf16 %v7365_v36, %v7363_v35  ;;  %v7378_v48 = vld [vmem:[#allocation3 + $0x139] sm:$0xff]  ;;  %v1538_v46 = vadd.f32 %v7152_v33, %v1537_v32  ;;  %v2160_v13 = vld [vmem:[#allocation3 + $0x142] sm:$0xff]  ;;  %v1709_v3 = vmax.f32 %v1535_v55, 0.0 }
 0x249   : > { %v6043_v0 = vpack.i.bf16 %v7380_v49, %v7378_v48  ;;  %v2159_v10 = vld [vmem:[#allocation3 + $0x13a] sm:$0xff]  ;;  %v1712_v21 = vmax.f32 %v1546_v56, 0.0 }
 0x24a   : > { %6039 = vrot.lane.b32.xlu1 %v6038_v41, %s6514_s30  ;;  %6024 = vrot.lane.b32.xlu0 %v6038_v41, %s6513_s10  ;;  %v1710_v11 = vmax.f32 %v1538_v46, 0.0  ;;  %v6048_v27 = vpack.i.bf16 %v2160_v13, %v2159_v10  ;;  %v6338_v46 = vld [vmem:[#allocation9] ss:$0 sm:$0xff] }
 0x24c   : > { %v1907_v37 = vld [vmem:[#allocation2 + $0x1b0] ss:$2 sm:$0xff]  ;;  %v1971_v53 = vld [vmem:[#allocation2 + $0x1b1] ss:$2 sm:$0xff]  ;;  %v5530_v57 = vpop.f32.mrb[116].mxu0  ;;  %v5815_v1 = vpop.permute.xlu0 %5814 }
 0x24d   : > { %v2007_v59 = vmax.f32 %v1907_v37, %v1971_v53  ;;  %v1905_v60 = vld [vmem:[#allocation2 + $0x1a0] ss:$2 sm:$0xff]  ;;  %v1969_v61 = vld [vmem:[#allocation2 + $0x1a1] ss:$2 sm:$0xff]  ;;  %v1559_v63 = vadd.f32 %v7152_v33, %v5530_v57  ;;  %v1550_v2 = vpop.f32.mrb[117].mxu0  ;;  %v5817_v15 = vunpack.i.h.bf16 %v5815_v1  ;;  %v5816_v16 = vunpack.i.l.bf16 %v5815_v1 }
 0x24e   : > { %v2006_v4 = vmax.f32 %v1905_v60, %v1969_v61  ;;  %v1551_v7 = vadd.f32 %v7152_v33, %v1550_v2  ;;  %v5531_v9 = vpop.f32.mrb[118].mxu0  ;;  %6044 = vrot.lane.b32.xlu1 %v6043_v0, %s6512_s29  ;;  %6029 = vrot.lane.b32.xlu0 %v6043_v0, %s6514_s30  ;;  %v3331_v37 = vpack.c.bf16 %v7391_v58, %v7386_v51  ;;  %v5812_v53 = vunpack.i.h.bf16 %v5810_v20  ;;  %v2079_v60 = vld [vmem:[#allocation3 + $0x78] sm:$0xff]  ;;  %v2080_v61 = vld [vmem:[#allocation3 + $0x80] sm:$0xff] }
 0x24f   : > { %2039 = vst.msk [vmem:[#allocation3 + $0x159] sm:$0xff] %vm347_vm3, %v2007_v59  ;;  %v1715_v14 = vmax.f32 %v1559_v63, 0.0  ;;  %v1562_v17 = vadd.f32 %v7152_v33, %v5531_v9  ;;  %v1553_v18 = vpop.f32.mrb[119].mxu0  ;;  %v3263_v38 = vsel %vm2044_vm6, %v3231_v6, %v5816_v16  ;;  %v3264_v39 = vsel %vm2044_vm6, %v3232_v5, %v5817_v15 }
 0x250   : > { %2038 = vst.msk [vmem:[#allocation3 + $0x151] sm:$0xff] %vm347_vm3, %v2006_v4  ;;  %v1713_v22 = vmax.f32 %v1551_v7, 0.0  ;;  %v1554_v23 = vadd.f32 %v7152_v33, %v1553_v18  ;;  %v5820_v26 = vpop.permute.xlu0 %5819  ;;  %v5830_v33 = vpop.permute.xlu1 %5829  ;;  %v3137_v51 = vsel %vm347_vm3, %v2080_v61, %v5807_v44  ;;  %v3136_v58 = vsel %vm347_vm3, %v2079_v60, %v5806_v45 }
 0x251   : > { %v1783_v12 = vmax.f32 %v1711_v54, %v1715_v14  ;;  %v1716_v24 = vmax.f32 %v1562_v17, 0.0  ;;  %v5822_v31 = vunpack.i.h.bf16 %v5820_v26  ;;  %v5821_v32 = vunpack.i.l.bf16 %v5820_v26  ;;  %v2208_v14 = vld [vmem:[#allocation3 + $0x99] sm:$0xff] }
 0x252   : > { %v1781_v28 = vmax.f32 %v1709_v3, %v1713_v22  ;;  %v1714_v30 = vmax.f32 %v1554_v23, 0.0  ;;  %6049 = vrot.lane.b32.xlu1 %v6048_v27, %s6513_s10  ;;  %6034 = vrot.lane.b32.xlu0 %v6048_v27, %s6512_s29  ;;  %v5831_v54 = vunpack.i.l.bf16 %v5830_v33  ;;  %v5832_v62 = vunpack.i.h.bf16 %v5830_v33 }
 0x253   : > { %1847 = vst.msk [vmem:[#allocation2 + $0x1d0] sm:$0xff] %vm347_vm3, %v1783_v12  ;;  %v1784_v19 = vmax.f32 %v1712_v21, %v1716_v24  ;;  %v3295_v25 = vsel %vm3190_vm7, %v3263_v38, %v5821_v32  ;;  %v3296_v41 = vsel %vm3190_vm7, %v3264_v39, %v5822_v31  ;;  %v3168_v0 = vsel %vm2044_vm6, %v3136_v58, %v5811_v50  ;;  %v2207_v24 = vld [vmem:[#allocation3 + $0x91] sm:$0xff] }
 0x254   : > { %1845 = vst.msk [vmem:[#allocation2 + $0x1c0] sm:$0xff] %vm347_vm3, %v1781_v28  ;;  %v1782_v42 = vmax.f32 %v1710_v11, %v1714_v30  ;;  %v5534_v43 = vpop.f32.mrb[120].mxu0  ;;  %v3332_v40 = vpack.c.bf16 %v3296_v41, %v3295_v25  ;;  %v5825_v55 = vpop.permute.xlu0 %5824  ;;  %v3169_v13 = vsel %vm2044_vm6, %v3137_v51, %v5812_v53  ;;  %v7445_v15 = vsel %vm3190_vm7, %v3168_v0, %v5831_v54 }
 0x255   : > { %1848 = vst.msk [vmem:[#allocation2 + $0x1d8] sm:$0xff] %vm347_vm3, %v1784_v19  ;;  %v1566_v47 = vpop.f32.mrb[121].mxu0  ;;  %v1575_v63 = vadd.f32 %v6338_v46, %v5534_v43  ;;  %v7433_v4 = vpop.permute.xlu1 %5834  ;;  %v5827_v5 = vunpack.i.h.bf16 %v5825_v55  ;;  %v5826_v6 = vunpack.i.l.bf16 %v5825_v55  ;;  %v3202_v22 = vsel %vm3190_vm7, %v3169_v13, %v5832_v62 }
 0x256   : > { %1846 = vst.msk [vmem:[#allocation2 + $0x1c8] sm:$0xff] %vm347_vm3, %v1782_v42  ;;  %v5535_v29 = vpop.f32.mrb[122].mxu0  ;;  %3630 = vmatprep.mubr.bf16.mxu1 %v3332_v40  ;;  %v7424_v8 = vld [vmem:[#allocation3 + $0x15a] sm:$0xff]  ;;  %v1567_v20 = vadd.f32 %v6338_v46, %v1566_v47 }
 0x257   : > { %v1569_v56 = vpop.f32.mrb[123].mxu0  ;;  %v7420_v57 = vld [vmem:[#allocation3 + $0x150] sm:$0xff]  ;;  %v7422_v59 = vld [vmem:[#allocation3 + $0x158] sm:$0xff]  ;;  %3631 = vmatmul.mubr.bf16.gmra.mrb[16].mxu1 %v3331_v37  ;;  %v1719_v18 = vmax.f32 %v1575_v63, 0.0  ;;  %v1578_v3 = vadd.f32 %v6338_v46, %v5535_v29  ;;  %v3234_v38 = vsel %vm347_vm3, %v2208_v14, %v5827_v5  ;;  %v3233_v39 = vsel %vm347_vm3, %v2207_v24, %v5826_v6 }
 0x258   : > { %v7426_v1 = vld [vmem:[#allocation3 + $0x152] sm:$0xff]  ;;  %v6068_v2 = vpack.i.bf16 %v7422_v59, %v7420_v57  ;;  %v1570_v26 = vadd.f32 %v6338_v46, %v1569_v56  ;;  %v1717_v47 = vmax.f32 %v1567_v20, 0.0  ;;  %v3334_v14 = vpack.c.bf16 %v3202_v22, %v7445_v15 }
 0x259   : > { %v7435_v7 = vld [vmem:[#allocation3 + $0x151] sm:$0xff]  ;;  %v7437_v9 = vld [vmem:[#allocation3 + $0x159] sm:$0xff]  ;;  %v3357_v10 = vpack.c.bf16 %v7424_v8, %v7426_v1  ;;  %v7456_v45 = vpop.permute.xlu1 %5839  ;;  %v1720_v40 = vmax.f32 %v1578_v3, 0.0  ;;  %v6078_v56 = vpack.i.bf16 %v7424_v8, %v7426_v1  ;;  %v5837_v24 = vunpack.i.h.bf16 %v7433_v4 }
 0x25a   : > { %6069 = vrot.lane.b32.xlu1 %v6068_v2, %s6514_s30  ;;  %6054 = vrot.lane.b32.xlu0 %v6068_v2, %s6513_s10  ;;  %v6073_v31 = vpack.i.bf16 %v7437_v9, %v7435_v7  ;;  %v1718_v37 = vmax.f32 %v1570_v26, 0.0  ;;  %v5841_v26 = vunpack.i.l.bf16 %v7456_v45 }
 0x25c   : > { %v1911_v16 = vld [vmem:[#allocation2 + $0x1d0] ss:$2 sm:$0xff]  ;;  %v1975_v17 = vld [vmem:[#allocation2 + $0x1d1] ss:$2 sm:$0xff]  ;;  %v5538_v21 = vpop.f32.mrb[124].mxu0  ;;  %v5845_v28 = vpop.permute.xlu0 %5844 }
 0x25d   : > { %v2009_v23 = vmax.f32 %v1911_v16, %v1975_v17  ;;  %v1909_v11 = vld [vmem:[#allocation2 + $0x1c0] ss:$2 sm:$0xff]  ;;  %v1973_v12 = vld [vmem:[#allocation2 + $0x1c1] ss:$2 sm:$0xff]  ;;  %v1591_v27 = vadd.f32 %v6338_v46, %v5538_v21  ;;  %v1582_v30 = vpop.f32.mrb[125].mxu0  ;;  %v5847_v43 = vunpack.i.h.bf16 %v5845_v28  ;;  %v5846_v25 = vunpack.i.l.bf16 %v5845_v28 }
 0x25e   : > { %v2008_v32 = vmax.f32 %v1909_v11, %v1973_v12  ;;  %v1583_v19 = vadd.f32 %v6338_v46, %v1582_v30  ;;  %v5539_v33 = vpop.f32.mrb[126].mxu0  ;;  %6074 = vrot.lane.b32.xlu1 %v6073_v31, %s6512_s29  ;;  %6059 = vrot.lane.b32.xlu0 %v6073_v31, %s6514_s30  ;;  %v5842_v28 = vunpack.i.h.bf16 %v7456_v45 }
 0x25f   : > { %2041 = vst.msk [vmem:[#allocation3 + $0x171] sm:$0xff] %vm347_vm3, %v2009_v23  ;;  %v1723_v42 = vmax.f32 %v1591_v27, 0.0  ;;  %v1594_v41 = vadd.f32 %v6338_v46, %v5539_v33  ;;  %v1585_v44 = vpop.f32.mrb[127].mxu0  ;;  %v3265_v51 = vsel %vm2044_vm6, %v3233_v39, %v5846_v25  ;;  %v3266_v58 = vsel %vm2044_vm6, %v3234_v38, %v5847_v43  ;;  %v2081_v27 = vld [vmem:[#allocation3 + $0x90] sm:$0xff] }
 0x260   : > { %2040 = vst.msk [vmem:[#allocation3 + $0x169] sm:$0xff] %vm347_vm3, %v2008_v32  ;;  %v1721_v50 = vmax.f32 %v1583_v19, 0.0  ;;  %v1586_v29 = vadd.f32 %v6338_v46, %v1585_v44  ;;  %v5850_v55 = vpop.permute.xlu0 %5849  ;;  %v7465_v46 = vpop.permute.xlu1 %5859  ;;  %v5836_v23 = vunpack.i.l.bf16 %v7433_v4 }
 0x261   : > { %v1787_v53 = vmax.f32 %v1719_v18, %v1723_v42  ;;  %v1724_v54 = vmax.f32 %v1594_v41, 0.0  ;;  %v5852_v62 = vunpack.i.h.bf16 %v5850_v55  ;;  %v5851_v63 = vunpack.i.l.bf16 %v5850_v55  ;;  %v2082_v41 = vld [vmem:[#allocation3 + $0x98] sm:$0xff] }
 0x262   : > { %v1785_v60 = vmax.f32 %v1717_v47, %v1721_v50  ;;  %v1722_v61 = vmax.f32 %v1586_v29, 0.0  ;;  %6079 = vrot.lane.b32.xlu1 %v6078_v56, %s6513_s10  ;;  %6064 = vrot.lane.b32.xlu0 %v6078_v56, %s6512_s29  ;;  %v5861_v30 = vunpack.i.l.bf16 %v7465_v46  ;;  %v3138_v19 = vsel %vm347_vm3, %v2081_v27, %v5836_v23  ;;  %v2210_v55 = vld [vmem:[#allocation3 + $0xb1] sm:$0xff] }
 0x263   : > { %1851 = vst.msk [vmem:[#allocation2 + $0x1f0] sm:$0xff] %vm347_vm3, %v1787_v53  ;;  %v1788_v2 = vmax.f32 %v1720_v40, %v1724_v54  ;;  %v3297_v5 = vsel %vm3190_vm7, %v3265_v51, %v5851_v63  ;;  %v3298_v6 = vsel %vm3190_vm7, %v3266_v58, %v5852_v62  ;;  %v5862_v44 = vunpack.i.h.bf16 %v7465_v46  ;;  %v2209_v54 = vld [vmem:[#allocation3 + $0xa9] sm:$0xff] }
 0x264   : > { %1849 = vst.msk [vmem:[#allocation2 + $0x1e0] sm:$0xff] %vm347_vm3, %v1785_v60  ;;  %v1786_v0 = vmax.f32 %v1718_v37, %v1722_v61  ;;  %v3335_v13 = vpack.c.bf16 %v3298_v6, %v3297_v5  ;;  %v5855_v20 = vpop.permute.xlu0 %5854  ;;  %v7490_v22 = vpop.permute.xlu1 %5864  ;;  %v3139_v50 = vsel %vm347_vm3, %v2082_v41, %v5837_v24  ;;  %v3170_v29 = vsel %vm2044_vm6, %v3138_v19, %v5841_v26 }
 0x265   : > { %1852 = vst.msk [vmem:[#allocation2 + $0x1f8] sm:$0xff] %vm347_vm3, %v1788_v2  ;;  %v5857_v25 = vunpack.i.h.bf16 %v5855_v20  ;;  %v5856_v4 = vunpack.i.l.bf16 %v5855_v20  ;;  %v3171_v37 = vsel %vm2044_vm6, %v3139_v50, %v5842_v28  ;;  %v3203_v61 = vsel %vm3190_vm7, %v3170_v29, %v5861_v30 }
 0x266   : > { %1850 = vst.msk [vmem:[#allocation2 + $0x1e8] sm:$0xff] %vm347_vm3, %v1786_v0  ;;  %v7473_v16 = vld [vmem:[#allocation3 + $0x172] sm:$0xff]  ;;  %3638 = vmatprep.mubr.bf16.mxu1 %v3335_v13  ;;  %v3204_v0 = vsel %vm3190_vm7, %v3171_v37, %v5862_v44  ;;  %v5866_v19 = vunpack.i.l.bf16 %v7490_v22 }
 0x267   : > { %v7475_v17 = vld [vmem:[#allocation3 + $0x168] sm:$0xff]  ;;  %v7477_v18 = vld [vmem:[#allocation3 + $0x170] sm:$0xff]  ;;  %3639 = vmatmul.mubr.bf16.gmra.mrb[20].mxu1 %v3334_v14  ;;  %v3236_v62 = vsel %vm347_vm3, %v2210_v55, %v5857_v25  ;;  %v3235_v63 = vsel %vm347_vm3, %v2209_v54, %v5856_v4  ;;  %v3337_v20 = vpack.c.bf16 %v3204_v0, %v3203_v61  ;;  %v2324_v44 = vld [vmem:[#allocation3 + $0x199] sm:$0xff] }
 0x268   : > { %v6098_v3 = vpack.i.bf16 %v7477_v18, %v7475_v17  ;;  %v7481_v21 = vld [vmem:[#allocation3 + $0x16a] sm:$0xff]  ;;  %v5870_v53 = vpop.permute.xlu1 %5869  ;;  %v2211_v61 = vld [vmem:[#allocation3 + $0xc1] sm:$0xff] }
 0x269   : > { %v7484_v11 = vld [vmem:[#allocation3 + $0x169] sm:$0xff]  ;;  %v7486_v12 = vld [vmem:[#allocation3 + $0x171] sm:$0xff]  ;;  %v3360_v15 = vpack.c.bf16 %v7473_v16, %v7481_v21  ;;  %v6108_v60 = vpack.i.bf16 %v7473_v16, %v7481_v21 }
 0x26a   : > { %6099 = vrot.lane.b32.xlu1 %v6098_v3, %s6514_s30  ;;  %6084 = vrot.lane.b32.xlu0 %v6098_v3, %s6513_s10  ;;  %v6103_v39 = vpack.i.bf16 %v7486_v12, %v7484_v11 }
 0x26c   : > { %v1915_v31 = vld [vmem:[#allocation2 + $0x1f0] ss:$2 sm:$0xff]  ;;  %v1979_v32 = vld [vmem:[#allocation2 + $0x1f1] ss:$2 sm:$0xff]  ;;  %v5875_v38 = vpop.permute.xlu0 %5874  ;;  %v5890_v13 = vpop.permute.xlu1 %5889 }
 0x26d   : > { %v2011_v33 = vmax.f32 %v1915_v31, %v1979_v32  ;;  %v1913_v42 = vld [vmem:[#allocation2 + $0x1e0] ss:$2 sm:$0xff]  ;;  %v1977_v43 = vld [vmem:[#allocation2 + $0x1e1] ss:$2 sm:$0xff]  ;;  %v5877_v45 = vunpack.i.h.bf16 %v5875_v38  ;;  %v5876_v40 = vunpack.i.l.bf16 %v5875_v38  ;;  %v5892_v50 = vunpack.i.h.bf16 %v5890_v13 }
 0x26e   : > { %v2010_v47 = vmax.f32 %v1913_v42, %v1977_v43  ;;  %6104 = vrot.lane.b32.xlu1 %v6103_v39, %s6512_s29  ;;  %6089 = vrot.lane.b32.xlu0 %v6103_v39, %s6514_s30  ;;  %v5867_v39 = vunpack.i.h.bf16 %v7490_v22  ;;  %v5871_v42 = vunpack.i.l.bf16 %v5870_v53  ;;  %v5891_v29 = vunpack.i.l.bf16 %v5890_v13 }
 0x26f   : > { %2043 = vst.msk [vmem:[#allocation3 + $0x189] sm:$0xff] %vm347_vm3, %v2011_v33  ;;  %v3267_v2 = vsel %vm2044_vm6, %v3235_v63, %v5876_v40  ;;  %v3268_v46 = vsel %vm2044_vm6, %v3236_v62, %v5877_v45  ;;  %v5872_v33 = vunpack.i.h.bf16 %v5870_v53  ;;  %v2083_v45 = vld [vmem:[#allocation3 + $0xa8] sm:$0xff]  ;;  %v2084_v40 = vld [vmem:[#allocation3 + $0xb0] sm:$0xff] }
 0x270   : > { %2042 = vst.msk [vmem:[#allocation3 + $0x181] sm:$0xff] %vm347_vm3, %v2010_v47  ;;  %v5880_v56 = vpop.permute.xlu0 %5879  ;;  %v7531_v38 = vpop.permute.xlu1 %5894  ;;  %v2325_v47 = vld [vmem:[#allocation3 + $0x1a1] sm:$0xff]  ;;  %v3141_v22 = vsel %vm347_vm3, %v2084_v40, %v5867_v39  ;;  %v3140_v53 = vsel %vm347_vm3, %v2083_v45, %v5866_v19  ;;  %v2212_v62 = vld [vmem:[#allocation3 + $0xc9] sm:$0xff] }
 0x271   : > { %v5882_v51 = vunpack.i.h.bf16 %v5880_v56  ;;  %v5881_v58 = vunpack.i.l.bf16 %v5880_v56  ;;  %v3172_v55 = vsel %vm2044_vm6, %v3140_v53, %v5871_v42  ;;  %v3173_v56 = vsel %vm2044_vm6, %v3141_v22, %v5872_v33  ;;  %v2085_v45 = vld [vmem:[#allocation3 + $0xc0] sm:$0xff]  ;;  %v2086_v40 = vld [vmem:[#allocation3 + $0xc8] sm:$0xff] }
 0x272   : > { %6109 = vrot.lane.b32.xlu1 %v6108_v60, %s6513_s10  ;;  %6094 = vrot.lane.b32.xlu0 %v6108_v60, %s6512_s29  ;;  %v5897_v42 = vunpack.i.h.bf16 %v7531_v38 }
 0x273   : > { %v3299_v5 = vsel %vm3190_vm7, %v3267_v2, %v5881_v58  ;;  %v3300_v6 = vsel %vm3190_vm7, %v3268_v46, %v5882_v51  ;;  %v6128_v58 = vpack.i.bf16 %v2325_v47, %v2324_v44 }
 0x274   : > { %v3338_v14 = vpack.c.bf16 %v3300_v6, %v3299_v5  ;;  %v5885_v26 = vpop.permute.xlu0 %5884  ;;  %v5900_v60 = vpop.permute.xlu1 %5899  ;;  %v3143_v22 = vsel %vm347_vm3, %v2086_v40, %v5897_v42 }
 0x275   : > { %v5887_v4 = vunpack.i.h.bf16 %v5885_v26  ;;  %v5886_v41 = vunpack.i.l.bf16 %v5885_v26 }
 0x276   : > { %3646 = vmatprep.mubr.bf16.mxu1 %v3338_v14  ;;  %v7521_v3 = vld [vmem:[#allocation3 + $0x18a] sm:$0xff]  ;;  %v3205_v14 = vsel %vm3190_vm7, %v3172_v55, %v5891_v29 }
 0x277   : > { %3647 = vmatmul.mubr.bf16.gmra.mrb[24].mxu1 %v3337_v20  ;;  %v2195_v23 = vld [vmem:[#allocation3 + $0x180] sm:$0xff]  ;;  %v2196_v24 = vld [vmem:[#allocation3 + $0x188] sm:$0xff]  ;;  %v3238_v2 = vsel %vm347_vm3, %v2212_v62, %v5887_v4  ;;  %v3237_v46 = vsel %vm347_vm3, %v2211_v61, %v5886_v41  ;;  %v3206_v20 = vsel %vm3190_vm7, %v3173_v56, %v5892_v50  ;;  %v5901_v4 = vunpack.i.l.bf16 %v5900_v60 }
 0x278   : > { %v6133_v27 = vpack.i.bf16 %v2196_v24, %v2195_v23  ;;  %v7523_v28 = vld [vmem:[#allocation3 + $0x182] sm:$0xff]  ;;  %v3340_v39 = vpack.c.bf16 %v3206_v20, %v3205_v14  ;;  %v2213_v61 = vld [vmem:[#allocation3 + $0xd9] sm:$0xff] }
 0x279   : > { %v7525_v30 = vld [vmem:[#allocation3 + $0x181] sm:$0xff]  ;;  %v7527_v31 = vld [vmem:[#allocation3 + $0x189] sm:$0xff]  ;;  %v3363_v32 = vpack.c.bf16 %v7521_v3, %v7523_v28  ;;  %v6123_v51 = vpack.i.bf16 %v7521_v3, %v7523_v28 }
 0x27a   : > { %6134 = vrot.lane.b32.xlu1 %v6133_v27, %s6514_s30  ;;  %6114 = vrot.lane.b32.xlu0 %v6133_v27, %s6513_s10  ;;  %v6118_v25 = vpack.i.bf16 %v7527_v31, %v7525_v30 }
 0x27c   : > { %v5905_v43 = vpop.permute.xlu0 %5904  ;;  %v5920_v26 = vpop.permute.xlu1 %5919 }
 0x27d   : > { %v5907_v37 = vunpack.i.h.bf16 %v5905_v43  ;;  %v5906_v54 = vunpack.i.l.bf16 %v5905_v43  ;;  %v5896_v43 = vunpack.i.l.bf16 %v7531_v38  ;;  %v5922_v50 = vunpack.i.h.bf16 %v5920_v26 }
 0x27e   : > { %6119 = vrot.lane.b32.xlu0 %v6118_v25, %s6514_s30  ;;  %v5902_v25 = vunpack.i.h.bf16 %v5900_v60  ;;  %v5921_v29 = vunpack.i.l.bf16 %v5920_v26  ;;  %v2214_v60 = vld [vmem:[#allocation3 + $0xe1] sm:$0xff] }
 0x27f   : > { %v3269_v6 = vsel %vm2044_vm6, %v3237_v46, %v5906_v54  ;;  %v3270_v13 = vsel %vm2044_vm6, %v3238_v2, %v5907_v37  ;;  %v3142_v53 = vsel %vm347_vm3, %v2085_v45, %v5896_v43 }
 0x280   : > { %v5910_v63 = vpop.permute.xlu0 %5909  ;;  %v5925_v33 = vpop.permute.xlu1 %5924  ;;  %v3174_v55 = vsel %vm2044_vm6, %v3142_v53, %v5901_v4  ;;  %v3175_v56 = vsel %vm2044_vm6, %v3143_v22, %v5902_v25 }
 0x281   : > { %v5912_v0 = vunpack.i.h.bf16 %v5910_v63  ;;  %v5911_v5 = vunpack.i.l.bf16 %v5910_v63 }
 0x282   : > { %6124 = vrot.lane.b32.xlu0 %v6123_v51, %s6512_s29  ;;  %s5126_s29 = sshll.u32 %s8085_s27, 4 }
 0x283   : > { %v3301_v23 = vsel %vm3190_vm7, %v3269_v6, %v5911_v5  ;;  %v3302_v24 = vsel %vm3190_vm7, %v3270_v13, %v5912_v0  ;;  %v3207_v5 = vsel %vm3190_vm7, %v3174_v55, %v5921_v29  ;;  %v3208_v6 = vsel %vm3190_vm7, %v3175_v56, %v5922_v50  ;;  %v2215_v55 = vld [vmem:[#allocation3 + $0xf1] sm:$0xff]  ;;  %v2216_v56 = vld [vmem:[#allocation3 + $0xf9] sm:$0xff]  ;;  %s8051_s19 = scalar_lea.vmem %s8071_s7, %s5126_s29 }
 0x284   : > { %v3341_v27 = vpack.c.bf16 %v3302_v24, %v3301_v23  ;;  %v5915_v19 = vpop.permute.xlu0 %5914  ;;  %v5930_v38 = vpop.permute.xlu1 %5929  ;;  %v3343_v24 = vpack.c.bf16 %v3208_v6, %v3207_v5 }
 0x285   : > { %v5917_v44 = vunpack.i.h.bf16 %v5915_v19  ;;  %v5916_v47 = vunpack.i.l.bf16 %v5915_v19  ;;  %v5926_v19 = vunpack.i.l.bf16 %v5925_v33  ;;  %v5932_v42 = vunpack.i.h.bf16 %v5930_v38 }
 0x286   : > { %6129 = vrot.lane.b32.xlu0 %v6128_v58, %s6514_s30  ;;  %3654 = vmatprep.mubr.bf16.mxu1 %v3341_v27  ;;  %v5931_v43 = vunpack.i.l.bf16 %v5930_v38 }
 0x287   : > { %3655 = vmatmul.mubr.bf16.gmra.mrb[28].mxu1 %v3340_v39  ;;  %v3240_v63 = vsel %vm347_vm3, %v2214_v60, %v5917_v44  ;;  %v3239_v51 = vsel %vm347_vm3, %v2213_v61, %v5916_v47  ;;  %v5927_v39 = vunpack.i.h.bf16 %v5925_v33  ;;  %v2087_v44 = vld [vmem:[#allocation3 + $0xd8] sm:$0xff]  ;;  %v2088_v47 = vld [vmem:[#allocation3 + $0xe0] sm:$0xff] }
 0x28c   : > { %v5935_v41 = vpop.permute.xlu0 %5934  ;;  %v5950_v20 = vpop.permute.xlu1 %5949 }
 0x28d   : > { %v5937_v37 = vunpack.i.h.bf16 %v5935_v41  ;;  %v5936_v54 = vunpack.i.l.bf16 %v5935_v41  ;;  %v5952_v45 = vunpack.i.h.bf16 %v5950_v20  ;;  %v5951_v40 = vunpack.i.l.bf16 %v5950_v20 }
 0x28f   : > { %v3271_v46 = vsel %vm2044_vm6, %v3239_v51, %v5936_v54  ;;  %v3272_v0 = vsel %vm2044_vm6, %v3240_v63, %v5937_v37  ;;  %v3145_v37 = vsel %vm347_vm3, %v2088_v47, %v5927_v39  ;;  %v3144_v54 = vsel %vm347_vm3, %v2087_v44, %v5926_v19 }
 0x290   : > { %v5940_v62 = vpop.permute.xlu0 %5939  ;;  %v5955_v27 = vpop.permute.xlu1 %5954  ;;  %v3176_v53 = vsel %vm2044_vm6, %v3144_v54, %v5931_v43  ;;  %v3177_v33 = vsel %vm2044_vm6, %v3145_v37, %v5932_v42 }
 0x291   : > { %v5942_v58 = vunpack.i.h.bf16 %v5940_v62  ;;  %v5941_v2 = vunpack.i.l.bf16 %v5940_v62 }
 0x293   : > { %v3303_v13 = vsel %vm3190_vm7, %v3271_v46, %v5941_v2  ;;  %v3304_v14 = vsel %vm3190_vm7, %v3272_v0, %v5942_v58  ;;  %v3209_v2 = vsel %vm3190_vm7, %v3176_v53, %v5951_v40  ;;  %v3210_v46 = vsel %vm3190_vm7, %v3177_v33, %v5952_v45  ;;  %v2217_v53 = vld [vmem:[#allocation3 + $0x109] sm:$0xff] }
 0x294   : > { %v3344_v23 = vpack.c.bf16 %v3304_v14, %v3303_v13  ;;  %v5945_v26 = vpop.permute.xlu0 %5944  ;;  %v5960_v22 = vpop.permute.xlu1 %5959  ;;  %v3346_v14 = vpack.c.bf16 %v3210_v46, %v3209_v2 }
 0x295   : > { %v5947_v4 = vunpack.i.h.bf16 %v5945_v26  ;;  %v5946_v41 = vunpack.i.l.bf16 %v5945_v26  ;;  %v5956_v26 = vunpack.i.l.bf16 %v5955_v27  ;;  %v5962_v39 = vunpack.i.h.bf16 %v5960_v22 }
 0x296   : > { %3662 = vmatprep.mubr.bf16.mxu1 %v3344_v23  ;;  %v5961_v19 = vunpack.i.l.bf16 %v5960_v22  ;;  %v2218_v22 = vld [vmem:[#allocation3 + $0x111] sm:$0xff] }
 0x297   : > { %3663 = vmatmul.mubr.bf16.gmra.mrb[32].mxu1 %v3343_v24  ;;  %v3242_v61 = vsel %vm347_vm3, %v2216_v56, %v5947_v4  ;;  %v3241_v60 = vsel %vm347_vm3, %v2215_v55, %v5946_v41  ;;  %v5957_v24 = vunpack.i.h.bf16 %v5955_v27  ;;  %v2089_v4 = vld [vmem:[#allocation3 + $0xf0] sm:$0xff]  ;;  %v2090_v41 = vld [vmem:[#allocation3 + $0xf8] sm:$0xff] }
 0x29c   : > { %v5965_v25 = vpop.permute.xlu0 %5964  ;;  %v5980_v0 = vpop.permute.xlu1 %5979 }
 0x29d   : > { %v5967_v50 = vunpack.i.h.bf16 %v5965_v25  ;;  %v5966_v29 = vunpack.i.l.bf16 %v5965_v25  ;;  %v5982_v44 = vunpack.i.h.bf16 %v5980_v0  ;;  %v5981_v47 = vunpack.i.l.bf16 %v5980_v0 }
 0x29f   : > { %v3273_v51 = vsel %vm2044_vm6, %v3241_v60, %v5966_v29  ;;  %v3274_v58 = vsel %vm2044_vm6, %v3242_v61, %v5967_v50  ;;  %v3147_v50 = vsel %vm347_vm3, %v2090_v41, %v5957_v24  ;;  %v3146_v29 = vsel %vm347_vm3, %v2089_v4, %v5956_v26 }
 0x2a0   : > { %v5970_v38 = vpop.permute.xlu0 %5969  ;;  %v5985_v23 = vpop.permute.xlu1 %5984  ;;  %v3178_v54 = vsel %vm2044_vm6, %v3146_v29, %v5961_v19  ;;  %v3179_v27 = vsel %vm2044_vm6, %v3147_v50, %v5962_v39 }
 0x2a1   : > { %v5972_v62 = vunpack.i.h.bf16 %v5970_v38  ;;  %v5971_v63 = vunpack.i.l.bf16 %v5970_v38 }
 0x2a3   : > { %v3305_v5 = vsel %vm3190_vm7, %v3273_v51, %v5971_v63  ;;  %v3306_v6 = vsel %vm3190_vm7, %v3274_v58, %v5972_v62  ;;  %v3211_v63 = vsel %vm3190_vm7, %v3178_v54, %v5981_v47  ;;  %v3212_v51 = vsel %vm3190_vm7, %v3179_v27, %v5982_v44 }
 0x2a4   : > { %v3347_v13 = vpack.c.bf16 %v3306_v6, %v3305_v5  ;;  %v5975_v20 = vpop.permute.xlu0 %5974  ;;  %v5990_v37 = vpop.permute.xlu1 %5989  ;;  %v3349_v5 = vpack.c.bf16 %v3212_v51, %v3211_v63 }
 0x2a5   : > { %v5977_v43 = vunpack.i.h.bf16 %v5975_v20  ;;  %v5976_v25 = vunpack.i.l.bf16 %v5975_v20  ;;  %v5986_v20 = vunpack.i.l.bf16 %v5985_v23  ;;  %v5992_v24 = vunpack.i.h.bf16 %v5990_v37 }
 0x2a6   : > { %3670 = vmatprep.mubr.bf16.mxu1 %v3347_v13  ;;  %v5991_v26 = vunpack.i.l.bf16 %v5990_v37  ;;  %v6339_v37 = vld [vmem:[#allocation3 + $0x129] sm:$0xff] }
 0x2a7   : > { %3671 = vmatmul.mubr.bf16.gmra.mrb[36].mxu1 %v3346_v14  ;;  %v3244_v55 = vsel %vm347_vm3, %v2218_v22, %v5977_v43  ;;  %v3243_v56 = vsel %vm347_vm3, %v2217_v53, %v5976_v25  ;;  %v5987_v14 = vunpack.i.h.bf16 %v5985_v23  ;;  %v2091_v43 = vld [vmem:[#allocation3 + $0x108] sm:$0xff]  ;;  %v2092_v25 = vld [vmem:[#allocation3 + $0x110] sm:$0xff] }
 0x2a8   : > { %v6340_v53 = vld [vmem:[#allocation3 + $0x121] sm:$0xff] }
 0x2ac   : > { %v5995_v42 = vpop.permute.xlu0 %5994  ;;  %v6010_v58 = vpop.permute.xlu1 %6009 }
 0x2ad   : > { %v5997_v45 = vunpack.i.h.bf16 %v5995_v42  ;;  %v5996_v40 = vunpack.i.l.bf16 %v5995_v42  ;;  %v6012_v4 = vunpack.i.h.bf16 %v6010_v58  ;;  %v6011_v41 = vunpack.i.l.bf16 %v6010_v58 }
 0x2af   : > { %v3275_v60 = vsel %vm2044_vm6, %v3243_v56, %v5996_v40  ;;  %v3276_v62 = vsel %vm2044_vm6, %v3244_v55, %v5997_v45  ;;  %v3149_v45 = vsel %vm347_vm3, %v2092_v25, %v5987_v14  ;;  %v3148_v40 = vsel %vm347_vm3, %v2091_v43, %v5986_v20 }
 0x2b0   : > { %v6000_v33 = vpop.permute.xlu0 %5999  ;;  %v6015_v13 = vpop.permute.xlu1 %6014  ;;  %v3180_v29 = vsel %vm2044_vm6, %v3148_v40, %v5991_v26  ;;  %v3181_v23 = vsel %vm2044_vm6, %v3149_v45, %v5992_v24 }
 0x2b1   : > { %v6002_v38 = vunpack.i.h.bf16 %v6000_v33  ;;  %v6001_v61 = vunpack.i.l.bf16 %v6000_v33 }
 0x2b3   : > { %v3307_v2 = vsel %vm3190_vm7, %v3275_v60, %v6001_v61  ;;  %v3308_v46 = vsel %vm3190_vm7, %v3276_v62, %v6002_v38  ;;  %v3213_v61 = vsel %vm3190_vm7, %v3180_v29, %v6011_v41  ;;  %v3214_v60 = vsel %vm3190_vm7, %v3181_v23, %v6012_v4  ;;  %v6341_v4 = vld [vmem:[#allocation3 + $0x128] sm:$0xff] }
 0x2b4   : > { %v3350_v0 = vpack.c.bf16 %v3308_v46, %v3307_v2  ;;  %v6005_v6 = vpop.permute.xlu0 %6004  ;;  %v6020_v50 = vpop.permute.xlu1 %6019  ;;  %v3352_v2 = vpack.c.bf16 %v3214_v60, %v3213_v61 }
 0x2b5   : > { %v6007_v19 = vunpack.i.h.bf16 %v6005_v6  ;;  %v6006_v42 = vunpack.i.l.bf16 %v6005_v6  ;;  %v6016_v6 = vunpack.i.l.bf16 %v6015_v13  ;;  %v6022_v14 = vunpack.i.h.bf16 %v6020_v50 }
 0x2b6   : > { %3678 = vmatprep.mubr.bf16.mxu1 %v3350_v0  ;;  %v6021_v20 = vunpack.i.l.bf16 %v6020_v50 }
 0x2b7   : > { %3679 = vmatmul.mubr.bf16.gmra.mrb[40].mxu1 %v3349_v5  ;;  %v3246_v27 = vsel %vm347_vm3, %v6339_v37, %v6007_v19  ;;  %v3245_v22 = vsel %vm347_vm3, %v6340_v53, %v6006_v42  ;;  %v6017_v5 = vunpack.i.h.bf16 %v6015_v13 }
 0x2b9   : > { %v3151_v41 = vsel %vm347_vm3, %v6341_v4, %v6017_v5 }
 0x2ba   : > { %v3183_v13 = vsel %vm2044_vm6, %v3151_v41, %v6022_v14 }
 0x2bc   : > { %v6025_v39 = vpop.permute.xlu0 %6024  ;;  %v6040_v62 = vpop.permute.xlu1 %6039 }
 0x2bd   : > { %v6027_v44 = vunpack.i.h.bf16 %v6025_v39  ;;  %v6026_v47 = vunpack.i.l.bf16 %v6025_v39  ;;  %v6042_v19 = vunpack.i.h.bf16 %v6040_v62  ;;  %v6041_v42 = vunpack.i.l.bf16 %v6040_v62 }
 0x2bf   : > { %v3277_v56 = vsel %vm2044_vm6, %v3245_v22, %v6026_v47  ;;  %v3278_v38 = vsel %vm2044_vm6, %v3246_v27, %v6027_v44  ;;  %v6342_v44 = vld [vmem:[#allocation3 + $0x120] sm:$0xff] }
 0x2c0   : > { %v6030_v54 = vpop.permute.xlu0 %6029  ;;  %v6045_v0 = vpop.permute.xlu1 %6044  ;;  %v3150_v47 = vsel %vm347_vm3, %v6342_v44, %v6016_v6 }
 0x2c1   : > { %v6032_v33 = vunpack.i.h.bf16 %v6030_v54  ;;  %v6031_v55 = vunpack.i.l.bf16 %v6030_v54  ;;  %v3182_v40 = vsel %vm2044_vm6, %v3150_v47, %v6021_v20  ;;  %v6047_v62 = vunpack.i.h.bf16 %v6045_v0 }
 0x2c2   : > { %v3215_v22 = vsel %vm3190_vm7, %v3182_v40, %v6041_v42 }
 0x2c3   : > { %v3309_v63 = vsel %vm3190_vm7, %v3277_v56, %v6031_v55  ;;  %v3310_v51 = vsel %vm3190_vm7, %v3278_v38, %v6032_v33  ;;  %v3216_v33 = vsel %vm3190_vm7, %v3183_v13, %v6042_v19 }
 0x2c4   : > { %v3353_v58 = vpack.c.bf16 %v3310_v51, %v3309_v63  ;;  %v6035_v46 = vpop.permute.xlu0 %6034  ;;  %v6050_v45 = vpop.permute.xlu1 %6049  ;;  %v6046_v63 = vunpack.i.l.bf16 %v6045_v0 }
 0x2c5   : > { %v6037_v26 = vunpack.i.h.bf16 %v6035_v46  ;;  %v6036_v39 = vunpack.i.l.bf16 %v6035_v46  ;;  %v6052_v51 = vunpack.i.h.bf16 %v6050_v45 }
 0x2c6   : > { %3686 = vmatprep.mubr.bf16.mxu1 %v3353_v58  ;;  %v6051_v58 = vunpack.i.l.bf16 %v6050_v45 }
 0x2c7   : > { %3687 = vmatmul.mubr.bf16.gmra.mrb[44].mxu1 %v3352_v2  ;;  %v3248_v50 = vsel %vm347_vm3, %v7380_v49, %v6037_v26  ;;  %v3247_v23 = vsel %vm347_vm3, %v7378_v48, %v6036_v39  ;;  %v3355_v49 = vpack.c.bf16 %v3216_v33, %v3215_v22  ;;  %v3153_v26 = vsel %vm347_vm3, %v7365_v36, %v6047_v62 }
 0x2c8   : > { %v3152_v39 = vsel %vm347_vm3, %v7363_v35, %v6046_v63  ;;  %v3185_v42 = vsel %vm2044_vm6, %v3153_v26, %v6052_v51 }
 0x2c9   : > { %v3184_v19 = vsel %vm2044_vm6, %v3152_v39, %v6051_v58 }
 0x2cc   : > { %v6055_v24 = vpop.permute.xlu0 %6054  ;;  %v6070_v55 = vpop.permute.xlu1 %6069 }
 0x2cd   : > { %v6057_v43 = vunpack.i.h.bf16 %v6055_v24  ;;  %v6056_v25 = vunpack.i.l.bf16 %v6055_v24  ;;  %v6072_v6 = vunpack.i.h.bf16 %v6070_v55  ;;  %v6071_v14 = vunpack.i.l.bf16 %v6070_v55 }
 0x2cf   : > { %v3279_v27 = vsel %vm2044_vm6, %v3247_v23, %v6056_v25  ;;  %v3280_v53 = vsel %vm2044_vm6, %v3248_v50, %v6057_v43  ;;  %v3217_v35 = vsel %vm3190_vm7, %v3184_v19, %v6071_v14  ;;  %v3218_v45 = vsel %vm3190_vm7, %v3185_v42, %v6072_v6 }
 0x2d0   : > { %v6060_v29 = vpop.permute.xlu0 %6059  ;;  %v6075_v48 = vpop.permute.xlu1 %6074 }
 0x2d1   : > { %v6062_v54 = vunpack.i.h.bf16 %v6060_v29  ;;  %v6061_v37 = vunpack.i.l.bf16 %v6060_v29 }
 0x2d3   : > { %v3311_v56 = vsel %vm3190_vm7, %v3279_v27, %v6061_v37  ;;  %v3312_v38 = vsel %vm3190_vm7, %v3280_v53, %v6062_v54  ;;  %v6077_v27 = vunpack.i.h.bf16 %v6075_v48  ;;  %v6076_v53 = vunpack.i.l.bf16 %v6075_v48 }
 0x2d4   : > { %v3356_v61 = vpack.c.bf16 %v3312_v38, %v3311_v56  ;;  %v6065_v60 = vpop.permute.xlu0 %6064  ;;  %v6080_v0 = vpop.permute.xlu1 %6079 }
 0x2d5   : > { %v6067_v46 = vunpack.i.h.bf16 %v6065_v60  ;;  %v6066_v5 = vunpack.i.l.bf16 %v6065_v60  ;;  %v6082_v55 = vunpack.i.h.bf16 %v6080_v0  ;;  %v6081_v56 = vunpack.i.l.bf16 %v6080_v0 }
 0x2d6   : > { %3694 = vmatprep.mubr.bf16.mxu1 %v3356_v61  ;;  %v3155_v58 = vsel %vm347_vm3, %v7422_v59, %v6077_v27 }
 0x2d7   : > { %3695 = vmatmul.mubr.bf16.gmra.mrb[48].mxu1 %v3355_v49  ;;  %v3250_v25 = vsel %vm347_vm3, %v7437_v9, %v6067_v46  ;;  %v3249_v4 = vsel %vm347_vm3, %v7435_v7, %v6066_v5  ;;  %v3358_v9 = vpack.c.bf16 %v3218_v45, %v3217_v35  ;;  %v3187_v6 = vsel %vm2044_vm6, %v3155_v58, %v6082_v55 }
 0x2dc   : > { %v6085_v2 = vpop.permute.xlu0 %6084  ;;  %v6100_v29 = vpop.permute.xlu1 %6099 }
 0x2dd   : > { %v6087_v20 = vunpack.i.h.bf16 %v6085_v2  ;;  %v6086_v24 = vunpack.i.l.bf16 %v6085_v2  ;;  %v6102_v61 = vunpack.i.h.bf16 %v6100_v29  ;;  %v6101_v49 = vunpack.i.l.bf16 %v6100_v29 }
 0x2de   : > { %v3154_v2 = vsel %vm347_vm3, %v7420_v57, %v6076_v53 }
 0x2df   : > { %v3281_v47 = vsel %vm2044_vm6, %v3249_v4, %v6086_v24  ;;  %v3282_v36 = vsel %vm2044_vm6, %v3250_v25, %v6087_v20  ;;  %v3186_v5 = vsel %vm2044_vm6, %v3154_v2, %v6081_v56  ;;  %v3220_v26 = vsel %vm3190_vm7, %v3187_v6, %v6102_v61 }
 0x2e0   : > { %v6090_v43 = vpop.permute.xlu0 %6089  ;;  %v6105_v54 = vpop.permute.xlu1 %6104  ;;  %v3219_v24 = vsel %vm3190_vm7, %v3186_v5, %v6101_v49 }
 0x2e1   : > { %v6092_v41 = vunpack.i.h.bf16 %v6090_v43  ;;  %v6091_v44 = vunpack.i.l.bf16 %v6090_v43  ;;  %v3361_v35 = vpack.c.bf16 %v3220_v26, %v3219_v24  ;;  %v2330_v24 = vld [vmem:[#allocation3 + $0x62] sm:$0xff]  ;;  %v2331_v26 = vld [vmem:[#allocation3 + $0x6a] sm:$0xff] }
 0x2e3   : > { %v3313_v40 = vsel %vm3190_vm7, %v3281_v47, %v6091_v44  ;;  %v3314_v13 = vsel %vm3190_vm7, %v3282_v36, %v6092_v41  ;;  %v6107_v41 = vunpack.i.h.bf16 %v6105_v54  ;;  %v6106_v44 = vunpack.i.l.bf16 %v6105_v54 }
 0x2e4   : > { %v3359_v50 = vpack.c.bf16 %v3314_v13, %v3313_v40  ;;  %v6095_v7 = vpop.permute.xlu0 %6094  ;;  %v6110_v14 = vpop.permute.xlu1 %6109 }
 0x2e5   : > { %v6097_v63 = vunpack.i.h.bf16 %v6095_v7  ;;  %v6096_v51 = vunpack.i.l.bf16 %v6095_v7  ;;  %v6111_v45 = vunpack.i.l.bf16 %v6110_v14  ;;  %v5672_v7 = vunpack.i.h.bf16 %v7161_v52 }
 0x2e6   : > { %3702 = vmatprep.mubr.bf16.mxu1 %v3359_v50  ;;  %v3157_v54 = vsel %vm347_vm3, %v7477_v18, %v6107_v41 }
 0x2e7   : > { %3703 = vmatmul.mubr.bf16.gmra.mrb[52].mxu1 %v3358_v9  ;;  %v5208_v23 = vpop.f32.mrb[0].mxu1  ;;  %v3252_v39 = vsel %vm347_vm3, %v7486_v12, %v6097_v63  ;;  %v3251_v59 = vsel %vm347_vm3, %v7484_v11, %v6096_v51  ;;  %v6112_v12 = vunpack.i.h.bf16 %v6110_v14  ;;  %v2327_v63 = vld [vmem:[#allocation3 + $0x3a] sm:$0xff]  ;;  %v2328_v14 = vld [vmem:[#allocation3 + $0x4a] sm:$0xff] }
 0x2e8   : > { %v5209_v37 = vpop.f32.mrb[1].mxu1 }
 0x2e9   : > { %v7636_v22 = vadd.f32 %v5209_v37, %v5208_v23  ;;  %v5211_v33 = vpop.f32.mrb[2].mxu1  ;;  %v5671_v23 = vunpack.i.l.bf16 %v7161_v52  ;;  %v3156_v37 = vsel %vm347_vm3, %v7475_v17, %v6106_v44 }
 0x2ea   : > { %v5212_v38 = vpop.f32.mrb[3].mxu1  ;;  %v3188_v53 = vsel %vm2044_vm6, %v3156_v37, %v6111_v45  ;;  %v2337_v45 = vld [vmem:[#allocation3 + $0xb2] sm:$0xff]  ;;  %v2343_v37 = vld [vmem:[#allocation3 + $0xfa] sm:$0xff] }
 0x2eb   : > { %v7638_v60 = vadd.f32 %v5212_v38, %v5211_v33  ;;  %v3189_v33 = vsel %vm2044_vm6, %v3157_v54, %v6112_v12  ;;  %v2336_v12 = vld [vmem:[#allocation3 + $0xaa] sm:$0xff]  ;;  %v2342_v54 = vld [vmem:[#allocation3 + $0xf2] sm:$0xff] }
 0x2ec   : > { %v6115_v62 = vpop.permute.xlu0 %6114  ;;  %v6135_v43 = vpop.permute.xlu1 %6134 }
 0x2ed   : > { %v6117_v48 = vunpack.i.h.bf16 %v6115_v62  ;;  %v6116_v46 = vunpack.i.l.bf16 %v6115_v62  ;;  %v6137_v13 = vunpack.i.h.bf16 %v6135_v43  ;;  %v6136_v29 = vunpack.i.l.bf16 %v6135_v43  ;;  %v2326_v62 = vld [vmem:[#allocation3 + $0x32] sm:$0xff] }
 0x2ee   : > { %v3321_v6 = vpack.c.bf16 %v2327_v63, %v2326_v62  ;;  %v2334_v43 = vld [vmem:[#allocation3 + $0x92] sm:$0xff]  ;;  %v2348_v62 = vld [vmem:[#allocation3 + $0x13a] sm:$0xff]  ;;  %v2349_v63 = vld [vmem:[#allocation3 + $0x142] sm:$0xff] }
 0x2ef   : > { %v3283_v42 = vsel %vm2044_vm6, %v3251_v59, %v6116_v46  ;;  %v3284_v0 = vsel %vm2044_vm6, %v3252_v39, %v6117_v48  ;;  %v3221_v52 = vsel %vm3190_vm7, %v3188_v53, %v6136_v29  ;;  %v3222_v61 = vsel %vm3190_vm7, %v3189_v33, %v6137_v13 }
 0x2f0   : > { %v6120_v20 = vpop.permute.xlu0 %6119  ;;  %v3364_v46 = vpack.c.bf16 %v3222_v61, %v3221_v52  ;;  %v3327_v59 = vpack.c.bf16 %v2331_v26, %v2330_v24  ;;  %v3336_v13 = vpack.c.bf16 %v2337_v45, %v2336_v12  ;;  %v2346_v52 = vld [vmem:[#allocation3 + $0x122] sm:$0xff]  ;;  %v2347_v61 = vld [vmem:[#allocation3 + $0x12a] sm:$0xff] }
 0x2f1   : > { %v6122_v19 = vunpack.i.h.bf16 %v6120_v20  ;;  %v6121_v57 = vunpack.i.l.bf16 %v6120_v20  ;;  %v2329_v20 = vld [vmem:[#allocation3 + $0x52] sm:$0xff]  ;;  %v2357_v24 = vld [vmem:[#allocation3 + $0x1a2] sm:$0xff] }
 0x2f2   : > { %v3324_v39 = vpack.c.bf16 %v2329_v20, %v2328_v14  ;;  %v2356_v20 = vld [vmem:[#allocation3 + $0x19a] sm:$0xff] }
 0x2f3   : > { %v3315_v25 = vsel %vm3190_vm7, %v3283_v42, %v6121_v57  ;;  %v3316_v4 = vsel %vm3190_vm7, %v3284_v0, %v6122_v19  ;;  %v2332_v57 = vld [vmem:[#allocation3 + $0x7a] sm:$0xff]  ;;  %v2333_v42 = vld [vmem:[#allocation3 + $0x82] sm:$0xff] }
 0x2f4   : > { %v6125_v47 = vpop.permute.xlu0 %6124  ;;  %v3362_v36 = vpack.c.bf16 %v3316_v4, %v3315_v25  ;;  %v2335_v25 = vld [vmem:[#allocation3 + $0x9a] sm:$0xff] }
 0x2f5   : > { %v6127_v40 = vunpack.i.h.bf16 %v6125_v47  ;;  %v6126_v11 = vunpack.i.l.bf16 %v6125_v47  ;;  %v3330_v47 = vpack.c.bf16 %v2333_v42, %v2332_v57 }
 0x2f6   : > { %3710 = vmatprep.mubr.bf16.mxu1 %v3362_v36 }
 0x2f7   : > { %v3254_v50 = vsel %vm347_vm3, %v7527_v31, %v6127_v40  ;;  %v3253_v9 = vsel %vm347_vm3, %v7525_v30, %v6126_v11  ;;  %3711 = vmatmul.mubr.bf16.gmra.mrb[56].mxu1 %v3361_v35  ;;  %v3333_v35 = vpack.c.bf16 %v2335_v25, %v2334_v43  ;;  %v2338_v40 = vld [vmem:[#allocation3 + $0xc2] sm:$0xff]  ;;  %v2339_v11 = vld [vmem:[#allocation3 + $0xca] sm:$0xff] }
 0x2f8   : > { %v6130_v27 = vpop.permute.xlu0 %6129  ;;  %v3285_v30 = vsel %vm2044_vm6, %v3253_v9, %v5671_v23  ;;  %v3286_v38 = vsel %vm2044_vm6, %v3254_v50, %v5672_v7  ;;  %v3339_v29 = vpack.c.bf16 %v2339_v11, %v2338_v40  ;;  %v2340_v9 = vld [vmem:[#allocation3 + $0xda] sm:$0xff]  ;;  %v2341_v7 = vld [vmem:[#allocation3 + $0xe2] sm:$0xff] }
 0x2f9   : > { %v6132_v31 = vunpack.i.h.bf16 %v6130_v27  ;;  %v6131_v55 = vunpack.i.l.bf16 %v6130_v27 }
 0x2fa   : > { %v5214_v56 = vpop.f32.mrb[4].mxu1 }
 0x2fb   : > { %v5215_v18 = vpop.f32.mrb[5].mxu1  ;;  %v3317_v49 = vsel %vm3190_vm7, %v3285_v30, %v6131_v55  ;;  %v3318_v17 = vsel %vm3190_vm7, %v3286_v38, %v6132_v31  ;;  %v3342_v31 = vpack.c.bf16 %v2341_v7, %v2340_v9  ;;  %v2344_v30 = vld [vmem:[#allocation3 + $0x10a] sm:$0xff]  ;;  %v2345_v38 = vld [vmem:[#allocation3 + $0x112] sm:$0xff] }
 0x2fc   : > { %v7674_v51 = vadd.f32 %v5215_v18, %v5214_v56  ;;  %v5217_v58 = vpop.f32.mrb[6].mxu1  ;;  %v3365_v2 = vpack.c.bf16 %v3318_v17, %v3317_v49  ;;  %v3345_v56 = vpack.c.bf16 %v2343_v37, %v2342_v54  ;;  %v3348_v18 = vpack.c.bf16 %v2345_v38, %v2344_v30  ;;  %v6304_v38 = vld [vmem:[#allocation12 + $0x118] sm:$0xff]  }
 0x2fd   : > { %v5218_v48 = vpop.f32.mrb[7].mxu1  ;;  %v3351_v49 = vpack.c.bf16 %v2347_v61, %v2346_v52 }
 0x2fe   : > { %v7676_v5 = vadd.f32 %v5218_v48, %v5217_v58  ;;  %3718 = vmatprep.mubr.bf16.mxu1 %v3365_v2 }
 0x2ff   : > { %3719 = vmatmul.mubr.bf16.gmra.mrb[60].mxu1 %v3364_v46 }
 0x300   : > { %5544 = vmatprep.mubr.msk.bf16.mxu1 %vm347_vm3, %v3321_v6  ;;  %v3354_v6 = vpack.c.bf16 %v2349_v63, %v2348_v62 }
 0x307   : > { %5545 = vmatmul.mubr.msk.bf16.vlgmr.msra.gmra.mrb[64].mxu1 %vm347_vm3, %v3324_v39 }
 0x308   : > { %5548 = vmatprep.mubr.msk.bf16.mxu1 %vm347_vm3, %v3327_v59  ;;  %v3366_v59 = vpack.c.bf16 %v2357_v24, %v2356_v20 }
 0x30a   : > { %v5220_v19 = vpop.f32.mrb[8].mxu1 }
 0x30b   : > { %v5221_v0 = vpop.f32.mrb[9].mxu1 }
 0x30c   : > { %v7681_v4 = vadd.f32 %v5221_v0, %v5220_v19  ;;  %v5223_v41 = vpop.f32.mrb[10].mxu1 }
 0x30d   : > { %v5224_v44 = vpop.f32.mrb[11].mxu1 }
 0x30e   : > { %v7683_v36 = vadd.f32 %v5224_v44, %v5223_v41 }
 0x30f   : > { %5549 = vmatmul.mubr.msk.bf16.gmra.mrb[68].mxu1 %vm347_vm3, %v3330_v47 }
 0x310   : > { %5552 = vmatprep.mubr.msk.bf16.mxu1 %vm347_vm3, %v3333_v35 }
 0x317   : > { %5553 = vmatmul.mubr.msk.bf16.gmra.mrb[72].mxu1 %vm347_vm3, %v3336_v13 }
 0x318   : > { %5556 = vmatprep.mubr.msk.bf16.mxu1 %vm347_vm3, %v3339_v29 }
 0x31a   : > { %v5226_v50 = vpop.f32.mrb[12].mxu1 }
 0x31b   : > { %v5227_v23 = vpop.f32.mrb[13].mxu1 }
 0x31c   : > { %v7689_v27 = vadd.f32 %v5227_v23, %v5226_v50  ;;  %v5229_v53 = vpop.f32.mrb[14].mxu1 }
 0x31d   : > { %v5230_v33 = vpop.f32.mrb[15].mxu1 }
 0x31e   : > { %v7691_v55 = vadd.f32 %v5230_v33, %v5229_v53 }
 0x31f   : > { %5557 = vmatmul.mubr.msk.bf16.gmra.mrb[76].mxu1 %vm347_vm3, %v3342_v31 }
 0x320   : > { %5560 = vmatprep.mubr.msk.bf16.mxu1 %vm347_vm3, %v3345_v56  ;;  %v6302_v56 = vld [vmem:[#allocation12 + $0x108] sm:$0xff]  }
 0x327   : > { %5561 = vmatmul.mubr.msk.bf16.gmra.mrb[80].mxu1 %vm347_vm3, %v3348_v18 }
 0x328   : > { %5564 = vmatprep.mubr.msk.bf16.mxu1 %vm347_vm3, %v3351_v49 }
 0x32a   : > { %v5232_v17 = vpop.f32.mrb[16].mxu1 }
 0x32b   : > { %v5233_v58 = vpop.f32.mrb[17].mxu1 }
 0x32c   : > { %v7697_v2 = vadd.f32 %v5233_v58, %v5232_v17  ;;  %v5235_v48 = vpop.f32.mrb[18].mxu1 }
 0x32d   : > { %v5236_v46 = vpop.f32.mrb[19].mxu1 }
 0x32e   : > { %v7699_v14 = vadd.f32 %v5236_v46, %v5235_v48 }
 0x32f   : > { %5565 = vmatmul.mubr.msk.bf16.gmra.mrb[84].mxu1 %vm347_vm3, %v3354_v6 }
 0x330   : > { %5568 = vmatprep.mubr.msk.bf16.mxu1 %vm347_vm3, %v3357_v10  ;;  %v6301_v10 = vld [vmem:[#allocation12 + $0x100] sm:$0xff]  }
 0x331   : > { %5576 = vmatprep.subr.bf16.mxu0 %v6301_v10 }
 0x332   : > { %5577 = vmatpush3.bf16.msra.mxu0 %v6301_v10  ;;  %v6305_v10 = vld [vmem:[#allocation12 + $0x40] sm:$0xff]  }
 0x333   : > { %5578 = vmatprep.subr.bf16.mxu0 %v6302_v56  ;;  %5322 = vmatprep.subr.bf16.mxu1 %v6305_v10 }
 0x336   : > { %5579 = vmatpush3.bf16.msra.mxu0 %v6302_v56 }
 0x337   : > { %5569 = vmatmul.mubr.msk.bf16.gmra.mrb[88].mxu1 %vm347_vm3, %v3360_v15  ;;  %5580 = vmatprep.subr.bf16.mxu0 %v6303_v34 }
 0x338   : > { %5572 = vmatprep.mubr.msk.bf16.mxu1 %vm347_vm3, %v3363_v32 }
 0x33a   : > { %v5238_v26 = vpop.f32.mrb[20].mxu1  ;;  %5581 = vmatpush3.bf16.msra.mxu0 %v6303_v34  ;;  %v7793_v34 = vld [vmem:[#allocation11] ss:$0 sm:$0xff] }
 0x33b   : > { %v5239_v39 = vpop.f32.mrb[21].mxu1  ;;  %5582 = vmatprep.subr.bf16.mxu0 %v6304_v38 }
 0x33c   : > { %v7714_v19 = vadd.f32 %v5239_v39, %v5238_v26  ;;  %v5241_v8 = vpop.f32.mrb[22].mxu1 }
 0x33d   : > { %v5242_v1 = vpop.f32.mrb[23].mxu1 }
 0x33e   : > { %v7716_v57 = vadd.f32 %v5242_v1, %v5241_v8  ;;  %5583 = vmatpush3.bf16.msra.mxu0 %v6304_v38  ;;  %v3609_v38 = vadd.f32 %v7674_v51, %v7793_v34 }
 0x33f   : > { %5573 = vmatmul.mubr.msk.bf16.gmra.mrb[92].mxu1 %vm347_vm3, %v3366_v59 }
 0x34a   : > { %v5244_v16 = vpop.f32.mrb[24].mxu1 }
 0x34b   : > { %v5245_v21 = vpop.f32.mrb[25].mxu1 }
 0x34c   : > { %v7719_v15 = vadd.f32 %v5245_v21, %v5244_v16  ;;  %v5247_v3 = vpop.f32.mrb[26].mxu1  ;;  %v6306_v16 = vld [vmem:[#allocation12] sm:$0xff]   ;;  %v6307_v21 = vld [vmem:[#allocation12 + $0x48] sm:$0xff]  }
 0x34d   : > { %v5248_v28 = vpop.f32.mrb[27].mxu1  ;;  %5323 = vmatpush3.bf16.msra.mxu1 %v6306_v16 }
 0x34e   : > { %v7721_v32 = vadd.f32 %v5248_v28, %v5247_v3  ;;  %v6308_v3 = vld [vmem:[#allocation12 + $0x8] sm:$0xff]   ;;  %5324 = vmatprep.subr.bf16.mxu1 %v6307_v21  ;;  %v6309_v28 = vld [vmem:[#allocation12 + $0x50] sm:$0xff]  }
 0x351   : > { %5325 = vmatpush3.bf16.msra.mxu1 %v6308_v3 }
 0x352   : > { %5326 = vmatprep.subr.bf16.mxu1 %v6309_v28  ;;  %v3617_v28 = vadd.f32 %v7681_v4, %v7793_v34 }
 0x35a   : > { %v5250_v42 = vpop.f32.mrb[28].mxu1 }
 0x35b   : > { %v5251_v0 = vpop.f32.mrb[29].mxu1 }
 0x35c   : > { %v7723_v43 = vadd.f32 %v5251_v0, %v5250_v42  ;;  %v5253_v25 = vpop.f32.mrb[30].mxu1  ;;  %v6310_v42 = vld [vmem:[#allocation12 + $0x10] sm:$0xff]   ;;  %v6311_v0 = vld [vmem:[#allocation12 + $0x58] sm:$0xff]  }
 0x35d   : > { %v5254_v41 = vpop.f32.mrb[31].mxu1  ;;  %5327 = vmatpush3.bf16.msra.mxu1 %v6310_v42 }
 0x35e   : > { %v7725_v44 = vadd.f32 %v5254_v41, %v5253_v25  ;;  %5328 = vmatprep.subr.bf16.mxu1 %v6311_v0  ;;  %v3628_v0 = vadd.f32 %v7691_v55, %v7793_v34 }
 0x36a   : > { %v5256_v47 = vpop.f32.mrb[32].mxu1 }
 0x36b   : > { %v5257_v35 = vpop.f32.mrb[33].mxu1 }
 0x36c   : > { %v7727_v12 = vadd.f32 %v5257_v35, %v5256_v47  ;;  %v5259_v45 = vpop.f32.mrb[34].mxu1  ;;  %v6312_v47 = vld [vmem:[#allocation12 + $0x18] sm:$0xff]  }
 0x36d   : > { %v5260_v40 = vpop.f32.mrb[35].mxu1  ;;  %5329 = vmatpush3.bf16.msra.mxu1 %v6312_v47  ;;  %v3620_v47 = vadd.f32 %v7683_v36, %v7793_v34 }
 0x36e   : > { %v7729_v11 = vadd.f32 %v5260_v40, %v5259_v45  ;;  %v6313_v40 = vld [vmem:[#allocation12 + $0x60] sm:$0xff]  }
 0x36f   : > { %5330 = vmatprep.subr.bf16.mxu1 %v6313_v40 }
 0x37a   : > { %v5262_v13 = vpop.f32.mrb[36].mxu1 }
 0x37b   : > { %v5263_v29 = vpop.f32.mrb[37].mxu1 }
 0x37c   : > { %v7765_v50 = vadd.f32 %v5263_v29, %v5262_v13  ;;  %v5265_v9 = vpop.f32.mrb[38].mxu1 }
 0x37d   : > { %v5266_v7 = vpop.f32.mrb[39].mxu1 }
 0x37e   : > { %v7767_v23 = vadd.f32 %v5266_v7, %v5265_v9  ;;  %v6314_v9 = vld [vmem:[#allocation12 + $0x20] sm:$0xff]  }
 0x37f   : > { %5331 = vmatpush3.bf16.msra.mxu1 %v6314_v9 }
 0x38a   : > { %v5268_v54 = vpop.f32.mrb[40].mxu1 }
 0x38b   : > { %v5269_v37 = vpop.f32.mrb[41].mxu1 }
 0x38c   : > { %v7769_v53 = vadd.f32 %v5269_v37, %v5268_v54  ;;  %v5271_v33 = vpop.f32.mrb[42].mxu1 }
 0x38d   : > { %v5272_v31 = vpop.f32.mrb[43].mxu1 }
 0x38e   : > { %v7771_v30 = vadd.f32 %v5272_v31, %v5271_v33 }
 0x39a   : > { %v5274_v52 = vpop.f32.mrb[44].mxu1 }
 0x39b   : > { %v5275_v61 = vpop.f32.mrb[45].mxu1 }
 0x39c   : > { %v7773_v18 = vadd.f32 %v5275_v61, %v5274_v52  ;;  %v5277_v49 = vpop.f32.mrb[46].mxu1  ;;  %v3601_v61 = vadd.f32 %v7636_v22, %v7793_v34  ;;  %v3625_v22 = vadd.f32 %v7689_v27, %v7793_v34 }
 0x39d   : > { %v5278_v17 = vpop.f32.mrb[47].mxu1 }
 0x39e   : > { %v7775_v62 = vadd.f32 %v5278_v17, %v5277_v49 }
 0x3aa   : > { %v5280_v63 = vpop.f32.mrb[48].mxu1 }
 0x3ab   : > { %v5281_v58 = vpop.f32.mrb[49].mxu1 }
 0x3ac   : > { %v7777_v48 = vadd.f32 %v5281_v58, %v5280_v63  ;;  %v5283_v46 = vpop.f32.mrb[50].mxu1  ;;  %v3612_v63 = vadd.f32 %v7676_v5, %v7793_v34 }
 0x3ad   : > { %v5284_v6 = vpop.f32.mrb[51].mxu1 }
 0x3ae   : > { %v7779_v20 = vadd.f32 %v5284_v6, %v5283_v46  ;;  %v3604_v6 = vadd.f32 %v7638_v60, %v7793_v34 }
 0x3ba   : > { %v5286_v24 = vpop.f32.mrb[52].mxu1 }
 0x3bb   : > { %v5287_v26 = vpop.f32.mrb[53].mxu1 }
 0x3bc   : > { %v7781_v39 = vadd.f32 %v5287_v26, %v5286_v24  ;;  %v5289_v59 = vpop.f32.mrb[54].mxu1 }
 0x3bd   : > { %v5290_v8 = vpop.f32.mrb[55].mxu1 }
 0x3be   : > { %v7783_v1 = vadd.f32 %v5290_v8, %v5289_v59 }
 0x3ca   : > { %v5292_v25 = vpop.f32.mrb[56].mxu1 }
 0x3cb   : > { %v5293_v41 = vpop.f32.mrb[57].mxu1 }
 0x3cc   : > { %v7785_v35 = vadd.f32 %v5293_v41, %v5292_v25  ;;  %v5295_v45 = vpop.f32.mrb[58].mxu1 }
 0x3cd   : > { %v5296_v13 = vpop.f32.mrb[59].mxu1 }
 0x3ce   : > { %v7787_v29 = vadd.f32 %v5296_v13, %v5295_v45 }
 0x3d2   : > { %v5298_v7 = vpop.f32.mrb[60].mxu1 }
 0x3d3   : > { %v5299_v54 = vpop.f32.mrb[61].mxu1 }
 0x3d4   : > { %v7789_v37 = vadd.f32 %v5299_v54, %v5298_v7  ;;  %v5301_v33 = vpop.f32.mrb[62].mxu1 }
 0x3d5   : > { %v5302_v31 = vpop.f32.mrb[63].mxu1 }
 0x3d6   : > { %v7791_v56 = vadd.f32 %v5302_v31, %v5301_v33  ;;  %v3641_v33 = vadd.f32 %v7714_v19, %v7793_v34  ;;  %v3636_v19 = vadd.f32 %v7699_v14, %v7793_v34 }
 0x3da   : > { %v5546_v52 = vpop.f32.mrb[64].mxu1 }
 0x3db   : > { %v3770_v49 = vadd.f32 %v5546_v52, %v3609_v38  ;;  %v3761_v17 = vpop.f32.mrb[65].mxu1  ;;  %v3633_v38 = vadd.f32 %v7697_v2, %v7793_v34 }
 0x3dc   : > { %v3762_v58 = vadd.f32 %v3761_v17, %v3601_v61  ;;  %v5547_v46 = vpop.f32.mrb[66].mxu1  ;;  %v3644_v17 = vadd.f32 %v7716_v57, %v7793_v34 }
 0x3dd   : > { %v3890_v24 = vmax.f32 %v3770_v49, 0.0  ;;  %v3773_v26 = vadd.f32 %v5547_v46, %v3612_v63  ;;  %v3764_v59 = vpop.f32.mrb[67].mxu1 }
 0x3de   : > { %v3888_v8 = vmax.f32 %v3762_v58, 0.0  ;;  %v3765_v10 = vadd.f32 %v3764_v59, %v3604_v6 }
 0x3df   : > { %v3891_v51 = vmax.f32 %v3773_v26, 0.0 }
 0x3e0   : > { %v3920_v16 = vmax.f32 %v3888_v8, %v3890_v24  ;;  %v3889_v21 = vmax.f32 %v3765_v10, 0.0  ;;  %v6315_v8 = vld [vmem:[#allocation12 + $0x68] sm:$0xff]  }
 0x3e1   : > { %v6316_v10 = vld [vmem:[#allocation12 + $0x28] sm:$0xff]   ;;  %5332 = vmatprep.subr.bf16.mxu1 %v6315_v8 }
 0x3e2   : > { %3936 = vst.msk [vmem:[#allocation4] sm:$0xff] %vm2044_vm6, %v3920_v16  ;;  %v3921_v3 = vmax.f32 %v3889_v21, %v3891_v51  ;;  %v5550_v5 = vpop.f32.mrb[68].mxu1  ;;  %v6317_v51 = vld [vmem:[#allocation12 + $0x70] sm:$0xff]   ;;  %5333 = vmatpush3.bf16.msra.mxu1 %v6316_v10 }
 0x3e3   : > { %v3786_v42 = vadd.f32 %v5550_v5, %v3625_v22  ;;  %v3777_v60 = vpop.f32.mrb[69].mxu1  ;;  %v3657_v22 = vadd.f32 %v7723_v43, %v7793_v34  ;;  %5334 = vmatprep.subr.bf16.mxu1 %v6317_v51 }
 0x3e4   : > { %3937 = vst.msk [vmem:[#allocation4 + $0x8] sm:$0xff] %vm2044_vm6, %v3921_v3  ;;  %v3778_v25 = vadd.f32 %v3777_v60, %v3617_v28  ;;  %v5551_v41 = vpop.f32.mrb[70].mxu1  ;;  %v6318_v3 = vld [vmem:[#allocation12 + $0x30] sm:$0xff]   ;;  %v3649_v28 = vadd.f32 %v7719_v15, %v7793_v34 }
 0x3e5   : > { %v3894_v27 = vmax.f32 %v3786_v42, 0.0  ;;  %v3789_v45 = vadd.f32 %v5551_v41, %v3628_v0  ;;  %v3780_v40 = vpop.f32.mrb[71].mxu1  ;;  %v4007_v42 = vld [vmem:[#allocation5 + $0x1] sm:$0xff] }
 0x3e6   : > { %v3892_v13 = vmax.f32 %v3778_v25, 0.0  ;;  %v3781_v9 = vadd.f32 %v3780_v40, %v3620_v47  ;;  %v3660_v47 = vadd.f32 %v7725_v44, %v7793_v34  ;;  %5335 = vmatpush3.bf16.msra.mxu1 %v6318_v3 }
 0x3e7   : > { %v3895_v7 = vmax.f32 %v3789_v45, 0.0 }
 0x3e8   : > { %v3922_v54 = vmax.f32 %v3892_v13, %v3894_v27  ;;  %v3893_v4 = vmax.f32 %v3781_v9, 0.0  ;;  %v6319_v27 = vld [vmem:[#allocation12 + $0x78] sm:$0xff]   ;;  %v3652_v13 = vadd.f32 %v7721_v32, %v7793_v34  ;;  %v3673_v32 = vadd.f32 %v7765_v50, %v7793_v34 }
 0x3e9   : > { %5336 = vmatprep.subr.bf16.mxu1 %v6319_v27 }
 0x3ea   : > { %3938 = vst.msk [vmem:[#allocation4 + $0x10] sm:$0xff] %vm2044_vm6, %v3922_v54  ;;  %v3923_v55 = vmax.f32 %v3893_v4, %v3895_v7  ;;  %v5554_v31 = vpop.f32.mrb[72].mxu1  ;;  %v6320_v4 = vld [vmem:[#allocation12 + $0x38] sm:$0xff]  }
 0x3eb   : > { %v3952_v52 = vld [vmem:[#allocation4] ss:$2 sm:$0xff]  ;;  %v3968_v36 = vld [vmem:[#allocation4 + $0x1] ss:$2 sm:$0xff]  ;;  %v3802_v61 = vadd.f32 %v5554_v31, %v3641_v33  ;;  %v3793_v49 = vpop.f32.mrb[73].mxu1  ;;  %5337 = vmatpush3.bf16.msra.mxu1 %v6320_v4 }
 0x3ec   : > { %v3983_v63 = vmax.f32 %v3952_v52, %v3968_v36  ;;  %3939 = vst.msk [vmem:[#allocation4 + $0x18] sm:$0xff] %vm2044_vm6, %v3923_v55  ;;  %v3794_v58 = vadd.f32 %v3793_v49, %v3633_v38  ;;  %v5555_v46 = vpop.f32.mrb[74].mxu1  ;;  %v3665_v49 = vadd.f32 %v7727_v12, %v7793_v34 }
 0x3ed   : > { %v3898_v6 = vmax.f32 %v3802_v61, 0.0  ;;  %v3805_v24 = vadd.f32 %v5555_v46, %v3644_v17  ;;  %v3796_v26 = vpop.f32.mrb[75].mxu1 }
 0x3ee   : > { %3991 = vst.msk [vmem:[#allocation5 + $0x11] sm:$0xff] %vm2044_vm6, %v3983_v63  ;;  %v3896_v2 = vmax.f32 %v3794_v58, 0.0  ;;  %v3797_v59 = vadd.f32 %v3796_v26, %v3636_v19  ;;  %v3676_v19 = vadd.f32 %v7767_v23, %v7793_v34  ;;  %v3668_v26 = vadd.f32 %v7729_v11, %v7793_v34 }
 0x3ef   : > { %v3899_v16 = vmax.f32 %v3805_v24, 0.0  ;;  %v3689_v11 = vadd.f32 %v7773_v18, %v7793_v34  ;;  %v3684_v18 = vadd.f32 %v7771_v30, %v7793_v34 }
 0x3f0   : > { %v3924_v57 = vmax.f32 %v3896_v2, %v3898_v6  ;;  %v3897_v21 = vmax.f32 %v3797_v59, 0.0 }
 0x3f2   : > { %3940 = vst.msk [vmem:[#allocation4 + $0x20] sm:$0xff] %vm2044_vm6, %v3924_v57  ;;  %v3925_v14 = vmax.f32 %v3897_v21, %v3899_v16  ;;  %v5558_v5 = vpop.f32.mrb[76].mxu1 }
 0x3f3   : > { %v3954_v60 = vld [vmem:[#allocation4 + $0x10] ss:$2 sm:$0xff]  ;;  %v3970_v0 = vld [vmem:[#allocation4 + $0x11] ss:$2 sm:$0xff]  ;;  %v3818_v25 = vadd.f32 %v5558_v5, %v3657_v22  ;;  %v3809_v41 = vpop.f32.mrb[77].mxu1  ;;  %v3681_v5 = vadd.f32 %v7769_v53, %v7793_v34 }
 0x3f4   : > { %v3984_v43 = vmax.f32 %v3954_v60, %v3970_v0  ;;  %3941 = vst.msk [vmem:[#allocation4 + $0x28] sm:$0xff] %vm2044_vm6, %v3925_v14  ;;  %v3810_v45 = vadd.f32 %v3809_v41, %v3649_v28  ;;  %v5559_v40 = vpop.f32.mrb[78].mxu1 }
 0x3f5   : > { %v3902_v9 = vmax.f32 %v3818_v25, 0.0  ;;  %v3821_v15 = vadd.f32 %v5559_v40, %v3660_v47  ;;  %v3812_v7 = vpop.f32.mrb[79].mxu1  ;;  %v7834_v54 = vld [vmem:[#allocation5 + $0x11] sm:$0xff]  ;;  %v3692_v25 = vadd.f32 %v7775_v62, %v7793_v34 }
 0x3f6   : > { %3992 = vst.msk [vmem:[#allocation5 + $0x21] sm:$0xff] %vm2044_vm6, %v3984_v43  ;;  %v3900_v33 = vmax.f32 %v3810_v45, 0.0  ;;  %v3813_v44 = vadd.f32 %v3812_v7, %v3652_v13  ;;  %v6143_v55 = vpack.i.bf16 %v7834_v54, %v4007_v42  ;;  %v7849_v10 = vld [vmem:[#allocation5 + $0x10] sm:$0xff] }
 0x3f7   : > { %v3903_v31 = vmax.f32 %v3821_v15, 0.0 }
 0x3f8   : > { %v3926_v38 = vmax.f32 %v3900_v33, %v3902_v9  ;;  %v3901_v52 = vmax.f32 %v3813_v44, 0.0  ;;  %6144 = vrot.lane.b32.xlu1 %v6143_v55, %s6513_s10 }
 0x3fa   : > { %3942 = vst.msk [vmem:[#allocation4 + $0x30] sm:$0xff] %vm2044_vm6, %v3926_v38  ;;  %v3927_v36 = vmax.f32 %v3901_v52, %v3903_v31  ;;  %v5562_v61 = vpop.f32.mrb[80].mxu1  ;;  %v3705_v31 = vadd.f32 %v7781_v39, %v7793_v34 }
 0x3fb   : > { %v3956_v17 = vld [vmem:[#allocation4 + $0x20] ss:$2 sm:$0xff]  ;;  %v3972_v63 = vld [vmem:[#allocation4 + $0x21] ss:$2 sm:$0xff]  ;;  %v3834_v58 = vadd.f32 %v5562_v61, %v3673_v32  ;;  %v3825_v46 = vpop.f32.mrb[81].mxu1  ;;  %v3697_v32 = vadd.f32 %v7777_v48, %v7793_v34 }
 0x3fc   : > { %v3985_v6 = vmax.f32 %v3956_v17, %v3972_v63  ;;  %3943 = vst.msk [vmem:[#allocation4 + $0x38] sm:$0xff] %vm2044_vm6, %v3927_v36  ;;  %v3826_v24 = vadd.f32 %v3825_v46, %v3665_v49  ;;  %v5563_v50 = vpop.f32.mrb[82].mxu1  ;;  %v3708_v63 = vadd.f32 %v7783_v1, %v7793_v34 }
 0x3fd   : > { %v3906_v2 = vmax.f32 %v3834_v58, 0.0  ;;  %v3837_v59 = vadd.f32 %v5563_v50, %v3676_v19  ;;  %v3828_v8 = vpop.f32.mrb[83].mxu1  ;;  %v7851_v12 = vld [vmem:[#allocation5 + $0x20] sm:$0xff]  ;;  %v6321_v58 = vld [vmem:[#allocation12 + $0xc0] sm:$0xff]  }
 0x3fe   : > { %3993 = vst.msk [vmem:[#allocation5 + $0x31] sm:$0xff] %vm2044_vm6, %v3985_v6  ;;  %v3904_v51 = vmax.f32 %v3826_v24, 0.0  ;;  %v3829_v16 = vadd.f32 %v3828_v8, %v3668_v26  ;;  %v6138_v23 = vpack.i.bf16 %v7851_v12, %v7849_v10  ;;  %v7867_v43 = vld [vmem:[#allocation5 + $0x22] sm:$0xff]  ;;  %v3700_v6 = vadd.f32 %v7779_v20, %v7793_v34  ;;  %5362 = vmatprep.subr.bf16.mxu1 %v6321_v58 }
 0x3ff   : > { %v3907_v57 = vmax.f32 %v3837_v59, 0.0  ;;  %v7871_v9 = vld [vmem:[#allocation5 + $0x21] sm:$0xff]  ;;  %v3721_v20 = vadd.f32 %v7789_v37, %v7793_v34  ;;  %v3716_v37 = vadd.f32 %v7787_v29, %v7793_v34 }
 0x400   : > { %v3928_v21 = vmax.f32 %v3904_v51, %v3906_v2  ;;  %v3905_v22 = vmax.f32 %v3829_v16, 0.0  ;;  %6139 = vrot.lane.b32.xlu0 %v6138_v23, %s6513_s10 }
 0x402   : > { %3944 = vst.msk [vmem:[#allocation4 + $0x40] sm:$0xff] %vm2044_vm6, %v3928_v21  ;;  %v3929_v3 = vmax.f32 %v3905_v22, %v3907_v57  ;;  %v5566_v14 = vpop.f32.mrb[84].mxu1  ;;  %v3713_v22 = vadd.f32 %v7785_v35, %v7793_v34 }
 0x403   : > { %v3958_v28 = vld [vmem:[#allocation4 + $0x30] ss:$2 sm:$0xff]  ;;  %v3974_v42 = vld [vmem:[#allocation4 + $0x31] ss:$2 sm:$0xff]  ;;  %v3850_v60 = vadd.f32 %v5566_v14, %v3689_v11  ;;  %v3841_v0 = vpop.f32.mrb[85].mxu1 }
 0x404   : > { %v3986_v41 = vmax.f32 %v3958_v28, %v3974_v42  ;;  %3945 = vst.msk [vmem:[#allocation4 + $0x48] sm:$0xff] %vm2044_vm6, %v3929_v3  ;;  %v3842_v47 = vadd.f32 %v3841_v0, %v3681_v5  ;;  %v5567_v27 = vpop.f32.mrb[86].mxu1  ;;  %v3724_v28 = vadd.f32 %v7791_v56, %v7793_v34 }
 0x405   : > { %v3910_v45 = vmax.f32 %v3850_v60, 0.0  ;;  %v3853_v40 = vadd.f32 %v5567_v27, %v3692_v25  ;;  %v3844_v53 = vpop.f32.mrb[87].mxu1  ;;  %v7869_v13 = vld [vmem:[#allocation5 + $0x32] sm:$0xff] }
 0x406   : > { %v7873_v15 = vld [vmem:[#allocation5 + $0x31] sm:$0xff]  ;;  %3994 = vst.msk [vmem:[#allocation5 + $0x41] sm:$0xff] %vm2044_vm6, %v3986_v41  ;;  %v3908_v62 = vmax.f32 %v3842_v47, 0.0  ;;  %v3845_v7 = vadd.f32 %v3844_v53, %v3684_v18  ;;  %v4236_v4 = vpack.c.bf16 %v7869_v13, %v7867_v43 }
 0x407   : > { %v7880_v30 = vpack.i.bf16 %v7873_v15, %v7871_v9  ;;  %v3911_v33 = vmax.f32 %v3853_v40, 0.0  ;;  %v7895_v48 = vld [vmem:[#allocation5 + $0x30] sm:$0xff] }
 0x408   : > { %v3930_v44 = vmax.f32 %v3908_v62, %v3910_v45  ;;  %v3909_v55 = vmax.f32 %v3845_v7, 0.0  ;;  %5584 = vmatprep.mubr.msk.bf16.mxu0 %vm2044_vm6, %v4236_v4 }
 0x409   : > { %6154 = vrot.lane.b32.xlu1 %v7880_v30, %s6513_s10 }
 0x40a   : > { %3946 = vst.msk [vmem:[#allocation4 + $0x50] sm:$0xff] %vm2044_vm6, %v3930_v44  ;;  %v3931_v38 = vmax.f32 %v3909_v55, %v3911_v33  ;;  %v5570_v52 = vpop.f32.mrb[88].mxu1 }
 0x40b   : > { %v3960_v36 = vld [vmem:[#allocation4 + $0x40] ss:$2 sm:$0xff]  ;;  %v3976_v61 = vld [vmem:[#allocation4 + $0x41] ss:$2 sm:$0xff]  ;;  %v3866_v49 = vadd.f32 %v5570_v52, %v3705_v31  ;;  %v3857_v17 = vpop.f32.mrb[89].mxu1 }
 0x40c   : > { %v3987_v46 = vmax.f32 %v3960_v36, %v3976_v61  ;;  %3947 = vst.msk [vmem:[#allocation4 + $0x58] sm:$0xff] %vm2044_vm6, %v3931_v38  ;;  %v3858_v19 = vadd.f32 %v3857_v17, %v3697_v32  ;;  %v5571_v39 = vpop.f32.mrb[90].mxu1 }
 0x40d   : > { %v3914_v24 = vmax.f32 %v3866_v49, 0.0  ;;  %v3869_v50 = vadd.f32 %v5571_v39, %v3708_v63  ;;  %v3860_v26 = vpop.f32.mrb[91].mxu1  ;;  %v7897_v2 = vld [vmem:[#allocation5 + $0x40] sm:$0xff]  ;;  %v4039_v39 = vld [vmem:[#allocation5 + $0x12] sm:$0xff] }
 0x40e   : > { %3995 = vst.msk [vmem:[#allocation5 + $0x51] sm:$0xff] %vm2044_vm6, %v3987_v46  ;;  %v3912_v1 = vmax.f32 %v3858_v19, 0.0  ;;  %v3861_v59 = vadd.f32 %v3860_v26, %v3700_v6  ;;  %v6148_v8 = vpack.i.bf16 %v7897_v2, %v7895_v48  ;;  %v7913_v25 = vld [vmem:[#allocation5 + $0x42] sm:$0xff]  ;;  %v6183_v6 = vpack.i.bf16 %v7867_v43, %v4039_v39 }
 0x40f   : > { %v3915_v51 = vmax.f32 %v3869_v50, 0.0  ;;  %v7917_v18 = vld [vmem:[#allocation5 + $0x41] sm:$0xff] }
 0x410   : > { %v3932_v16 = vmax.f32 %v3912_v1, %v3914_v24  ;;  %v3913_v23 = vmax.f32 %v3861_v59, 0.0  ;;  %6149 = vrot.lane.b32.xlu0 %v6148_v8, %s6513_s10  ;;  %v4071_v24 = vld [vmem:[#allocation5 + $0x92] sm:$0xff] }
 0x412   : > { %3948 = vst.msk [vmem:[#allocation4 + $0x60] sm:$0xff] %vm2044_vm6, %v3932_v16  ;;  %v3933_v57 = vmax.f32 %v3913_v23, %v3915_v51  ;;  %v5574_v21 = vpop.f32.mrb[92].mxu1  ;;  %v6193_v51 = vpack.i.bf16 %v7913_v25, %v7869_v13 }
 0x413   : > { %v3962_v11 = vld [vmem:[#allocation4 + $0x50] ss:$2 sm:$0xff]  ;;  %v3978_v3 = vld [vmem:[#allocation4 + $0x51] ss:$2 sm:$0xff]  ;;  %v3882_v14 = vadd.f32 %v5574_v21, %v3721_v20  ;;  %v3873_v5 = vpop.f32.mrb[93].mxu1 }
 0x414   : > { %v3988_v42 = vmax.f32 %v3962_v11, %v3978_v3  ;;  %3949 = vst.msk [vmem:[#allocation4 + $0x68] sm:$0xff] %vm2044_vm6, %v3933_v57  ;;  %v3874_v60 = vadd.f32 %v3873_v5, %v3713_v22  ;;  %v5575_v0 = vpop.f32.mrb[94].mxu1  ;;  %v4063_v57 = vld [vmem:[#allocation5 + $0x91] sm:$0xff]  ;;  %v3999_v3 = vld [vmem:[#allocation5] sm:$0xff] }
 0x415   : > { %v3918_v41 = vmax.f32 %v3882_v14, 0.0  ;;  %v3885_v47 = vadd.f32 %v5575_v0, %v3724_v28  ;;  %v3876_v35 = vpop.f32.mrb[95].mxu1  ;;  %v7915_v27 = vld [vmem:[#allocation5 + $0x52] sm:$0xff]  ;;  %v4015_v5 = vld [vmem:[#allocation5 + $0x2] sm:$0xff] }
 0x416   : > { %v7919_v45 = vld [vmem:[#allocation5 + $0x51] sm:$0xff]  ;;  %3996 = vst.msk [vmem:[#allocation5 + $0x61] sm:$0xff] %vm2044_vm6, %v3988_v42  ;;  %v3916_v56 = vmax.f32 %v3874_v60, 0.0  ;;  %v3877_v40 = vadd.f32 %v3876_v35, %v3716_v37  ;;  %v4241_v53 = vpack.c.bf16 %v7915_v27, %v7913_v25 }
 0x417   : > { %v6163_v29 = vpack.i.bf16 %v7919_v45, %v7917_v18  ;;  %v3919_v34 = vmax.f32 %v3885_v47, 0.0  ;;  %v7930_v31 = vld [vmem:[#allocation5 + $0x50] sm:$0xff] }
 0x418   : > { %v3934_v62 = vmax.f32 %v3916_v56, %v3918_v41  ;;  %v3917_v7 = vmax.f32 %v3877_v40, 0.0  ;;  %5585 = vmatmul.mubr.msk.bf16.vlgmr.msra.gmra.mrb[128].mxu0 %vm2044_vm6, %v4241_v53  ;;  %v6322_v35 = vld [vmem:[#allocation12 + $0x80] sm:$0xff]   ;;  %v6323_v40 = vld [vmem:[#allocation12 + $0xc8] sm:$0xff]  }
 0x419   : > { %6164 = vrot.lane.b32.xlu1 %v6163_v29, %s6513_s10  ;;  %v6324_v53 = vld [vmem:[#allocation12 + $0x88] sm:$0xff]  }
 0x41a   : > { %3950 = vst.msk [vmem:[#allocation4 + $0x70] sm:$0xff] %vm2044_vm6, %v3934_v62  ;;  %v3935_v4 = vmax.f32 %v3917_v7, %v3919_v34  ;;  %v6326_v62 = vld [vmem:[#allocation12 + $0x90] sm:$0xff]   ;;  %v6327_v7 = vld [vmem:[#allocation12 + $0xd8] sm:$0xff]  }
 0x41b   : > { %v3964_v33 = vld [vmem:[#allocation4 + $0x60] ss:$2 sm:$0xff]  ;;  %v3980_v44 = vld [vmem:[#allocation4 + $0x61] ss:$2 sm:$0xff] }
 0x41c   : > { %v3989_v55 = vmax.f32 %v3964_v33, %v3980_v44  ;;  %3951 = vst.msk [vmem:[#allocation4 + $0x78] sm:$0xff] %vm2044_vm6, %v3935_v4  ;;  %v6328_v44 = vld [vmem:[#allocation12 + $0x98] sm:$0xff]  }
 0x41d   : > { %v7932_v38 = vld [vmem:[#allocation5 + $0x60] sm:$0xff] }
 0x41e   : > { %3997 = vst.msk [vmem:[#allocation5 + $0x71] sm:$0xff] %vm2044_vm6, %v3989_v55  ;;  %v6158_v52 = vpack.i.bf16 %v7932_v38, %v7930_v31  ;;  %v7938_v49 = vld [vmem:[#allocation5 + $0x62] sm:$0xff] }
 0x41f   : > { %v7942_v63 = vld [vmem:[#allocation5 + $0x61] sm:$0xff]  ;;  %v6203_v16 = vpack.i.bf16 %v7938_v49, %v7915_v27 }
 0x420   : > { %6159 = vrot.lane.b32.xlu0 %v6158_v52, %s6513_s10 }
 0x423   : > { %v3966_v32 = vld [vmem:[#allocation4 + $0x70] ss:$2 sm:$0xff]  ;;  %v3982_v36 = vld [vmem:[#allocation4 + $0x71] ss:$2 sm:$0xff] }
 0x424   : > { %v3990_v61 = vmax.f32 %v3966_v32, %v3982_v36  ;;  %v6329_v32 = vld [vmem:[#allocation12 + $0xe0] sm:$0xff]  }
 0x425   : > { %v7940_v17 = vld [vmem:[#allocation5 + $0x72] sm:$0xff] }
 0x426   : > { %v7944_v58 = vld [vmem:[#allocation5 + $0x71] sm:$0xff]  ;;  %3998 = vst.msk [vmem:[#allocation5 + $0x81] sm:$0xff] %vm2044_vm6, %v3990_v61  ;;  %v4246_v46 = vpack.c.bf16 %v7940_v17, %v7938_v49 }
 0x427   : > { %v6173_v19 = vpack.i.bf16 %v7944_v58, %v7942_v63  ;;  %v7955_v26 = vld [vmem:[#allocation5 + $0x70] sm:$0xff] }
 0x428   : > { %5588 = vmatprep.mubr.msk.bf16.mxu0 %vm2044_vm6, %v4246_v46 }
 0x429   : > { %6174 = vrot.lane.b32.xlu1 %v6173_v19, %s6513_s10 }
 0x42d   : > { %6184 = vrot.lane.b32.xlu1 %v6183_v6, %s6513_s10  ;;  %v4070_v50 = vld [vmem:[#allocation5 + $0x82] sm:$0xff]  ;;  %v6330_v6 = vld [vmem:[#allocation12 + $0xa0] sm:$0xff]  }
 0x42e   : > { %v7957_v1 = vld [vmem:[#allocation5 + $0x80] sm:$0xff]  ;;  %v4251_v59 = vpack.c.bf16 %v4071_v24, %v4070_v50  ;;  %v6213_v23 = vpack.i.bf16 %v4070_v50, %v7940_v17  ;;  %v6331_v50 = vld [vmem:[#allocation12 + $0xe8] sm:$0xff]  }
 0x42f   : > { %v6168_v8 = vpack.i.bf16 %v7957_v1, %v7955_v26  ;;  %v7974_v20 = vld [vmem:[#allocation5 + $0x81] sm:$0xff] }
 0x430   : > { %5589 = vmatmul.mubr.msk.bf16.gmra.mrb[132].mxu0 %vm2044_vm6, %v4251_v59  ;;  %v6208_v21 = vpack.i.bf16 %v4063_v57, %v7974_v20  ;;  %v6332_v59 = vld [vmem:[#allocation12 + $0xa8] sm:$0xff]  }
 0x431   : > { %6169 = vrot.lane.b32.xlu0 %v6168_v8, %s6513_s10  ;;  %6194 = vrot.lane.b32.xlu1 %v6193_v51, %s6513_s10  ;;  %v6333_v8 = vld [vmem:[#allocation12 + $0xf0] sm:$0xff]  }
 0x435   : > { %6179 = vrot.lane.b32.xlu0 %v7880_v30, %s6513_s10  ;;  %6204 = vrot.lane.b32.xlu1 %v6203_v16, %s6513_s10  ;;  %v6334_v16 = vld [vmem:[#allocation12 + $0xb0] sm:$0xff]  }
 0x439   : > { %6189 = vrot.lane.b32.xlu0 %v6163_v29, %s6513_s10  ;;  %6214 = vrot.lane.b32.xlu1 %v6213_v23, %s6513_s10  ;;  %v6325_v29 = vld [vmem:[#allocation12 + $0xd0] sm:$0xff]  }
 0x43d   : > { %6199 = vrot.lane.b32.xlu0 %v6173_v19, %s6513_s10 }
 0x441   : > { %6209 = vrot.lane.b32.xlu0 %v6208_v21, %s6513_s10  ;;  %v6336_v21 = vld [vmem:[#allocation12 + $0xb8] sm:$0xff]  }
 0x46a   : > { %v6145_v22 = vpop.permute.xlu1 %6144 }
 0x46b   : > { %v6147_v11 = vunpack.i.h.bf16 %v6145_v22  ;;  %v6146_v30 = vunpack.i.l.bf16 %v6145_v22 }
 0x46d   : > { %v4200_v60 = vsel %vm2044_vm6, %v3999_v3, %v6146_v30  ;;  %v4201_v0 = vsel %vm2044_vm6, %v7849_v10, %v6147_v11 }
 0x46e   : > { %v4232_v56 = vpack.c.bf16 %v4201_v0, %v4200_v60 }
 0x472   : > { %v6140_v14 = vpop.permute.xlu0 %6139 }
 0x473   : > { %v6142_v28 = vunpack.i.h.bf16 %v6140_v14  ;;  %v6141_v42 = vunpack.i.l.bf16 %v6140_v14 }
 0x475   : > { %v4208_v37 = vsel %vm2044_vm6, %v4015_v5, %v6141_v42  ;;  %v4209_v41 = vsel %vm2044_vm6, %v4039_v39, %v6142_v28 }
 0x476   : > { %v4233_v47 = vpack.c.bf16 %v4209_v41, %v4208_v37 }
 0x478   : > { %4591 = vmatprep.mubr.bf16.mxu1 %v4233_v47 }
 0x479   : > { %4592 = vmatmul.mubr.bf16.vlgmr.msra.gmra.mrb[96].mxu1 %v4232_v56 }
 0x47a   : > { %5363 = vmatpush3.bf16.msra.mxu1 %v6322_v35 }
 0x47b   : > { %5364 = vmatprep.subr.bf16.mxu1 %v6323_v40  ;;  %v6155_v34 = vpop.permute.xlu1 %6154 }
 0x47c   : > { %v6157_v10 = vunpack.i.h.bf16 %v6155_v34  ;;  %v6156_v4 = vunpack.i.l.bf16 %v6155_v34 }
 0x47e   : > { %5365 = vmatpush3.bf16.msra.mxu1 %v6324_v53  ;;  %v4202_v36 = vsel %vm2044_vm6, %v7851_v12, %v6156_v4  ;;  %v4203_v61 = vsel %vm2044_vm6, %v7895_v48, %v6157_v10 }
 0x47f   : > { %5366 = vmatprep.subr.bf16.mxu1 %v6325_v29  ;;  %v4237_v24 = vpack.c.bf16 %v4203_v61, %v4202_v36 }
 0x482   : > { %v6150_v33 = vpop.permute.xlu0 %6149  ;;  %5367 = vmatpush3.bf16.msra.mxu1 %v6326_v62 }
 0x483   : > { %v6152_v55 = vunpack.i.h.bf16 %v6150_v33  ;;  %v6151_v52 = vunpack.i.l.bf16 %v6150_v33  ;;  %5368 = vmatprep.subr.bf16.mxu1 %v6327_v7 }
 0x485   : > { %v4210_v46 = vsel %vm2044_vm6, %v7867_v43, %v6151_v52  ;;  %v4211_v19 = vsel %vm2044_vm6, %v7869_v13, %v6152_v55  ;;  %v6335_v43 = vld [vmem:[#allocation12 + $0xf8] sm:$0xff]  }
 0x486   : > { %v4238_v39 = vpack.c.bf16 %v4211_v19, %v4210_v46  ;;  %5369 = vmatpush3.bf16.msra.mxu1 %v6328_v44 }
 0x487   : > { %5370 = vmatprep.subr.bf16.mxu1 %v6329_v32 }
 0x488   : > { %4599 = vmatprep.mubr.bf16.mxu1 %v4238_v39 }
 0x489   : > { %4600 = vmatmul.mubr.bf16.gmra.mrb[100].mxu1 %v4237_v24 }
 0x48a   : > { %5371 = vmatpush3.bf16.msra.mxu1 %v6330_v6 }
 0x48b   : > { %5372 = vmatprep.subr.bf16.mxu1 %v6331_v50  ;;  %v6165_v51 = vpop.permute.xlu1 %6164 }
 0x48c   : > { %v6167_v23 = vunpack.i.h.bf16 %v6165_v51  ;;  %v6166_v57 = vunpack.i.l.bf16 %v6165_v51 }
 0x48e   : > { %5373 = vmatpush3.bf16.msra.mxu1 %v6332_v59  ;;  %v4204_v30 = vsel %vm2044_vm6, %v7897_v2, %v6166_v57  ;;  %v4205_v3 = vsel %vm2044_vm6, %v7930_v31, %v6167_v23 }
 0x48f   : > { %5374 = vmatprep.subr.bf16.mxu1 %v6333_v8  ;;  %v4242_v42 = vpack.c.bf16 %v4205_v3, %v4204_v30 }
 0x492   : > { %v6160_v13 = vpop.permute.xlu0 %6159  ;;  %5375 = vmatpush3.bf16.msra.mxu1 %v6334_v16 }
 0x493   : > { %v6162_v22 = vunpack.i.h.bf16 %v6160_v13  ;;  %v6161_v11 = vunpack.i.l.bf16 %v6160_v13  ;;  %5376 = vmatprep.subr.bf16.mxu1 %v6335_v43 }
 0x495   : > { %v4212_v14 = vsel %vm2044_vm6, %v7913_v25, %v6161_v11  ;;  %v4213_v5 = vsel %vm2044_vm6, %v7915_v27, %v6162_v22 }
 0x496   : > { %v4243_v28 = vpack.c.bf16 %v4213_v5, %v4212_v14  ;;  %5377 = vmatpush3.bf16.msra.mxu1 %v6336_v21 }
 0x498   : > { %4607 = vmatprep.mubr.bf16.mxu1 %v4243_v28 }
 0x499   : > { %4608 = vmatmul.mubr.bf16.gmra.mrb[104].mxu1 %v4242_v42 }
 0x49b   : > { %v6175_v60 = vpop.permute.xlu1 %6174 }
 0x49c   : > { %v6177_v0 = vunpack.i.h.bf16 %v6175_v60  ;;  %v6176_v37 = vunpack.i.l.bf16 %v6175_v60 }
 0x49e   : > { %v4206_v56 = vsel %vm2044_vm6, %v7932_v38, %v6176_v37  ;;  %v4207_v25 = vsel %vm2044_vm6, %v7955_v26, %v6177_v0 }
 0x49f   : > { %v6185_v40 = vpop.permute.xlu1 %6184  ;;  %v4247_v10 = vpack.c.bf16 %v4207_v25, %v4206_v56 }
 0x4a0   : > { %v6187_v4 = vunpack.i.h.bf16 %v6185_v40  ;;  %v6186_v33 = vunpack.i.l.bf16 %v6185_v40 }
 0x4a2   : > { %v4216_v61 = vsel %vm2044_vm6, %v7834_v54, %v6186_v33 }
 0x4a3   : > { %v6170_v41 = vpop.permute.xlu0 %6169  ;;  %v6195_v46 = vpop.permute.xlu1 %6194 }
 0x4a4   : > { %v6172_v47 = vunpack.i.h.bf16 %v6170_v41  ;;  %v6171_v35 = vunpack.i.l.bf16 %v6170_v41  ;;  %v6197_v6 = vunpack.i.h.bf16 %v6195_v46  ;;  %v6196_v24 = vunpack.i.l.bf16 %v6195_v46 }
 0x4a6   : > { %v4214_v27 = vsel %vm2044_vm6, %v7938_v49, %v6171_v35  ;;  %v4215_v53 = vsel %vm2044_vm6, %v7940_v17, %v6172_v47  ;;  %v4217_v17 = vsel %vm2044_vm6, %v7871_v9, %v6187_v4  ;;  %v4218_v54 = vsel %vm2044_vm6, %v7873_v15, %v6196_v24  ;;  %v4055_v15 = vld [vmem:[#allocation5 + $0x90] sm:$0xff] }
 0x4a7   : > { %v6180_v29 = vpop.permute.xlu0 %6179  ;;  %v4248_v34 = vpack.c.bf16 %v4215_v53, %v4214_v27  ;;  %v4219_v9 = vsel %vm2044_vm6, %v7917_v18, %v6197_v6  ;;  %v6205_v51 = vpop.permute.xlu1 %6204 }
 0x4a8   : > { %v6182_v62 = vunpack.i.h.bf16 %v6180_v29  ;;  %v6181_v7 = vunpack.i.l.bf16 %v6180_v29  ;;  %v4239_v43 = vpack.c.bf16 %v4219_v9, %v4218_v54  ;;  %v6207_v23 = vunpack.i.h.bf16 %v6205_v51 }
 0x4a9   : > { %4615 = vmatprep.mubr.bf16.mxu1 %v4248_v34  ;;  %v6206_v57 = vunpack.i.l.bf16 %v6205_v51 }
 0x4aa   : > { %4616 = vmatmul.mubr.bf16.gmra.mrb[108].mxu1 %v4247_v10  ;;  %v4224_v44 = vsel %vm2044_vm6, %v7851_v12, %v6181_v7  ;;  %v4225_v55 = vsel %vm2044_vm6, %v7895_v48, %v6182_v62  ;;  %v4234_v48 = vpack.c.bf16 %v4217_v17, %v4216_v61  ;;  %v4221_v11 = vsel %vm2044_vm6, %v7942_v63, %v6207_v23 }
 0x4ab   : > { %v6190_v52 = vpop.permute.xlu0 %6189  ;;  %v4235_v49 = vpack.c.bf16 %v4225_v55, %v4224_v44  ;;  %v4220_v18 = vsel %vm2044_vm6, %v7919_v45, %v6206_v57 }
 0x4ac   : > { %v6192_v32 = vunpack.i.h.bf16 %v6190_v52  ;;  %v6191_v36 = vunpack.i.l.bf16 %v6190_v52  ;;  %v4244_v3 = vpack.c.bf16 %v4221_v11, %v4220_v18 }
 0x4ad   : > { %4656 = vmatprep.mubr.bf16.mxu1 %v4235_v49 }
 0x4ae   : > { %v4226_v19 = vsel %vm2044_vm6, %v7897_v2, %v6191_v36  ;;  %v4227_v12 = vsel %vm2044_vm6, %v7930_v31, %v6192_v32 }
 0x4af   : > { %v6200_v39 = vpop.permute.xlu0 %6199  ;;  %v4240_v50 = vpack.c.bf16 %v4227_v12, %v4226_v19 }
 0x4b0   : > { %v6202_v59 = vunpack.i.h.bf16 %v6200_v39  ;;  %v6201_v8 = vunpack.i.l.bf16 %v6200_v39  ;;  %v5082_v39 = vld [vmem:[#allocation14] ss:$0 sm:$0xff] }
 0x4b2   : > { %4657 = vmatmul.mubr.bf16.vlgmr.msra.gmra.mrb[112].mxu1 %v4234_v48  ;;  %v4228_v2 = vsel %vm2044_vm6, %v7932_v38, %v6201_v8  ;;  %v4229_v31 = vsel %vm2044_vm6, %v7955_v26, %v6202_v59  ;;  %v6215_v38 = vpop.permute.xlu1 %6214 }
 0x4b3   : > { %4664 = vmatprep.mubr.bf16.mxu1 %v4240_v50  ;;  %v6210_v16 = vpop.permute.xlu0 %6209  ;;  %v4245_v13 = vpack.c.bf16 %v4229_v31, %v4228_v2  ;;  %v6217_v14 = vunpack.i.h.bf16 %v6215_v38  ;;  %v6216_v5 = vunpack.i.l.bf16 %v6215_v38 }
 0x4b4   : > { %v6212_v21 = vunpack.i.h.bf16 %v6210_v16  ;;  %v6211_v22 = vunpack.i.l.bf16 %v6210_v16 }
 0x4b5   : > { %v4222_v42 = vsel %vm2044_vm6, %v7944_v58, %v6216_v5  ;;  %v4223_v45 = vsel %vm2044_vm6, %v7974_v20, %v6217_v14 }
 0x4b6   : > { %v4230_v26 = vsel %vm2044_vm6, %v7957_v1, %v6211_v22  ;;  %v4231_v30 = vsel %vm2044_vm6, %v4055_v15, %v6212_v21  ;;  %v4249_v60 = vpack.c.bf16 %v4223_v45, %v4222_v42 }
 0x4b7   : > { %v4250_v28 = vpack.c.bf16 %v4231_v30, %v4230_v26 }
 0x4ba   : > { %4665 = vmatmul.mubr.bf16.gmra.mrb[116].mxu1 %v4239_v43 }
 0x4bb   : > { %4672 = vmatprep.mubr.bf16.mxu1 %v4245_v13 }
 0x4c2   : > { %4673 = vmatmul.mubr.bf16.gmra.mrb[120].mxu1 %v4244_v3 }
 0x4c3   : > { %4680 = vmatprep.mubr.bf16.mxu1 %v4250_v28 }
 0x4ca   : > { %4681 = vmatmul.mubr.bf16.gmra.mrb[124].mxu1 %v4249_v60 }
 0x4eb   : > { %v5586_v63 = vpop.f32.mrb[128].mxu0 }
 0x4ec   : > { %v4723_v0 = vpop.f32.mrb[129].mxu0 }
 0x4ed   : > { %v5587_v37 = vpop.f32.mrb[130].mxu0 }
 0x4ee   : > { %v4726_v1 = vpop.f32.mrb[131].mxu0 }
 0x503   : > { %v8039_v41 = vpop.f32.mrb[132].mxu0 }
 0x504   : > { %v8041_v47 = vpop.f32.mrb[133].mxu0 }
 0x505   : > { %v8043_v35 = vpop.f32.mrb[134].mxu0 }
 0x506   : > { %v8045_v56 = vpop.f32.mrb[135].mxu0 }
 0x54c   : > { %v5338_v25 = vpop.f32.mrb[96].mxu1 }
 0x54d   : > { %v5339_v40 = vpop.f32.mrb[97].mxu1 }
 0x54e   : > { %v5340_v58 = vadd.f32 %v5339_v40, %v5338_v25  ;;  %v5341_v27 = vpop.f32.mrb[98].mxu1 }
 0x54f   : > { %v5342_v53 = vpop.f32.mrb[99].mxu1 }
 0x550   : > { %v5343_v20 = vadd.f32 %v5342_v53, %v5341_v27  ;;  %v4594_v24 = vadd.f32 %v5340_v58, %v5082_v39 }
 0x552   : > { %v4597_v54 = vadd.f32 %v5343_v20, %v5082_v39 }
 0x55c   : > { %v5344_v29 = vpop.f32.mrb[100].mxu1 }
 0x55d   : > { %v5345_v34 = vpop.f32.mrb[101].mxu1 }
 0x55e   : > { %v5346_v62 = vadd.f32 %v5345_v34, %v5344_v29  ;;  %v5347_v7 = vpop.f32.mrb[102].mxu1 }
 0x55f   : > { %v5348_v10 = vpop.f32.mrb[103].mxu1 }
 0x560   : > { %v5349_v4 = vadd.f32 %v5348_v10, %v5347_v7  ;;  %v4602_v57 = vadd.f32 %v5346_v62, %v5082_v39 }
 0x562   : > { %v4605_v11 = vadd.f32 %v5349_v4, %v5082_v39 }
 0x56c   : > { %v5350_v33 = vpop.f32.mrb[104].mxu1 }
 0x56d   : > { %v5351_v44 = vpop.f32.mrb[105].mxu1 }
 0x56e   : > { %v5352_v55 = vadd.f32 %v5351_v44, %v5350_v33  ;;  %v5353_v52 = vpop.f32.mrb[106].mxu1 }
 0x56f   : > { %v5354_v49 = vpop.f32.mrb[107].mxu1 }
 0x570   : > { %v5355_v32 = vadd.f32 %v5354_v49, %v5353_v52  ;;  %v4610_v45 = vadd.f32 %v5352_v55, %v5082_v39 }
 0x572   : > { %v4613_v58 = vadd.f32 %v5355_v32, %v5082_v39 }
 0x57d   : > { %v5356_v36 = vpop.f32.mrb[108].mxu1 }
 0x57e   : > { %v5357_v17 = vpop.f32.mrb[109].mxu1 }
 0x57f   : > { %v5358_v61 = vadd.f32 %v5357_v17, %v5356_v36  ;;  %v5359_v46 = vpop.f32.mrb[110].mxu1 }
 0x580   : > { %v5360_v19 = vpop.f32.mrb[111].mxu1 }
 0x581   : > { %v5361_v12 = vadd.f32 %v5360_v19, %v5359_v46  ;;  %v4618_v33 = vadd.f32 %v5358_v61, %v5082_v39 }
 0x583   : > { %v4621_v36 = vadd.f32 %v5361_v12, %v5082_v39 }
 0x585   : > { %v5378_v48 = vpop.f32.mrb[112].mxu1 }
 0x586   : > { %v5379_v6 = vpop.f32.mrb[113].mxu1 }
 0x587   : > { %v5380_v50 = vadd.f32 %v5379_v6, %v5378_v48  ;;  %v5381_v59 = vpop.f32.mrb[114].mxu1 }
 0x588   : > { %v5382_v8 = vpop.f32.mrb[115].mxu1 }
 0x589   : > { %v4659_v9 = vadd.f32 %v5380_v50, %v4594_v24  ;;  %v5383_v51 = vadd.f32 %v5382_v8, %v5381_v59 }
 0x58b   : > { %v4724_v2 = vadd.f32 %v4723_v0, %v4659_v9  ;;  %v4662_v31 = vadd.f32 %v5383_v51, %v4597_v54 }
 0x58d   : > { %v4727_v16 = vadd.f32 %v4726_v1, %v4662_v31  ;;  %v5384_v43 = vpop.f32.mrb[116].mxu1  ;;  %v4754_v13 = vmax.f32 %v4724_v2, 0.0 }
 0x58e   : > { %v5385_v23 = vpop.f32.mrb[117].mxu1 }
 0x58f   : > { %v4755_v21 = vmax.f32 %v4727_v16, 0.0  ;;  %v5386_v22 = vadd.f32 %v5385_v23, %v5384_v43  ;;  %v5387_v15 = vpop.f32.mrb[118].mxu1 }
 0x590   : > { %v5388_v18 = vpop.f32.mrb[119].mxu1 }
 0x591   : > { %v4762_v38 = vmax.f32 %v4754_v13, %v4755_v21  ;;  %v4667_v26 = vadd.f32 %v5386_v22, %v4602_v57  ;;  %v5389_v30 = vadd.f32 %v5388_v18, %v5387_v15 }
 0x593   : > { %4766 = vst [vmem:[#allocation6] sm:$0xff] %v4762_v38  ;;  %v4732_v3 = vadd.f32 %v5586_v63, %v4667_v26  ;;  %v4670_v14 = vadd.f32 %v5389_v30, %v4605_v11 }
 0x595   : > { %v4735_v5 = vadd.f32 %v5587_v37, %v4670_v14  ;;  %v5390_v28 = vpop.f32.mrb[120].mxu1  ;;  %v4756_v60 = vmax.f32 %v4732_v3, 0.0 }
 0x596   : > { %v5391_v42 = vpop.f32.mrb[121].mxu1 }
 0x597   : > { %v4757_v0 = vmax.f32 %v4735_v5, 0.0  ;;  %v5392_v1 = vadd.f32 %v5391_v42, %v5390_v28  ;;  %v5393_v25 = vpop.f32.mrb[122].mxu1 }
 0x598   : > { %v5394_v40 = vpop.f32.mrb[123].mxu1 }
 0x599   : > { %v4763_v27 = vmax.f32 %v4756_v60, %v4757_v0  ;;  %v4675_v53 = vadd.f32 %v5392_v1, %v4610_v45  ;;  %v5395_v20 = vadd.f32 %v5394_v40, %v5393_v25 }
 0x59a   : > { %v4770_v63 = vld [vmem:[#allocation6] ss:$2 sm:$0xf]  ;;  %v4778_v37 = vld [vmem:[#allocation6 + $0x1] ss:$2 sm:$0xf] }
 0x59b   : > { %v4785_v29 = vmax.f32 %v4770_v63, %v4778_v37  ;;  %4767 = vst [vmem:[#allocation6 + $0x8] sm:$0xff] %v4763_v27  ;;  %v4740_v34 = vadd.f32 %v8041_v47, %v4675_v53  ;;  %v4678_v62 = vadd.f32 %v5395_v20, %v4613_v58 }
 0x59d   : > { %4789 = vst [vmem:[%s8051_s19] sm:$0xf] %v4785_v29  ;;  %v4743_v7 = vadd.f32 %v8045_v56, %v4678_v62  ;;  %v5396_v10 = vpop.f32.mrb[124].mxu1  ;;  %v4758_v44 = vmax.f32 %v4740_v34, 0.0 }
 0x59e   : > { %v5397_v4 = vpop.f32.mrb[125].mxu1 }
 0x59f   : > { %v4759_v55 = vmax.f32 %v4743_v7, 0.0  ;;  %v5398_v52 = vadd.f32 %v5397_v4, %v5396_v10  ;;  %v5399_v49 = vpop.f32.mrb[126].mxu1 }
 0x5a0   : > { %v5400_v32 = vpop.f32.mrb[127].mxu1 }
 0x5a1   : > { %v4764_v17 = vmax.f32 %v4758_v44, %v4759_v55  ;;  %v4683_v46 = vadd.f32 %v5398_v52, %v4618_v33  ;;  %v5401_v19 = vadd.f32 %v5400_v32, %v5399_v49 }
 0x5a2   : > { %v4772_v48 = vld [vmem:[#allocation6 + $0x8] ss:$2 sm:$0xf]  ;;  %v4780_v47 = vld [vmem:[#allocation6 + $0x9] ss:$2 sm:$0xf] }
 0x5a3   : > { %v4786_v6 = vmax.f32 %v4772_v48, %v4780_v47  ;;  %4768 = vst [vmem:[#allocation6 + $0x10] sm:$0xff] %v4764_v17  ;;  %v4748_v56 = vadd.f32 %v8039_v41, %v4683_v46  ;;  %v4686_v24 = vadd.f32 %v5401_v19, %v4621_v36 }
 0x5a5   : > { %4790 = vst [vmem:[%s8051_s19 + $0x4] sm:$0xf] %v4786_v6  ;;  %v4751_v61 = vadd.f32 %v8043_v35, %v4686_v24  ;;  %v4760_v50 = vmax.f32 %v4748_v56, 0.0 }
 0x5a7   : > { %v4761_v59 = vmax.f32 %v4751_v61, 0.0 }
 0x5a9   : > { %v4765_v8 = vmax.f32 %v4760_v50, %v4761_v59 }
 0x5aa   : > { %v4774_v54 = vld [vmem:[#allocation6 + $0x10] ss:$2 sm:$0xf]  ;;  %v4782_v12 = vld [vmem:[#allocation6 + $0x11] ss:$2 sm:$0xf] }
 0x5ab   : > { %v4787_v39 = vmax.f32 %v4774_v54, %v4782_v12  ;;  %4769 = vst [vmem:[#allocation6 + $0x18] sm:$0xff] %v4765_v8 }
 0x5ad   : > { %4791 = vst [vmem:[%s8051_s19 + $0x8] sm:$0xf] %v4787_v39 }
 0x5b2   : > { %v4776_v9 = vld [vmem:[#allocation6 + $0x18] ss:$2 sm:$0xf]  ;;  %v4784_v51 = vld [vmem:[#allocation6 + $0x19] ss:$2 sm:$0xf] }
 0x5b3   : > { %v4788_v2 = vmax.f32 %v4776_v9, %v4784_v51 }
 0x5b5   : > { %4792 = vst [vmem:[%s8051_s19 + $0xc] sm:$0xf] %v4788_v2 }
 0x5b6 PF: > { %s20_s24 = sadd.s32 1, %s6501_s24  }
 0x5b7   : > { %p17_p6 = scmp.ge.s32.totalorder %s20_s24, 4  }
 0x5b9   :  { %19 = sbr.rel (!%p17_p6) target bundleno = 3 (0x3), region = 190 }
 0x5c0   :  { %4814 = vsyncpa [#allocation8], 1 }
 0x5c1   :  { %4816 = vsyncpa [#allocation8 + $0x1], 1 }
 0x5c2   :  { %4817 = vsyncpa [#allocation10], 1 }
 0x5c3   :  { %4818 = vsyncpa [#allocation13], 1 }

// kernel: keypoint_cnn_forward.3
= control target key start
LH: loop header
LB: loop body
LE: loop exit
PB: predicated region body
PF: predicated region fallthrough
CT: control target
= control target key end

     0   :  { %10 = vsyncpa [#allocation3], 0  ;;  %s8931_s0 = inlined_call_operand.vmem [shape: f32[2,2048], index: 0, kind: input, shape index: {}]   ;;  %s8932_s1 = inlined_call_operand.hbm [shape: bf16[2048,768], index: 1, kind: input, shape index: {}]   ;;  %s8933_s2 = inlined_call_operand.hbm [shape: f32[1,768], index: 2, kind: input, shape index: {}]   ;;  %s8934_s3 = inlined_call_operand.hbm [shape: bf16[768,128], index: 3, kind: input, shape index: {}]   ;;  %s8935_s4 = inlined_call_operand.hbm [shape: f32[1,128], index: 4, kind: input, shape index: {}]   ;;  %s8936_s5 = inlined_call_operand.hbm [shape: f32[2,128], index: 5, kind: output, shape index: {}]  }
   0x1   :  { %11 = vsyncpa [#allocation6], 0 }
   0x2   :  { %12 = vsyncpa [#allocation9], 0 }
   0x3   :  { %13 = vsyncpa [#allocation4], 0  ;;  %s8650_s18 = smov [#allocation5]   ;;  %s8651_s20 = smov [#allocation2]  }
   0x4   :  { %s34_s19 = sshll.u32 %s8650_s18, 4  ;;  %s21_s21 = sshll.u32 %s8651_s20, 4  ;;  %s35_s19 = int_to_ptr.vmem [resolvable:$true] %s34_s19  ;;  %s8690_s21 = int_to_ptr.vmem [resolvable:$true] %s21_s21 }
   0x5   :  { %s8532_s24 = scalar_lea.hbm %s8933_s2, 96 }
   0x6   :  { %p8533_p0 = scmp.ne.s32.totalorder %s8933_s2, %s8532_s24  ;;  %p8536_p1 = scmp.lt.u32.totalorder %s8532_s24, %s8933_s2 }
   0x8   :  { %p8538_p2 = pnand %p8536_p1, %p8533_p0 }
   0xa   :  { %8541 = shalt.err (!%p8538_p2)
}
   0xb   :  { %s8542_s29 = scalar_lea.vmem %s35_s19, 96  ;;  %p8547_p4 = scmp.lt.s32.totalorder %s35_s19, %s35_s19 }
   0xc   :  { %p8543_p3 = scmp.ne.s32.totalorder %s35_s19, %s8542_s29  ;;  %p8548_p5 = scmp.lt.s32.totalorder %s8542_s29, %s8542_s29 }
   0xe   :  { %p8549_p6 = por %p8548_p5, %p8547_p4 }
  0x10   :  { %p8550_p7 = pnand %p8549_p6, %p8543_p3 }
  0x12   :  { %8553 = shalt.err (!%p8550_p7)
}
  0x13   :  { %37 = dma.hbm_to_vmem [thread:$0]  %s8933_s2, 96, %s35_s19, [#allocation6]  }
  0x14   :  { %s8554_s9 = scalar_lea.hbm %s8932_s1, 98304 }
  0x15   :  { %p8555_p8 = scmp.ne.s32.totalorder %s8932_s1, %s8554_s9  ;;  %p8558_p9 = scmp.lt.u32.totalorder %s8554_s9, %s8932_s1 }
  0x17   :  { %p8560_p10 = pnand %p8558_p9, %p8555_p8 }
  0x19   :  { %8563 = shalt.err (!%p8560_p10)
}
  0x1a   :  { %s8564_s14 = scalar_lea.vmem %s8690_s21, 98304  ;;  %p8569_p12 = scmp.lt.s32.totalorder %s8690_s21, %s8690_s21 }
  0x1b   :  { %p8565_p11 = scmp.ne.s32.totalorder %s8690_s21, %s8564_s14  ;;  %p8570_p13 = scmp.lt.s32.totalorder %s8564_s14, %s8564_s14 }
  0x1d   :  { %p8571_p0 = por %p8570_p13, %p8569_p12 }
  0x1f   :  { %p8572_p1 = pnand %p8571_p0, %p8565_p11 }
  0x21   :  { %8575 = shalt.err (!%p8572_p1)
}
  0x22   :  { %s8652_s2 = smov 384   ;;  %s8653_s15 = smov 24  }
  0x23   :  { %27 = dma.hbm_to_vmem [thread:$0]  %s8932_s1, 98304, %s8690_s21, [#allocation3], %s8652_s2, %s8652_s2, %s8653_s15  }
  0x24   :  { %s8654_s18 = smov [#allocation7]   ;;  %s8576_s23 = scalar_lea.hbm %s8934_s3, 6144 }
  0x25   :  { %s43_s19 = sshll.u32 %s8654_s18, 4  ;;  %p8577_p2 = scmp.ne.s32.totalorder %s8934_s3, %s8576_s23  ;;  %s44_s19 = int_to_ptr.vmem [resolvable:$true] %s43_s19 }
  0x26   :  { %p8580_p3 = scmp.lt.u32.totalorder %s8576_s23, %s8934_s3 }
  0x28   :  { %p8582_p4 = pnand %p8580_p3, %p8577_p2 }
  0x2a   :  { %8585 = shalt.err (!%p8582_p4)
}
  0x2b   :  { %s8586_s28 = scalar_lea.vmem %s44_s19, 6144  ;;  %p8591_p6 = scmp.lt.s32.totalorder %s44_s19, %s44_s19 }
  0x2c   :  { %p8587_p5 = scmp.ne.s32.totalorder %s44_s19, %s8586_s28  ;;  %p8592_p7 = scmp.lt.s32.totalorder %s8586_s28, %s8586_s28 }
  0x2e   :  { %p8593_p8 = por %p8592_p7, %p8591_p6 }
  0x30   :  { %p8594_p9 = pnand %p8593_p8, %p8587_p5 }
  0x32   :  { %8597 = shalt.err (!%p8594_p9)
}
  0x33   :  { %s8655_s1 = smov 64   ;;  %s8656_s21 = smov 4  }
  0x34   :  { %49 = dma.hbm_to_vmem [thread:$0]  %s8934_s3, 6144, %s44_s19, [#allocation6], %s8655_s1, %s8655_s1, %s8656_s21  }
  0x35   :  { %s8657_s6 = smov [#allocation8]   ;;  %s8598_s10 = scalar_lea.hbm %s8935_s4, 16 }
  0x36   :  { %s56_s7 = sshll.u32 %s8657_s6, 4  ;;  %p8599_p10 = scmp.ne.s32.totalorder %s8935_s4, %s8598_s10  ;;  %s57_s7 = int_to_ptr.vmem [resolvable:$true] %s56_s7 }
  0x37   :  { %p8602_p11 = scmp.lt.u32.totalorder %s8598_s10, %s8935_s4 }
  0x39   :  { %p8604_p12 = pnand %p8602_p11, %p8599_p10 }
  0x3b   :  { %8607 = shalt.err (!%p8604_p12)
}
  0x3c   :  { %s8608_s2 = scalar_lea.vmem %s57_s7, 16  ;;  %s8612_s3 = scalar_lea.vmem %s57_s7, 32 }
  0x3d   :  { %p8609_p13 = scmp.ne.s32.totalorder %s57_s7, %s8608_s2  ;;  %p8613_p0 = scmp.lt.s32.totalorder %s57_s7, %s57_s7 }
  0x3e   :  { %p8614_p1 = scmp.lt.s32.totalorder %s8612_s3, %s8608_s2 }
  0x40   :  { %p8615_p2 = por %p8614_p1, %p8613_p0 }
  0x42   :  { %p8616_p3 = pnand %p8615_p2, %p8609_p13 }
  0x44   :  { %8619 = shalt.err (!%p8616_p3)
}
  0x45   :  { %59 = dma.hbm_to_vmem [thread:$0]  %s8935_s4, 16, %s57_s7, [#allocation9]  }
  0x46   :  { %8642 = dma.done.wait [#allocation3], 98304  }
  0x47   :  { %8643 = vsyncadd [#allocation3], 4294868992 }
  0x48   :  { %8644 = dma.done.wait [#allocation6], 6240  }
  0x49   :  { %8645 = vsyncadd [#allocation6], 4294961056 }
  0x4a   :  { %8646 = dma.done.wait [#allocation9], 16  }
  0x4b   :  { %8647 = vsyncadd [#allocation9], 4294967280  ;;  %v7327_v0 = vld [vmem:[#allocation2 + $0x4] ss:$24 sps:$4 sm:$0xff]   ;;  %v7331_v2 = vld [vmem:[#allocation2] ss:$24 sps:$4 sm:$0xff]   ;;  %v85_v38 = vlaneseq }
  0x4c   :  { %v7329_v1 = vld [vmem:[#allocation2 + $0x904] ss:$24 sps:$4 sm:$0xff]   ;;  %4821 = vmatprep.subr.bf16.mxu1 %v7327_v0  ;;  %v7332_v3 = vld [vmem:[#allocation2 + $0x900] ss:$24 sps:$4 sm:$0xff]   ;;  %v7333_v4 = vld [vmem:[#allocation2 + $0x34] ss:$24 sps:$4 sm:$0xff]  }
  0x4d   :  { %4944 = vmatprep.subr.bf16.mxu0 %v7329_v1  ;;  %4822 = vmatpush1.bf16.msra.mxu1 %v7331_v2  ;;  %v7335_v5 = vld [vmem:[#allocation2 + $0x934] ss:$24 sps:$4 sm:$0xff]   ;;  %v7337_v6 = vld [vmem:[#allocation2 + $0x30] ss:$24 sps:$4 sm:$0xff]   ;;  %v7339_v8 = vld [vmem:[#allocation2 + $0x64] ss:$24 sps:$4 sm:$0xff]  }
  0x4e   :  { %4945 = vmatpush1.bf16.msra.mxu0 %v7332_v3  ;;  %4823 = vmatprep.subr.bf16.mxu1 %v7333_v4  ;;  %v7338_v7 = vld [vmem:[#allocation2 + $0x930] ss:$24 sps:$4 sm:$0xff]   ;;  %v7341_v9 = vld [vmem:[#allocation2 + $0x964] ss:$24 sps:$4 sm:$0xff]   ;;  %v7343_v10 = vld [vmem:[#allocation2 + $0x60] ss:$24 sps:$4 sm:$0xff]  }
  0x4f   :  { %4946 = vmatprep.subr.bf16.mxu0 %v7335_v5  ;;  %v7344_v11 = vld [vmem:[#allocation2 + $0x960] ss:$24 sps:$4 sm:$0xff]   ;;  %v7345_v12 = vld [vmem:[#allocation2 + $0x94] ss:$24 sps:$4 sm:$0xff]   ;;  %v7349_v14 = vld [vmem:[#allocation2 + $0x90] ss:$24 sps:$4 sm:$0xff]  }
  0x50   :  { %v7347_v13 = vld [vmem:[#allocation2 + $0x994] ss:$24 sps:$4 sm:$0xff]   ;;  %v7350_v15 = vld [vmem:[#allocation2 + $0x990] ss:$24 sps:$4 sm:$0xff]   ;;  %v7351_v16 = vld [vmem:[#allocation2 + $0xc4] ss:$24 sps:$4 sm:$0xff]  }
  0x51   :  { %4824 = vmatpush1.bf16.msra.mxu1 %v7337_v6  ;;  %v7353_v17 = vld [vmem:[#allocation2 + $0x9c4] ss:$24 sps:$4 sm:$0xff]   ;;  %v7355_v18 = vld [vmem:[#allocation2 + $0xc0] ss:$24 sps:$4 sm:$0xff]   ;;  %v7357_v20 = vld [vmem:[#allocation2 + $0xf4] ss:$24 sps:$4 sm:$0xff]  }
  0x52   :  { %4947 = vmatpush1.bf16.msra.mxu0 %v7338_v7  ;;  %4825 = vmatprep.subr.bf16.mxu1 %v7339_v8  ;;  %v7356_v19 = vld [vmem:[#allocation2 + $0x9c0] ss:$24 sps:$4 sm:$0xff]   ;;  %v7359_v21 = vld [vmem:[#allocation2 + $0x9f4] ss:$24 sps:$4 sm:$0xff]   ;;  %v7361_v22 = vld [vmem:[#allocation2 + $0xf0] ss:$24 sps:$4 sm:$0xff]  }
  0x53   :  { %4948 = vmatprep.subr.bf16.mxu0 %v7341_v9  ;;  %v7362_v23 = vld [vmem:[#allocation2 + $0x9f0] ss:$24 sps:$4 sm:$0xff]   ;;  %v7363_v24 = vld [vmem:[#allocation2 + $0x124] ss:$24 sps:$4 sm:$0xff]   ;;  %v7367_v26 = vld [vmem:[#allocation2 + $0x120] ss:$24 sps:$4 sm:$0xff]  }
  0x54   :  { %v7365_v25 = vld [vmem:[#allocation2 + $0xa24] ss:$24 sps:$4 sm:$0xff]   ;;  %v7368_v27 = vld [vmem:[#allocation2 + $0xa20] ss:$24 sps:$4 sm:$0xff]   ;;  %v7369_v28 = vld [vmem:[#allocation2 + $0x154] ss:$24 sps:$4 sm:$0xff]  }
  0x55   :  { %4826 = vmatpush1.bf16.msra.mxu1 %v7343_v10  ;;  %v7371_v29 = vld [vmem:[#allocation2 + $0xa54] ss:$24 sps:$4 sm:$0xff]   ;;  %v7373_v30 = vld [vmem:[#allocation2 + $0x150] ss:$24 sps:$4 sm:$0xff]   ;;  %v7375_v32 = vld [vmem:[#allocation2 + $0x184] ss:$24 sps:$4 sm:$0xff]  }
  0x56   :  { %4949 = vmatpush1.bf16.msra.mxu0 %v7344_v11  ;;  %4827 = vmatprep.subr.bf16.mxu1 %v7345_v12  ;;  %v7374_v31 = vld [vmem:[#allocation2 + $0xa50] ss:$24 sps:$4 sm:$0xff]   ;;  %v7377_v33 = vld [vmem:[#allocation2 + $0xa84] ss:$24 sps:$4 sm:$0xff]   ;;  %v7379_v34 = vld [vmem:[#allocation2 + $0x180] ss:$24 sps:$4 sm:$0xff]  }
  0x57   :  { %4950 = vmatprep.subr.bf16.mxu0 %v7347_v13  ;;  %v7380_v35 = vld [vmem:[#allocation2 + $0xa80] ss:$24 sps:$4 sm:$0xff]   ;;  %v8658_v36 = vmov 1983009808   ;;  %v7381_v39 = vld [vmem:[#allocation2 + $0x1b4] ss:$24 sps:$4 sm:$0xff]  }
  0x58   :  { %v83_v37 = vunpack.c.l.s4 %v8658_v36  ;;  %v7383_v40 = vld [vmem:[#allocation2 + $0xab4] ss:$24 sps:$4 sm:$0xff]   ;;  %v7385_v41 = vld [vmem:[#allocation2 + $0x1b0] ss:$24 sps:$4 sm:$0xff]   ;;  %v8745_v43 = vshrl.u32 %v85_v38, 7  ;;  %v73_v52 = vld [vmem:[%s8931_s0] sm:$0xff] }
  0x59   :  { %4828 = vmatpush1.bf16.msra.mxu1 %v7349_v14  ;;  %v7386_v44 = vld [vmem:[#allocation2 + $0xab0] ss:$24 sps:$4 sm:$0xff]   ;;  %v7387_v45 = vld [vmem:[#allocation2 + $0x1e4] ss:$24 sps:$4 sm:$0xff]   ;;  %v7391_v47 = vld [vmem:[#allocation2 + $0x1e0] ss:$24 sps:$4 sm:$0xff]   ;;  %v81_v9 = vcombine.high %v73_v52, %v73_v52 }
  0x5a   :  { %4951 = vmatpush1.bf16.msra.mxu0 %v7350_v15  ;;  %4829 = vmatprep.subr.bf16.mxu1 %v7351_v16  ;;  %v84_v42 = vunpack.c.0.s8 %v83_v37  ;;  %v7389_v46 = vld [vmem:[#allocation2 + $0xae4] ss:$24 sps:$4 sm:$0xff]   ;;  %v7392_v48 = vld [vmem:[#allocation2 + $0xae0] ss:$24 sps:$4 sm:$0xff]   ;;  %v7393_v50 = vld [vmem:[#allocation2 + $0x214] ss:$24 sps:$4 sm:$0xff]  }
  0x5b   :  { %4952 = vmatprep.subr.bf16.mxu0 %v7353_v17  ;;  %v7395_v51 = vld [vmem:[#allocation2 + $0xb14] ss:$24 sps:$4 sm:$0xff]   ;;  %v7397_v53 = vld [vmem:[#allocation2 + $0x210] ss:$24 sps:$4 sm:$0xff]   ;;  %v7399_v57 = vld [vmem:[#allocation2 + $0x244] ss:$24 sps:$4 sm:$0xff]  }
  0x5c   :  { %v8748_v49 = vsub.s32 %v84_v42, %v8745_v43  ;;  %v7398_v55 = vld [vmem:[#allocation2 + $0xb10] ss:$24 sps:$4 sm:$0xff]   ;;  %v7401_v58 = vld [vmem:[#allocation2 + $0xb44] ss:$24 sps:$4 sm:$0xff]   ;;  %v7403_v63 = vld [vmem:[#allocation2 + $0x240] ss:$24 sps:$4 sm:$0xff]  }
  0x5d   :  { %4830 = vmatpush1.bf16.msra.mxu1 %v7355_v18  ;;  %v8757_v56 = vld [vmem:[%s8931_s0 + $0x8] sm:$0xff]  ;;  %v7404_v0 = vld [vmem:[#allocation2 + $0xb40] ss:$24 sps:$4 sm:$0xff]   ;;  %v7411_v7 = vld [vmem:[#allocation2 + $0x2a4] ss:$24 sps:$4 sm:$0xff]  }
  0x5e   :  { %4953 = vmatpush1.bf16.msra.mxu0 %v7356_v19  ;;  %4831 = vmatprep.subr.bf16.mxu1 %v7357_v20  ;;  %v88_v54 = vrot.slane %v73_v52, %v8748_v49  ;;  %v98_v60 = vcombine.high %v8757_v56, %v8757_v56  ;;  %v7405_v1 = vld [vmem:[#allocation2 + $0x274] ss:$24 sps:$4 sm:$0xff]   ;;  %v7409_v5 = vld [vmem:[#allocation2 + $0x270] ss:$24 sps:$4 sm:$0xff]   ;;  %v7413_v8 = vld [vmem:[#allocation2 + $0xba4] ss:$24 sps:$4 sm:$0xff]   ;;  %v8769_v14 = vrot.slane %v81_v9, %v8748_v49 }
  0x5f   :  { %4954 = vmatprep.subr.bf16.mxu0 %v7359_v21  ;;  %v7407_v2 = vld [vmem:[#allocation2 + $0xb74] ss:$24 sps:$4 sm:$0xff]   ;;  %v7410_v6 = vld [vmem:[#allocation2 + $0xb70] ss:$24 sps:$4 sm:$0xff]   ;;  %v7415_v10 = vld [vmem:[#allocation2 + $0x2a0] ss:$24 sps:$4 sm:$0xff]  }
  0x60   :  { %v96_v59 = vcombine.high %v88_v54, %v88_v54  ;;  %v112_v62 = vrot.slane %v98_v60, %v8748_v49  ;;  %v7416_v11 = vld [vmem:[#allocation2 + $0xba0] ss:$24 sps:$4 sm:$0xff]   ;;  %v7417_v12 = vld [vmem:[#allocation2 + $0x2d4] ss:$24 sps:$4 sm:$0xff]   ;;  %v7421_v15 = vld [vmem:[#allocation2 + $0x2d0] ss:$24 sps:$4 sm:$0xff]   ;;  %v97_v19 = vcombine.high %v8769_v14, %v8769_v14  ;;  %v8773_v20 = vpack.c.bf16 %v88_v54, %v88_v54 }
  0x61   :  { %4832 = vmatpush1.bf16.msra.mxu1 %v7361_v22  ;;  %v7419_v13 = vld [vmem:[#allocation2 + $0xbd4] ss:$24 sps:$4 sm:$0xff]   ;;  %v7422_v16 = vld [vmem:[#allocation2 + $0xbd0] ss:$24 sps:$4 sm:$0xff]   ;;  %v7425_v17 = vld [vmem:[#allocation2 + $0x304] ss:$24 sps:$4 sm:$0xff]  }
  0x62   :  { %4955 = vmatpush1.bf16.msra.mxu0 %v7362_v23  ;;  %4833 = vmatprep.subr.bf16.mxu1 %v7363_v24  ;;  %v8761_v61 = vpack.c.bf16 %v96_v59, %v96_v59  ;;  %v114_v3 = vcombine.high %v112_v62, %v112_v62  ;;  %v7429_v18 = vld [vmem:[#allocation2 + $0xc04] ss:$24 sps:$4 sm:$0xff]   ;;  %v8775_v21 = vpack.c.bf16 %v112_v62, %v112_v62  ;;  %v7423_v22 = vld [vmem:[#allocation2 + $0x300] ss:$24 sps:$4 sm:$0xff]   ;;  %v7432_v24 = vld [vmem:[#allocation2 + $0x334] ss:$24 sps:$4 sm:$0xff]  }
  0x63   :  { %4956 = vmatprep.subr.bf16.mxu0 %v7365_v25  ;;  %v7427_v23 = vld [vmem:[#allocation2 + $0xc00] ss:$24 sps:$4 sm:$0xff]   ;;  %v7435_v25 = vld [vmem:[#allocation2 + $0xc34] ss:$24 sps:$4 sm:$0xff]   ;;  %v7445_v36 = vld [vmem:[#allocation2 + $0xc90] ss:$24 sps:$4 sm:$0xff]  }
  0x64   :  { %4853 = vmatprep.mubr.bf16.mxu1 %v8761_v61  ;;  %v8765_v4 = vpack.c.bf16 %v114_v3, %v114_v3  ;;  %v7450_v37 = vld [vmem:[#allocation2 + $0x3c4] ss:$24 sps:$4 sm:$0xff]   ;;  %v7459_v42 = vld [vmem:[#allocation2 + $0xcf4] ss:$24 sps:$4 sm:$0xff]   ;;  %v7478_v3 = vld [vmem:[#allocation2 + $0x4b0] ss:$24 sps:$4 sm:$0xff]  }
  0x65   :  { %4834 = vmatpush1.bf16.msra.mxu1 %v7367_v26  ;;  %v8777_v26 = vpack.c.bf16 %v97_v19, %v97_v19  ;;  %v7453_v38 = vld [vmem:[#allocation2 + $0xcc4] ss:$24 sps:$4 sm:$0xff]   ;;  %v7468_v52 = vld [vmem:[#allocation2 + $0x454] ss:$24 sps:$4 sm:$0xff]   ;;  %v7487_v9 = vld [vmem:[#allocation2 + $0xde0] ss:$24 sps:$4 sm:$0xff]  }
  0x66   :  { %4957 = vmatpush1.bf16.msra.mxu0 %v7368_v27  ;;  %4835 = vmatprep.subr.bf16.mxu1 %v7369_v28  ;;  %v7430_v27 = vld [vmem:[#allocation2 + $0x330] ss:$24 sps:$4 sm:$0xff]   ;;  %v7471_v54 = vld [vmem:[#allocation2 + $0xd54] ss:$24 sps:$4 sm:$0xff]   ;;  %v7474_v59 = vld [vmem:[#allocation2 + $0x484] ss:$24 sps:$4 sm:$0xff]  }
  0x67   :  { %4958 = vmatprep.subr.bf16.mxu0 %v7371_v29  ;;  %4976 = vmatprep.mubr.bf16.mxu0 %v8765_v4  ;;  %v7433_v28 = vld [vmem:[#allocation2 + $0xc30] ss:$24 sps:$4 sm:$0xff]   ;;  %v7438_v29 = vld [vmem:[#allocation2 + $0x364] ss:$24 sps:$4 sm:$0xff]   ;;  %v7504_v19 = vld [vmem:[#allocation2 + $0x574] ss:$24 sps:$4 sm:$0xff]  }
  0x68   :  { %v7477_v62 = vld [vmem:[#allocation2 + $0xd84] ss:$24 sps:$4 sm:$0xff]  }
  0x69   :  { %4836 = vmatpush1.bf16.msra.mxu1 %v7373_v30  ;;  %v7441_v30 = vld [vmem:[#allocation2 + $0xc64] ss:$24 sps:$4 sm:$0xff]  }
  0x6a   :  { %4959 = vmatpush1.bf16.msra.mxu0 %v7374_v31  ;;  %4837 = vmatprep.subr.bf16.mxu1 %v7375_v32  ;;  %v7436_v31 = vld [vmem:[#allocation2 + $0x360] ss:$24 sps:$4 sm:$0xff]  }
  0x6b   :  { %4960 = vmatprep.subr.bf16.mxu0 %v7377_v33  ;;  %v7439_v32 = vld [vmem:[#allocation2 + $0xc60] ss:$24 sps:$4 sm:$0xff]   ;;  %v7444_v33 = vld [vmem:[#allocation2 + $0x394] ss:$24 sps:$4 sm:$0xff]  }
  0x6d   :  { %4838 = vmatpush1.bf16.msra.mxu1 %v7379_v34  ;;  %v7447_v34 = vld [vmem:[#allocation2 + $0xc94] ss:$24 sps:$4 sm:$0xff]  }
  0x6e   :  { %4961 = vmatpush1.bf16.msra.mxu0 %v7380_v35  ;;  %4839 = vmatprep.subr.bf16.mxu1 %v7381_v39  ;;  %v7442_v35 = vld [vmem:[#allocation2 + $0x390] ss:$24 sps:$4 sm:$0xff]   ;;  %v7448_v39 = vld [vmem:[#allocation2 + $0x3c0] ss:$24 sps:$4 sm:$0xff]  }
  0x6f   :  { %4962 = vmatprep.subr.bf16.mxu0 %v7383_v40  ;;  %v7451_v40 = vld [vmem:[#allocation2 + $0xcc0] ss:$24 sps:$4 sm:$0xff]  }
  0x71   :  { %4840 = vmatpush1.bf16.msra.mxu1 %v7385_v41  ;;  %v7456_v41 = vld [vmem:[#allocation2 + $0x3f4] ss:$24 sps:$4 sm:$0xff]  }
  0x72   :  { %4963 = vmatpush1.bf16.msra.mxu0 %v7386_v44  ;;  %4841 = vmatprep.subr.bf16.mxu1 %v7387_v45  ;;  %v7454_v44 = vld [vmem:[#allocation2 + $0x3f0] ss:$24 sps:$4 sm:$0xff]  }
  0x73   :  { %4964 = vmatprep.subr.bf16.mxu0 %v7389_v46  ;;  %v7457_v45 = vld [vmem:[#allocation2 + $0xcf0] ss:$24 sps:$4 sm:$0xff]   ;;  %v7462_v46 = vld [vmem:[#allocation2 + $0x424] ss:$24 sps:$4 sm:$0xff]  }
  0x75   :  { %4842 = vmatpush1.bf16.msra.mxu1 %v7391_v47  ;;  %v7465_v47 = vld [vmem:[#allocation2 + $0xd24] ss:$24 sps:$4 sm:$0xff]  }
  0x76   :  { %4965 = vmatpush1.bf16.msra.mxu0 %v7392_v48  ;;  %4843 = vmatprep.subr.bf16.mxu1 %v7393_v50  ;;  %v7460_v48 = vld [vmem:[#allocation2 + $0x420] ss:$24 sps:$4 sm:$0xff]   ;;  %v8785_v50 = vld [vmem:[%s8931_s0 + $0x10] sm:$0xff] }
  0x77   :  { %4966 = vmatprep.subr.bf16.mxu0 %v7395_v51  ;;  %v7463_v51 = vld [vmem:[#allocation2 + $0xd20] ss:$24 sps:$4 sm:$0xff]  }
  0x79   :  { %4844 = vmatpush1.bf16.msra.mxu1 %v7397_v53  ;;  %v8789_v53 = vrot.slane %v8785_v50, %v8748_v49 }
  0x7a   :  { %4967 = vmatpush1.bf16.msra.mxu0 %v7398_v55  ;;  %4845 = vmatprep.subr.bf16.mxu1 %v7399_v57  ;;  %v7466_v57 = vld [vmem:[#allocation2 + $0x450] ss:$24 sps:$4 sm:$0xff]  }
  0x7b   :  { %4968 = vmatprep.subr.bf16.mxu0 %v7401_v58  ;;  %v130_v55 = vcombine.high %v8789_v53, %v8789_v53  ;;  %v7469_v58 = vld [vmem:[#allocation2 + $0xd50] ss:$24 sps:$4 sm:$0xff]  }
  0x7d   :  { %4846 = vmatpush1.bf16.msra.mxu1 %v7403_v63  ;;  %v8793_v60 = vpack.c.bf16 %v130_v55, %v130_v55  ;;  %v7472_v63 = vld [vmem:[#allocation2 + $0x480] ss:$24 sps:$4 sm:$0xff]   ;;  %v7541_v55 = vld [vmem:[#allocation2 + $0x694] ss:$24 sps:$4 sm:$0xff]  }
  0x7e   :  { %4969 = vmatpush1.bf16.msra.mxu0 %v7404_v0  ;;  %4847 = vmatprep.subr.bf16.mxu1 %v7405_v1  ;;  %v7475_v0 = vld [vmem:[#allocation2 + $0xd80] ss:$24 sps:$4 sm:$0xff]   ;;  %v7480_v1 = vld [vmem:[#allocation2 + $0x4b4] ss:$24 sps:$4 sm:$0xff]  }
  0x7f   :  { %4970 = vmatprep.subr.bf16.mxu0 %v7407_v2  ;;  %v7483_v2 = vld [vmem:[#allocation2 + $0xdb4] ss:$24 sps:$4 sm:$0xff]  }
  0x81   :  { %4848 = vmatpush1.bf16.msra.mxu1 %v7409_v5  ;;  %v7481_v5 = vld [vmem:[#allocation2 + $0xdb0] ss:$24 sps:$4 sm:$0xff]  }
  0x82   :  { %4971 = vmatpush1.bf16.msra.mxu0 %v7410_v6  ;;  %4849 = vmatprep.subr.bf16.mxu1 %v7411_v7  ;;  %v7486_v6 = vld [vmem:[#allocation2 + $0x4e4] ss:$24 sps:$4 sm:$0xff]  }
  0x83   :  { %4972 = vmatprep.subr.bf16.mxu0 %v7413_v8  ;;  %v7489_v7 = vld [vmem:[#allocation2 + $0xde4] ss:$24 sps:$4 sm:$0xff]   ;;  %v7484_v8 = vld [vmem:[#allocation2 + $0x4e0] ss:$24 sps:$4 sm:$0xff]  }
  0x85   :  { %4850 = vmatpush1.bf16.msra.mxu1 %v7415_v10  ;;  %v7492_v10 = vld [vmem:[#allocation2 + $0x514] ss:$24 sps:$4 sm:$0xff]  }
  0x86   :  { %4973 = vmatpush1.bf16.msra.mxu0 %v7416_v11  ;;  %4851 = vmatprep.subr.bf16.mxu1 %v7417_v12  ;;  %v7495_v11 = vld [vmem:[#allocation2 + $0xe14] ss:$24 sps:$4 sm:$0xff]   ;;  %v7490_v12 = vld [vmem:[#allocation2 + $0x510] ss:$24 sps:$4 sm:$0xff]  }
  0x87   :  { %4974 = vmatprep.subr.bf16.mxu0 %v7419_v13  ;;  %v7493_v13 = vld [vmem:[#allocation2 + $0xe10] ss:$24 sps:$4 sm:$0xff]  }
  0x89   :  { %4852 = vmatpush1.bf16.msra.mxu1 %v7421_v15  ;;  %v7498_v15 = vld [vmem:[#allocation2 + $0x544] ss:$24 sps:$4 sm:$0xff]  }
  0x8a   :  { %4975 = vmatpush1.bf16.msra.mxu0 %v7422_v16  ;;  %4862 = vmatprep.subr.bf16.mxu1 %v7425_v17  ;;  %v7501_v16 = vld [vmem:[#allocation2 + $0xe44] ss:$24 sps:$4 sm:$0xff]   ;;  %v7496_v17 = vld [vmem:[#allocation2 + $0x540] ss:$24 sps:$4 sm:$0xff]  }
  0x8b   :  { %4985 = vmatprep.subr.bf16.mxu0 %v7429_v18  ;;  %v7499_v18 = vld [vmem:[#allocation2 + $0xe40] ss:$24 sps:$4 sm:$0xff]  }
  0x8c   :  { %4854 = vmatmul.mubr.bf16.vlgmr.msra.gmra.mrb[0].mxu1 %v8773_v20 }
  0x8d   :  { %4977 = vmatmul.mubr.bf16.vlgmr.msra.gmra.mrb[0].mxu0 %v8775_v21  ;;  %4863 = vmatpush1.bf16.msra.mxu1 %v7423_v22  ;;  %v7507_v22 = vld [vmem:[#allocation2 + $0xe74] ss:$24 sps:$4 sm:$0xff]  }
  0x8e   :  { %4986 = vmatpush1.bf16.msra.mxu0 %v7427_v23  ;;  %4864 = vmatprep.subr.bf16.mxu1 %v7432_v24  ;;  %v7502_v23 = vld [vmem:[#allocation2 + $0x570] ss:$24 sps:$4 sm:$0xff]  }
  0x8f   :  { %4987 = vmatprep.subr.bf16.mxu0 %v7435_v25  ;;  %4894 = vmatprep.mubr.bf16.mxu1 %v8777_v26  ;;  %v7505_v24 = vld [vmem:[#allocation2 + $0xe70] ss:$24 sps:$4 sm:$0xff]   ;;  %v7510_v25 = vld [vmem:[#allocation2 + $0x5a4] ss:$24 sps:$4 sm:$0xff]  }
  0x90   :  { %5017 = vmatprep.mubr.bf16.mxu0 %v8793_v60 }
  0x91   :  { %4865 = vmatpush1.bf16.msra.mxu1 %v7430_v27  ;;  %v7513_v27 = vld [vmem:[#allocation2 + $0xea4] ss:$24 sps:$4 sm:$0xff]  }
  0x92   :  { %4988 = vmatpush1.bf16.msra.mxu0 %v7433_v28  ;;  %4866 = vmatprep.subr.bf16.mxu1 %v7438_v29  ;;  %v115_v28 = vcombine.high %v8785_v50, %v8785_v50  ;;  %v7508_v29 = vld [vmem:[#allocation2 + $0x5a0] ss:$24 sps:$4 sm:$0xff]   ;;  %v7530_v50 = vld [vmem:[#allocation2 + $0xf30] ss:$24 sps:$4 sm:$0xff]  }
  0x93   :  { %4989 = vmatprep.subr.bf16.mxu0 %v7441_v30  ;;  %v7511_v30 = vld [vmem:[#allocation2 + $0xea0] ss:$24 sps:$4 sm:$0xff]  }
  0x95   :  { %4867 = vmatpush1.bf16.msra.mxu1 %v7436_v31  ;;  %v7516_v31 = vld [vmem:[#allocation2 + $0x5d4] ss:$24 sps:$4 sm:$0xff]  }
  0x96   :  { %4990 = vmatpush1.bf16.msra.mxu0 %v7439_v32  ;;  %4868 = vmatprep.subr.bf16.mxu1 %v7444_v33  ;;  %v7519_v32 = vld [vmem:[#allocation2 + $0xed4] ss:$24 sps:$4 sm:$0xff]   ;;  %v8800_v33 = vrot.slane %v8757_v56, %v8748_v49  ;;  %v8811_v56 = vpack.c.bf16 %v8769_v14, %v8769_v14  ;;  %v7527_v14 = vld [vmem:[#allocation2 + $0x630] ss:$24 sps:$4 sm:$0xff]  }
  0x97   :  { %4991 = vmatprep.subr.bf16.mxu0 %v7447_v34  ;;  %v8803_v34 = vrot.slane %v115_v28, %v8748_v49  ;;  %v7586_v28 = vld [vmem:[#allocation2 + $0x10e4] ss:$24 sps:$4 sm:$0xff]  }
  0x99   :  { %4869 = vmatpush1.bf16.msra.mxu1 %v7442_v35  ;;  %v7514_v35 = vld [vmem:[#allocation2 + $0x5d0] ss:$24 sps:$4 sm:$0xff]  }
  0x9a   :  { %4992 = vmatpush1.bf16.msra.mxu0 %v7445_v36  ;;  %4870 = vmatprep.subr.bf16.mxu1 %v7450_v37  ;;  %v7517_v36 = vld [vmem:[#allocation2 + $0xed0] ss:$24 sps:$4 sm:$0xff]   ;;  %v7523_v37 = vld [vmem:[#allocation2 + $0x604] ss:$24 sps:$4 sm:$0xff]  }
  0x9b   :  { %4993 = vmatprep.subr.bf16.mxu0 %v7453_v38  ;;  %v7526_v38 = vld [vmem:[#allocation2 + $0xf04] ss:$24 sps:$4 sm:$0xff]  }
  0x9d   :  { %4871 = vmatpush1.bf16.msra.mxu1 %v7448_v39  ;;  %v113_v39 = vcombine.high %v8800_v33, %v8800_v33 }
  0x9e   :  { %4994 = vmatpush1.bf16.msra.mxu0 %v7451_v40  ;;  %4872 = vmatprep.subr.bf16.mxu1 %v7456_v41  ;;  %v131_v40 = vcombine.high %v8803_v34, %v8803_v34  ;;  %v7521_v41 = vld [vmem:[#allocation2 + $0x600] ss:$24 sps:$4 sm:$0xff]  }
  0x9f   :  { %4995 = vmatprep.subr.bf16.mxu0 %v7459_v42  ;;  %v8815_v42 = vpack.c.bf16 %v8789_v53, %v8789_v53  ;;  %v7533_v53 = vld [vmem:[#allocation2 + $0x660] ss:$24 sps:$4 sm:$0xff]  }
  0xa1   :  { %4873 = vmatpush1.bf16.msra.mxu1 %v7454_v44  ;;  %v7524_v44 = vld [vmem:[#allocation2 + $0xf00] ss:$24 sps:$4 sm:$0xff]  }
  0xa2   :  { %4996 = vmatpush1.bf16.msra.mxu0 %v7457_v45  ;;  %4874 = vmatprep.subr.bf16.mxu1 %v7462_v46  ;;  %v7529_v45 = vld [vmem:[#allocation2 + $0x634] ss:$24 sps:$4 sm:$0xff]  }
  0xa3   :  { %4997 = vmatprep.subr.bf16.mxu0 %v7465_v47  ;;  %v7532_v46 = vld [vmem:[#allocation2 + $0xf34] ss:$24 sps:$4 sm:$0xff]   ;;  %v8817_v47 = vpack.c.bf16 %v113_v39, %v113_v39  ;;  %v7593_v39 = vld [vmem:[#allocation2 + $0x840] ss:$24 sps:$4 sm:$0xff]  }
  0xa5   :  { %4875 = vmatpush1.bf16.msra.mxu1 %v7460_v48  ;;  %v8819_v48 = vpack.c.bf16 %v131_v40, %v131_v40  ;;  %v7596_v40 = vld [vmem:[#allocation2 + $0x1140] ss:$24 sps:$4 sm:$0xff]  }
  0xa6   :  { %4998 = vmatpush1.bf16.msra.mxu0 %v7463_v51  ;;  %4876 = vmatprep.subr.bf16.mxu1 %v7468_v52  ;;  %v7535_v51 = vld [vmem:[#allocation2 + $0x664] ss:$24 sps:$4 sm:$0xff]  }
  0xa7   :  { %4999 = vmatprep.subr.bf16.mxu0 %v7471_v54  ;;  %v7538_v52 = vld [vmem:[#allocation2 + $0xf64] ss:$24 sps:$4 sm:$0xff]   ;;  %v7536_v54 = vld [vmem:[#allocation2 + $0xf60] ss:$24 sps:$4 sm:$0xff]  }
  0xa9   :  { %4877 = vmatpush1.bf16.msra.mxu1 %v7466_v57  ;;  %v7544_v57 = vld [vmem:[#allocation2 + $0xf94] ss:$24 sps:$4 sm:$0xff]  }
  0xaa   :  { %5000 = vmatpush1.bf16.msra.mxu0 %v7469_v58  ;;  %4878 = vmatprep.subr.bf16.mxu1 %v7474_v59  ;;  %v7539_v58 = vld [vmem:[#allocation2 + $0x690] ss:$24 sps:$4 sm:$0xff]  }
  0xab   :  { %5001 = vmatprep.subr.bf16.mxu0 %v7477_v62  ;;  %v7542_v59 = vld [vmem:[#allocation2 + $0xf90] ss:$24 sps:$4 sm:$0xff]   ;;  %v7547_v62 = vld [vmem:[#allocation2 + $0x6c4] ss:$24 sps:$4 sm:$0xff]  }
  0xad   :  { %4879 = vmatpush1.bf16.msra.mxu1 %v7472_v63  ;;  %v7550_v63 = vld [vmem:[#allocation2 + $0xfc4] ss:$24 sps:$4 sm:$0xff]  }
  0xae   :  { %5002 = vmatpush1.bf16.msra.mxu0 %v7475_v0  ;;  %4880 = vmatprep.subr.bf16.mxu1 %v7480_v1  ;;  %v7545_v0 = vld [vmem:[#allocation2 + $0x6c0] ss:$24 sps:$4 sm:$0xff]  }
  0xaf   :  { %5003 = vmatprep.subr.bf16.mxu0 %v7483_v2  ;;  %v7548_v1 = vld [vmem:[#allocation2 + $0xfc0] ss:$24 sps:$4 sm:$0xff]   ;;  %v7553_v2 = vld [vmem:[#allocation2 + $0x6f4] ss:$24 sps:$4 sm:$0xff]  }
  0xb1   :  { %4881 = vmatpush1.bf16.msra.mxu1 %v7478_v3  ;;  %v7556_v3 = vld [vmem:[#allocation2 + $0xff4] ss:$24 sps:$4 sm:$0xff]  }
  0xb2   :  { %5004 = vmatpush1.bf16.msra.mxu0 %v7481_v5  ;;  %4882 = vmatprep.subr.bf16.mxu1 %v7486_v6  ;;  %v7551_v5 = vld [vmem:[#allocation2 + $0x6f0] ss:$24 sps:$4 sm:$0xff]  }
  0xb3   :  { %5005 = vmatprep.subr.bf16.mxu0 %v7489_v7  ;;  %v7554_v6 = vld [vmem:[#allocation2 + $0xff0] ss:$24 sps:$4 sm:$0xff]   ;;  %v7559_v7 = vld [vmem:[#allocation2 + $0x724] ss:$24 sps:$4 sm:$0xff]  }
  0xb5   :  { %4883 = vmatpush1.bf16.msra.mxu1 %v7484_v8  ;;  %v7562_v8 = vld [vmem:[#allocation2 + $0x1024] ss:$24 sps:$4 sm:$0xff]  }
  0xb6   :  { %5006 = vmatpush1.bf16.msra.mxu0 %v7487_v9  ;;  %4884 = vmatprep.subr.bf16.mxu1 %v7492_v10  ;;  %v7557_v9 = vld [vmem:[#allocation2 + $0x720] ss:$24 sps:$4 sm:$0xff]  }
  0xb7   :  { %5007 = vmatprep.subr.bf16.mxu0 %v7495_v11  ;;  %v7560_v10 = vld [vmem:[#allocation2 + $0x1020] ss:$24 sps:$4 sm:$0xff]   ;;  %v7565_v11 = vld [vmem:[#allocation2 + $0x754] ss:$24 sps:$4 sm:$0xff]  }
  0xb9   :  { %4885 = vmatpush1.bf16.msra.mxu1 %v7490_v12  ;;  %v7568_v12 = vld [vmem:[#allocation2 + $0x1054] ss:$24 sps:$4 sm:$0xff]  }
  0xba   :  { %5008 = vmatpush1.bf16.msra.mxu0 %v7493_v13  ;;  %4886 = vmatprep.subr.bf16.mxu1 %v7498_v15  ;;  %v7563_v13 = vld [vmem:[#allocation2 + $0x750] ss:$24 sps:$4 sm:$0xff]  }
  0xbb   :  { %5009 = vmatprep.subr.bf16.mxu0 %v7501_v16  ;;  %v7566_v15 = vld [vmem:[#allocation2 + $0x1050] ss:$24 sps:$4 sm:$0xff]   ;;  %v7571_v16 = vld [vmem:[#allocation2 + $0x784] ss:$24 sps:$4 sm:$0xff]  }
  0xbd   :  { %4887 = vmatpush1.bf16.msra.mxu1 %v7496_v17  ;;  %v7574_v17 = vld [vmem:[#allocation2 + $0x1084] ss:$24 sps:$4 sm:$0xff]  }
  0xbe   :  { %5010 = vmatpush1.bf16.msra.mxu0 %v7499_v18  ;;  %4888 = vmatprep.subr.bf16.mxu1 %v7504_v19  ;;  %v7569_v18 = vld [vmem:[#allocation2 + $0x780] ss:$24 sps:$4 sm:$0xff]  }
  0xbf   :  { %5011 = vmatprep.subr.bf16.mxu0 %v7507_v22  ;;  %v7572_v19 = vld [vmem:[#allocation2 + $0x1080] ss:$24 sps:$4 sm:$0xff]   ;;  %v7577_v22 = vld [vmem:[#allocation2 + $0x7b4] ss:$24 sps:$4 sm:$0xff]  }
  0xc1   :  { %4889 = vmatpush1.bf16.msra.mxu1 %v7502_v23  ;;  %v7580_v23 = vld [vmem:[#allocation2 + $0x10b4] ss:$24 sps:$4 sm:$0xff]  }
  0xc2   :  { %5012 = vmatpush1.bf16.msra.mxu0 %v7505_v24  ;;  %4890 = vmatprep.subr.bf16.mxu1 %v7510_v25  ;;  %v7575_v24 = vld [vmem:[#allocation2 + $0x7b0] ss:$24 sps:$4 sm:$0xff]  }
  0xc3   :  { %5013 = vmatprep.subr.bf16.mxu0 %v7513_v27  ;;  %v7578_v25 = vld [vmem:[#allocation2 + $0x10b0] ss:$24 sps:$4 sm:$0xff]   ;;  %v7583_v27 = vld [vmem:[#allocation2 + $0x7e4] ss:$24 sps:$4 sm:$0xff]  }
  0xc5   :  { %4891 = vmatpush1.bf16.msra.mxu1 %v7508_v29  ;;  %v7581_v29 = vld [vmem:[#allocation2 + $0x7e0] ss:$24 sps:$4 sm:$0xff]  }
  0xc6   :  { %5014 = vmatpush1.bf16.msra.mxu0 %v7511_v30  ;;  %4892 = vmatprep.subr.bf16.mxu1 %v7516_v31  ;;  %v7584_v30 = vld [vmem:[#allocation2 + $0x10e0] ss:$24 sps:$4 sm:$0xff]   ;;  %v7589_v31 = vld [vmem:[#allocation2 + $0x814] ss:$24 sps:$4 sm:$0xff]  }
  0xc7   :  { %5015 = vmatprep.subr.bf16.mxu0 %v7519_v32  ;;  %v7592_v32 = vld [vmem:[#allocation2 + $0x1114] ss:$24 sps:$4 sm:$0xff]  }
  0xc9   :  { %4893 = vmatpush1.bf16.msra.mxu1 %v7514_v35  ;;  %v7587_v35 = vld [vmem:[#allocation2 + $0x810] ss:$24 sps:$4 sm:$0xff]  }
  0xca   :  { %5016 = vmatpush1.bf16.msra.mxu0 %v7517_v36  ;;  %4903 = vmatprep.subr.bf16.mxu1 %v7523_v37  ;;  %v7590_v36 = vld [vmem:[#allocation2 + $0x1110] ss:$24 sps:$4 sm:$0xff]   ;;  %v7595_v37 = vld [vmem:[#allocation2 + $0x844] ss:$24 sps:$4 sm:$0xff]  }
  0xcb   :  { %5026 = vmatprep.subr.bf16.mxu0 %v7526_v38  ;;  %v7598_v38 = vld [vmem:[#allocation2 + $0x1144] ss:$24 sps:$4 sm:$0xff]  }
  0xcc   :  { %4895 = vmatmul.mubr.bf16.vlgmr.msra.gmra.mrb[0].mxu1 %v8811_v56 }
  0xcd   :  { %5018 = vmatmul.mubr.bf16.vlgmr.msra.gmra.mrb[0].mxu0 %v8815_v42  ;;  %4904 = vmatpush1.bf16.msra.mxu1 %v7521_v41  ;;  %v7601_v41 = vld [vmem:[#allocation2 + $0x874] ss:$24 sps:$4 sm:$0xff]  }
  0xce   :  { %5027 = vmatpush1.bf16.msra.mxu0 %v7524_v44  ;;  %4905 = vmatprep.subr.bf16.mxu1 %v7529_v45  ;;  %v7604_v44 = vld [vmem:[#allocation2 + $0x1174] ss:$24 sps:$4 sm:$0xff]   ;;  %v7599_v45 = vld [vmem:[#allocation2 + $0x870] ss:$24 sps:$4 sm:$0xff]  }
  0xcf   :  { %5028 = vmatprep.subr.bf16.mxu0 %v7532_v46  ;;  %4935 = vmatprep.mubr.bf16.mxu1 %v8817_v47  ;;  %v7602_v46 = vld [vmem:[#allocation2 + $0x1170] ss:$24 sps:$4 sm:$0xff]  }
  0xd0   :  { %5058 = vmatprep.mubr.bf16.mxu0 %v8819_v48 }
  0xd1   :  { %4906 = vmatpush1.bf16.msra.mxu1 %v7527_v14  ;;  %v7607_v14 = vld [vmem:[#allocation2 + $0x8a4] ss:$24 sps:$4 sm:$0xff]  }
  0xd2   :  { %5029 = vmatpush1.bf16.msra.mxu0 %v7530_v50  ;;  %4907 = vmatprep.subr.bf16.mxu1 %v7535_v51  ;;  %v7610_v50 = vld [vmem:[#allocation2 + $0x11a4] ss:$24 sps:$4 sm:$0xff]   ;;  %v7605_v51 = vld [vmem:[#allocation2 + $0x8a0] ss:$24 sps:$4 sm:$0xff]  }
  0xd3   :  { %5030 = vmatprep.subr.bf16.mxu0 %v7538_v52  ;;  %v7608_v52 = vld [vmem:[#allocation2 + $0x11a0] ss:$24 sps:$4 sm:$0xff]  }
  0xd5   :  { %4908 = vmatpush1.bf16.msra.mxu1 %v7533_v53  ;;  %v8828_v53 = vld [vmem:[%s8931_s0 + $0x18] sm:$0xff]  ;;  %s8659_s0 = smov [#allocation10]  }
  0xd6   :  { %5031 = vmatpush1.bf16.msra.mxu0 %v7536_v54  ;;  %4909 = vmatprep.subr.bf16.mxu1 %v7541_v55  ;;  %v7613_v54 = vld [vmem:[#allocation2 + $0x8d4] ss:$24 sps:$4 sm:$0xff]   ;;  %s6335_s25 = sshll.u32 %s8659_s0, 4  ;;  %s6336_s25 = int_to_ptr.vmem [resolvable:$true] %s6335_s25 }
  0xd7   :  { %5032 = vmatprep.subr.bf16.mxu0 %v7544_v57  ;;  %v7616_v55 = vld [vmem:[#allocation2 + $0x11d4] ss:$24 sps:$4 sm:$0xff]   ;;  %v8832_v57 = vrot.slane %v8828_v53, %v8748_v49  ;;  %s8620_s26 = scalar_lea.vmem %s6336_s25, 32  ;;  %p8625_p5 = scmp.lt.s32.totalorder %s6336_s25, %s6336_s25 }
  0xd8   :  { %p8621_p4 = scmp.ne.s32.totalorder %s6336_s25, %s8620_s26  ;;  %p8626_p6 = scmp.lt.s32.totalorder %s8620_s26, %s8620_s26 }
  0xd9   :  { %4910 = vmatpush1.bf16.msra.mxu1 %v7539_v58  ;;  %v7611_v58 = vld [vmem:[#allocation2 + $0x8d0] ss:$24 sps:$4 sm:$0xff]  }
  0xda   :  { %5033 = vmatpush1.bf16.msra.mxu0 %v7542_v59  ;;  %4911 = vmatprep.subr.bf16.mxu1 %v7547_v62  ;;  %v7614_v59 = vld [vmem:[#allocation2 + $0x11d0] ss:$24 sps:$4 sm:$0xff]   ;;  %v7620_v62 = vld [vmem:[#allocation2 + $0x1204] ss:$24 sps:$4 sm:$0xff]   ;;  %p8627_p7 = por %p8626_p6, %p8625_p5 }
  0xdb   :  { %5034 = vmatprep.subr.bf16.mxu0 %v7550_v63  ;;  %v7623_v63 = vld [vmem:[#allocation2 + $0xc] ss:$24 sps:$4 sm:$0xff]  }
  0xdc   :  { %p8628_p8 = pnand %p8627_p7, %p8621_p4 }
  0xdd   :  { %4912 = vmatpush1.bf16.msra.mxu1 %v7545_v0  ;;  %v147_v0 = vcombine.high %v8832_v57, %v8832_v57 }
  0xde   :  { %5035 = vmatpush1.bf16.msra.mxu0 %v7548_v1  ;;  %4913 = vmatprep.subr.bf16.mxu1 %v7553_v2  ;;  %v8838_v1 = vpack.c.bf16 %v8800_v33, %v8800_v33  ;;  %v7618_v2 = vld [vmem:[#allocation2 + $0x1200] ss:$24 sps:$4 sm:$0xff]   ;;  %v7624_v33 = vld [vmem:[#allocation2 + $0x1230] ss:$24 sps:$4 sm:$0xff]  }
  0xdf   :  { %5036 = vmatprep.subr.bf16.mxu0 %v7556_v3  ;;  %v7621_v3 = vld [vmem:[#allocation2 + $0x8] ss:$24 sps:$4 sm:$0xff]  }
  0xe1   :  { %4914 = vmatpush1.bf16.msra.mxu1 %v7551_v5  ;;  %v8842_v5 = vpack.c.bf16 %v8803_v34, %v8803_v34  ;;  %v7635_v34 = vld [vmem:[#allocation2 + $0x6c] ss:$24 sps:$4 sm:$0xff]  }
  0xe2   :  { %5037 = vmatpush1.bf16.msra.mxu0 %v7554_v6  ;;  %4915 = vmatprep.subr.bf16.mxu1 %v7559_v7  ;;  %v7626_v6 = vld [vmem:[#allocation2 + $0x1234] ss:$24 sps:$4 sm:$0xff]  }
  0xe3   :  { %5038 = vmatprep.subr.bf16.mxu0 %v7562_v8  ;;  %v7629_v7 = vld [vmem:[#allocation2 + $0x3c] ss:$24 sps:$4 sm:$0xff]   ;;  %v8844_v8 = vpack.c.bf16 %v147_v0, %v147_v0 }
  0xe4   :  { %v7692_v0 = vld [vmem:[#allocation2 + $0x1444] ss:$24 sps:$4 sm:$0xff]  }
  0xe5   :  { %4916 = vmatpush1.bf16.msra.mxu1 %v7557_v9  ;;  %v7627_v9 = vld [vmem:[#allocation2 + $0x38] ss:$24 sps:$4 sm:$0xff]  }
  0xe6   :  { %5039 = vmatpush1.bf16.msra.mxu0 %v7560_v10  ;;  %4917 = vmatprep.subr.bf16.mxu1 %v7565_v11  ;;  %v7632_v10 = vld [vmem:[#allocation2 + $0x1264] ss:$24 sps:$4 sm:$0xff]   ;;  %v7630_v11 = vld [vmem:[#allocation2 + $0x1260] ss:$24 sps:$4 sm:$0xff]  }
  0xe7   :  { %5040 = vmatprep.subr.bf16.mxu0 %v7568_v12  ;;  %v7633_v12 = vld [vmem:[#allocation2 + $0x68] ss:$24 sps:$4 sm:$0xff]  }
  0xe9   :  { %4918 = vmatpush1.bf16.msra.mxu1 %v7563_v13  ;;  %v7638_v13 = vld [vmem:[#allocation2 + $0x1294] ss:$24 sps:$4 sm:$0xff]  }
  0xea   :  { %5041 = vmatpush1.bf16.msra.mxu0 %v7566_v15  ;;  %4919 = vmatprep.subr.bf16.mxu1 %v7571_v16  ;;  %v7641_v15 = vld [vmem:[#allocation2 + $0x9c] ss:$24 sps:$4 sm:$0xff]   ;;  %v7636_v16 = vld [vmem:[#allocation2 + $0x1290] ss:$24 sps:$4 sm:$0xff]  }
  0xeb   :  { %5042 = vmatprep.subr.bf16.mxu0 %v7574_v17  ;;  %v7639_v17 = vld [vmem:[#allocation2 + $0x98] ss:$24 sps:$4 sm:$0xff]  }
  0xed   :  { %4920 = vmatpush1.bf16.msra.mxu1 %v7569_v18  ;;  %v7644_v18 = vld [vmem:[#allocation2 + $0x12c4] ss:$24 sps:$4 sm:$0xff]  }
  0xee   :  { %5043 = vmatpush1.bf16.msra.mxu0 %v7572_v19  ;;  %4921 = vmatprep.subr.bf16.mxu1 %v7577_v22  ;;  %v7647_v19 = vld [vmem:[#allocation2 + $0xcc] ss:$24 sps:$4 sm:$0xff]   ;;  %v7642_v22 = vld [vmem:[#allocation2 + $0x12c0] ss:$24 sps:$4 sm:$0xff]  }
  0xef   :  { %5044 = vmatprep.subr.bf16.mxu0 %v7580_v23  ;;  %v7645_v23 = vld [vmem:[#allocation2 + $0xc8] ss:$24 sps:$4 sm:$0xff]  }
  0xf1   :  { %4922 = vmatpush1.bf16.msra.mxu1 %v7575_v24  ;;  %v7650_v24 = vld [vmem:[#allocation2 + $0x12f4] ss:$24 sps:$4 sm:$0xff]  }
  0xf2   :  { %5045 = vmatpush1.bf16.msra.mxu0 %v7578_v25  ;;  %4923 = vmatprep.subr.bf16.mxu1 %v7583_v27  ;;  %v7653_v25 = vld [vmem:[#allocation2 + $0xfc] ss:$24 sps:$4 sm:$0xff]   ;;  %v7648_v27 = vld [vmem:[#allocation2 + $0x12f0] ss:$24 sps:$4 sm:$0xff]  }
  0xf3   :  { %5046 = vmatprep.subr.bf16.mxu0 %v7586_v28  ;;  %v7651_v28 = vld [vmem:[#allocation2 + $0xf8] ss:$24 sps:$4 sm:$0xff]  }
  0xf5   :  { %4924 = vmatpush1.bf16.msra.mxu1 %v7581_v29  ;;  %v7656_v29 = vld [vmem:[#allocation2 + $0x1324] ss:$24 sps:$4 sm:$0xff]  }
  0xf6   :  { %5047 = vmatpush1.bf16.msra.mxu0 %v7584_v30  ;;  %4925 = vmatprep.subr.bf16.mxu1 %v7589_v31  ;;  %v7659_v30 = vld [vmem:[#allocation2 + $0x12c] ss:$24 sps:$4 sm:$0xff]   ;;  %v7654_v31 = vld [vmem:[#allocation2 + $0x1320] ss:$24 sps:$4 sm:$0xff]  }
  0xf7   :  { %5048 = vmatprep.subr.bf16.mxu0 %v7592_v32  ;;  %v7657_v32 = vld [vmem:[#allocation2 + $0x128] ss:$24 sps:$4 sm:$0xff]  }
  0xf9   :  { %4926 = vmatpush1.bf16.msra.mxu1 %v7587_v35  ;;  %v7662_v35 = vld [vmem:[#allocation2 + $0x1354] ss:$24 sps:$4 sm:$0xff]  }
  0xfa   :  { %5049 = vmatpush1.bf16.msra.mxu0 %v7590_v36  ;;  %4927 = vmatprep.subr.bf16.mxu1 %v7595_v37  ;;  %v7665_v36 = vld [vmem:[#allocation2 + $0x15c] ss:$24 sps:$4 sm:$0xff]   ;;  %v7660_v37 = vld [vmem:[#allocation2 + $0x1350] ss:$24 sps:$4 sm:$0xff]  }
  0xfb   :  { %5050 = vmatprep.subr.bf16.mxu0 %v7598_v38  ;;  %v7663_v38 = vld [vmem:[#allocation2 + $0x158] ss:$24 sps:$4 sm:$0xff]  }
  0xfd   :  { %4928 = vmatpush1.bf16.msra.mxu1 %v7593_v39  ;;  %v7668_v39 = vld [vmem:[#allocation2 + $0x1384] ss:$24 sps:$4 sm:$0xff]  }
  0xfe   :  { %5051 = vmatpush1.bf16.msra.mxu0 %v7596_v40  ;;  %4929 = vmatprep.subr.bf16.mxu1 %v7601_v41  ;;  %v7671_v40 = vld [vmem:[#allocation2 + $0x18c] ss:$24 sps:$4 sm:$0xff]   ;;  %v7666_v41 = vld [vmem:[#allocation2 + $0x1380] ss:$24 sps:$4 sm:$0xff]  }
  0xff   :  { %5052 = vmatprep.subr.bf16.mxu0 %v7604_v44  ;;  %v7669_v44 = vld [vmem:[#allocation2 + $0x188] ss:$24 sps:$4 sm:$0xff]  }
 0x101   :  { %4930 = vmatpush1.bf16.msra.mxu1 %v7599_v45  ;;  %v7674_v45 = vld [vmem:[#allocation2 + $0x13b4] ss:$24 sps:$4 sm:$0xff]  }
 0x102   :  { %5053 = vmatpush1.bf16.msra.mxu0 %v7602_v46  ;;  %4931 = vmatprep.subr.bf16.mxu1 %v7607_v14  ;;  %v7677_v46 = vld [vmem:[#allocation2 + $0x1bc] ss:$24 sps:$4 sm:$0xff]   ;;  %v7672_v14 = vld [vmem:[#allocation2 + $0x13b0] ss:$24 sps:$4 sm:$0xff]  }
 0x103   :  { %5054 = vmatprep.subr.bf16.mxu0 %v7610_v50  ;;  %v7675_v50 = vld [vmem:[#allocation2 + $0x1b8] ss:$24 sps:$4 sm:$0xff]  }
 0x105   :  { %4932 = vmatpush1.bf16.msra.mxu1 %v7605_v51  ;;  %v7680_v51 = vld [vmem:[#allocation2 + $0x13e4] ss:$24 sps:$4 sm:$0xff]  }
 0x106   :  { %5055 = vmatpush1.bf16.msra.mxu0 %v7608_v52  ;;  %4933 = vmatprep.subr.bf16.mxu1 %v7613_v54  ;;  %v7683_v52 = vld [vmem:[#allocation2 + $0x1ec] ss:$24 sps:$4 sm:$0xff]   ;;  %v7678_v54 = vld [vmem:[#allocation2 + $0x13e0] ss:$24 sps:$4 sm:$0xff]  }
 0x107   :  { %5056 = vmatprep.subr.bf16.mxu0 %v7616_v55  ;;  %v7681_v55 = vld [vmem:[#allocation2 + $0x1e8] ss:$24 sps:$4 sm:$0xff]  }
 0x109   :  { %4934 = vmatpush1.bf16.msra.mxu1 %v7611_v58  ;;  %v7686_v58 = vld [vmem:[#allocation2 + $0x1414] ss:$24 sps:$4 sm:$0xff]  }
 0x10a   :  { %5057 = vmatpush1.bf16.msra.mxu0 %v7614_v59  ;;  %5149 = vmatprep.subr.bf16.mxu1 %v7623_v63  ;;  %v7689_v59 = vld [vmem:[#allocation2 + $0x21c] ss:$24 sps:$4 sm:$0xff]   ;;  %v7687_v63 = vld [vmem:[#allocation2 + $0x218] ss:$24 sps:$4 sm:$0xff]  }
 0x10b   :  { %5067 = vmatprep.subr.bf16.mxu0 %v7620_v62  ;;  %v7684_v62 = vld [vmem:[#allocation2 + $0x1410] ss:$24 sps:$4 sm:$0xff]  }
 0x10c   :  { %4936 = vmatmul.mubr.bf16.vlgmr.msra.gmra.mrb[0].mxu1 %v8838_v1 }
 0x10d   :  { %5059 = vmatmul.mubr.bf16.vlgmr.msra.gmra.mrb[0].mxu0 %v8842_v5  ;;  %5150 = vmatpush1.bf16.msra.mxu1 %v7621_v3  ;;  %v7690_v3 = vld [vmem:[#allocation2 + $0x1440] ss:$24 sps:$4 sm:$0xff]  }
 0x10e   :  { %5068 = vmatpush1.bf16.msra.mxu0 %v7618_v2  ;;  %5151 = vmatprep.subr.bf16.mxu1 %v7629_v7  ;;  %v7695_v2 = vld [vmem:[#allocation2 + $0x24c] ss:$24 sps:$4 sm:$0xff]  }
 0x10f   :  { %5069 = vmatprep.subr.bf16.mxu0 %v7626_v6  ;;  %5099 = vmatprep.mubr.bf16.mxu0 %v8844_v8  ;;  %v7693_v6 = vld [vmem:[#allocation2 + $0x248] ss:$24 sps:$4 sm:$0xff]   ;;  %v7698_v7 = vld [vmem:[#allocation2 + $0x1474] ss:$24 sps:$4 sm:$0xff]  }
 0x110   :  { %5181 = vmatprep.mubr.bf16.mxu1 %v8761_v61 }
 0x111   :  { %5152 = vmatpush1.bf16.msra.mxu1 %v7627_v9  ;;  %v7696_v9 = vld [vmem:[#allocation2 + $0x1470] ss:$24 sps:$4 sm:$0xff]  }
 0x112   :  { %5070 = vmatpush1.bf16.msra.mxu0 %v7624_v33  ;;  %5153 = vmatprep.subr.bf16.mxu1 %v7635_v34  ;;  %v7701_v33 = vld [vmem:[#allocation2 + $0x27c] ss:$24 sps:$4 sm:$0xff]  }
 0x113   :  { %5071 = vmatprep.subr.bf16.mxu0 %v7632_v10  ;;  %v7699_v10 = vld [vmem:[#allocation2 + $0x278] ss:$24 sps:$4 sm:$0xff]   ;;  %v7704_v34 = vld [vmem:[#allocation2 + $0x14a4] ss:$24 sps:$4 sm:$0xff]  }
 0x115   :  { %5154 = vmatpush1.bf16.msra.mxu1 %v7633_v12  ;;  %v132_v12 = vcombine.high %v8828_v53, %v8828_v53 }
 0x116   :  { %5072 = vmatpush1.bf16.msra.mxu0 %v7630_v11  ;;  %5155 = vmatprep.subr.bf16.mxu1 %v7641_v15  ;;  %v7707_v11 = vld [vmem:[#allocation2 + $0x2ac] ss:$24 sps:$4 sm:$0xff]   ;;  %v7705_v15 = vld [vmem:[#allocation2 + $0x2a8] ss:$24 sps:$4 sm:$0xff]  }
 0x117   :  { %5073 = vmatprep.subr.bf16.mxu0 %v7638_v13  ;;  %v7702_v13 = vld [vmem:[#allocation2 + $0x14a0] ss:$24 sps:$4 sm:$0xff]  }
 0x119   :  { %5156 = vmatpush1.bf16.msra.mxu1 %v7639_v17  ;;  %v7713_v17 = vld [vmem:[#allocation2 + $0x2dc] ss:$24 sps:$4 sm:$0xff]  }
 0x11a   :  { %5074 = vmatpush1.bf16.msra.mxu0 %v7636_v16  ;;  %5157 = vmatprep.subr.bf16.mxu1 %v7647_v19  ;;  %v7710_v16 = vld [vmem:[#allocation2 + $0x14d4] ss:$24 sps:$4 sm:$0xff]   ;;  %v7708_v19 = vld [vmem:[#allocation2 + $0x14d0] ss:$24 sps:$4 sm:$0xff]  }
 0x11b   :  { %5075 = vmatprep.subr.bf16.mxu0 %v7644_v18  ;;  %v8853_v18 = vrot.slane %v132_v12, %v8748_v49  ;;  %v7722_v49 = vld [vmem:[#allocation2 + $0x1534] ss:$24 sps:$4 sm:$0xff]   ;;  %v7771_v12 = vld [vmem:[#allocation2 + $0x4b8] ss:$24 sps:$4 sm:$0xff]  }
 0x11d   :  { %5158 = vmatpush1.bf16.msra.mxu1 %v7645_v23  ;;  %v7716_v23 = vld [vmem:[#allocation2 + $0x1504] ss:$24 sps:$4 sm:$0xff]   ;;  %v148_v53 = vcombine.high %v8853_v18, %v8853_v18 }
 0x11e   :  { %5076 = vmatpush1.bf16.msra.mxu0 %v7642_v22  ;;  %5159 = vmatprep.subr.bf16.mxu1 %v7653_v25  ;;  %v7711_v22 = vld [vmem:[#allocation2 + $0x2d8] ss:$24 sps:$4 sm:$0xff]  }
 0x11f   :  { %5077 = vmatprep.subr.bf16.mxu0 %v7650_v24  ;;  %v7719_v24 = vld [vmem:[#allocation2 + $0x30c] ss:$24 sps:$4 sm:$0xff]   ;;  %v7714_v25 = vld [vmem:[#allocation2 + $0x1500] ss:$24 sps:$4 sm:$0xff]  }
 0x121   :  { %5160 = vmatpush1.bf16.msra.mxu1 %v7651_v28  ;;  %v8859_v28 = vpack.c.bf16 %v8832_v57, %v8832_v57  ;;  %v7731_v57 = vld [vmem:[#allocation2 + $0x36c] ss:$24 sps:$4 sm:$0xff]  }
 0x122   :  { %5078 = vmatpush1.bf16.msra.mxu0 %v7648_v27  ;;  %5161 = vmatprep.subr.bf16.mxu1 %v7659_v30  ;;  %v7717_v27 = vld [vmem:[#allocation2 + $0x308] ss:$24 sps:$4 sm:$0xff]   ;;  %v8861_v30 = vpack.c.bf16 %v148_v53, %v148_v53  ;;  %v7788_v53 = vld [vmem:[#allocation2 + $0x1744] ss:$24 sps:$4 sm:$0xff]  }
 0x123   :  { %5079 = vmatprep.subr.bf16.mxu0 %v7656_v29  ;;  %v7725_v29 = vld [vmem:[#allocation2 + $0x33c] ss:$24 sps:$4 sm:$0xff]  }
 0x125   :  { %5162 = vmatpush1.bf16.msra.mxu1 %v7657_v32  ;;  %v7723_v32 = vld [vmem:[#allocation2 + $0x338] ss:$24 sps:$4 sm:$0xff]  }
 0x126   :  { %5080 = vmatpush1.bf16.msra.mxu0 %v7654_v31  ;;  %5163 = vmatprep.subr.bf16.mxu1 %v7665_v36  ;;  %v7720_v31 = vld [vmem:[#allocation2 + $0x1530] ss:$24 sps:$4 sm:$0xff]   ;;  %v7726_v36 = vld [vmem:[#allocation2 + $0x1560] ss:$24 sps:$4 sm:$0xff]  }
 0x127   :  { %5081 = vmatprep.subr.bf16.mxu0 %v7662_v35  ;;  %v7728_v35 = vld [vmem:[#allocation2 + $0x1564] ss:$24 sps:$4 sm:$0xff]  }
 0x129   :  { %5164 = vmatpush1.bf16.msra.mxu1 %v7663_v38  ;;  %v7734_v38 = vld [vmem:[#allocation2 + $0x1594] ss:$24 sps:$4 sm:$0xff]  }
 0x12a   :  { %5082 = vmatpush1.bf16.msra.mxu0 %v7660_v37  ;;  %5165 = vmatprep.subr.bf16.mxu1 %v7671_v40  ;;  %v7729_v37 = vld [vmem:[#allocation2 + $0x368] ss:$24 sps:$4 sm:$0xff]  }
 0x12b   :  { %5083 = vmatprep.subr.bf16.mxu0 %v7668_v39  ;;  %v7737_v39 = vld [vmem:[#allocation2 + $0x39c] ss:$24 sps:$4 sm:$0xff]   ;;  %v7732_v40 = vld [vmem:[#allocation2 + $0x1590] ss:$24 sps:$4 sm:$0xff]  }
 0x12d   :  { %5166 = vmatpush1.bf16.msra.mxu1 %v7669_v44  ;;  %v7740_v44 = vld [vmem:[#allocation2 + $0x15c4] ss:$24 sps:$4 sm:$0xff]  }
 0x12e   :  { %5084 = vmatpush1.bf16.msra.mxu0 %v7666_v41  ;;  %5167 = vmatprep.subr.bf16.mxu1 %v7677_v46  ;;  %v7735_v41 = vld [vmem:[#allocation2 + $0x398] ss:$24 sps:$4 sm:$0xff]  }
 0x12f   :  { %5085 = vmatprep.subr.bf16.mxu0 %v7674_v45  ;;  %v7743_v45 = vld [vmem:[#allocation2 + $0x3cc] ss:$24 sps:$4 sm:$0xff]   ;;  %v7738_v46 = vld [vmem:[#allocation2 + $0x15c0] ss:$24 sps:$4 sm:$0xff]  }
 0x131   :  { %5168 = vmatpush1.bf16.msra.mxu1 %v7675_v50  ;;  %v7746_v50 = vld [vmem:[#allocation2 + $0x15f4] ss:$24 sps:$4 sm:$0xff]  }
 0x132   :  { %5086 = vmatpush1.bf16.msra.mxu0 %v7672_v14  ;;  %5169 = vmatprep.subr.bf16.mxu1 %v7683_v52  ;;  %v7741_v14 = vld [vmem:[#allocation2 + $0x3c8] ss:$24 sps:$4 sm:$0xff]  }
 0x133   :  { %5087 = vmatprep.subr.bf16.mxu0 %v7680_v51  ;;  %v7749_v51 = vld [vmem:[#allocation2 + $0x3fc] ss:$24 sps:$4 sm:$0xff]   ;;  %v7744_v52 = vld [vmem:[#allocation2 + $0x15f0] ss:$24 sps:$4 sm:$0xff]  }
 0x135   :  { %5170 = vmatpush1.bf16.msra.mxu1 %v7681_v55  ;;  %v7752_v55 = vld [vmem:[#allocation2 + $0x1624] ss:$24 sps:$4 sm:$0xff]  }
 0x136   :  { %5088 = vmatpush1.bf16.msra.mxu0 %v7678_v54  ;;  %5171 = vmatprep.subr.bf16.mxu1 %v7689_v59  ;;  %v7747_v54 = vld [vmem:[#allocation2 + $0x3f8] ss:$24 sps:$4 sm:$0xff]  }
 0x137   :  { %5089 = vmatprep.subr.bf16.mxu0 %v7686_v58  ;;  %v7755_v58 = vld [vmem:[#allocation2 + $0x42c] ss:$24 sps:$4 sm:$0xff]   ;;  %v7750_v59 = vld [vmem:[#allocation2 + $0x1620] ss:$24 sps:$4 sm:$0xff]  }
 0x139   :  { %5172 = vmatpush1.bf16.msra.mxu1 %v7687_v63  ;;  %v7758_v63 = vld [vmem:[#allocation2 + $0x1654] ss:$24 sps:$4 sm:$0xff]  }
 0x13a   :  { %5090 = vmatpush1.bf16.msra.mxu0 %v7684_v62  ;;  %5173 = vmatprep.subr.bf16.mxu1 %v7695_v2  ;;  %v7753_v62 = vld [vmem:[#allocation2 + $0x428] ss:$24 sps:$4 sm:$0xff]  }
 0x13b   :  { %5091 = vmatprep.subr.bf16.mxu0 %v7692_v0  ;;  %v7761_v0 = vld [vmem:[#allocation2 + $0x45c] ss:$24 sps:$4 sm:$0xff]   ;;  %v7756_v2 = vld [vmem:[#allocation2 + $0x1650] ss:$24 sps:$4 sm:$0xff]  }
 0x13d   :  { %5174 = vmatpush1.bf16.msra.mxu1 %v7693_v6  ;;  %v7764_v6 = vld [vmem:[#allocation2 + $0x1684] ss:$24 sps:$4 sm:$0xff]  }
 0x13e   :  { %5092 = vmatpush1.bf16.msra.mxu0 %v7690_v3  ;;  %5175 = vmatprep.subr.bf16.mxu1 %v7701_v33  ;;  %v7759_v3 = vld [vmem:[#allocation2 + $0x458] ss:$24 sps:$4 sm:$0xff]  }
 0x13f   :  { %5093 = vmatprep.subr.bf16.mxu0 %v7698_v7  ;;  %v7767_v7 = vld [vmem:[#allocation2 + $0x48c] ss:$24 sps:$4 sm:$0xff]   ;;  %v7762_v33 = vld [vmem:[#allocation2 + $0x1680] ss:$24 sps:$4 sm:$0xff]  }
 0x141   :  { %5176 = vmatpush1.bf16.msra.mxu1 %v7699_v10  ;;  %v7770_v10 = vld [vmem:[#allocation2 + $0x16b4] ss:$24 sps:$4 sm:$0xff]  }
 0x142   :  { %5094 = vmatpush1.bf16.msra.mxu0 %v7696_v9  ;;  %5177 = vmatprep.subr.bf16.mxu1 %v7707_v11  ;;  %v7765_v9 = vld [vmem:[#allocation2 + $0x488] ss:$24 sps:$4 sm:$0xff]  }
 0x143   :  { %5095 = vmatprep.subr.bf16.mxu0 %v7704_v34  ;;  %v7773_v34 = vld [vmem:[#allocation2 + $0x4bc] ss:$24 sps:$4 sm:$0xff]   ;;  %v7768_v11 = vld [vmem:[#allocation2 + $0x16b0] ss:$24 sps:$4 sm:$0xff]  }
 0x145   :  { %5178 = vmatpush1.bf16.msra.mxu1 %v7705_v15  ;;  %v7779_v15 = vld [vmem:[#allocation2 + $0x4ec] ss:$24 sps:$4 sm:$0xff]  }
 0x146   :  { %5096 = vmatpush1.bf16.msra.mxu0 %v7702_v13  ;;  %5179 = vmatprep.subr.bf16.mxu1 %v7713_v17  ;;  %v7776_v13 = vld [vmem:[#allocation2 + $0x16e4] ss:$24 sps:$4 sm:$0xff]   ;;  %v7777_v17 = vld [vmem:[#allocation2 + $0x4e8] ss:$24 sps:$4 sm:$0xff]  }
 0x147   :  { %5097 = vmatprep.subr.bf16.mxu0 %v7710_v16  ;;  %v7774_v16 = vld [vmem:[#allocation2 + $0x16e0] ss:$24 sps:$4 sm:$0xff]  }
 0x149   :  { %5180 = vmatpush1.bf16.msra.mxu1 %v7711_v22  ;;  %v7785_v22 = vld [vmem:[#allocation2 + $0x51c] ss:$24 sps:$4 sm:$0xff]  }
 0x14a   :  { %5098 = vmatpush1.bf16.msra.mxu0 %v7708_v19  ;;  %5190 = vmatprep.subr.bf16.mxu1 %v7719_v24  ;;  %v7782_v19 = vld [vmem:[#allocation2 + $0x1714] ss:$24 sps:$4 sm:$0xff]   ;;  %v7783_v24 = vld [vmem:[#allocation2 + $0x518] ss:$24 sps:$4 sm:$0xff]  }
 0x14b   :  { %5108 = vmatprep.subr.bf16.mxu0 %v7716_v23  ;;  %v7780_v23 = vld [vmem:[#allocation2 + $0x1710] ss:$24 sps:$4 sm:$0xff]  }
 0x14c   :  { %5182 = vmatmul.mubr.bf16.vlgmr.msra.gmra.mrb[4].mxu1 %v8773_v20 }
 0x14d   :  { %5100 = vmatmul.mubr.bf16.vlgmr.msra.gmra.mrb[0].mxu0 %v8859_v28  ;;  %5191 = vmatpush1.bf16.msra.mxu1 %v7717_v27  ;;  %v7786_v27 = vld [vmem:[#allocation2 + $0x1740] ss:$24 sps:$4 sm:$0xff]  }
 0x14e   :  { %5109 = vmatpush1.bf16.msra.mxu0 %v7714_v25  ;;  %5192 = vmatprep.subr.bf16.mxu1 %v7725_v29  ;;  %v7791_v25 = vld [vmem:[#allocation2 + $0x54c] ss:$24 sps:$4 sm:$0xff]  }
 0x14f   :  { %5110 = vmatprep.subr.bf16.mxu0 %v7722_v49  ;;  %5140 = vmatprep.mubr.bf16.mxu0 %v8861_v30  ;;  %v7789_v49 = vld [vmem:[#allocation2 + $0x548] ss:$24 sps:$4 sm:$0xff]   ;;  %v7794_v29 = vld [vmem:[#allocation2 + $0x1774] ss:$24 sps:$4 sm:$0xff]  }
 0x150   :  { %5222 = vmatprep.mubr.bf16.mxu1 %v8777_v26 }
 0x151   :  { %5193 = vmatpush1.bf16.msra.mxu1 %v7723_v32  ;;  %v7792_v32 = vld [vmem:[#allocation2 + $0x1770] ss:$24 sps:$4 sm:$0xff]  }
 0x152   :  { %5111 = vmatpush1.bf16.msra.mxu0 %v7720_v31  ;;  %5194 = vmatprep.subr.bf16.mxu1 %v7731_v57  ;;  %v7797_v31 = vld [vmem:[#allocation2 + $0x57c] ss:$24 sps:$4 sm:$0xff]  }
 0x153   :  { %5112 = vmatprep.subr.bf16.mxu0 %v7728_v35  ;;  %v7795_v35 = vld [vmem:[#allocation2 + $0x578] ss:$24 sps:$4 sm:$0xff]   ;;  %v7800_v57 = vld [vmem:[#allocation2 + $0x17a4] ss:$24 sps:$4 sm:$0xff]  }
 0x155   :  { %5195 = vmatpush1.bf16.msra.mxu1 %v7729_v37  ;;  %v7798_v37 = vld [vmem:[#allocation2 + $0x17a0] ss:$24 sps:$4 sm:$0xff]  }
 0x156   :  { %5113 = vmatpush1.bf16.msra.mxu0 %v7726_v36  ;;  %5196 = vmatprep.subr.bf16.mxu1 %v7737_v39  ;;  %v7803_v36 = vld [vmem:[#allocation2 + $0x5ac] ss:$24 sps:$4 sm:$0xff]  }
 0x157   :  { %5114 = vmatprep.subr.bf16.mxu0 %v7734_v38  ;;  %v7801_v38 = vld [vmem:[#allocation2 + $0x5a8] ss:$24 sps:$4 sm:$0xff]   ;;  %v7806_v39 = vld [vmem:[#allocation2 + $0x17d4] ss:$24 sps:$4 sm:$0xff]  }
 0x159   :  { %5197 = vmatpush1.bf16.msra.mxu1 %v7735_v41  ;;  %v7804_v41 = vld [vmem:[#allocation2 + $0x17d0] ss:$24 sps:$4 sm:$0xff]  }
 0x15a   :  { %5115 = vmatpush1.bf16.msra.mxu0 %v7732_v40  ;;  %5198 = vmatprep.subr.bf16.mxu1 %v7743_v45  ;;  %v7809_v40 = vld [vmem:[#allocation2 + $0x5dc] ss:$24 sps:$4 sm:$0xff]   ;;  %v7813_v45 = vld [vmem:[#allocation2 + $0x60c] ss:$24 sps:$4 sm:$0xff]  }
 0x15b   :  { %5116 = vmatprep.subr.bf16.mxu0 %v7740_v44  ;;  %v7807_v44 = vld [vmem:[#allocation2 + $0x5d8] ss:$24 sps:$4 sm:$0xff]  }
 0x15d   :  { %5199 = vmatpush1.bf16.msra.mxu1 %v7741_v14  ;;  %v8869_v14 = vpack.c.bf16 %v8853_v18, %v8853_v18  ;;  %v7825_v18 = vld [vmem:[#allocation2 + $0x66c] ss:$24 sps:$4 sm:$0xff]  }
 0x15e   :  { %5117 = vmatpush1.bf16.msra.mxu0 %v7738_v46  ;;  %5200 = vmatprep.subr.bf16.mxu1 %v7749_v51  ;;  %v7816_v46 = vld [vmem:[#allocation2 + $0x14] ss:$24 sps:$4 sm:$0xff]   ;;  %v7814_v51 = vld [vmem:[#allocation2 + $0x10] ss:$24 sps:$4 sm:$0xff]  }
 0x15f   :  { %5118 = vmatprep.subr.bf16.mxu0 %v7746_v50  ;;  %v7811_v50 = vld [vmem:[#allocation2 + $0x608] ss:$24 sps:$4 sm:$0xff]  }
 0x161   :  { %5201 = vmatpush1.bf16.msra.mxu1 %v7747_v54  ;;  %v7822_v54 = vld [vmem:[#allocation2 + $0x44] ss:$24 sps:$4 sm:$0xff]  }
 0x162   :  { %5119 = vmatpush1.bf16.msra.mxu0 %v7744_v52  ;;  %5202 = vmatprep.subr.bf16.mxu1 %v7755_v58  ;;  %v7819_v52 = vld [vmem:[#allocation2 + $0x63c] ss:$24 sps:$4 sm:$0xff]   ;;  %v7820_v58 = vld [vmem:[#allocation2 + $0x40] ss:$24 sps:$4 sm:$0xff]  }
 0x163   :  { %5120 = vmatprep.subr.bf16.mxu0 %v7752_v55  ;;  %v7817_v55 = vld [vmem:[#allocation2 + $0x638] ss:$24 sps:$4 sm:$0xff]  }
 0x165   :  { %5203 = vmatpush1.bf16.msra.mxu1 %v7753_v62  ;;  %v7823_v62 = vld [vmem:[#allocation2 + $0x668] ss:$24 sps:$4 sm:$0xff]  }
 0x166   :  { %5121 = vmatpush1.bf16.msra.mxu0 %v7750_v59  ;;  %5204 = vmatprep.subr.bf16.mxu1 %v7761_v0  ;;  %v7828_v59 = vld [vmem:[#allocation2 + $0x74] ss:$24 sps:$4 sm:$0xff]  }
 0x167   :  { %5122 = vmatprep.subr.bf16.mxu0 %v7758_v63  ;;  %v7826_v63 = vld [vmem:[#allocation2 + $0x70] ss:$24 sps:$4 sm:$0xff]   ;;  %v7831_v0 = vld [vmem:[#allocation2 + $0x69c] ss:$24 sps:$4 sm:$0xff]  }
 0x169   :  { %5205 = vmatpush1.bf16.msra.mxu1 %v7759_v3  ;;  %v7829_v3 = vld [vmem:[#allocation2 + $0x698] ss:$24 sps:$4 sm:$0xff]  }
 0x16a   :  { %5123 = vmatpush1.bf16.msra.mxu0 %v7756_v2  ;;  %5206 = vmatprep.subr.bf16.mxu1 %v7767_v7  ;;  %v7834_v2 = vld [vmem:[#allocation2 + $0xa4] ss:$24 sps:$4 sm:$0xff]  }
 0x16b   :  { %5124 = vmatprep.subr.bf16.mxu0 %v7764_v6  ;;  %v7832_v6 = vld [vmem:[#allocation2 + $0xa0] ss:$24 sps:$4 sm:$0xff]   ;;  %v7837_v7 = vld [vmem:[#allocation2 + $0x6cc] ss:$24 sps:$4 sm:$0xff]  }
 0x16d   :  { %5207 = vmatpush1.bf16.msra.mxu1 %v7765_v9  ;;  %v7835_v9 = vld [vmem:[#allocation2 + $0x6c8] ss:$24 sps:$4 sm:$0xff]  }
 0x16e   :  { %5125 = vmatpush1.bf16.msra.mxu0 %v7762_v33  ;;  %5208 = vmatprep.subr.bf16.mxu1 %v7773_v34  ;;  %v7840_v33 = vld [vmem:[#allocation2 + $0xd4] ss:$24 sps:$4 sm:$0xff]   ;;  %v7846_v34 = vld [vmem:[#allocation2 + $0x104] ss:$24 sps:$4 sm:$0xff]  }
 0x16f   :  { %5126 = vmatprep.subr.bf16.mxu0 %v7770_v10  ;;  %v7843_v10 = vld [vmem:[#allocation2 + $0x6fc] ss:$24 sps:$4 sm:$0xff]  }
 0x171   :  { %5209 = vmatpush1.bf16.msra.mxu1 %v7771_v12  ;;  %v7844_v12 = vld [vmem:[#allocation2 + $0x100] ss:$24 sps:$4 sm:$0xff]  }
 0x172   :  { %5127 = vmatpush1.bf16.msra.mxu0 %v7768_v11  ;;  %5210 = vmatprep.subr.bf16.mxu1 %v7779_v15  ;;  %v7841_v11 = vld [vmem:[#allocation2 + $0x6f8] ss:$24 sps:$4 sm:$0xff]   ;;  %v7852_v15 = vld [vmem:[#allocation2 + $0x134] ss:$24 sps:$4 sm:$0xff]  }
 0x173   :  { %5128 = vmatprep.subr.bf16.mxu0 %v7776_v13  ;;  %v7849_v13 = vld [vmem:[#allocation2 + $0x72c] ss:$24 sps:$4 sm:$0xff]  }
 0x175   :  { %5211 = vmatpush1.bf16.msra.mxu1 %v7777_v17  ;;  %v7850_v17 = vld [vmem:[#allocation2 + $0x130] ss:$24 sps:$4 sm:$0xff]  }
 0x176   :  { %5129 = vmatpush1.bf16.msra.mxu0 %v7774_v16  ;;  %5212 = vmatprep.subr.bf16.mxu1 %v7785_v22  ;;  %v7847_v16 = vld [vmem:[#allocation2 + $0x728] ss:$24 sps:$4 sm:$0xff]   ;;  %v7858_v22 = vld [vmem:[#allocation2 + $0x164] ss:$24 sps:$4 sm:$0xff]  }
 0x177   :  { %5130 = vmatprep.subr.bf16.mxu0 %v7782_v19  ;;  %v7855_v19 = vld [vmem:[#allocation2 + $0x75c] ss:$24 sps:$4 sm:$0xff]  }
 0x179   :  { %5213 = vmatpush1.bf16.msra.mxu1 %v7783_v24  ;;  %v7856_v24 = vld [vmem:[#allocation2 + $0x160] ss:$24 sps:$4 sm:$0xff]  }
 0x17a   :  { %5131 = vmatpush1.bf16.msra.mxu0 %v7780_v23  ;;  %5214 = vmatprep.subr.bf16.mxu1 %v7791_v25  ;;  %v7853_v23 = vld [vmem:[#allocation2 + $0x758] ss:$24 sps:$4 sm:$0xff]   ;;  %v7864_v25 = vld [vmem:[#allocation2 + $0x194] ss:$24 sps:$4 sm:$0xff]  }
 0x17b   :  { %5132 = vmatprep.subr.bf16.mxu0 %v7788_v53  ;;  %v7861_v53 = vld [vmem:[#allocation2 + $0x78c] ss:$24 sps:$4 sm:$0xff]  }
 0x17d   :  { %5215 = vmatpush1.bf16.msra.mxu1 %v7789_v49  ;;  %v7862_v49 = vld [vmem:[#allocation2 + $0x190] ss:$24 sps:$4 sm:$0xff]  }
 0x17e   :  { %5133 = vmatpush1.bf16.msra.mxu0 %v7786_v27  ;;  %5216 = vmatprep.subr.bf16.mxu1 %v7797_v31  ;;  %v7859_v27 = vld [vmem:[#allocation2 + $0x788] ss:$24 sps:$4 sm:$0xff]   ;;  %v7870_v31 = vld [vmem:[#allocation2 + $0x1c4] ss:$24 sps:$4 sm:$0xff]  }
 0x17f   :  { %5134 = vmatprep.subr.bf16.mxu0 %v7794_v29  ;;  %v7867_v29 = vld [vmem:[#allocation2 + $0x7bc] ss:$24 sps:$4 sm:$0xff]  }
 0x181   :  { %5217 = vmatpush1.bf16.msra.mxu1 %v7795_v35  ;;  %v7868_v35 = vld [vmem:[#allocation2 + $0x1c0] ss:$24 sps:$4 sm:$0xff]  }
 0x182   :  { %5135 = vmatpush1.bf16.msra.mxu0 %v7792_v32  ;;  %5218 = vmatprep.subr.bf16.mxu1 %v7803_v36  ;;  %v7865_v32 = vld [vmem:[#allocation2 + $0x7b8] ss:$24 sps:$4 sm:$0xff]   ;;  %v7876_v36 = vld [vmem:[#allocation2 + $0x1f4] ss:$24 sps:$4 sm:$0xff]  }
 0x183   :  { %5136 = vmatprep.subr.bf16.mxu0 %v7800_v57  ;;  %v7873_v57 = vld [vmem:[#allocation2 + $0x7ec] ss:$24 sps:$4 sm:$0xff]  }
 0x185   :  { %5219 = vmatpush1.bf16.msra.mxu1 %v7801_v38  ;;  %v7874_v38 = vld [vmem:[#allocation2 + $0x1f0] ss:$24 sps:$4 sm:$0xff]  }
 0x186   :  { %5137 = vmatpush1.bf16.msra.mxu0 %v7798_v37  ;;  %5220 = vmatprep.subr.bf16.mxu1 %v7809_v40  ;;  %v7871_v37 = vld [vmem:[#allocation2 + $0x7e8] ss:$24 sps:$4 sm:$0xff]   ;;  %v7882_v40 = vld [vmem:[#allocation2 + $0x224] ss:$24 sps:$4 sm:$0xff]  }
 0x187   :  { %5138 = vmatprep.subr.bf16.mxu0 %v7806_v39  ;;  %v7879_v39 = vld [vmem:[#allocation2 + $0x81c] ss:$24 sps:$4 sm:$0xff]  }
 0x189   :  { %5221 = vmatpush1.bf16.msra.mxu1 %v7807_v44  ;;  %v7880_v44 = vld [vmem:[#allocation2 + $0x220] ss:$24 sps:$4 sm:$0xff]  }
 0x18a   :  { %5139 = vmatpush1.bf16.msra.mxu0 %v7804_v41  ;;  %5231 = vmatprep.subr.bf16.mxu1 %v7813_v45  ;;  %v7877_v41 = vld [vmem:[#allocation2 + $0x818] ss:$24 sps:$4 sm:$0xff]   ;;  %v7885_v45 = vld [vmem:[#allocation2 + $0x84c] ss:$24 sps:$4 sm:$0xff]  }
 0x18b   :  { %5477 = vmatprep.subr.bf16.mxu0 %v7816_v46  ;;  %v7888_v46 = vld [vmem:[#allocation2 + $0x254] ss:$24 sps:$4 sm:$0xff]  }
 0x18c   :  { %5223 = vmatmul.mubr.bf16.vlgmr.msra.gmra.mrb[4].mxu1 %v8811_v56 }
 0x18d   :  { %5141 = vmatmul.mubr.bf16.vlgmr.msra.gmra.mrb[0].mxu0 %v8869_v14  ;;  %5232 = vmatpush1.bf16.msra.mxu1 %v7811_v50  ;;  %v7883_v50 = vld [vmem:[#allocation2 + $0x848] ss:$24 sps:$4 sm:$0xff]  }
 0x18e   :  { %5478 = vmatpush1.bf16.msra.mxu0 %v7814_v51  ;;  %5233 = vmatprep.subr.bf16.mxu1 %v7819_v52  ;;  %v7886_v51 = vld [vmem:[#allocation2 + $0x250] ss:$24 sps:$4 sm:$0xff]   ;;  %v7891_v52 = vld [vmem:[#allocation2 + $0x87c] ss:$24 sps:$4 sm:$0xff]  }
 0x18f   :  { %5479 = vmatprep.subr.bf16.mxu0 %v7822_v54  ;;  %5263 = vmatprep.mubr.bf16.mxu1 %v8817_v47  ;;  %v7894_v54 = vld [vmem:[#allocation2 + $0x284] ss:$24 sps:$4 sm:$0xff]  }
 0x190   :  { %5509 = vmatprep.mubr.bf16.mxu0 %v8761_v61  ;;  %v7838_v61 = vld [vmem:[#allocation2 + $0xd0] ss:$24 sps:$4 sm:$0xff]  }
 0x191   :  { %5234 = vmatpush1.bf16.msra.mxu1 %v7817_v55  ;;  %v7889_v55 = vld [vmem:[#allocation2 + $0x878] ss:$24 sps:$4 sm:$0xff]  }
 0x192   :  { %5480 = vmatpush1.bf16.msra.mxu0 %v7820_v58  ;;  %5235 = vmatprep.subr.bf16.mxu1 %v7825_v18  ;;  %v7892_v58 = vld [vmem:[#allocation2 + $0x280] ss:$24 sps:$4 sm:$0xff]   ;;  %v7897_v18 = vld [vmem:[#allocation2 + $0x8ac] ss:$24 sps:$4 sm:$0xff]  }
 0x193   :  { %5481 = vmatprep.subr.bf16.mxu0 %v7828_v59  ;;  %v7900_v59 = vld [vmem:[#allocation2 + $0x2b4] ss:$24 sps:$4 sm:$0xff]  }
 0x195   :  { %5236 = vmatpush1.bf16.msra.mxu1 %v7823_v62  ;;  %v7895_v62 = vld [vmem:[#allocation2 + $0x8a8] ss:$24 sps:$4 sm:$0xff]  }
 0x196   :  { %5482 = vmatpush1.bf16.msra.mxu0 %v7826_v63  ;;  %5237 = vmatprep.subr.bf16.mxu1 %v7831_v0  ;;  %v7898_v63 = vld [vmem:[#allocation2 + $0x2b0] ss:$24 sps:$4 sm:$0xff]   ;;  %v7903_v0 = vld [vmem:[#allocation2 + $0x8dc] ss:$24 sps:$4 sm:$0xff]  }
 0x197   :  { %5483 = vmatprep.subr.bf16.mxu0 %v7834_v2  ;;  %v7906_v2 = vld [vmem:[#allocation2 + $0x2e4] ss:$24 sps:$4 sm:$0xff]  }
 0x199   :  { %5238 = vmatpush1.bf16.msra.mxu1 %v7829_v3  ;;  %v7901_v3 = vld [vmem:[#allocation2 + $0x8d8] ss:$24 sps:$4 sm:$0xff]  }
 0x19a   :  { %5484 = vmatpush1.bf16.msra.mxu0 %v7832_v6  ;;  %5239 = vmatprep.subr.bf16.mxu1 %v7837_v7  ;;  %v7904_v6 = vld [vmem:[#allocation2 + $0x2e0] ss:$24 sps:$4 sm:$0xff]   ;;  %v7909_v7 = vld [vmem:[#allocation2 + $0x90c] ss:$24 sps:$4 sm:$0xff]  }
 0x19b   :  { %5485 = vmatprep.subr.bf16.mxu0 %v7840_v33  ;;  %v7912_v33 = vld [vmem:[#allocation2 + $0x314] ss:$24 sps:$4 sm:$0xff]  }
 0x19d   :  { %5240 = vmatpush1.bf16.msra.mxu1 %v7835_v9  ;;  %v7907_v9 = vld [vmem:[#allocation2 + $0x908] ss:$24 sps:$4 sm:$0xff]  }
 0x19e   :  { %5486 = vmatpush1.bf16.msra.mxu0 %v7838_v61  ;;  %5241 = vmatprep.subr.bf16.mxu1 %v7843_v10  ;;  %v7910_v61 = vld [vmem:[#allocation2 + $0x310] ss:$24 sps:$4 sm:$0xff]   ;;  %v7915_v10 = vld [vmem:[#allocation2 + $0x93c] ss:$24 sps:$4 sm:$0xff]  }
 0x19f   :  { %5487 = vmatprep.subr.bf16.mxu0 %v7846_v34  ;;  %v7918_v34 = vld [vmem:[#allocation2 + $0x344] ss:$24 sps:$4 sm:$0xff]  }
 0x1a1   :  { %5242 = vmatpush1.bf16.msra.mxu1 %v7841_v11  ;;  %v7913_v11 = vld [vmem:[#allocation2 + $0x938] ss:$24 sps:$4 sm:$0xff]  }
 0x1a2   :  { %5488 = vmatpush1.bf16.msra.mxu0 %v7844_v12  ;;  %5243 = vmatprep.subr.bf16.mxu1 %v7849_v13  ;;  %v7916_v12 = vld [vmem:[#allocation2 + $0x340] ss:$24 sps:$4 sm:$0xff]   ;;  %v7921_v13 = vld [vmem:[#allocation2 + $0x96c] ss:$24 sps:$4 sm:$0xff]  }
 0x1a3   :  { %5489 = vmatprep.subr.bf16.mxu0 %v7852_v15  ;;  %v7924_v15 = vld [vmem:[#allocation2 + $0x374] ss:$24 sps:$4 sm:$0xff]  }
 0x1a5   :  { %5244 = vmatpush1.bf16.msra.mxu1 %v7847_v16  ;;  %v7919_v16 = vld [vmem:[#allocation2 + $0x968] ss:$24 sps:$4 sm:$0xff]  }
 0x1a6   :  { %5490 = vmatpush1.bf16.msra.mxu0 %v7850_v17  ;;  %5245 = vmatprep.subr.bf16.mxu1 %v7855_v19  ;;  %v7922_v17 = vld [vmem:[#allocation2 + $0x370] ss:$24 sps:$4 sm:$0xff]   ;;  %v7927_v19 = vld [vmem:[#allocation2 + $0x99c] ss:$24 sps:$4 sm:$0xff]  }
 0x1a7   :  { %5491 = vmatprep.subr.bf16.mxu0 %v7858_v22  ;;  %v7925_v22 = vld [vmem:[#allocation2 + $0x998] ss:$24 sps:$4 sm:$0xff]  }
 0x1a9   :  { %5246 = vmatpush1.bf16.msra.mxu1 %v7853_v23  ;;  %v7928_v23 = vld [vmem:[#allocation2 + $0x3a0] ss:$24 sps:$4 sm:$0xff]  }
 0x1aa   :  { %5492 = vmatpush1.bf16.msra.mxu0 %v7856_v24  ;;  %5247 = vmatprep.subr.bf16.mxu1 %v7861_v53  ;;  %v7933_v24 = vld [vmem:[#allocation2 + $0x9cc] ss:$24 sps:$4 sm:$0xff]  }
 0x1ab   :  { %5493 = vmatprep.subr.bf16.mxu0 %v7864_v25  ;;  %v7936_v53 = vld [vmem:[#allocation2 + $0x3d4] ss:$24 sps:$4 sm:$0xff]   ;;  %v7931_v25 = vld [vmem:[#allocation2 + $0x9c8] ss:$24 sps:$4 sm:$0xff]  }
 0x1ad   :  { %5248 = vmatpush1.bf16.msra.mxu1 %v7859_v27  ;;  %v7939_v27 = vld [vmem:[#allocation2 + $0x9fc] ss:$24 sps:$4 sm:$0xff]  }
 0x1ae   :  { %5494 = vmatpush1.bf16.msra.mxu0 %v7862_v49  ;;  %5249 = vmatprep.subr.bf16.mxu1 %v7867_v29  ;;  %v7942_v49 = vld [vmem:[#allocation2 + $0x404] ss:$24 sps:$4 sm:$0xff]   ;;  %v7937_v29 = vld [vmem:[#allocation2 + $0x9f8] ss:$24 sps:$4 sm:$0xff]  }
 0x1af   :  { %5495 = vmatprep.subr.bf16.mxu0 %v7870_v31  ;;  %v7940_v31 = vld [vmem:[#allocation2 + $0x400] ss:$24 sps:$4 sm:$0xff]  }
 0x1b1   :  { %5250 = vmatpush1.bf16.msra.mxu1 %v7865_v32  ;;  %v7945_v32 = vld [vmem:[#allocation2 + $0xa2c] ss:$24 sps:$4 sm:$0xff]  }
 0x1b2   :  { %5496 = vmatpush1.bf16.msra.mxu0 %v7868_v35  ;;  %5251 = vmatprep.subr.bf16.mxu1 %v7873_v57  ;;  %v7948_v35 = vld [vmem:[#allocation2 + $0x434] ss:$24 sps:$4 sm:$0xff]  }
 0x1b3   :  { %5497 = vmatprep.subr.bf16.mxu0 %v7876_v36  ;;  %v7943_v36 = vld [vmem:[#allocation2 + $0xa28] ss:$24 sps:$4 sm:$0xff]  }
 0x1b5   :  { %5252 = vmatpush1.bf16.msra.mxu1 %v7871_v37  ;;  %v7946_v37 = vld [vmem:[#allocation2 + $0x430] ss:$24 sps:$4 sm:$0xff]  }
 0x1b6   :  { %5498 = vmatpush1.bf16.msra.mxu0 %v7874_v38  ;;  %5253 = vmatprep.subr.bf16.mxu1 %v7879_v39 }
 0x1b7   :  { %5499 = vmatprep.subr.bf16.mxu0 %v7882_v40 }
 0x1b9   :  { %5254 = vmatpush1.bf16.msra.mxu1 %v7877_v41  ;;  %v7951_v41 = vld [vmem:[#allocation2 + $0xa5c] ss:$24 sps:$4 sm:$0xff]  }
 0x1ba   :  { %5500 = vmatpush1.bf16.msra.mxu0 %v7880_v44  ;;  %5255 = vmatprep.subr.bf16.mxu1 %v7885_v45  ;;  %v7954_v44 = vld [vmem:[#allocation2 + $0x464] ss:$24 sps:$4 sm:$0xff]   ;;  %v7949_v45 = vld [vmem:[#allocation2 + $0xa58] ss:$24 sps:$4 sm:$0xff]  }
 0x1bb   :  { %5501 = vmatprep.subr.bf16.mxu0 %v7888_v46  ;;  %v7952_v46 = vld [vmem:[#allocation2 + $0x460] ss:$24 sps:$4 sm:$0xff]  }
 0x1bd   :  { %5256 = vmatpush1.bf16.msra.mxu1 %v7883_v50  ;;  %v7957_v50 = vld [vmem:[#allocation2 + $0xa8c] ss:$24 sps:$4 sm:$0xff]  }
 0x1be   :  { %5502 = vmatpush1.bf16.msra.mxu0 %v7886_v51  ;;  %5257 = vmatprep.subr.bf16.mxu1 %v7891_v52  ;;  %v7960_v51 = vld [vmem:[#allocation2 + $0x494] ss:$24 sps:$4 sm:$0xff]   ;;  %v7955_v52 = vld [vmem:[#allocation2 + $0xa88] ss:$24 sps:$4 sm:$0xff]  }
 0x1bf   :  { %5503 = vmatprep.subr.bf16.mxu0 %v7894_v54  ;;  %v7958_v54 = vld [vmem:[#allocation2 + $0x490] ss:$24 sps:$4 sm:$0xff]  }
 0x1c1   :  { %5258 = vmatpush1.bf16.msra.mxu1 %v7889_v55  ;;  %v7963_v55 = vld [vmem:[#allocation2 + $0xabc] ss:$24 sps:$4 sm:$0xff]  }
 0x1c2   :  { %5504 = vmatpush1.bf16.msra.mxu0 %v7892_v58  ;;  %5259 = vmatprep.subr.bf16.mxu1 %v7897_v18  ;;  %v7966_v58 = vld [vmem:[#allocation2 + $0x4c4] ss:$24 sps:$4 sm:$0xff]   ;;  %v7961_v18 = vld [vmem:[#allocation2 + $0xab8] ss:$24 sps:$4 sm:$0xff]  }
 0x1c3   :  { %5505 = vmatprep.subr.bf16.mxu0 %v7900_v59  ;;  %v7964_v59 = vld [vmem:[#allocation2 + $0x4c0] ss:$24 sps:$4 sm:$0xff]  }
 0x1c5   :  { %5260 = vmatpush1.bf16.msra.mxu1 %v7895_v62  ;;  %v7969_v62 = vld [vmem:[#allocation2 + $0xaec] ss:$24 sps:$4 sm:$0xff]  }
 0x1c6   :  { %5506 = vmatpush1.bf16.msra.mxu0 %v7898_v63  ;;  %5261 = vmatprep.subr.bf16.mxu1 %v7903_v0  ;;  %v7972_v63 = vld [vmem:[#allocation2 + $0x4f4] ss:$24 sps:$4 sm:$0xff]   ;;  %v7967_v0 = vld [vmem:[#allocation2 + $0xae8] ss:$24 sps:$4 sm:$0xff]  }
 0x1c7   :  { %5507 = vmatprep.subr.bf16.mxu0 %v7906_v2  ;;  %v7970_v2 = vld [vmem:[#allocation2 + $0x4f0] ss:$24 sps:$4 sm:$0xff]  }
 0x1c9   :  { %5262 = vmatpush1.bf16.msra.mxu1 %v7901_v3  ;;  %v7975_v3 = vld [vmem:[#allocation2 + $0xb1c] ss:$24 sps:$4 sm:$0xff]  }
 0x1ca   :  { %5508 = vmatpush1.bf16.msra.mxu0 %v7904_v6  ;;  %5272 = vmatprep.subr.bf16.mxu1 %v7909_v7  ;;  %v7978_v6 = vld [vmem:[#allocation2 + $0x524] ss:$24 sps:$4 sm:$0xff]   ;;  %v7973_v7 = vld [vmem:[#allocation2 + $0xb18] ss:$24 sps:$4 sm:$0xff]  }
 0x1cb   :  { %5518 = vmatprep.subr.bf16.mxu0 %v7912_v33  ;;  %v7976_v33 = vld [vmem:[#allocation2 + $0x520] ss:$24 sps:$4 sm:$0xff]  }
 0x1cc   :  { %5264 = vmatmul.mubr.bf16.vlgmr.msra.gmra.mrb[4].mxu1 %v8838_v1 }
 0x1cd   :  { %5510 = vmatmul.mubr.bf16.vlgmr.msra.gmra.mrb[4].mxu0 %v8773_v20  ;;  %5273 = vmatpush1.bf16.msra.mxu1 %v7907_v9  ;;  %v7930_v20 = vld [vmem:[#allocation2 + $0x3a4] ss:$24 sps:$4 sm:$0xff]  }
 0x1ce   :  { %5519 = vmatpush1.bf16.msra.mxu0 %v7910_v61  ;;  %5274 = vmatprep.subr.bf16.mxu1 %v7915_v10  ;;  %v7981_v9 = vld [vmem:[#allocation2 + $0xb4c] ss:$24 sps:$4 sm:$0xff]   ;;  %v7979_v10 = vld [vmem:[#allocation2 + $0xb48] ss:$24 sps:$4 sm:$0xff]  }
 0x1cf   :  { %5520 = vmatprep.subr.bf16.mxu0 %v7918_v34  ;;  %5304 = vmatprep.mubr.bf16.mxu1 %v8765_v4  ;;  %v7984_v61 = vld [vmem:[#allocation2 + $0x554] ss:$24 sps:$4 sm:$0xff]   ;;  %v7982_v34 = vld [vmem:[#allocation2 + $0x550] ss:$24 sps:$4 sm:$0xff]  }
 0x1d0   :  { %5550 = vmatprep.mubr.bf16.mxu0 %v8777_v26  ;;  %v7934_v26 = vld [vmem:[#allocation2 + $0x3d0] ss:$24 sps:$4 sm:$0xff]  }
 0x1d1   :  { %5275 = vmatpush1.bf16.msra.mxu1 %v7913_v11  ;;  %v7987_v11 = vld [vmem:[#allocation2 + $0xb7c] ss:$24 sps:$4 sm:$0xff]  }
 0x1d2   :  { %5521 = vmatpush1.bf16.msra.mxu0 %v7916_v12  ;;  %5276 = vmatprep.subr.bf16.mxu1 %v7921_v13  ;;  %v7990_v12 = vld [vmem:[#allocation2 + $0x584] ss:$24 sps:$4 sm:$0xff]   ;;  %v7985_v13 = vld [vmem:[#allocation2 + $0xb78] ss:$24 sps:$4 sm:$0xff]  }
 0x1d3   :  { %5522 = vmatprep.subr.bf16.mxu0 %v7924_v15  ;;  %v7988_v15 = vld [vmem:[#allocation2 + $0x580] ss:$24 sps:$4 sm:$0xff]  }
 0x1d5   :  { %5277 = vmatpush1.bf16.msra.mxu1 %v7919_v16  ;;  %v7993_v16 = vld [vmem:[#allocation2 + $0xbac] ss:$24 sps:$4 sm:$0xff]  }
 0x1d6   :  { %5523 = vmatpush1.bf16.msra.mxu0 %v7922_v17  ;;  %5278 = vmatprep.subr.bf16.mxu1 %v7927_v19  ;;  %v7996_v17 = vld [vmem:[#allocation2 + $0x5b4] ss:$24 sps:$4 sm:$0xff]   ;;  %v7991_v19 = vld [vmem:[#allocation2 + $0xba8] ss:$24 sps:$4 sm:$0xff]  }
 0x1d7   :  { %5524 = vmatprep.subr.bf16.mxu0 %v7930_v20  ;;  %v7994_v20 = vld [vmem:[#allocation2 + $0x5b0] ss:$24 sps:$4 sm:$0xff]  }
 0x1d9   :  { %5279 = vmatpush1.bf16.msra.mxu1 %v7925_v22  ;;  %v7999_v22 = vld [vmem:[#allocation2 + $0xbdc] ss:$24 sps:$4 sm:$0xff]  }
 0x1da   :  { %5525 = vmatpush1.bf16.msra.mxu0 %v7928_v23  ;;  %5280 = vmatprep.subr.bf16.mxu1 %v7933_v24  ;;  %v8002_v23 = vld [vmem:[#allocation2 + $0x5e4] ss:$24 sps:$4 sm:$0xff]   ;;  %v7997_v24 = vld [vmem:[#allocation2 + $0xbd8] ss:$24 sps:$4 sm:$0xff]  }
 0x1db   :  { %5526 = vmatprep.subr.bf16.mxu0 %v7936_v53  ;;  %v8000_v53 = vld [vmem:[#allocation2 + $0x5e0] ss:$24 sps:$4 sm:$0xff]  }
 0x1dd   :  { %5281 = vmatpush1.bf16.msra.mxu1 %v7931_v25  ;;  %v8005_v25 = vld [vmem:[#allocation2 + $0xc0c] ss:$24 sps:$4 sm:$0xff]  }
 0x1de   :  { %5527 = vmatpush1.bf16.msra.mxu0 %v7934_v26  ;;  %5282 = vmatprep.subr.bf16.mxu1 %v7939_v27  ;;  %v8008_v26 = vld [vmem:[#allocation2 + $0x614] ss:$24 sps:$4 sm:$0xff]   ;;  %v8003_v27 = vld [vmem:[#allocation2 + $0xc08] ss:$24 sps:$4 sm:$0xff]  }
 0x1df   :  { %5528 = vmatprep.subr.bf16.mxu0 %v7942_v49  ;;  %v8879_v57 = vpop.f32.mrb[0].mxu1  ;;  %v8006_v49 = vld [vmem:[#allocation2 + $0x610] ss:$24 sps:$4 sm:$0xff]  }
 0x1e0   :  { %v8881_v38 = vpop.f32.mrb[1].mxu1 }
 0x1e1   :  { %v4941_v39 = vpop.f32.mrb[2].mxu1  ;;  %5283 = vmatpush1.bf16.msra.mxu1 %v7937_v29  ;;  %v8011_v29 = vld [vmem:[#allocation2 + $0xc3c] ss:$24 sps:$4 sm:$0xff]  }
 0x1e2   :  { %5529 = vmatpush1.bf16.msra.mxu0 %v7940_v31  ;;  %v4942_v40 = vpop.f32.mrb[3].mxu1  ;;  %5284 = vmatprep.subr.bf16.mxu1 %v7945_v32  ;;  %v8014_v31 = vld [vmem:[#allocation2 + $0x644] ss:$24 sps:$4 sm:$0xff]   ;;  %v8009_v32 = vld [vmem:[#allocation2 + $0xc38] ss:$24 sps:$4 sm:$0xff]  }
 0x1e3   :  { %5530 = vmatprep.subr.bf16.mxu0 %v7948_v35  ;;  %v8012_v35 = vld [vmem:[#allocation2 + $0x640] ss:$24 sps:$4 sm:$0xff]   ;;  %v8018_v40 = vld [vmem:[#allocation2 + $0x670] ss:$24 sps:$4 sm:$0xff]  }
 0x1e4   :  { %v8015_v39 = vld [vmem:[#allocation2 + $0xc68] ss:$24 sps:$4 sm:$0xff]  }
 0x1e5   :  { %5285 = vmatpush1.bf16.msra.mxu1 %v7943_v36  ;;  %v8017_v36 = vld [vmem:[#allocation2 + $0xc6c] ss:$24 sps:$4 sm:$0xff]  }
 0x1e6   :  { %5531 = vmatpush1.bf16.msra.mxu0 %v7946_v37  ;;  %5286 = vmatprep.subr.bf16.mxu1 %v7951_v41  ;;  %v8020_v37 = vld [vmem:[#allocation2 + $0x674] ss:$24 sps:$4 sm:$0xff]  }
 0x1e7   :  { %5532 = vmatprep.subr.bf16.mxu0 %v7954_v44  ;;  %v8023_v41 = vld [vmem:[#allocation2 + $0xc9c] ss:$24 sps:$4 sm:$0xff]   ;;  %v8021_v44 = vld [vmem:[#allocation2 + $0xc98] ss:$24 sps:$4 sm:$0xff]  }
 0x1e9   :  { %5287 = vmatpush1.bf16.msra.mxu1 %v7949_v45  ;;  %v8024_v45 = vld [vmem:[#allocation2 + $0x6a0] ss:$24 sps:$4 sm:$0xff]  }
 0x1ea   :  { %5533 = vmatpush1.bf16.msra.mxu0 %v7952_v46  ;;  %5288 = vmatprep.subr.bf16.mxu1 %v7957_v50  ;;  %v8029_v46 = vld [vmem:[#allocation2 + $0xccc] ss:$24 sps:$4 sm:$0xff]  }
 0x1eb   :  { %5534 = vmatprep.subr.bf16.mxu0 %v7960_v51  ;;  %v8032_v50 = vld [vmem:[#allocation2 + $0x6d4] ss:$24 sps:$4 sm:$0xff]   ;;  %v8027_v51 = vld [vmem:[#allocation2 + $0xcc8] ss:$24 sps:$4 sm:$0xff]  }
 0x1ed   :  { %5289 = vmatpush1.bf16.msra.mxu1 %v7955_v52  ;;  %v8035_v52 = vld [vmem:[#allocation2 + $0xcfc] ss:$24 sps:$4 sm:$0xff]  }
 0x1ee   :  { %5535 = vmatpush1.bf16.msra.mxu0 %v7958_v54  ;;  %5290 = vmatprep.subr.bf16.mxu1 %v7963_v55  ;;  %v8038_v54 = vld [vmem:[#allocation2 + $0x704] ss:$24 sps:$4 sm:$0xff]   ;;  %v8033_v55 = vld [vmem:[#allocation2 + $0xcf8] ss:$24 sps:$4 sm:$0xff]  }
 0x1ef   :  { %5536 = vmatprep.subr.bf16.mxu0 %v7966_v58  ;;  %v8036_v58 = vld [vmem:[#allocation2 + $0x700] ss:$24 sps:$4 sm:$0xff]  }
 0x1f1   :  { %5291 = vmatpush1.bf16.msra.mxu1 %v7961_v18  ;;  %v8041_v18 = vld [vmem:[#allocation2 + $0xd2c] ss:$24 sps:$4 sm:$0xff]  }
 0x1f2   :  { %5537 = vmatpush1.bf16.msra.mxu0 %v7964_v59  ;;  %5292 = vmatprep.subr.bf16.mxu1 %v7969_v62  ;;  %v8044_v59 = vld [vmem:[#allocation2 + $0x734] ss:$24 sps:$4 sm:$0xff]   ;;  %v8039_v62 = vld [vmem:[#allocation2 + $0xd28] ss:$24 sps:$4 sm:$0xff]  }
 0x1f3   :  { %5538 = vmatprep.subr.bf16.mxu0 %v7972_v63  ;;  %v8042_v63 = vld [vmem:[#allocation2 + $0x730] ss:$24 sps:$4 sm:$0xff]  }
 0x1f5   :  { %5293 = vmatpush1.bf16.msra.mxu1 %v7967_v0  ;;  %v8047_v0 = vld [vmem:[#allocation2 + $0xd5c] ss:$24 sps:$4 sm:$0xff]  }
 0x1f6   :  { %5539 = vmatpush1.bf16.msra.mxu0 %v7970_v2  ;;  %5294 = vmatprep.subr.bf16.mxu1 %v7975_v3  ;;  %v8050_v2 = vld [vmem:[#allocation2 + $0x764] ss:$24 sps:$4 sm:$0xff]   ;;  %v8045_v3 = vld [vmem:[#allocation2 + $0xd58] ss:$24 sps:$4 sm:$0xff]  }
 0x1f7   :  { %5540 = vmatprep.subr.bf16.mxu0 %v7978_v6  ;;  %v8048_v6 = vld [vmem:[#allocation2 + $0x760] ss:$24 sps:$4 sm:$0xff]  }
 0x1f9   :  { %5295 = vmatpush1.bf16.msra.mxu1 %v7973_v7  ;;  %v8053_v7 = vld [vmem:[#allocation2 + $0xd8c] ss:$24 sps:$4 sm:$0xff]  }
 0x1fa   :  { %5541 = vmatpush1.bf16.msra.mxu0 %v7976_v33  ;;  %5296 = vmatprep.subr.bf16.mxu1 %v7981_v9  ;;  %v8056_v33 = vld [vmem:[#allocation2 + $0x794] ss:$24 sps:$4 sm:$0xff]   ;;  %v8051_v9 = vld [vmem:[#allocation2 + $0xd88] ss:$24 sps:$4 sm:$0xff]  }
 0x1fb   :  { %5542 = vmatprep.subr.bf16.mxu0 %v7984_v61  ;;  %v8054_v61 = vld [vmem:[#allocation2 + $0x790] ss:$24 sps:$4 sm:$0xff]  }
 0x1fd   :  { %5297 = vmatpush1.bf16.msra.mxu1 %v7979_v10  ;;  %v8059_v10 = vld [vmem:[#allocation2 + $0xdbc] ss:$24 sps:$4 sm:$0xff]  }
 0x1fe   :  { %5543 = vmatpush1.bf16.msra.mxu0 %v7982_v34  ;;  %5298 = vmatprep.subr.bf16.mxu1 %v7987_v11  ;;  %v8062_v34 = vld [vmem:[#allocation2 + $0x7c4] ss:$24 sps:$4 sm:$0xff]   ;;  %v8057_v11 = vld [vmem:[#allocation2 + $0xdb8] ss:$24 sps:$4 sm:$0xff]  }
 0x1ff   :  { %5544 = vmatprep.subr.bf16.mxu0 %v7990_v12  ;;  %v8060_v12 = vld [vmem:[#allocation2 + $0x7c0] ss:$24 sps:$4 sm:$0xff]  }
 0x201   :  { %5299 = vmatpush1.bf16.msra.mxu1 %v7985_v13  ;;  %v8065_v13 = vld [vmem:[#allocation2 + $0xdec] ss:$24 sps:$4 sm:$0xff]  }
 0x202   :  { %5545 = vmatpush1.bf16.msra.mxu0 %v7988_v15  ;;  %5300 = vmatprep.subr.bf16.mxu1 %v7993_v16  ;;  %v8068_v15 = vld [vmem:[#allocation2 + $0x7f4] ss:$24 sps:$4 sm:$0xff]   ;;  %v8063_v16 = vld [vmem:[#allocation2 + $0xde8] ss:$24 sps:$4 sm:$0xff]  }
 0x203   :  { %5546 = vmatprep.subr.bf16.mxu0 %v7996_v17  ;;  %v8066_v17 = vld [vmem:[#allocation2 + $0x7f0] ss:$24 sps:$4 sm:$0xff]  }
 0x205   :  { %5301 = vmatpush1.bf16.msra.mxu1 %v7991_v19  ;;  %v8071_v19 = vld [vmem:[#allocation2 + $0xe1c] ss:$24 sps:$4 sm:$0xff]  }
 0x206   :  { %5547 = vmatpush1.bf16.msra.mxu0 %v7994_v20  ;;  %5302 = vmatprep.subr.bf16.mxu1 %v7999_v22  ;;  %v8074_v20 = vld [vmem:[#allocation2 + $0x824] ss:$24 sps:$4 sm:$0xff]   ;;  %v8069_v22 = vld [vmem:[#allocation2 + $0xe18] ss:$24 sps:$4 sm:$0xff]  }
 0x207   :  { %5548 = vmatprep.subr.bf16.mxu0 %v8002_v23  ;;  %v8072_v23 = vld [vmem:[#allocation2 + $0x820] ss:$24 sps:$4 sm:$0xff]  }
 0x209   :  { %5303 = vmatpush1.bf16.msra.mxu1 %v7997_v24  ;;  %v8077_v24 = vld [vmem:[#allocation2 + $0xe4c] ss:$24 sps:$4 sm:$0xff]  }
 0x20a   :  { %5549 = vmatpush1.bf16.msra.mxu0 %v8000_v53  ;;  %5313 = vmatprep.subr.bf16.mxu1 %v8005_v25  ;;  %v8080_v53 = vld [vmem:[#allocation2 + $0x854] ss:$24 sps:$4 sm:$0xff]   ;;  %v8075_v25 = vld [vmem:[#allocation2 + $0xe48] ss:$24 sps:$4 sm:$0xff]  }
 0x20b   :  { %5559 = vmatprep.subr.bf16.mxu0 %v8008_v26  ;;  %v8078_v26 = vld [vmem:[#allocation2 + $0x850] ss:$24 sps:$4 sm:$0xff]  }
 0x20c   :  { %5305 = vmatmul.mubr.bf16.vlgmr.msra.gmra.mrb[4].mxu1 %v8775_v21 }
 0x20d   :  { %5551 = vmatmul.mubr.bf16.vlgmr.msra.gmra.mrb[4].mxu0 %v8811_v56  ;;  %5314 = vmatpush1.bf16.msra.mxu1 %v8003_v27  ;;  %v8026_v56 = vld [vmem:[#allocation2 + $0x6a4] ss:$24 sps:$4 sm:$0xff]  }
 0x20e   :  { %5560 = vmatpush1.bf16.msra.mxu0 %v8006_v49  ;;  %5315 = vmatprep.subr.bf16.mxu1 %v8011_v29  ;;  %v8083_v27 = vld [vmem:[#allocation2 + $0xe7c] ss:$24 sps:$4 sm:$0xff]   ;;  %v8081_v29 = vld [vmem:[#allocation2 + $0xe78] ss:$24 sps:$4 sm:$0xff]  }
 0x20f   :  { %5561 = vmatprep.subr.bf16.mxu0 %v8014_v31  ;;  %5345 = vmatprep.mubr.bf16.mxu1 %v8793_v60  ;;  %v8086_v49 = vld [vmem:[#allocation2 + $0x884] ss:$24 sps:$4 sm:$0xff]   ;;  %v8084_v31 = vld [vmem:[#allocation2 + $0x880] ss:$24 sps:$4 sm:$0xff]  }
 0x210   :  { %5591 = vmatprep.mubr.bf16.mxu0 %v8817_v47  ;;  %v8030_v47 = vld [vmem:[#allocation2 + $0x6d0] ss:$24 sps:$4 sm:$0xff]  }
 0x211   :  { %5316 = vmatpush1.bf16.msra.mxu1 %v8009_v32  ;;  %v8089_v32 = vld [vmem:[#allocation2 + $0xeac] ss:$24 sps:$4 sm:$0xff]  }
 0x212   :  { %5562 = vmatpush1.bf16.msra.mxu0 %v8012_v35  ;;  %5317 = vmatprep.subr.bf16.mxu1 %v8017_v36  ;;  %v8092_v35 = vld [vmem:[#allocation2 + $0x8b4] ss:$24 sps:$4 sm:$0xff]   ;;  %v8087_v36 = vld [vmem:[#allocation2 + $0xea8] ss:$24 sps:$4 sm:$0xff]  }
 0x213   :  { %5563 = vmatprep.subr.bf16.mxu0 %v8020_v37  ;;  %v8090_v37 = vld [vmem:[#allocation2 + $0x8b0] ss:$24 sps:$4 sm:$0xff]  }
 0x215   :  { %5318 = vmatpush1.bf16.msra.mxu1 %v8015_v39  ;;  %v8095_v39 = vld [vmem:[#allocation2 + $0xedc] ss:$24 sps:$4 sm:$0xff]  }
 0x216   :  { %5564 = vmatpush1.bf16.msra.mxu0 %v8018_v40  ;;  %5319 = vmatprep.subr.bf16.mxu1 %v8023_v41  ;;  %v8098_v40 = vld [vmem:[#allocation2 + $0x8e4] ss:$24 sps:$4 sm:$0xff]   ;;  %v8093_v41 = vld [vmem:[#allocation2 + $0xed8] ss:$24 sps:$4 sm:$0xff]  }
 0x217   :  { %5565 = vmatprep.subr.bf16.mxu0 %v8026_v56  ;;  %v8096_v56 = vld [vmem:[#allocation2 + $0x8e0] ss:$24 sps:$4 sm:$0xff]  }
 0x219   :  { %5320 = vmatpush1.bf16.msra.mxu1 %v8021_v44  ;;  %v8101_v44 = vld [vmem:[#allocation2 + $0xf0c] ss:$24 sps:$4 sm:$0xff]  }
 0x21a   :  { %5566 = vmatpush1.bf16.msra.mxu0 %v8024_v45  ;;  %5321 = vmatprep.subr.bf16.mxu1 %v8029_v46  ;;  %v8104_v45 = vld [vmem:[#allocation2 + $0x914] ss:$24 sps:$4 sm:$0xff]   ;;  %v8099_v46 = vld [vmem:[#allocation2 + $0xf08] ss:$24 sps:$4 sm:$0xff]  }
 0x21b   :  { %5567 = vmatprep.subr.bf16.mxu0 %v8032_v50  ;;  %v8102_v50 = vld [vmem:[#allocation2 + $0x910] ss:$24 sps:$4 sm:$0xff]  }
 0x21d   :  { %5322 = vmatpush1.bf16.msra.mxu1 %v8027_v51  ;;  %v8107_v51 = vld [vmem:[#allocation2 + $0xf3c] ss:$24 sps:$4 sm:$0xff]  }
 0x21e   :  { %5568 = vmatpush1.bf16.msra.mxu0 %v8030_v47  ;;  %5323 = vmatprep.subr.bf16.mxu1 %v8035_v52  ;;  %v8110_v47 = vld [vmem:[#allocation2 + $0x944] ss:$24 sps:$4 sm:$0xff]   ;;  %v8105_v52 = vld [vmem:[#allocation2 + $0xf38] ss:$24 sps:$4 sm:$0xff]  }
 0x21f   :  { %5569 = vmatprep.subr.bf16.mxu0 %v8038_v54  ;;  %v8108_v54 = vld [vmem:[#allocation2 + $0x940] ss:$24 sps:$4 sm:$0xff]  }
 0x221   :  { %5324 = vmatpush1.bf16.msra.mxu1 %v8033_v55  ;;  %v8113_v55 = vld [vmem:[#allocation2 + $0xf6c] ss:$24 sps:$4 sm:$0xff]  }
 0x222   :  { %5570 = vmatpush1.bf16.msra.mxu0 %v8036_v58  ;;  %5325 = vmatprep.subr.bf16.mxu1 %v8041_v18  ;;  %v8116_v58 = vld [vmem:[#allocation2 + $0x974] ss:$24 sps:$4 sm:$0xff]   ;;  %v8111_v18 = vld [vmem:[#allocation2 + $0xf68] ss:$24 sps:$4 sm:$0xff]  }
 0x223   :  { %5571 = vmatprep.subr.bf16.mxu0 %v8044_v59  ;;  %v8114_v59 = vld [vmem:[#allocation2 + $0x970] ss:$24 sps:$4 sm:$0xff]  }
 0x225   :  { %5326 = vmatpush1.bf16.msra.mxu1 %v8039_v62  ;;  %v8119_v62 = vld [vmem:[#allocation2 + $0xf9c] ss:$24 sps:$4 sm:$0xff]  }
 0x226   :  { %5572 = vmatpush1.bf16.msra.mxu0 %v8042_v63  ;;  %5327 = vmatprep.subr.bf16.mxu1 %v8047_v0  ;;  %v8117_v63 = vld [vmem:[#allocation2 + $0xf98] ss:$24 sps:$4 sm:$0xff]  }
 0x227   :  { %5573 = vmatprep.subr.bf16.mxu0 %v8050_v2  ;;  %v8120_v0 = vld [vmem:[#allocation2 + $0x9a0] ss:$24 sps:$4 sm:$0xff]   ;;  %v953_v2 = vsub.s32 0, %v8745_v43 }
 0x229   :  { %5328 = vmatpush1.bf16.msra.mxu1 %v8045_v3  ;;  %v8125_v3 = vld [vmem:[#allocation2 + $0xfcc] ss:$24 sps:$4 sm:$0xff]  }
 0x22a   :  { %5574 = vmatpush1.bf16.msra.mxu0 %v8048_v6  ;;  %5329 = vmatprep.subr.bf16.mxu1 %v8053_v7  ;;  %v8128_v6 = vld [vmem:[#allocation2 + $0x9d4] ss:$24 sps:$4 sm:$0xff]   ;;  %v949_v7 = vld [vmem:[#allocation5] sm:$0x3f] }
 0x22b   :  { %5575 = vmatprep.subr.bf16.mxu0 %v8056_v33  ;;  %v8123_v33 = vld [vmem:[#allocation2 + $0xfc8] ss:$24 sps:$4 sm:$0xff]  }
 0x22d   :  { %5330 = vmatpush1.bf16.msra.mxu1 %v8051_v9  ;;  %v8126_v9 = vld [vmem:[#allocation2 + $0x9d0] ss:$24 sps:$4 sm:$0xff]  }
 0x22e   :  { %5576 = vmatpush1.bf16.msra.mxu0 %v8054_v61  ;;  %5331 = vmatprep.subr.bf16.mxu1 %v8059_v10  ;;  %v954_v61 = vrot.slane %v949_v7, %v953_v2  ;;  %v8131_v10 = vld [vmem:[#allocation2 + $0xffc] ss:$24 sps:$4 sm:$0xff]  }
 0x22f   :  { %5577 = vmatprep.subr.bf16.mxu0 %v8062_v34  ;;  %v8134_v34 = vld [vmem:[#allocation2 + $0xa04] ss:$24 sps:$4 sm:$0xff]   ;;  %v8188_v2 = vld [vmem:[#allocation2 + $0xbb4] ss:$24 sps:$4 sm:$0xff]  }
 0x231   :  { %5332 = vmatpush1.bf16.msra.mxu1 %v8057_v11 }
 0x232   :  { %5578 = vmatpush1.bf16.msra.mxu0 %v8060_v12  ;;  %5333 = vmatprep.subr.bf16.mxu1 %v8065_v13  ;;  %v8129_v12 = vld [vmem:[#allocation2 + $0xff8] ss:$24 sps:$4 sm:$0xff]  }
 0x233   :  { %5579 = vmatprep.subr.bf16.mxu0 %v8068_v15  ;;  %v8132_v13 = vld [vmem:[#allocation2 + $0xa00] ss:$24 sps:$4 sm:$0xff]   ;;  %v7229_v15 = vadd.f32 %v8879_v57, %v954_v61  ;;  %v8143_v57 = vld [vmem:[#allocation2 + $0x105c] ss:$24 sps:$4 sm:$0xff]   ;;  %v8197_v61 = vld [vmem:[#allocation2 + $0x120c] ss:$24 sps:$4 sm:$0xff]  }
 0x235   :  { %5334 = vmatpush1.bf16.msra.mxu1 %v8063_v16  ;;  %v8137_v16 = vld [vmem:[#allocation2 + $0x102c] ss:$24 sps:$4 sm:$0xff]  }
 0x236   :  { %5580 = vmatpush1.bf16.msra.mxu0 %v8066_v17  ;;  %5335 = vmatprep.subr.bf16.mxu1 %v8071_v19  ;;  %v8140_v17 = vld [vmem:[#allocation2 + $0xa34] ss:$24 sps:$4 sm:$0xff]  }
 0x237   :  { %5581 = vmatprep.subr.bf16.mxu0 %v8074_v20 }
 0x239   :  { %5336 = vmatpush1.bf16.msra.mxu1 %v8069_v22 }
 0x23a   :  { %5582 = vmatpush1.bf16.msra.mxu0 %v8072_v23  ;;  %5337 = vmatprep.subr.bf16.mxu1 %v8077_v24 }
 0x23b   :  { %5583 = vmatprep.subr.bf16.mxu0 %v8080_v53 }
 0x23d   :  { %5338 = vmatpush1.bf16.msra.mxu1 %v8075_v25  ;;  %v8135_v25 = vld [vmem:[#allocation2 + $0x1028] ss:$24 sps:$4 sm:$0xff]  }
 0x23e   :  { %5584 = vmatpush1.bf16.msra.mxu0 %v8078_v26  ;;  %5339 = vmatprep.subr.bf16.mxu1 %v8083_v27  ;;  %v8138_v26 = vld [vmem:[#allocation2 + $0xa30] ss:$24 sps:$4 sm:$0xff]  }
 0x23f   :  { %5585 = vmatprep.subr.bf16.mxu0 %v8086_v49  ;;  %v8146_v49 = vld [vmem:[#allocation2 + $0xa64] ss:$24 sps:$4 sm:$0xff]  }
 0x241   :  { %5340 = vmatpush1.bf16.msra.mxu1 %v8081_v29  ;;  %v8141_v29 = vld [vmem:[#allocation2 + $0x1058] ss:$24 sps:$4 sm:$0xff]  }
 0x242   :  { %5586 = vmatpush1.bf16.msra.mxu0 %v8084_v31  ;;  %5341 = vmatprep.subr.bf16.mxu1 %v8089_v32  ;;  %v8149_v31 = vld [vmem:[#allocation2 + $0x108c] ss:$24 sps:$4 sm:$0xff]  }
 0x243   :  { %5587 = vmatprep.subr.bf16.mxu0 %v8092_v35  ;;  %v8152_v32 = vld [vmem:[#allocation2 + $0xa94] ss:$24 sps:$4 sm:$0xff]   ;;  %v8147_v35 = vld [vmem:[#allocation2 + $0x1088] ss:$24 sps:$4 sm:$0xff]  }
 0x245   :  { %5342 = vmatpush1.bf16.msra.mxu1 %v8087_v36  ;;  %v8150_v36 = vld [vmem:[#allocation2 + $0xa90] ss:$24 sps:$4 sm:$0xff]  }
 0x246   :  { %5588 = vmatpush1.bf16.msra.mxu0 %v8090_v37  ;;  %5343 = vmatprep.subr.bf16.mxu1 %v8095_v39  ;;  %v8155_v37 = vld [vmem:[#allocation2 + $0x10bc] ss:$24 sps:$4 sm:$0xff]  }
 0x247   :  { %5589 = vmatprep.subr.bf16.mxu0 %v8098_v40  ;;  %v8158_v39 = vld [vmem:[#allocation2 + $0xac4] ss:$24 sps:$4 sm:$0xff]   ;;  %v8153_v40 = vld [vmem:[#allocation2 + $0x10b8] ss:$24 sps:$4 sm:$0xff]  }
 0x249   :  { %5344 = vmatpush1.bf16.msra.mxu1 %v8093_v41  ;;  %v8156_v41 = vld [vmem:[#allocation2 + $0xac0] ss:$24 sps:$4 sm:$0xff]  }
 0x24a   :  { %5590 = vmatpush1.bf16.msra.mxu0 %v8096_v56  ;;  %5354 = vmatprep.subr.bf16.mxu1 %v8101_v44  ;;  %v8161_v56 = vld [vmem:[#allocation2 + $0x10ec] ss:$24 sps:$4 sm:$0xff]  }
 0x24b   :  { %5600 = vmatprep.subr.bf16.mxu0 %v8104_v45  ;;  %v8164_v44 = vld [vmem:[#allocation2 + $0xaf4] ss:$24 sps:$4 sm:$0xff]   ;;  %v8159_v45 = vld [vmem:[#allocation2 + $0x10e8] ss:$24 sps:$4 sm:$0xff]  }
 0x24c   :  { %5346 = vmatmul.mubr.bf16.vlgmr.msra.gmra.mrb[4].mxu1 %v8815_v42 }
 0x24d   :  { %5592 = vmatmul.mubr.bf16.vlgmr.msra.gmra.mrb[4].mxu0 %v8838_v1  ;;  %5355 = vmatpush1.bf16.msra.mxu1 %v8099_v46  ;;  %v8122_v1 = vld [vmem:[#allocation2 + $0x9a4] ss:$24 sps:$4 sm:$0xff]   ;;  %v8162_v46 = vld [vmem:[#allocation2 + $0xaf0] ss:$24 sps:$4 sm:$0xff]  }
 0x24e   :  { %5601 = vmatpush1.bf16.msra.mxu0 %v8102_v50  ;;  %5356 = vmatprep.subr.bf16.mxu1 %v8107_v51  ;;  %v8167_v50 = vld [vmem:[#allocation2 + $0x111c] ss:$24 sps:$4 sm:$0xff]  }
 0x24f   :  { %5602 = vmatprep.subr.bf16.mxu0 %v8110_v47  ;;  %5386 = vmatprep.mubr.bf16.mxu1 %v8819_v48  ;;  %v8170_v51 = vld [vmem:[#allocation2 + $0xb24] ss:$24 sps:$4 sm:$0xff]   ;;  %v8165_v47 = vld [vmem:[#allocation2 + $0x1118] ss:$24 sps:$4 sm:$0xff]  }
 0x250   :  { %5632 = vmatprep.mubr.bf16.mxu0 %v8765_v4  ;;  %v957_v4 = vsub.s32 1, %v8745_v43 }
 0x251   :  { %5357 = vmatpush1.bf16.msra.mxu1 %v8105_v52  ;;  %v8168_v52 = vld [vmem:[#allocation2 + $0xb20] ss:$24 sps:$4 sm:$0xff]  }
 0x252   :  { %5603 = vmatpush1.bf16.msra.mxu0 %v8108_v54  ;;  %5358 = vmatprep.subr.bf16.mxu1 %v8113_v55  ;;  %v958_v11 = vrot.slane %v949_v7, %v957_v4  ;;  %v8173_v54 = vld [vmem:[#allocation2 + $0x114c] ss:$24 sps:$4 sm:$0xff]   ;;  %v8191_v7 = vld [vmem:[#allocation2 + $0x11dc] ss:$24 sps:$4 sm:$0xff]  }
 0x253   :  { %5604 = vmatprep.subr.bf16.mxu0 %v8116_v58  ;;  %v8176_v55 = vld [vmem:[#allocation2 + $0xb54] ss:$24 sps:$4 sm:$0xff]   ;;  %v8171_v58 = vld [vmem:[#allocation2 + $0x1148] ss:$24 sps:$4 sm:$0xff]   ;;  %v8194_v4 = vld [vmem:[#allocation2 + $0xbe4] ss:$24 sps:$4 sm:$0xff]  }
 0x254   :  { %v7231_v19 = vadd.f32 %v8881_v38, %v958_v11  ;;  %v8144_v38 = vld [vmem:[#allocation2 + $0xa60] ss:$24 sps:$4 sm:$0xff]   ;;  %v8198_v11 = vld [vmem:[#allocation2 + $0xc10] ss:$24 sps:$4 sm:$0xff]  }
 0x255   :  { %5359 = vmatpush1.bf16.msra.mxu1 %v8111_v18  ;;  %v8174_v18 = vld [vmem:[#allocation2 + $0xb50] ss:$24 sps:$4 sm:$0xff]  }
 0x256   :  { %5605 = vmatpush1.bf16.msra.mxu0 %v8114_v59  ;;  %5360 = vmatprep.subr.bf16.mxu1 %v8119_v62  ;;  %v8179_v59 = vld [vmem:[#allocation2 + $0x117c] ss:$24 sps:$4 sm:$0xff]  }
 0x257   :  { %5606 = vmatprep.subr.bf16.mxu0 %v8122_v1  ;;  %v8182_v62 = vld [vmem:[#allocation2 + $0xb84] ss:$24 sps:$4 sm:$0xff]   ;;  %v8177_v1 = vld [vmem:[#allocation2 + $0x1178] ss:$24 sps:$4 sm:$0xff]  }
 0x259   :  { %5361 = vmatpush1.bf16.msra.mxu1 %v8117_v63  ;;  %v8180_v63 = vld [vmem:[#allocation2 + $0xb80] ss:$24 sps:$4 sm:$0xff]  }
 0x25a   :  { %5607 = vmatpush1.bf16.msra.mxu0 %v8120_v0  ;;  %5362 = vmatprep.subr.bf16.mxu1 %v8125_v3  ;;  %v8185_v0 = vld [vmem:[#allocation2 + $0x11ac] ss:$24 sps:$4 sm:$0xff]   ;;  %v8183_v3 = vld [vmem:[#allocation2 + $0x11a8] ss:$24 sps:$4 sm:$0xff]  }
 0x25b   :  { %5608 = vmatprep.subr.bf16.mxu0 %v8128_v6  ;;  %v8186_v6 = vld [vmem:[#allocation2 + $0xbb0] ss:$24 sps:$4 sm:$0xff]  }
 0x25d   :  { %5363 = vmatpush1.bf16.msra.mxu1 %v8123_v33  ;;  %v8189_v33 = vld [vmem:[#allocation2 + $0x11d8] ss:$24 sps:$4 sm:$0xff]  }
 0x25e   :  { %5609 = vmatpush1.bf16.msra.mxu0 %v8126_v9  ;;  %5364 = vmatprep.subr.bf16.mxu1 %v8131_v10  ;;  %v8192_v9 = vld [vmem:[#allocation2 + $0xbe0] ss:$24 sps:$4 sm:$0xff]   ;;  %v8200_v10 = vld [vmem:[#allocation2 + $0xc14] ss:$24 sps:$4 sm:$0xff]  }
 0x25f   :  { %5610 = vmatprep.subr.bf16.mxu0 %v8134_v34  ;;  %v8195_v34 = vld [vmem:[#allocation2 + $0x1208] ss:$24 sps:$4 sm:$0xff]  }
 0x260   :  { %v5142_v20 = vpop.f32.mrb[0].mxu0 }
 0x261   :  { %v8895_v22 = vadd.f32 %v7229_v15, %v5142_v20  ;;  %v5144_v23 = vpop.f32.mrb[1].mxu0  ;;  %5365 = vmatpush1.bf16.msra.mxu1 %v8129_v12  ;;  %v8203_v12 = vld [vmem:[#allocation2 + $0x123c] ss:$24 sps:$4 sm:$0xff]   ;;  %v8201_v15 = vld [vmem:[#allocation2 + $0x1238] ss:$24 sps:$4 sm:$0xff]  }
 0x262   :  { %v8897_v24 = vadd.f32 %v7231_v19, %v5144_v23  ;;  %v5146_v53 = vpop.f32.mrb[2].mxu0  ;;  %5611 = vmatpush1.bf16.msra.mxu0 %v8132_v13  ;;  %5366 = vmatprep.subr.bf16.mxu1 %v8137_v16  ;;  %v8206_v13 = vld [vmem:[#allocation2 + $0xc44] ss:$24 sps:$4 sm:$0xff]   ;;  %v8204_v16 = vld [vmem:[#allocation2 + $0xc40] ss:$24 sps:$4 sm:$0xff]  }
 0x263   :  { %v5147_v27 = vpop.f32.mrb[3].mxu0  ;;  %5612 = vmatprep.subr.bf16.mxu0 %v8140_v17  ;;  %v8209_v17 = vld [vmem:[#allocation2 + $0x126c] ss:$24 sps:$4 sm:$0xff]   ;;  %v8207_v20 = vld [vmem:[#allocation2 + $0x1268] ss:$24 sps:$4 sm:$0xff]  }
 0x264   :  { %v8212_v19 = vld [vmem:[#allocation2 + $0xc74] ss:$24 sps:$4 sm:$0xff]   ;;  %v8210_v23 = vld [vmem:[#allocation2 + $0xc70] ss:$24 sps:$4 sm:$0xff]  }
 0x265   :  { %5367 = vmatpush1.bf16.msra.mxu1 %v8135_v25  ;;  %v8215_v53 = vld [vmem:[#allocation2 + $0x129c] ss:$24 sps:$4 sm:$0xff]   ;;  %v8213_v25 = vld [vmem:[#allocation2 + $0x1298] ss:$24 sps:$4 sm:$0xff]   ;;  %v8221_v27 = vld [vmem:[#allocation2 + $0x12cc] ss:$24 sps:$4 sm:$0xff]  }
 0x266   :  { %5613 = vmatpush1.bf16.msra.mxu0 %v8138_v26  ;;  %5368 = vmatprep.subr.bf16.mxu1 %v8143_v57  ;;  %v8216_v26 = vld [vmem:[#allocation2 + $0xca0] ss:$24 sps:$4 sm:$0xff]   ;;  %v8224_v57 = vld [vmem:[#allocation2 + $0xcd4] ss:$24 sps:$4 sm:$0xff]  }
 0x267   :  { %5614 = vmatprep.subr.bf16.mxu0 %v8146_v49  ;;  %v8219_v49 = vld [vmem:[#allocation2 + $0x12c8] ss:$24 sps:$4 sm:$0xff]  }
 0x269   :  { %5369 = vmatpush1.bf16.msra.mxu1 %v8141_v29  ;;  %v8227_v29 = vld [vmem:[#allocation2 + $0x12fc] ss:$24 sps:$4 sm:$0xff]  }
 0x26a   :  { %5615 = vmatpush1.bf16.msra.mxu0 %v8144_v38  ;;  %5370 = vmatprep.subr.bf16.mxu1 %v8149_v31  ;;  %v8230_v38 = vld [vmem:[#allocation2 + $0xd04] ss:$24 sps:$4 sm:$0xff]   ;;  %v8225_v31 = vld [vmem:[#allocation2 + $0x12f8] ss:$24 sps:$4 sm:$0xff]  }
 0x26b   :  { %5616 = vmatprep.subr.bf16.mxu0 %v8152_v32  ;;  %v8228_v32 = vld [vmem:[#allocation2 + $0xd00] ss:$24 sps:$4 sm:$0xff]  }
 0x26d   :  { %5371 = vmatpush1.bf16.msra.mxu1 %v8147_v35  ;;  %v8233_v35 = vld [vmem:[#allocation2 + $0x132c] ss:$24 sps:$4 sm:$0xff]  }
 0x26e   :  { %5617 = vmatpush1.bf16.msra.mxu0 %v8150_v36  ;;  %5372 = vmatprep.subr.bf16.mxu1 %v8155_v37  ;;  %v8236_v36 = vld [vmem:[#allocation2 + $0xd34] ss:$24 sps:$4 sm:$0xff]   ;;  %v8231_v37 = vld [vmem:[#allocation2 + $0x1328] ss:$24 sps:$4 sm:$0xff]  }
 0x26f   :  { %5618 = vmatprep.subr.bf16.mxu0 %v8158_v39  ;;  %v8234_v39 = vld [vmem:[#allocation2 + $0xd30] ss:$24 sps:$4 sm:$0xff]  }
 0x271   :  { %5373 = vmatpush1.bf16.msra.mxu1 %v8153_v40  ;;  %v8239_v40 = vld [vmem:[#allocation2 + $0x135c] ss:$24 sps:$4 sm:$0xff]  }
 0x272   :  { %5619 = vmatpush1.bf16.msra.mxu0 %v8156_v41  ;;  %5374 = vmatprep.subr.bf16.mxu1 %v8161_v56  ;;  %v8242_v41 = vld [vmem:[#allocation2 + $0xd64] ss:$24 sps:$4 sm:$0xff]   ;;  %v8237_v56 = vld [vmem:[#allocation2 + $0x1358] ss:$24 sps:$4 sm:$0xff]  }
 0x273   :  { %5620 = vmatprep.subr.bf16.mxu0 %v8164_v44  ;;  %v8240_v44 = vld [vmem:[#allocation2 + $0xd60] ss:$24 sps:$4 sm:$0xff]  }
 0x275   :  { %5375 = vmatpush1.bf16.msra.mxu1 %v8159_v45  ;;  %v8245_v45 = vld [vmem:[#allocation2 + $0x138c] ss:$24 sps:$4 sm:$0xff]  }
 0x276   :  { %5621 = vmatpush1.bf16.msra.mxu0 %v8162_v46  ;;  %5376 = vmatprep.subr.bf16.mxu1 %v8167_v50  ;;  %v8248_v46 = vld [vmem:[#allocation2 + $0xd94] ss:$24 sps:$4 sm:$0xff]   ;;  %v8243_v50 = vld [vmem:[#allocation2 + $0x1388] ss:$24 sps:$4 sm:$0xff]  }
 0x277   :  { %5622 = vmatprep.subr.bf16.mxu0 %v8170_v51  ;;  %v8246_v51 = vld [vmem:[#allocation2 + $0xd90] ss:$24 sps:$4 sm:$0xff]  }
 0x279   :  { %5377 = vmatpush1.bf16.msra.mxu1 %v8165_v47  ;;  %v8251_v47 = vld [vmem:[#allocation2 + $0x13bc] ss:$24 sps:$4 sm:$0xff]  }
 0x27a   :  { %5623 = vmatpush1.bf16.msra.mxu0 %v8168_v52  ;;  %5378 = vmatprep.subr.bf16.mxu1 %v8173_v54  ;;  %v8254_v52 = vld [vmem:[#allocation2 + $0xdc4] ss:$24 sps:$4 sm:$0xff]   ;;  %v8249_v54 = vld [vmem:[#allocation2 + $0x13b8] ss:$24 sps:$4 sm:$0xff]  }
 0x27b   :  { %5624 = vmatprep.subr.bf16.mxu0 %v8176_v55  ;;  %v8252_v55 = vld [vmem:[#allocation2 + $0xdc0] ss:$24 sps:$4 sm:$0xff]  }
 0x27d   :  { %5379 = vmatpush1.bf16.msra.mxu1 %v8171_v58  ;;  %v8257_v58 = vld [vmem:[#allocation2 + $0x13ec] ss:$24 sps:$4 sm:$0xff]  }
 0x27e   :  { %5625 = vmatpush1.bf16.msra.mxu0 %v8174_v18  ;;  %5380 = vmatprep.subr.bf16.mxu1 %v8179_v59  ;;  %v8260_v18 = vld [vmem:[#allocation2 + $0xdf4] ss:$24 sps:$4 sm:$0xff]   ;;  %v8255_v59 = vld [vmem:[#allocation2 + $0x13e8] ss:$24 sps:$4 sm:$0xff]  }
 0x27f   :  { %5626 = vmatprep.subr.bf16.mxu0 %v8182_v62  ;;  %v8258_v62 = vld [vmem:[#allocation2 + $0xdf0] ss:$24 sps:$4 sm:$0xff]  }
 0x281   :  { %5381 = vmatpush1.bf16.msra.mxu1 %v8177_v1  ;;  %v8263_v1 = vld [vmem:[#allocation2 + $0x141c] ss:$24 sps:$4 sm:$0xff]  }
 0x282   :  { %5627 = vmatpush1.bf16.msra.mxu0 %v8180_v63  ;;  %5382 = vmatprep.subr.bf16.mxu1 %v8185_v0  ;;  %v8266_v63 = vld [vmem:[#allocation2 + $0xe24] ss:$24 sps:$4 sm:$0xff]   ;;  %v8261_v0 = vld [vmem:[#allocation2 + $0x1418] ss:$24 sps:$4 sm:$0xff]  }
 0x283   :  { %5628 = vmatprep.subr.bf16.mxu0 %v8188_v2  ;;  %v8264_v2 = vld [vmem:[#allocation2 + $0xe20] ss:$24 sps:$4 sm:$0xff]  }
 0x285   :  { %5383 = vmatpush1.bf16.msra.mxu1 %v8183_v3  ;;  %v8269_v3 = vld [vmem:[#allocation2 + $0x144c] ss:$24 sps:$4 sm:$0xff]  }
 0x286   :  { %5629 = vmatpush1.bf16.msra.mxu0 %v8186_v6  ;;  %5384 = vmatprep.subr.bf16.mxu1 %v8191_v7  ;;  %v8272_v6 = vld [vmem:[#allocation2 + $0xe54] ss:$24 sps:$4 sm:$0xff]   ;;  %v8267_v7 = vld [vmem:[#allocation2 + $0x1448] ss:$24 sps:$4 sm:$0xff]  }
 0x287   :  { %5630 = vmatprep.subr.bf16.mxu0 %v8194_v4  ;;  %v8270_v4 = vld [vmem:[#allocation2 + $0xe50] ss:$24 sps:$4 sm:$0xff]  }
 0x289   :  { %5385 = vmatpush1.bf16.msra.mxu1 %v8189_v33  ;;  %v8275_v33 = vld [vmem:[#allocation2 + $0x147c] ss:$24 sps:$4 sm:$0xff]  }
 0x28a   :  { %5631 = vmatpush1.bf16.msra.mxu0 %v8192_v9  ;;  %5395 = vmatprep.subr.bf16.mxu1 %v8197_v61  ;;  %v8278_v9 = vld [vmem:[#allocation2 + $0xe84] ss:$24 sps:$4 sm:$0xff]   ;;  %v8273_v61 = vld [vmem:[#allocation2 + $0x1478] ss:$24 sps:$4 sm:$0xff]  }
 0x28b   :  { %5641 = vmatprep.subr.bf16.mxu0 %v8200_v10  ;;  %v8276_v10 = vld [vmem:[#allocation2 + $0xe80] ss:$24 sps:$4 sm:$0xff]  }
 0x28c   :  { %5387 = vmatmul.mubr.bf16.vlgmr.msra.gmra.mrb[4].mxu1 %v8842_v5 }
 0x28d   :  { %5633 = vmatmul.mubr.bf16.vlgmr.msra.gmra.mrb[4].mxu0 %v8775_v21  ;;  %5396 = vmatpush1.bf16.msra.mxu1 %v8195_v34  ;;  %v8218_v21 = vld [vmem:[#allocation2 + $0xca4] ss:$24 sps:$4 sm:$0xff]  }
 0x28e   :  { %5642 = vmatpush1.bf16.msra.mxu0 %v8198_v11  ;;  %5397 = vmatprep.subr.bf16.mxu1 %v8203_v12  ;;  %v8281_v34 = vld [vmem:[#allocation2 + $0x14ac] ss:$24 sps:$4 sm:$0xff]   ;;  %v8279_v12 = vld [vmem:[#allocation2 + $0x14a8] ss:$24 sps:$4 sm:$0xff]  }
 0x28f   :  { %5643 = vmatprep.subr.bf16.mxu0 %v8206_v13  ;;  %5427 = vmatprep.mubr.bf16.mxu1 %v8844_v8  ;;  %v8284_v11 = vld [vmem:[#allocation2 + $0xeb4] ss:$24 sps:$4 sm:$0xff]   ;;  %v8282_v13 = vld [vmem:[#allocation2 + $0xeb0] ss:$24 sps:$4 sm:$0xff]  }
 0x290   :  { %5673 = vmatprep.mubr.bf16.mxu0 %v8793_v60  ;;  %v8222_v60 = vld [vmem:[#allocation2 + $0xcd0] ss:$24 sps:$4 sm:$0xff]  }
 0x291   :  { %5398 = vmatpush1.bf16.msra.mxu1 %v8201_v15  ;;  %v8287_v15 = vld [vmem:[#allocation2 + $0x14dc] ss:$24 sps:$4 sm:$0xff]  }
 0x292   :  { %5644 = vmatpush1.bf16.msra.mxu0 %v8204_v16  ;;  %5399 = vmatprep.subr.bf16.mxu1 %v8209_v17  ;;  %v8290_v16 = vld [vmem:[#allocation2 + $0xee4] ss:$24 sps:$4 sm:$0xff]   ;;  %v8285_v17 = vld [vmem:[#allocation2 + $0x14d8] ss:$24 sps:$4 sm:$0xff]  }
 0x293   :  { %5645 = vmatprep.subr.bf16.mxu0 %v8212_v19  ;;  %v8288_v19 = vld [vmem:[#allocation2 + $0xee0] ss:$24 sps:$4 sm:$0xff]  }
 0x295   :  { %5400 = vmatpush1.bf16.msra.mxu1 %v8207_v20  ;;  %v8293_v20 = vld [vmem:[#allocation2 + $0x150c] ss:$24 sps:$4 sm:$0xff]  }
 0x296   :  { %5646 = vmatpush1.bf16.msra.mxu0 %v8210_v23  ;;  %5401 = vmatprep.subr.bf16.mxu1 %v8215_v53  ;;  %v8296_v23 = vld [vmem:[#allocation2 + $0xf14] ss:$24 sps:$4 sm:$0xff]   ;;  %v8291_v53 = vld [vmem:[#allocation2 + $0x1508] ss:$24 sps:$4 sm:$0xff]  }
 0x297   :  { %5647 = vmatprep.subr.bf16.mxu0 %v8218_v21  ;;  %v8294_v21 = vld [vmem:[#allocation2 + $0xf10] ss:$24 sps:$4 sm:$0xff]  }
 0x299   :  { %5402 = vmatpush1.bf16.msra.mxu1 %v8213_v25  ;;  %v8299_v25 = vld [vmem:[#allocation2 + $0x153c] ss:$24 sps:$4 sm:$0xff]  }
 0x29a   :  { %5648 = vmatpush1.bf16.msra.mxu0 %v8216_v26  ;;  %5403 = vmatprep.subr.bf16.mxu1 %v8221_v27  ;;  %v8302_v26 = vld [vmem:[#allocation2 + $0xf44] ss:$24 sps:$4 sm:$0xff]   ;;  %v8297_v27 = vld [vmem:[#allocation2 + $0x1538] ss:$24 sps:$4 sm:$0xff]  }
 0x29b   :  { %5649 = vmatprep.subr.bf16.mxu0 %v8224_v57  ;;  %v8300_v57 = vld [vmem:[#allocation2 + $0xf40] ss:$24 sps:$4 sm:$0xff]  }
 0x29d   :  { %5404 = vmatpush1.bf16.msra.mxu1 %v8219_v49  ;;  %v8305_v49 = vld [vmem:[#allocation2 + $0x156c] ss:$24 sps:$4 sm:$0xff]  }
 0x29e   :  { %5650 = vmatpush1.bf16.msra.mxu0 %v8222_v60  ;;  %5405 = vmatprep.subr.bf16.mxu1 %v8227_v29  ;;  %v8308_v60 = vld [vmem:[#allocation2 + $0xf74] ss:$24 sps:$4 sm:$0xff]   ;;  %v8303_v29 = vld [vmem:[#allocation2 + $0x1568] ss:$24 sps:$4 sm:$0xff]  }
 0x29f   :  { %5651 = vmatprep.subr.bf16.mxu0 %v8230_v38  ;;  %v8306_v38 = vld [vmem:[#allocation2 + $0xf70] ss:$24 sps:$4 sm:$0xff]  }
 0x2a1   :  { %5406 = vmatpush1.bf16.msra.mxu1 %v8225_v31  ;;  %v8311_v31 = vld [vmem:[#allocation2 + $0x159c] ss:$24 sps:$4 sm:$0xff]  }
 0x2a2   :  { %5652 = vmatpush1.bf16.msra.mxu0 %v8228_v32  ;;  %5407 = vmatprep.subr.bf16.mxu1 %v8233_v35  ;;  %v8309_v32 = vld [vmem:[#allocation2 + $0x1598] ss:$24 sps:$4 sm:$0xff]  }
 0x2a3   :  { %5653 = vmatprep.subr.bf16.mxu0 %v8236_v36  ;;  %v8312_v35 = vld [vmem:[#allocation2 + $0xfa0] ss:$24 sps:$4 sm:$0xff]   ;;  %v8317_v36 = vld [vmem:[#allocation2 + $0x15cc] ss:$24 sps:$4 sm:$0xff]  }
 0x2a5   :  { %5408 = vmatpush1.bf16.msra.mxu1 %v8231_v37  ;;  %v8320_v37 = vld [vmem:[#allocation2 + $0xfd4] ss:$24 sps:$4 sm:$0xff]  }
 0x2a6   :  { %5654 = vmatpush1.bf16.msra.mxu0 %v8234_v39  ;;  %5409 = vmatprep.subr.bf16.mxu1 %v8239_v40  ;;  %v8315_v39 = vld [vmem:[#allocation2 + $0x15c8] ss:$24 sps:$4 sm:$0xff]   ;;  %v8323_v40 = vld [vmem:[#allocation2 + $0x15fc] ss:$24 sps:$4 sm:$0xff]  }
 0x2a7   :  { %5655 = vmatprep.subr.bf16.mxu0 %v8242_v41  ;;  %v8326_v41 = vld [vmem:[#allocation2 + $0x1004] ss:$24 sps:$4 sm:$0xff]  }
 0x2a9   :  { %5410 = vmatpush1.bf16.msra.mxu1 %v8237_v56  ;;  %v8321_v56 = vld [vmem:[#allocation2 + $0x15f8] ss:$24 sps:$4 sm:$0xff]  }
 0x2aa   :  { %5656 = vmatpush1.bf16.msra.mxu0 %v8240_v44  ;;  %5411 = vmatprep.subr.bf16.mxu1 %v8245_v45  ;;  %v8324_v44 = vld [vmem:[#allocation2 + $0x1000] ss:$24 sps:$4 sm:$0xff]   ;;  %v8329_v45 = vld [vmem:[#allocation2 + $0x162c] ss:$24 sps:$4 sm:$0xff]  }
 0x2ab   :  { %5657 = vmatprep.subr.bf16.mxu0 %v8248_v46  ;;  %v8332_v46 = vld [vmem:[#allocation2 + $0x1034] ss:$24 sps:$4 sm:$0xff]  }
 0x2ad   :  { %5412 = vmatpush1.bf16.msra.mxu1 %v8243_v50  ;;  %v8327_v50 = vld [vmem:[#allocation2 + $0x1628] ss:$24 sps:$4 sm:$0xff]  }
 0x2ae   :  { %5658 = vmatpush1.bf16.msra.mxu0 %v8246_v51  ;;  %5413 = vmatprep.subr.bf16.mxu1 %v8251_v47  ;;  %v8330_v51 = vld [vmem:[#allocation2 + $0x1030] ss:$24 sps:$4 sm:$0xff]   ;;  %v8335_v47 = vld [vmem:[#allocation2 + $0x165c] ss:$24 sps:$4 sm:$0xff]  }
 0x2af   :  { %5659 = vmatprep.subr.bf16.mxu0 %v8254_v52  ;;  %v8338_v52 = vld [vmem:[#allocation2 + $0x1064] ss:$24 sps:$4 sm:$0xff]  }
 0x2b1   :  { %5414 = vmatpush1.bf16.msra.mxu1 %v8249_v54  ;;  %v8333_v54 = vld [vmem:[#allocation2 + $0x1658] ss:$24 sps:$4 sm:$0xff]  }
 0x2b2   :  { %5660 = vmatpush1.bf16.msra.mxu0 %v8252_v55  ;;  %5415 = vmatprep.subr.bf16.mxu1 %v8257_v58  ;;  %v8336_v55 = vld [vmem:[#allocation2 + $0x1060] ss:$24 sps:$4 sm:$0xff]   ;;  %v8341_v58 = vld [vmem:[#allocation2 + $0x168c] ss:$24 sps:$4 sm:$0xff]  }
 0x2b3   :  { %5661 = vmatprep.subr.bf16.mxu0 %v8260_v18  ;;  %v8344_v18 = vld [vmem:[#allocation2 + $0x1094] ss:$24 sps:$4 sm:$0xff]  }
 0x2b5   :  { %5416 = vmatpush1.bf16.msra.mxu1 %v8255_v59  ;;  %v8339_v59 = vld [vmem:[#allocation2 + $0x1688] ss:$24 sps:$4 sm:$0xff]  }
 0x2b6   :  { %5662 = vmatpush1.bf16.msra.mxu0 %v8258_v62  ;;  %5417 = vmatprep.subr.bf16.mxu1 %v8263_v1  ;;  %v8342_v62 = vld [vmem:[#allocation2 + $0x1090] ss:$24 sps:$4 sm:$0xff]   ;;  %v8347_v1 = vld [vmem:[#allocation2 + $0x16bc] ss:$24 sps:$4 sm:$0xff]  }
 0x2b7   :  { %5663 = vmatprep.subr.bf16.mxu0 %v8266_v63  ;;  %v8350_v63 = vld [vmem:[#allocation2 + $0x10c4] ss:$24 sps:$4 sm:$0xff]  }
 0x2b9   :  { %5418 = vmatpush1.bf16.msra.mxu1 %v8261_v0  ;;  %v8345_v0 = vld [vmem:[#allocation2 + $0x16b8] ss:$24 sps:$4 sm:$0xff]  }
 0x2ba   :  { %5664 = vmatpush1.bf16.msra.mxu0 %v8264_v2  ;;  %5419 = vmatprep.subr.bf16.mxu1 %v8269_v3  ;;  %v8348_v2 = vld [vmem:[#allocation2 + $0x10c0] ss:$24 sps:$4 sm:$0xff]   ;;  %v8353_v3 = vld [vmem:[#allocation2 + $0x16ec] ss:$24 sps:$4 sm:$0xff]  }
 0x2bb   :  { %5665 = vmatprep.subr.bf16.mxu0 %v8272_v6  ;;  %v8356_v6 = vld [vmem:[#allocation2 + $0x10f4] ss:$24 sps:$4 sm:$0xff]  }
 0x2bd   :  { %5420 = vmatpush1.bf16.msra.mxu1 %v8267_v7  ;;  %v8351_v7 = vld [vmem:[#allocation2 + $0x16e8] ss:$24 sps:$4 sm:$0xff]  }
 0x2be   :  { %5666 = vmatpush1.bf16.msra.mxu0 %v8270_v4  ;;  %5421 = vmatprep.subr.bf16.mxu1 %v8275_v33  ;;  %v8354_v4 = vld [vmem:[#allocation2 + $0x10f0] ss:$24 sps:$4 sm:$0xff]   ;;  %v8359_v33 = vld [vmem:[#allocation2 + $0x171c] ss:$24 sps:$4 sm:$0xff]  }
 0x2bf   :  { %5667 = vmatprep.subr.bf16.mxu0 %v8278_v9  ;;  %v8362_v9 = vld [vmem:[#allocation2 + $0x1124] ss:$24 sps:$4 sm:$0xff]  }
 0x2c1   :  { %5422 = vmatpush1.bf16.msra.mxu1 %v8273_v61  ;;  %v8357_v61 = vld [vmem:[#allocation2 + $0x1718] ss:$24 sps:$4 sm:$0xff]  }
 0x2c2   :  { %5668 = vmatpush1.bf16.msra.mxu0 %v8276_v10  ;;  %5423 = vmatprep.subr.bf16.mxu1 %v8281_v34  ;;  %v8360_v10 = vld [vmem:[#allocation2 + $0x1120] ss:$24 sps:$4 sm:$0xff]   ;;  %v8365_v34 = vld [vmem:[#allocation2 + $0x174c] ss:$24 sps:$4 sm:$0xff]  }
 0x2c3   :  { %5669 = vmatprep.subr.bf16.mxu0 %v8284_v11  ;;  %v8368_v11 = vld [vmem:[#allocation2 + $0x1154] ss:$24 sps:$4 sm:$0xff]  }
 0x2c5   :  { %5424 = vmatpush1.bf16.msra.mxu1 %v8279_v12  ;;  %v8363_v12 = vld [vmem:[#allocation2 + $0x1748] ss:$24 sps:$4 sm:$0xff]  }
 0x2c6   :  { %5670 = vmatpush1.bf16.msra.mxu0 %v8282_v13  ;;  %5425 = vmatprep.subr.bf16.mxu1 %v8287_v15  ;;  %v8366_v13 = vld [vmem:[#allocation2 + $0x1150] ss:$24 sps:$4 sm:$0xff]   ;;  %v8371_v15 = vld [vmem:[#allocation2 + $0x177c] ss:$24 sps:$4 sm:$0xff]  }
 0x2c7   :  { %5671 = vmatprep.subr.bf16.mxu0 %v8290_v16  ;;  %v8374_v16 = vld [vmem:[#allocation2 + $0x1184] ss:$24 sps:$4 sm:$0xff]  }
 0x2c9   :  { %5426 = vmatpush1.bf16.msra.mxu1 %v8285_v17  ;;  %v8369_v17 = vld [vmem:[#allocation2 + $0x1778] ss:$24 sps:$4 sm:$0xff]  }
 0x2ca   :  { %5672 = vmatpush1.bf16.msra.mxu0 %v8288_v19  ;;  %5436 = vmatprep.subr.bf16.mxu1 %v8293_v20  ;;  %v8372_v19 = vld [vmem:[#allocation2 + $0x1180] ss:$24 sps:$4 sm:$0xff]   ;;  %v8377_v20 = vld [vmem:[#allocation2 + $0x17ac] ss:$24 sps:$4 sm:$0xff]  }
 0x2cb   :  { %5682 = vmatprep.subr.bf16.mxu0 %v8296_v23  ;;  %v8380_v23 = vld [vmem:[#allocation2 + $0x11b4] ss:$24 sps:$4 sm:$0xff]  }
 0x2cc   :  { %5428 = vmatmul.mubr.bf16.vlgmr.msra.gmra.mrb[4].mxu1 %v8859_v28 }
 0x2cd   :  { %5674 = vmatmul.mubr.bf16.vlgmr.msra.gmra.mrb[4].mxu0 %v8815_v42  ;;  %5437 = vmatpush1.bf16.msra.mxu1 %v8291_v53  ;;  %v8314_v42 = vld [vmem:[#allocation2 + $0xfa4] ss:$24 sps:$4 sm:$0xff]   ;;  %v8375_v53 = vld [vmem:[#allocation2 + $0x17a8] ss:$24 sps:$4 sm:$0xff]  }
 0x2ce   :  { %5683 = vmatpush1.bf16.msra.mxu0 %v8294_v21  ;;  %5438 = vmatprep.subr.bf16.mxu1 %v8299_v25  ;;  %v8378_v21 = vld [vmem:[#allocation2 + $0x11b0] ss:$24 sps:$4 sm:$0xff]   ;;  %v8383_v25 = vld [vmem:[#allocation2 + $0x17dc] ss:$24 sps:$4 sm:$0xff]  }
 0x2cf   :  { %5684 = vmatprep.subr.bf16.mxu0 %v8302_v26  ;;  %5468 = vmatprep.mubr.bf16.mxu1 %v8861_v30  ;;  %v8386_v26 = vld [vmem:[#allocation2 + $0x11e4] ss:$24 sps:$4 sm:$0xff]  }
 0x2d0   :  { %5714 = vmatprep.mubr.bf16.mxu0 %v8819_v48  ;;  %v8318_v48 = vld [vmem:[#allocation2 + $0xfd0] ss:$24 sps:$4 sm:$0xff]  }
 0x2d1   :  { %5439 = vmatpush1.bf16.msra.mxu1 %v8297_v27  ;;  %v8381_v27 = vld [vmem:[#allocation2 + $0x17d8] ss:$24 sps:$4 sm:$0xff]  }
 0x2d2   :  { %5685 = vmatpush1.bf16.msra.mxu0 %v8300_v57  ;;  %5440 = vmatprep.subr.bf16.mxu1 %v8305_v49  ;;  %v8384_v57 = vld [vmem:[#allocation2 + $0x11e0] ss:$24 sps:$4 sm:$0xff]   ;;  %v8389_v49 = vld [vmem:[#allocation2 + $0x1214] ss:$24 sps:$4 sm:$0xff]  }
 0x2d3   :  { %5686 = vmatprep.subr.bf16.mxu0 %v8308_v60  ;;  %v8390_v60 = vld [vmem:[#allocation7 + $0x40] sm:$0xff]  }
 0x2d5   :  { %5441 = vmatpush1.bf16.msra.mxu1 %v8303_v29  ;;  %v5806_v29 = vmax.f32 %v8897_v24, 0.0  ;;  %v8399_v24 = vld [vmem:[#allocation2 + $0x1274] ss:$24 sps:$4 sm:$0xff]  }
 0x2d6   :  { %5687 = vmatpush1.bf16.msra.mxu0 %v8306_v38  ;;  %5442 = vmatprep.subr.bf16.mxu1 %v8311_v31  ;;  %v8387_v38 = vld [vmem:[#allocation2 + $0x1210] ss:$24 sps:$4 sm:$0xff]  }
 0x2d7   :  { %5688 = vmatprep.subr.bf16.mxu0 %v8314_v42  ;;  %v8391_v31 = vld [vmem:[#allocation7] sm:$0xff]  }
 0x2d8   :  { %v8394_v42 = vld [vmem:[#allocation2 + $0x1244] ss:$24 sps:$4 sm:$0xff]  }
 0x2d9   :  { %5443 = vmatpush1.bf16.msra.mxu1 %v8309_v32  ;;  %v8395_v32 = vld [vmem:[#allocation7 + $0x48] sm:$0xff]  }
 0x2da   :  { %5689 = vmatpush1.bf16.msra.mxu0 %v8312_v35  ;;  %5444 = vmatprep.subr.bf16.mxu1 %v8317_v36  ;;  %v5812_v35 = vpack.c.bf16 %v5806_v29, %v5806_v29  ;;  %v8392_v36 = vld [vmem:[#allocation2 + $0x1240] ss:$24 sps:$4 sm:$0xff]   ;;  %v8450_v29 = vld [vmem:[#allocation2 + $0x14e4] ss:$24 sps:$4 sm:$0xff]  }
 0x2db   :  { %5690 = vmatprep.subr.bf16.mxu0 %v8320_v37  ;;  %v8396_v37 = vld [vmem:[#allocation7 + $0x8] sm:$0xff]  }
 0x2dd   :  { %5445 = vmatpush1.bf16.msra.mxu1 %v8315_v39  ;;  %v8400_v39 = vld [vmem:[#allocation7 + $0x50] sm:$0xff]  }
 0x2de   :  { %5691 = vmatpush1.bf16.msra.mxu0 %v8318_v48  ;;  %5446 = vmatprep.subr.bf16.mxu1 %v8323_v40  ;;  %v8397_v48 = vld [vmem:[#allocation2 + $0x1270] ss:$24 sps:$4 sm:$0xff]   ;;  %v8401_v40 = vld [vmem:[#allocation7 + $0x10] sm:$0xff]  }
 0x2df   :  { %5692 = vmatprep.subr.bf16.mxu0 %v8326_v41  ;;  %v8404_v41 = vld [vmem:[#allocation2 + $0x12a4] ss:$24 sps:$4 sm:$0xff]  }
 0x2e1   :  { %5447 = vmatpush1.bf16.msra.mxu1 %v8321_v56  ;;  %v8405_v56 = vld [vmem:[#allocation7 + $0x58] sm:$0xff]  }
 0x2e2   :  { %5693 = vmatpush1.bf16.msra.mxu0 %v8324_v44  ;;  %5448 = vmatprep.subr.bf16.mxu1 %v8329_v45  ;;  %v8406_v44 = vld [vmem:[#allocation7 + $0x18] sm:$0xff]   ;;  %v8409_v45 = vld [vmem:[#allocation2 + $0x12d4] ss:$24 sps:$4 sm:$0xff]  }
 0x2e3   :  { %5694 = vmatprep.subr.bf16.mxu0 %v8332_v46  ;;  %v8410_v46 = vld [vmem:[#allocation7 + $0x60] sm:$0xff]  }
 0x2e5   :  { %5449 = vmatpush1.bf16.msra.mxu1 %v8327_v50  ;;  %v8407_v50 = vld [vmem:[#allocation2 + $0x12d0] ss:$24 sps:$4 sm:$0xff]  }
 0x2e6   :  { %5695 = vmatpush1.bf16.msra.mxu0 %v8330_v51  ;;  %5450 = vmatprep.subr.bf16.mxu1 %v8335_v47  ;;  %v8414_v51 = vld [vmem:[#allocation2 + $0x1304] ss:$24 sps:$4 sm:$0xff]   ;;  %v8415_v47 = vld [vmem:[#allocation7 + $0x68] sm:$0xff]  }
 0x2e7   :  { %5696 = vmatprep.subr.bf16.mxu0 %v8338_v52  ;;  %v8412_v52 = vld [vmem:[#allocation2 + $0x1300] ss:$24 sps:$4 sm:$0xff]  }
 0x2e9   :  { %5451 = vmatpush1.bf16.msra.mxu1 %v8333_v54  ;;  %v8416_v54 = vld [vmem:[#allocation7 + $0x28] sm:$0xff]  }
 0x2ea   :  { %5697 = vmatpush1.bf16.msra.mxu0 %v8336_v55  ;;  %5452 = vmatprep.subr.bf16.mxu1 %v8341_v58  ;;  %v8419_v55 = vld [vmem:[#allocation2 + $0x1334] ss:$24 sps:$4 sm:$0xff]  }
 0x2eb   :  { %5698 = vmatprep.subr.bf16.mxu0 %v8344_v18  ;;  %v8420_v58 = vld [vmem:[#allocation7 + $0x70] sm:$0xff]   ;;  %v8417_v18 = vld [vmem:[#allocation2 + $0x1330] ss:$24 sps:$4 sm:$0xff]  }
 0x2ed   :  { %5453 = vmatpush1.bf16.msra.mxu1 %v8339_v59  ;;  %v8421_v59 = vld [vmem:[#allocation7 + $0x30] sm:$0xff]  }
 0x2ee   :  { %5699 = vmatpush1.bf16.msra.mxu0 %v8342_v62  ;;  %5454 = vmatprep.subr.bf16.mxu1 %v8347_v1  ;;  %v8424_v62 = vld [vmem:[#allocation2 + $0x1364] ss:$24 sps:$4 sm:$0xff]  }
 0x2ef   :  { %5700 = vmatprep.subr.bf16.mxu0 %v8350_v63  ;;  %v8425_v1 = vld [vmem:[#allocation7 + $0x78] sm:$0xff]  }
 0x2f0   :  { %v8422_v63 = vld [vmem:[#allocation2 + $0x1360] ss:$24 sps:$4 sm:$0xff]  }
 0x2f1   :  { %5455 = vmatpush1.bf16.msra.mxu1 %v8345_v0  ;;  %v8426_v0 = vld [vmem:[#allocation7 + $0x38] sm:$0xff]  }
 0x2f2   :  { %5701 = vmatpush1.bf16.msra.mxu0 %v8348_v2  ;;  %5456 = vmatprep.subr.bf16.mxu1 %v8353_v3  ;;  %v5805_v2 = vmax.f32 %v8895_v22, 0.0  ;;  %v8429_v3 = vld [vmem:[#allocation2 + $0x1394] ss:$24 sps:$4 sm:$0xff]  }
 0x2f3   :  { %5702 = vmatprep.subr.bf16.mxu0 %v8356_v6  ;;  %v8499_v6 = vld [vmem:[#allocation7 + $0xc0] sm:$0xff]  }
 0x2f4   :  { %v8435_v22 = vld [vmem:[#allocation2 + $0x13f4] ss:$24 sps:$4 sm:$0xff]  }
 0x2f5   :  { %5457 = vmatpush1.bf16.msra.mxu1 %v8351_v7  ;;  %v8427_v7 = vld [vmem:[#allocation2 + $0x1390] ss:$24 sps:$4 sm:$0xff]  }
 0x2f6   :  { %5703 = vmatpush1.bf16.msra.mxu0 %v8354_v4  ;;  %5458 = vmatprep.subr.bf16.mxu1 %v8359_v33  ;;  %v8500_v4 = vld [vmem:[#allocation7 + $0x80] sm:$0xff]   ;;  %v5811_v33 = vpack.c.bf16 %v5805_v2, %v5805_v2 }
 0x2f7   :  { %5704 = vmatprep.subr.bf16.mxu0 %v8362_v9  ;;  %v8432_v9 = vld [vmem:[#allocation2 + $0x13c4] ss:$24 sps:$4 sm:$0xff]   ;;  %v8495_v2 = vld [vmem:[#allocation2 + $0x17b4] ss:$24 sps:$4 sm:$0xff]  }
 0x2f9   :  { %5459 = vmatpush1.bf16.msra.mxu1 %v8357_v61  ;;  %v8501_v61 = vld [vmem:[#allocation7 + $0xc8] sm:$0xff]  }
 0x2fa   :  { %5705 = vmatpush1.bf16.msra.mxu0 %v8360_v10  ;;  %5460 = vmatprep.subr.bf16.mxu1 %v8365_v34  ;;  %v8430_v10 = vld [vmem:[#allocation2 + $0x13c0] ss:$24 sps:$4 sm:$0xff]   ;;  %v8502_v34 = vld [vmem:[#allocation7 + $0x88] sm:$0xff]  }
 0x2fb   :  { %5706 = vmatprep.subr.bf16.mxu0 %v8368_v11  ;;  %v8503_v11 = vld [vmem:[#allocation7 + $0xd0] sm:$0xff]  }
 0x2fd   :  { %5461 = vmatpush1.bf16.msra.mxu1 %v8363_v12  ;;  %v8433_v12 = vld [vmem:[#allocation2 + $0x13f0] ss:$24 sps:$4 sm:$0xff]  }
 0x2fe   :  { %5707 = vmatpush1.bf16.msra.mxu0 %v8366_v13  ;;  %5462 = vmatprep.subr.bf16.mxu1 %v8371_v15  ;;  %v8504_v13 = vld [vmem:[#allocation7 + $0x90] sm:$0xff]  }
 0x2ff   :  { %5708 = vmatprep.subr.bf16.mxu0 %v8374_v16  ;;  %v8438_v15 = vld [vmem:[#allocation2 + $0x1424] ss:$24 sps:$4 sm:$0xff]  }
 0x300   :  { %v8505_v16 = vld [vmem:[#allocation7 + $0xd8] sm:$0xff]  }
 0x301   :  { %5463 = vmatpush1.bf16.msra.mxu1 %v8369_v17  ;;  %v8436_v17 = vld [vmem:[#allocation2 + $0x1420] ss:$24 sps:$4 sm:$0xff]  }
 0x302   :  { %5709 = vmatpush1.bf16.msra.mxu0 %v8372_v19  ;;  %5464 = vmatprep.subr.bf16.mxu1 %v8377_v20  ;;  %v8506_v19 = vld [vmem:[#allocation7 + $0x98] sm:$0xff]   ;;  %v8441_v20 = vld [vmem:[#allocation2 + $0x1454] ss:$24 sps:$4 sm:$0xff]  }
 0x303   :  { %5710 = vmatprep.subr.bf16.mxu0 %v8380_v23  ;;  %v8507_v23 = vld [vmem:[#allocation7 + $0xe0] sm:$0xff]  }
 0x305   :  { %5465 = vmatpush1.bf16.msra.mxu1 %v8375_v53  ;;  %v8439_v53 = vld [vmem:[#allocation2 + $0x1450] ss:$24 sps:$4 sm:$0xff]  }
 0x306   :  { %5711 = vmatpush1.bf16.msra.mxu0 %v8378_v21  ;;  %5466 = vmatprep.subr.bf16.mxu1 %v8383_v25  ;;  %v8508_v21 = vld [vmem:[#allocation7 + $0xa0] sm:$0xff]  }
 0x307   :  { %5712 = vmatprep.subr.bf16.mxu0 %v8386_v26  ;;  %v8444_v25 = vld [vmem:[#allocation2 + $0x1484] ss:$24 sps:$4 sm:$0xff]   ;;  %v8509_v26 = vld [vmem:[#allocation7 + $0xe8] sm:$0xff]  }
 0x309   :  { %5467 = vmatpush1.bf16.msra.mxu1 %v8381_v27  ;;  %v8442_v27 = vld [vmem:[#allocation2 + $0x1480] ss:$24 sps:$4 sm:$0xff]  }
 0x30a   :  { %5713 = vmatpush1.bf16.msra.mxu0 %v8384_v57  ;;  %7163 = vmatprep.subr.bf16.mxu1 %v8390_v60  ;;  %v8510_v57 = vld [vmem:[#allocation7 + $0xa8] sm:$0xff]  }
 0x30b   :  { %5723 = vmatprep.subr.bf16.mxu0 %v8389_v49  ;;  %v8447_v49 = vld [vmem:[#allocation2 + $0x14b4] ss:$24 sps:$4 sm:$0xff]   ;;  %v8445_v60 = vld [vmem:[#allocation2 + $0x14b0] ss:$24 sps:$4 sm:$0xff]  }
 0x30c   :  { %5469 = vmatmul.mubr.bf16.vlgmr.msra.gmra.mrb[4].mxu1 %v8869_v14 }
 0x30d   :  { %5715 = vmatmul.mubr.bf16.vlgmr.msra.gmra.mrb[4].mxu0 %v8842_v5  ;;  %7164 = vmatpush3.bf16.msra.mxu1 %v8391_v31  ;;  %v8402_v5 = vld [vmem:[#allocation2 + $0x12a0] ss:$24 sps:$4 sm:$0xff]   ;;  %v8453_v31 = vld [vmem:[#allocation2 + $0x1514] ss:$24 sps:$4 sm:$0xff]  }
 0x30e   :  { %5724 = vmatpush1.bf16.msra.mxu0 %v8387_v38  ;;  %6240 = vmatprep.mubr.bf16.mxu1 %v5812_v35  ;;  %v8448_v38 = vld [vmem:[#allocation2 + $0x14e0] ss:$24 sps:$4 sm:$0xff]  }
 0x30f   :  { %5725 = vmatprep.subr.bf16.mxu0 %v8394_v42  ;;  %7165 = vmatprep.subr.bf16.mxu1 %v8395_v32  ;;  %v8451_v42 = vld [vmem:[#allocation2 + $0x1510] ss:$24 sps:$4 sm:$0xff]   ;;  %v8456_v32 = vld [vmem:[#allocation2 + $0x1544] ss:$24 sps:$4 sm:$0xff]   ;;  %v8454_v35 = vld [vmem:[#allocation2 + $0x1540] ss:$24 sps:$4 sm:$0xff]  }
 0x310   :  { %5755 = vmatprep.mubr.bf16.mxu0 %v8844_v8  ;;  %v8411_v8 = vld [vmem:[#allocation7 + $0x20] sm:$0xff]  }
 0x311   :  { %7166 = vmatpush3.bf16.msra.mxu1 %v8396_v37  ;;  %v8457_v37 = vld [vmem:[#allocation2 + $0x1570] ss:$24 sps:$4 sm:$0xff]  }
 0x312   :  { %5726 = vmatpush1.bf16.msra.mxu0 %v8392_v36  ;;  %7167 = vmatprep.subr.bf16.mxu1 %v8400_v39  ;;  %v8459_v36 = vld [vmem:[#allocation2 + $0x1574] ss:$24 sps:$4 sm:$0xff]   ;;  %v8460_v39 = vld [vmem:[#allocation2 + $0x15a0] ss:$24 sps:$4 sm:$0xff]  }
 0x313   :  { %5727 = vmatprep.subr.bf16.mxu0 %v8399_v24  ;;  %v8462_v24 = vld [vmem:[#allocation2 + $0x15a4] ss:$24 sps:$4 sm:$0xff]  }
 0x315   :  { %7168 = vmatpush3.bf16.msra.mxu1 %v8401_v40  ;;  %v8463_v40 = vld [vmem:[#allocation2 + $0x15d0] ss:$24 sps:$4 sm:$0xff]  }
 0x316   :  { %5728 = vmatpush1.bf16.msra.mxu0 %v8397_v48  ;;  %7169 = vmatprep.subr.bf16.mxu1 %v8405_v56  ;;  %v8465_v48 = vld [vmem:[#allocation2 + $0x15d4] ss:$24 sps:$4 sm:$0xff]  }
 0x317   :  { %5729 = vmatprep.subr.bf16.mxu0 %v8404_v41  ;;  %v8468_v41 = vld [vmem:[#allocation2 + $0x1604] ss:$24 sps:$4 sm:$0xff]   ;;  %v8471_v56 = vld [vmem:[#allocation2 + $0x1634] ss:$24 sps:$4 sm:$0xff]  }
 0x319   :  { %7170 = vmatpush3.bf16.msra.mxu1 %v8406_v44  ;;  %v8469_v44 = vld [vmem:[#allocation2 + $0x1630] ss:$24 sps:$4 sm:$0xff]  }
 0x31a   :  { %5730 = vmatpush1.bf16.msra.mxu0 %v8402_v5  ;;  %7171 = vmatprep.subr.bf16.mxu1 %v8410_v46  ;;  %v8511_v5 = vld [vmem:[#allocation7 + $0xf0] sm:$0xff]   ;;  %v8513_v46 = vld [vmem:[#allocation7 + $0xf8] sm:$0xff]  }
 0x31b   :  { %5731 = vmatprep.subr.bf16.mxu0 %v8409_v45  ;;  %v8474_v45 = vld [vmem:[#allocation2 + $0x1664] ss:$24 sps:$4 sm:$0xff]  }
 0x31d   :  { %7172 = vmatpush3.bf16.msra.mxu1 %v8411_v8  ;;  %v8472_v8 = vld [vmem:[#allocation2 + $0x1660] ss:$24 sps:$4 sm:$0xff]  }
 0x31e   :  { %5732 = vmatpush1.bf16.msra.mxu0 %v8407_v50  ;;  %7173 = vmatprep.subr.bf16.mxu1 %v8415_v47  ;;  %v8514_v50 = vld [vmem:[#allocation7 + $0xb8] sm:$0xff]   ;;  %v8475_v47 = vld [vmem:[#allocation2 + $0x1690] ss:$24 sps:$4 sm:$0xff]  }
 0x31f   :  { %5733 = vmatprep.subr.bf16.mxu0 %v8414_v51  ;;  %v8477_v51 = vld [vmem:[#allocation2 + $0x1694] ss:$24 sps:$4 sm:$0xff]  }
 0x321   :  { %7174 = vmatpush3.bf16.msra.mxu1 %v8416_v54  ;;  %v8478_v54 = vld [vmem:[#allocation2 + $0x16c0] ss:$24 sps:$4 sm:$0xff]  }
 0x322   :  { %5734 = vmatpush1.bf16.msra.mxu0 %v8412_v52  ;;  %7175 = vmatprep.subr.bf16.mxu1 %v8420_v58  ;;  %v8480_v52 = vld [vmem:[#allocation2 + $0x16c4] ss:$24 sps:$4 sm:$0xff]   ;;  %v8481_v58 = vld [vmem:[#allocation2 + $0x16f0] ss:$24 sps:$4 sm:$0xff]  }
 0x323   :  { %5735 = vmatprep.subr.bf16.mxu0 %v8419_v55  ;;  %v8483_v55 = vld [vmem:[#allocation2 + $0x16f4] ss:$24 sps:$4 sm:$0xff]  }
 0x325   :  { %7176 = vmatpush3.bf16.msra.mxu1 %v8421_v59  ;;  %v8484_v59 = vld [vmem:[#allocation2 + $0x1720] ss:$24 sps:$4 sm:$0xff]  }
 0x326   :  { %5736 = vmatpush1.bf16.msra.mxu0 %v8417_v18  ;;  %7177 = vmatprep.subr.bf16.mxu1 %v8425_v1  ;;  %v8486_v18 = vld [vmem:[#allocation2 + $0x1724] ss:$24 sps:$4 sm:$0xff]   ;;  %v8487_v1 = vld [vmem:[#allocation2 + $0x1750] ss:$24 sps:$4 sm:$0xff]  }
 0x327   :  { %5737 = vmatprep.subr.bf16.mxu0 %v8424_v62  ;;  %v8489_v62 = vld [vmem:[#allocation2 + $0x1754] ss:$24 sps:$4 sm:$0xff]  }
 0x329   :  { %7178 = vmatpush3.bf16.msra.mxu1 %v8426_v0  ;;  %v8490_v0 = vld [vmem:[#allocation2 + $0x1780] ss:$24 sps:$4 sm:$0xff]  }
 0x32a   :  { %5738 = vmatpush1.bf16.msra.mxu0 %v8422_v63  ;;  %7185 = vmatprep.subr.bf16.mxu1 %v8499_v6  ;;  %v8492_v63 = vld [vmem:[#allocation2 + $0x1784] ss:$24 sps:$4 sm:$0xff]  }
 0x32b   :  { %5739 = vmatprep.subr.bf16.mxu0 %v8429_v3  ;;  %v8493_v3 = vld [vmem:[#allocation2 + $0x17b0] ss:$24 sps:$4 sm:$0xff]   ;;  %v8498_v6 = vld [vmem:[#allocation2 + $0x17e4] ss:$24 sps:$4 sm:$0xff]  }
 0x32c   :  { %6241 = vmatmul.mubr.bf16.vlgmr.msra.gmra.mrb[8].mxu1 %v5811_v33  ;;  %v961_v33 = vsub.s32 2, %v8745_v43 }
 0x32d   :  { %7186 = vmatpush3.bf16.msra.mxu1 %v8500_v4  ;;  %v8496_v4 = vld [vmem:[#allocation2 + $0x17e0] ss:$24 sps:$4 sm:$0xff]  }
 0x32e   :  { %5740 = vmatpush1.bf16.msra.mxu0 %v8427_v7  ;;  %7187 = vmatprep.subr.bf16.mxu1 %v8501_v61  ;;  %v8515_v7 = vld [vmem:[#allocation7 + $0x140] sm:$0xff]   ;;  %v8531_v61 = vld [vmem:[#allocation5] sm:$0x3f] }
 0x32f   :  { %5741 = vmatprep.subr.bf16.mxu0 %v8432_v9  ;;  %v965_v9 = vsub.s32 3, %v8745_v43 }
 0x331   :  { %7188 = vmatpush3.bf16.msra.mxu1 %v8502_v34  ;;  %v966_v34 = vrot.slane %v8531_v61, %v965_v9 }
 0x332   :  { %5742 = vmatpush1.bf16.msra.mxu0 %v8430_v10  ;;  %7189 = vmatprep.subr.bf16.mxu1 %v8503_v11  ;;  %v962_v10 = vrot.slane %v8531_v61, %v961_v33 }
 0x333   :  { %5743 = vmatprep.subr.bf16.mxu0 %v8435_v22 }
 0x335   :  { %7190 = vmatpush3.bf16.msra.mxu1 %v8504_v13 }
 0x336   :  { %5744 = vmatpush1.bf16.msra.mxu0 %v8433_v12  ;;  %7191 = vmatprep.subr.bf16.mxu1 %v8505_v16 }
 0x337   :  { %5745 = vmatprep.subr.bf16.mxu0 %v8438_v15 }
 0x339   :  { %7192 = vmatpush3.bf16.msra.mxu1 %v8506_v19 }
 0x33a   :  { %5746 = vmatpush1.bf16.msra.mxu0 %v8436_v17  ;;  %7193 = vmatprep.subr.bf16.mxu1 %v8507_v23  ;;  %v8516_v23 = vld [vmem:[#allocation7 + $0x100] sm:$0xff]  }
 0x33b   :  { %5747 = vmatprep.subr.bf16.mxu0 %v8441_v20 }
 0x33d   :  { %7194 = vmatpush3.bf16.msra.mxu1 %v8508_v21  ;;  %v8517_v21 = vld [vmem:[#allocation7 + $0x148] sm:$0xff]  }
 0x33e   :  { %5748 = vmatpush1.bf16.msra.mxu0 %v8439_v53  ;;  %7195 = vmatprep.subr.bf16.mxu1 %v8509_v26  ;;  %v8520_v26 = vld [vmem:[#allocation7 + $0x110] sm:$0xff]  }
 0x33f   :  { %5749 = vmatprep.subr.bf16.mxu0 %v8444_v25  ;;  %v8519_v25 = vld [vmem:[#allocation7 + $0x150] sm:$0xff]  }
 0x341   :  { %7196 = vmatpush3.bf16.msra.mxu1 %v8510_v57  ;;  %v8522_v57 = vld [vmem:[#allocation7 + $0x118] sm:$0xff]  }
 0x342   :  { %5750 = vmatpush1.bf16.msra.mxu0 %v8442_v27  ;;  %7197 = vmatprep.subr.bf16.mxu1 %v8511_v5  ;;  %v8521_v27 = vld [vmem:[#allocation7 + $0x158] sm:$0xff]  }
 0x343   :  { %5751 = vmatprep.subr.bf16.mxu0 %v8447_v49  ;;  %v8523_v49 = vld [vmem:[#allocation7 + $0x160] sm:$0xff]  }
 0x346   :  { %5752 = vmatpush1.bf16.msra.mxu0 %v8445_v60  ;;  %v8524_v60 = vld [vmem:[#allocation7 + $0x120] sm:$0xff]  }
 0x347   :  { %5753 = vmatprep.subr.bf16.mxu0 %v8450_v29  ;;  %v8525_v29 = vld [vmem:[#allocation7 + $0x168] sm:$0xff]  }
 0x34a   :  { %5754 = vmatpush1.bf16.msra.mxu0 %v8448_v38  ;;  %v8526_v38 = vld [vmem:[#allocation7 + $0x128] sm:$0xff]  }
 0x34b   :  { %5764 = vmatprep.subr.bf16.mxu0 %v8453_v31  ;;  %v8527_v31 = vld [vmem:[#allocation7 + $0x170] sm:$0xff]  }
 0x34d   :  { %5756 = vmatmul.mubr.bf16.vlgmr.msra.gmra.mrb[4].mxu0 %v8859_v28  ;;  %v8466_v28 = vld [vmem:[#allocation2 + $0x1600] ss:$24 sps:$4 sm:$0xff]  }
 0x34e   :  { %5765 = vmatpush1.bf16.msra.mxu0 %v8451_v42  ;;  %5796 = vmatprep.mubr.bf16.mxu0 %v8861_v30  ;;  %v8512_v30 = vld [vmem:[#allocation7 + $0xb0] sm:$0xff]  }
 0x34f   :  { %5766 = vmatprep.subr.bf16.mxu0 %v8456_v32  ;;  %7198 = vmatpush3.bf16.msra.mxu1 %v8512_v30  ;;  %v8528_v42 = vld [vmem:[#allocation7 + $0x130] sm:$0xff]   ;;  %v8529_v32 = vld [vmem:[#allocation7 + $0x178] sm:$0xff]  }
 0x350   :  { %7199 = vmatprep.subr.bf16.mxu1 %v8513_v46 }
 0x352   :  { %5767 = vmatpush1.bf16.msra.mxu0 %v8454_v35 }
 0x353   :  { %5768 = vmatprep.subr.bf16.mxu0 %v8459_v36  ;;  %7200 = vmatpush3.bf16.msra.mxu1 %v8514_v50 }
 0x354   :  { %7207 = vmatprep.subr.bf16.mxu1 %v8515_v7 }
 0x356   :  { %5769 = vmatpush1.bf16.msra.mxu0 %v8457_v37 }
 0x357   :  { %5770 = vmatprep.subr.bf16.mxu0 %v8462_v24 }
 0x35a   :  { %5771 = vmatpush1.bf16.msra.mxu0 %v8460_v39  ;;  %v8530_v39 = vld [vmem:[#allocation7 + $0x138] sm:$0xff]  }
 0x35b   :  { %5772 = vmatprep.subr.bf16.mxu0 %v8465_v48 }
 0x35e   :  { %5773 = vmatpush1.bf16.msra.mxu0 %v8463_v40  ;;  %v969_v40 = vsub.s32 4, %v8745_v43 }
 0x35f   :  { %5774 = vmatprep.subr.bf16.mxu0 %v8468_v41  ;;  %v973_v41 = vsub.s32 5, %v8745_v43 }
 0x362   :  { %5775 = vmatpush1.bf16.msra.mxu0 %v8466_v28  ;;  %v970_v28 = vrot.slane %v8531_v61, %v969_v40 }
 0x363   :  { %5776 = vmatprep.subr.bf16.mxu0 %v8471_v56  ;;  %v974_v56 = vrot.slane %v8531_v61, %v973_v41 }
 0x366   :  { %5777 = vmatpush1.bf16.msra.mxu0 %v8469_v44 }
 0x367   :  { %5778 = vmatprep.subr.bf16.mxu0 %v8474_v45 }
 0x36a   :  { %5779 = vmatpush1.bf16.msra.mxu0 %v8472_v8 }
 0x36b   :  { %5780 = vmatprep.subr.bf16.mxu0 %v8477_v51 }
 0x36e   :  { %5781 = vmatpush1.bf16.msra.mxu0 %v8475_v47 }
 0x36f   :  { %5782 = vmatprep.subr.bf16.mxu0 %v8480_v52 }
 0x372   :  { %5783 = vmatpush1.bf16.msra.mxu0 %v8478_v54  ;;  %v7114_v54 = vld [vmem:[#allocation8] ss:$0 sm:$0xff] }
 0x373   :  { %5784 = vmatprep.subr.bf16.mxu0 %v8483_v55 }
 0x376   :  { %5785 = vmatpush1.bf16.msra.mxu0 %v8481_v58 }
 0x377   :  { %5786 = vmatprep.subr.bf16.mxu0 %v8486_v18 }
 0x37a   :  { %5787 = vmatpush1.bf16.msra.mxu0 %v8484_v59 }
 0x37b   :  { %5788 = vmatprep.subr.bf16.mxu0 %v8489_v62 }
 0x37e   :  { %5789 = vmatpush1.bf16.msra.mxu0 %v8487_v1 }
 0x37f   :  { %5790 = vmatprep.subr.bf16.mxu0 %v8492_v63 }
 0x382   :  { %5791 = vmatpush1.bf16.msra.mxu0 %v8490_v0 }
 0x383   :  { %5792 = vmatprep.subr.bf16.mxu0 %v8495_v2 }
 0x386   :  { %5793 = vmatpush1.bf16.msra.mxu0 %v8493_v3 }
 0x387   :  { %5794 = vmatprep.subr.bf16.mxu0 %v8498_v6 }
 0x38a   :  { %5795 = vmatpush1.bf16.msra.mxu0 %v8496_v4 }
 0x38d   :  { %5797 = vmatmul.mubr.bf16.vlgmr.msra.gmra.mrb[4].mxu0 %v8869_v14  ;;  %v8518_v14 = vld [vmem:[#allocation7 + $0x108] sm:$0xff]  }
 0x3df   :  { %v5470_v22 = vpop.f32.mrb[4].mxu1 }
 0x3e0   :  { %v7233_v11 = vadd.f32 %v5470_v22, %v962_v10  ;;  %v5472_v12 = vpop.f32.mrb[5].mxu1 }
 0x3e1   :  { %v7234_v13 = vadd.f32 %v5472_v12, %v966_v34  ;;  %v5474_v15 = vpop.f32.mrb[6].mxu1 }
 0x3e2   :  { %v5807_v16 = vmax.f32 %v7233_v11, 0.0  ;;  %v5475_v17 = vpop.f32.mrb[7].mxu1 }
 0x3e3   :  { %v5808_v19 = vmax.f32 %v7234_v13, 0.0 }
 0x3e4   :  { %v5813_v53 = vpack.c.bf16 %v5807_v16, %v5807_v16 }
 0x3e5   :  { %v5814_v20 = vpack.c.bf16 %v5808_v19, %v5808_v19 }
 0x3e7   :  { %6280 = vmatprep.mubr.bf16.mxu1 %v5814_v20 }
 0x3e8   :  { %6281 = vmatmul.mubr.bf16.vlgmr.msra.gmra.mrb[12].mxu1 %v5813_v53 }
 0x3e9   :  { %7208 = vmatpush3.bf16.msra.mxu1 %v8516_v23 }
 0x3ea   :  { %7209 = vmatprep.subr.bf16.mxu1 %v8517_v21 }
 0x3ed   :  { %7210 = vmatpush3.bf16.msra.mxu1 %v8518_v14 }
 0x3ee   :  { %7211 = vmatprep.subr.bf16.mxu1 %v8519_v25 }
 0x3f1   :  { %7212 = vmatpush3.bf16.msra.mxu1 %v8520_v26 }
 0x3f2   :  { %7213 = vmatprep.subr.bf16.mxu1 %v8521_v27 }
 0x3f5   :  { %7214 = vmatpush3.bf16.msra.mxu1 %v8522_v57 }
 0x3f6   :  { %7215 = vmatprep.subr.bf16.mxu1 %v8523_v49 }
 0x3f9   :  { %7216 = vmatpush3.bf16.msra.mxu1 %v8524_v60 }
 0x3fa   :  { %7217 = vmatprep.subr.bf16.mxu1 %v8525_v29 }
 0x3fd   :  { %7218 = vmatpush3.bf16.msra.mxu1 %v8526_v38 }
 0x3fe   :  { %7219 = vmatprep.subr.bf16.mxu1 %v8527_v31 }
 0x3ff   :  { %v7179_v35 = vpop.f32.mrb[8].mxu1 }
 0x400   :  { %v7180_v36 = vpop.f32.mrb[9].mxu1 }
 0x401   :  { %v7181_v37 = vadd.f32 %v7180_v36, %v7179_v35  ;;  %v7182_v24 = vpop.f32.mrb[10].mxu1  ;;  %7220 = vmatpush3.bf16.msra.mxu1 %v8528_v42 }
 0x402   :  { %v7183_v48 = vpop.f32.mrb[11].mxu1  ;;  %7221 = vmatprep.subr.bf16.mxu1 %v8529_v32 }
 0x403   :  { %v6243_v18 = vadd.f32 %v7181_v37, %v7114_v54 }
 0x405   :  { %7222 = vmatpush3.bf16.msra.mxu1 %v8530_v39 }
 0x460   :  { %v5798_v5 = vpop.f32.mrb[4].mxu0 }
 0x461   :  { %v7235_v30 = vadd.f32 %v5798_v5, %v970_v28  ;;  %v5800_v44 = vpop.f32.mrb[5].mxu0 }
 0x462   :  { %v7236_v45 = vadd.f32 %v5800_v44, %v974_v56  ;;  %v5802_v46 = vpop.f32.mrb[6].mxu0 }
 0x463   :  { %v5809_v50 = vmax.f32 %v7235_v30, 0.0  ;;  %v5803_v8 = vpop.f32.mrb[7].mxu0 }
 0x464   :  { %v5810_v51 = vmax.f32 %v7236_v45, 0.0 }
 0x465   :  { %v5815_v52 = vpack.c.bf16 %v5809_v50, %v5809_v50 }
 0x466   :  { %v5816_v47 = vpack.c.bf16 %v5810_v51, %v5810_v51 }
 0x468   :  { %6320 = vmatprep.mubr.bf16.mxu1 %v5816_v47 }
 0x469   :  { %6321 = vmatmul.mubr.bf16.vlgmr.msra.gmra.mrb[16].mxu1 %v5815_v52 }
 0x4bb   :  { %v7201_v55 = vpop.f32.mrb[12].mxu1 }
 0x4bc   :  { %v7202_v58 = vpop.f32.mrb[13].mxu1 }
 0x4bd   :  { %v7203_v59 = vadd.f32 %v7202_v58, %v7201_v55  ;;  %v7204_v43 = vpop.f32.mrb[14].mxu1 }
 0x4be   :  { %v7205_v62 = vpop.f32.mrb[15].mxu1 }
 0x4bf   :  { %v6283_v1 = vadd.f32 %v7203_v59, %v6243_v18 }
 0x53c   :  { %v7223_v63 = vpop.f32.mrb[16].mxu1 }
 0x53d   :  { %v7224_v0 = vpop.f32.mrb[17].mxu1 }
 0x53e   :  { %v7225_v2 = vadd.f32 %v7224_v0, %v7223_v63  ;;  %v7226_v3 = vpop.f32.mrb[18].mxu1 }
 0x53f   :  { %v7227_v6 = vpop.f32.mrb[19].mxu1 }
 0x540   :  { %v6323_v7 = vadd.f32 %v7225_v2, %v6283_v1 }
 0x542   :  { %6328 = vst [vmem:[#allocation10] sm:$0x3] %v6323_v7 }
 0x543   :  { %8631 = shalt.err (!%p8628_p8)
}
 0x544   :  { %s8632_s1 = scalar_lea.hbm %s8936_s5, 32 }
 0x545   :  { %p8633_p9 = scmp.ne.s32.totalorder %s8936_s5, %s8632_s1  ;;  %p8636_p10 = scmp.lt.u32.totalorder %s8632_s1, %s8936_s5 }
 0x547   :  { %p8638_p11 = pnand %p8636_p10, %p8633_p9 }
 0x549   :  { %8641 = shalt.err (!%p8638_p11)
}
 0x54a   :  { %6338 = dma.vmem_to_hbm [thread:$0]  %s6336_s25, 32, %s8936_s5, [#allocation4]  }
 0x54b   :  { %8648 = dma.done.wait [#allocation4], 32  }
 0x54c   :  { %8649 = vsyncadd [#allocation4], 4294967264 }
 0x54d   :  { %6342 = vsyncpa [#allocation3], 1 }
 0x54e   :  { %6343 = vsyncpa [#allocation6], 1 }
 0x54f   :  { %6344 = vsyncpa [#allocation9], 1 }
 0x550   :  { %6345 = vsyncpa [#allocation4], 1 }

</bundles_post_ra>
